<compile_context>
chip_gen: v7x
topology: tpu7x:2x2x1
jax: 0.10.0
libtpu: 0.0.40
codegen_flags: <defaults>
</compile_context>

<pallas_src>
import jax
import jax.numpy as jnp
from jax import lax
from jax.experimental import pallas as pl
from jax.experimental.pallas import tpu as pltpu


def _vmem_limit_bytes():
    """Generation-aware VMEM budget: ~75% of physical (v5e/v6e ~96 MiB, v7x ~48 MiB)."""
    try:
        info = pltpu.get_tpu_info()
        cap = int(getattr(info, "vmem_capacity_bytes", 64 * 1024 * 1024))
    except Exception:
        cap = 64 * 1024 * 1024  # conservative fallback, safe on all generations
    return min((cap * 3) // 4, 100 * 1024 * 1024)


def _prep_kernel(x_ref, h_ref, temb_ref, wl_ref, wt_ref, a1_ref, a2_ref, ball_ref,
                 dinv_ref, binv_ref, xl_ref, u_ref, v_ref, tterm_ref):
    """One-shot prep: degrees, shared linears, per-head attention logit terms, temb branch.

    x_ref  : [N, C_in+1]  f32   (last column is 1.0 so edge degree falls out of H^T x)
    h_ref  : [N, M]       bf16  incidence
    wl_ref : [C_in+1, H*F] bf16 (last row is 0.0)
    """
    heads, F = a1_ref.shape
    xa = x_ref[...].astype(jnp.bfloat16)                                 # [N, Cin+1]
    Hm = h_ref[...]                                                      # [N, M] bf16 {0,1}

    # D^{-1}: node degree (lane reduction, exact in f32).
    node_deg = jnp.sum(Hm.astype(jnp.float32), axis=1, keepdims=True)    # [N, 1]
    dinv_ref[...] = jnp.where(node_deg > 0, 1.0 / node_deg, 0.0)

    # H^T [x | 1] in a single MXU pass: hyperedge feature sums + edge degree (last column).
    e_aug = lax.dot_general(Hm, xa, (((0,), (0,)), ((), ())),
                            preferred_element_type=jnp.float32)          # [M, Cin+1]
    edge_deg = e_aug[:, -1:]                                             # [M, 1] (exact)
    binv = jnp.where(edge_deg > 0, 1.0 / edge_deg, 0.0)
    binv_ref[...] = binv

    # XL = x @ W_lin   (bf16 MXU operands, f32 accumulation); store bf16.
    wl = wl_ref[...]                                                     # [Cin+1, H*F]
    xl_f32 = jnp.dot(xa, wl, preferred_element_type=jnp.float32)         # [N, H*F]
    xl_ref[...] = xl_f32.astype(jnp.bfloat16)

    # makeHyperEdgeFeatures (mean of member nodes) -> shared linear. EL stays on-chip.
    el_f32 = jnp.dot((e_aug * binv).astype(jnp.bfloat16), wl,
                     preferred_element_type=jnp.float32)                 # [M, H*F]

    # Per-head attention logit projections (hoisted out of the attention kernel):
    #   u[n,h] = XL[n,h]·a1[h]   -> [heads, N, 1]
    #   v[m,h] = EL[m,h]·a2[h]   -> [heads, 1, M]
    a1 = a1_ref[...]                                                     # [heads, F] f32
    a2 = a2_ref[...]
    for h in range(heads):
        xl_h = xl_f32[:, h * F:(h + 1) * F]                              # [N, F]
        el_h = el_f32[:, h * F:(h + 1) * F]                              # [M, F]
        u_ref[h] = jnp.sum(xl_h * a1[h:h + 1, :], axis=1, keepdims=True)  # [N, 1]
        v_ref[h] = lax.dot_general(a2[h:h + 1, :], el_h, (((1,), (1,)), ((), ())),
                                   preferred_element_type=jnp.float32)    # [1, M]

    # Time-embedding branch + all biases fused: SiLU(temb) @ W_temb + (b_conv@W_proj + b_proj + b_temb).
    t = temb_ref[...]
    t = (t * jax.nn.sigmoid(t)).astype(jnp.bfloat16)                     # SiLU(temb)
    tterm_ref[...] = (jnp.dot(t, wt_ref[...], preferred_element_type=jnp.float32)
                      + ball_ref[...])


def _attn_proj_kernel(hm_ref, dinv_ref, binv_ref, tterm_ref, xl_ref, u_ref, v_ref,
                      wp_ref, out_ref):
    """Fused per-head-group attention + hypergraph aggregations + output projection.

    Grid axis = head groups ("arbitrary"); the f32 output block is resident across the grid
    and used directly as the accumulator (init at step 0, SiLU finalize at the last step).
    """
    kh = u_ref.shape[0]                    # heads per grid step
    F = xl_ref.shape[1] // kh
    g = pl.program_id(0)

    @pl.when(g == 0)
    def _init():
        out_ref[...] = tterm_ref[...]      # SiLU(temb)@W_temb + fused biases

    Hm = hm_ref[...]                       # [N, M] bf16
    mask = Hm > 0
    dinv = dinv_ref[...]                   # [N, 1] f32
    binv = binv_ref[...]                   # [M, 1] f32

    for hh in range(kh):
        # Separable attention logits s[n, m] = u[n] + v[m] (precomputed in prep).
        u_h = u_ref[hh]                                                  # [N, 1]
        v_h = v_ref[hh]                                                  # [1, M]
        s = u_h + v_h                                                    # [N, M]
        s = jnp.where(s > 0, s, 0.2 * s)                                 # leaky_relu(0.2)

        # Masked softmax over the member nodes of each hyperedge (attention_mode='node').
        s = jnp.where(mask, s, jnp.float32(-1e30))
        s_max = jnp.max(s, axis=0, keepdims=True)                        # [1, M]
        p = jnp.where(mask, jnp.exp(s - s_max), 0.0)
        denom = jnp.sum(p, axis=0, keepdims=True)                        # [1, M]
        inv = 1.0 / jnp.where(denom > 0, denom, 1.0)
        alpha = (p * inv).astype(jnp.bfloat16)                           # single cast, reused

        # Node -> hyperedge:  E = B^{-1} (alpha^T @ XL)
        xl_h = xl_ref[:, hh * F:(hh + 1) * F]                            # [N, F] bf16
        e = lax.dot_general(alpha, xl_h, (((0,), (0,)), ((), ())),
                            preferred_element_type=jnp.float32)          # [M, F]
        e = (e * binv).astype(jnp.bfloat16)

        # Hyperedge -> node:  O = D^{-1} (alpha @ E)
        o = jnp.dot(alpha, e, preferred_element_type=jnp.float32)        # [N, F]
        o = (o * dinv).astype(jnp.bfloat16)

        # Fused projection: accumulate O_h @ W_proj[hF slice] into the resident output.
        wp_h = wp_ref[hh * F:(hh + 1) * F, :]                            # [F, C_out] bf16
        out_ref[...] += jnp.dot(o, wp_h, preferred_element_type=jnp.float32)

    @pl.when(g == pl.num_programs(0) - 1)
    def _finalize():
        hfin = out_ref[...]
        out_ref[...] = hfin * jax.nn.sigmoid(hfin)                       # SiLU
    # dropout on attention coefficients and on the hidden state: identity (eval mode)


def attn_down_block_forward(x, incidence, temb, params, *, heads, heads_per_step=4):
    N, c_in = x.shape
    M = incidence.shape[1]
    c_temb = temb.shape[1]
    hF = params["w_lin"].shape[1]
    F = hF // heads
    c_out = params["w_proj"].shape[1]
    assert F == c_out, "HypergraphConv: per-head width must equal out_channels"
    kh = min(heads_per_step, heads)
    assert heads % kh == 0

    vmem_limit = _vmem_limit_bytes()
    vmem = pl.BlockSpec(memory_space=pltpu.MemorySpace.VMEM)

    # bf16 MXU operands / intermediates (accumulation stays f32 in-kernel).
    inc_bf = incidence.astype(jnp.bfloat16)                              # {0,1} exact in bf16
    w_temb = params["w_temb"].astype(jnp.bfloat16)
    w_proj = params["w_proj"].astype(jnp.bfloat16)
    # Fold edge-degree into the H^T x matmul: ones column on x, zero row on W_lin.
    x_aug = jnp.concatenate([x.astype(jnp.float32), jnp.ones((N, 1), jnp.float32)], axis=1)
    w_lin_aug = jnp.concatenate(
        [params["w_lin"], jnp.zeros((1, hF), params["w_lin"].dtype)], axis=0
    ).astype(jnp.bfloat16)                                               # [c_in+1, H*F]

    # Fold HypergraphConv / proj / temb biases into a single [1, C_out] term:
    #   (conv + b_conv) @ Wp + bp + bt == conv @ Wp + (b_conv @ Wp + bp + bt)
    b_all = (params["b_conv"] @ params["w_proj"]
             + params["b_proj"] + params["b_temb"]).astype(jnp.float32)

    # Attention vectors split into per-head node / hyperedge halves.
    att = params["att"]                                                  # [heads, 2*F]
    a1 = att[:, :F].astype(jnp.float32)                                  # [heads, F]
    a2 = att[:, F:].astype(jnp.float32)

    # ---- phase 0: degrees, shared linears, per-head logit terms, temb branch (one shot) ----
    d_inv, b_inv, xl, u3, v3, tterm = pl.pallas_call(
        _prep_kernel,
        out_shape=(
            jax.ShapeDtypeStruct((N, 1), jnp.float32),        # D^{-1}
            jax.ShapeDtypeStruct((M, 1), jnp.float32),        # B^{-1}
            jax.ShapeDtypeStruct((N, hF), jnp.bfloat16),      # XL (bf16 per feedback)
            jax.ShapeDtypeStruct((heads, N, 1), jnp.float32), # u = XL·a1
            jax.ShapeDtypeStruct((heads, 1, M), jnp.float32), # v = EL·a2
            jax.ShapeDtypeStruct((N, c_out), jnp.float32),    # SiLU(temb)@Wt + fused biases
        ),
        in_specs=[vmem] * 8,
        out_specs=(vmem,) * 6,
        compiler_params=pltpu.CompilerParams(vmem_limit_bytes=vmem_limit),
    )(x_aug, inc_bf, temb.astype(jnp.float32), w_lin_aug, w_temb, a1, a2, b_all)

    # ---- fused phase: attention + aggregations + projection + temb add + SiLU -------------
    hidden = pl.pallas_call(
        _attn_proj_kernel,
        out_shape=jax.ShapeDtypeStruct((N, c_out), jnp.float32),
        grid=(heads // kh,),
        in_specs=[
            pl.BlockSpec((N, M), lambda g: (0, 0)),            # incidence (bf16)
            pl.BlockSpec((N, 1), lambda g: (0, 0)),            # D^{-1}
            pl.BlockSpec((M, 1), lambda g: (0, 0)),            # B^{-1}
            pl.BlockSpec((N, c_out), lambda g: (0, 0)),        # temb/bias term
            pl.BlockSpec((N, kh * F), lambda g: (0, g)),       # XL head-group slice (bf16)
            pl.BlockSpec((kh, N, 1), lambda g: (g, 0, 0)),     # u (node logit term)
            pl.BlockSpec((kh, 1, M), lambda g: (g, 0, 0)),     # v (hyperedge logit term)
            pl.BlockSpec((kh * F, c_out), lambda g: (g, 0)),   # W_proj head-group rows (bf16)
        ],
        out_specs=pl.BlockSpec((N, c_out), lambda g: (0, 0)),  # resident accumulator
        compiler_params=pltpu.CompilerParams(
            dimension_semantics=("arbitrary",),                # accumulation over head groups
            vmem_limit_bytes=vmem_limit),
    )(inc_bf, d_inv, b_inv, tterm, xl, u3, v3, w_proj)

    # AttnDownBlock calls ConvBlock with res_in=None -> res_out = (zeros_like(x),)
    res_out = (jnp.zeros_like(x),)
    return hidden, res_out


def init_params(key, c_in, c_out, heads, c_temb):
    ks = jax.random.split(key, 7)
    s = 0.1
    hF = heads * c_out
    return {
        # HypergraphConv.lin: Linear(c_in, heads*c_out, bias=False); stored [c_in, heads*c_out]
        "w_lin": s * jax.random.normal(ks[0], (c_in, hF), jnp.float32),
        # HypergraphConv.att: [heads, 2*c_out]  (node half | hyperedge half)
        "att": s * jax.random.normal(ks[1], (heads, 2 * c_out), jnp.float32),
        # HypergraphConv bias (concat=True -> heads*c_out)
        "b_conv": s * jax.random.normal(ks[2], (1, hF), jnp.float32),
        # proj_down: Linear(heads*c_out, c_out); stored pre-transposed
        "w_proj": s * jax.random.normal(ks[3], (hF, c_out), jnp.float32),
        "b_proj": s * jax.random.normal(ks[4], (1, c_out), jnp.float32),
        # time_emb_proj: Linear(c_temb, c_out); stored pre-transposed
        "w_temb": s * jax.random.normal(ks[5], (c_temb, c_out), jnp.float32),
        "b_temb": s * jax.random.normal(ks[6], (1, c_out), jnp.float32),
    }


if __name__ == "__main__":
    key = jax.random.PRNGKey(0)
    k_x, k_h, k_t, k_p = jax.random.split(key, 4)

    # Small but MXU/lane-friendly shapes (channel dims multiples of 128).
    N, M = 256, 128           # nodes, hyperedges
    C_IN, C_OUT = 64, 128     # channels (per-head width == C_OUT)
    HEADS = 8                 # AttnDownBlock default
    C_TEMB = 512              # module default temb_channels

    x = jax.random.normal(k_x, (N, C_IN), jnp.float32)
    incidence = (jax.random.uniform(k_h, (N, M)) > 0.5).astype(jnp.float32)
    temb = jax.random.normal(k_t, (N, C_TEMB), jnp.float32)

    params = init_params(k_p, C_IN, C_OUT, HEADS, C_TEMB)

    hidden, res_out = attn_down_block_forward(x, incidence, temb, params, heads=HEADS)
    jax.block_until_ready(hidden)
    assert hidden.shape == (N, C_OUT)
    assert isinstance(res_out, tuple) and res_out[0].shape == x.shape
    assert bool(jnp.all(jnp.isfinite(hidden)))
    print("KERNEL_OK")
</pallas_src>

<mosaic_0001>
module attributes {stable_mosaic.version = 11 : i64} {
  func.func @_prep_kernel(%arg0: memref<256x65xf32, #tpu.memory_space<vmem>>, %arg1: memref<256x128xbf16, #tpu.memory_space<vmem>>, %arg2: memref<256x512xf32, #tpu.memory_space<vmem>>, %arg3: memref<65x1024xbf16, #tpu.memory_space<vmem>>, %arg4: memref<512x128xbf16, #tpu.memory_space<vmem>>, %arg5: memref<8x128xf32, #tpu.memory_space<vmem>>, %arg6: memref<8x128xf32, #tpu.memory_space<vmem>>, %arg7: memref<1x128xf32, #tpu.memory_space<vmem>>, %arg8: memref<256x1xf32, #tpu.memory_space<vmem>>, %arg9: memref<128x1xf32, #tpu.memory_space<vmem>>, %arg10: memref<256x1024xbf16, #tpu.memory_space<vmem>>, %arg11: memref<8x256x1xf32, #tpu.memory_space<vmem>>, %arg12: memref<8x1x128xf32, #tpu.memory_space<vmem>>, %arg13: memref<256x128xf32, #tpu.memory_space<vmem>>) attributes {dimension_semantics = [], scalar_prefetch = 0 : i64, scratch_operands = 0 : i64, tpu.core_type = #tpu.core_type<tc>} {
    %c0 = arith.constant 0 : index
    %c0_0 = arith.constant 0 : index
    %0 = vector.load %arg0[%c0, %c0_0] : memref<256x65xf32, #tpu.memory_space<vmem>>, vector<256x65xf32>
    %1 = arith.truncf %0 : vector<256x65xf32> to vector<256x65xbf16>
    %c0_1 = arith.constant 0 : index
    %c0_2 = arith.constant 0 : index
    %2 = vector.load %arg1[%c0_1, %c0_2] : memref<256x128xbf16, #tpu.memory_space<vmem>>, vector<256x128xbf16>
    %3 = arith.extf %2 : vector<256x128xbf16> to vector<256x128xf32>
    %cst = arith.constant dense<0.000000e+00> : vector<256xf32>
    %4 = vector.multi_reduction <add>, %3, %cst [1] : vector<256x128xf32> to vector<256xf32>
    %5 = vector.shape_cast %4 : vector<256xf32> to vector<256x1xf32>
    %cst_3 = arith.constant 0.000000e+00 : f32
    %6 = vector.broadcast %cst_3 : f32 to vector<256x1xf32>
    %7 = arith.cmpf ogt, %5, %6 : vector<256x1xf32>
    %cst_4 = arith.constant 1.000000e+00 : f32
    %8 = vector.broadcast %cst_4 : f32 to vector<256x1xf32>
    %9 = arith.divf %8, %5 : vector<256x1xf32>
    %cst_5 = arith.constant 0.000000e+00 : f32
    %10 = vector.broadcast %cst_5 : f32 to vector<256x1xf32>
    %11 = arith.select %7, %9, %10 : vector<256x1xi1>, vector<256x1xf32>
    %c0_6 = arith.constant 0 : index
    %c0_7 = arith.constant 0 : index
    %12 = vector.load %arg8[%c0_6, %c0_7] : memref<256x1xf32, #tpu.memory_space<vmem>>, vector<256x1xf32>
    tpu.vector_store %arg8[%c0_6, %c0_7], %11 {strides = array<i32>} : memref<256x1xf32, #tpu.memory_space<vmem>>, vector<256x1xf32>,
    %cst_8 = arith.constant dense<0.000000e+00> : vector<128x65xf32>
    %13 = tpu.matmul %2, %1, %cst_8 {dimension_numbers = #tpu.dot_dimension_numbers<[0], [0], [1], [1], [0, 1, 1, 1], [], []>} : vector<256x128xbf16>, vector<256x65xbf16>, vector<128x65xf32> -> vector<128x65xf32>
    %14 = vector.extract_strided_slice %13 {offsets = [0, 64], sizes = [128, 1], strides = [1, 1]} : vector<128x65xf32> to vector<128x1xf32>
    %cst_9 = arith.constant 0.000000e+00 : f32
    %15 = vector.broadcast %cst_9 : f32 to vector<128x1xf32>
    %16 = arith.cmpf ogt, %14, %15 : vector<128x1xf32>
    %cst_10 = arith.constant 1.000000e+00 : f32
    %17 = vector.broadcast %cst_10 : f32 to vector<128x1xf32>
    %18 = arith.divf %17, %14 : vector<128x1xf32>
    %cst_11 = arith.constant 0.000000e+00 : f32
    %19 = vector.broadcast %cst_11 : f32 to vector<128x1xf32>
    %20 = arith.select %16, %18, %19 : vector<128x1xi1>, vector<128x1xf32>
    %c0_12 = arith.constant 0 : index
    %c0_13 = arith.constant 0 : index
    %21 = vector.load %arg9[%c0_12, %c0_13] : memref<128x1xf32, #tpu.memory_space<vmem>>, vector<128x1xf32>
    tpu.vector_store %arg9[%c0_12, %c0_13], %20 {strides = array<i32>} : memref<128x1xf32, #tpu.memory_space<vmem>>, vector<128x1xf32>,
    %c0_14 = arith.constant 0 : index
    %c0_15 = arith.constant 0 : index
    %22 = vector.load %arg3[%c0_14, %c0_15] : memref<65x1024xbf16, #tpu.memory_space<vmem>>, vector<65x1024xbf16>
    %cst_16 = arith.constant dense<0.000000e+00> : vector<256x1024xf32>
    %23 = tpu.matmul %1, %22, %cst_16 {dimension_numbers = #tpu.dot_dimension_numbers<[1], [0], [0], [1], [0, 0, 1, 1], [], []>} : vector<256x65xbf16>, vector<65x1024xbf16>, vector<256x1024xf32> -> vector<256x1024xf32>
    %24 = arith.truncf %23 : vector<256x1024xf32> to vector<256x1024xbf16>
    %c0_17 = arith.constant 0 : index
    %c0_18 = arith.constant 0 : index
    %25 = vector.load %arg10[%c0_17, %c0_18] : memref<256x1024xbf16, #tpu.memory_space<vmem>>, vector<256x1024xbf16>
    tpu.vector_store %arg10[%c0_17, %c0_18], %24 {strides = array<i32>} : memref<256x1024xbf16, #tpu.memory_space<vmem>>, vector<256x1024xbf16>,
    %26 = vector.broadcast %20 : vector<128x1xf32> to vector<128x65xf32>
    %27 = arith.mulf %13, %26 : vector<128x65xf32>
    %28 = arith.truncf %27 : vector<128x65xf32> to vector<128x65xbf16>
    %cst_19 = arith.constant dense<0.000000e+00> : vector<128x1024xf32>
    %29 = tpu.matmul %28, %22, %cst_19 {dimension_numbers = #tpu.dot_dimension_numbers<[1], [0], [0], [1], [0, 0, 1, 1], [], []>} : vector<128x65xbf16>, vector<65x1024xbf16>, vector<128x1024xf32> -> vector<128x1024xf32>
    %c0_20 = arith.constant 0 : index
    %c0_21 = arith.constant 0 : index
    %30 = vector.load %arg5[%c0_20, %c0_21] : memref<8x128xf32, #tpu.memory_space<vmem>>, vector<8x128xf32>
    %c0_22 = arith.constant 0 : index
    %c0_23 = arith.constant 0 : index
    %31 = vector.load %arg6[%c0_22, %c0_23] : memref<8x128xf32, #tpu.memory_space<vmem>>, vector<8x128xf32>
    %32 = vector.extract_strided_slice %23 {offsets = [0, 0], sizes = [256, 128], strides = [1, 1]} : vector<256x1024xf32> to vector<256x128xf32>
    %33 = vector.extract_strided_slice %29 {offsets = [0, 0], sizes = [128, 128], strides = [1, 1]} : vector<128x1024xf32> to vector<128x128xf32>
    %34 = vector.extract_strided_slice %30 {offsets = [0, 0], sizes = [1, 128], strides = [1, 1]} : vector<8x128xf32> to vector<1x128xf32>
    %35 = vector.broadcast %34 : vector<1x128xf32> to vector<256x128xf32>
    %36 = arith.mulf %32, %35 : vector<256x128xf32>
    %cst_24 = arith.constant dense<0.000000e+00> : vector<256xf32>
    %37 = vector.multi_reduction <add>, %36, %cst_24 [1] : vector<256x128xf32> to vector<256xf32>
    %38 = vector.shape_cast %37 : vector<256xf32> to vector<256x1xf32>
    %c0_25 = arith.constant 0 : index
    %c0_26 = arith.constant 0 : index
    %c0_27 = arith.constant 0 : index
    %39 = vector.load %arg11[%c0_25, %c0_26, %c0_27] : memref<8x256x1xf32, #tpu.memory_space<vmem>>, vector<1x256x1xf32>
    %40 = vector.shape_cast %39 : vector<1x256x1xf32> to vector<256x1xf32>
    %41 = vector.shape_cast %38 : vector<256x1xf32> to vector<1x256x1xf32>
    tpu.vector_store %arg11[%c0_25, %c0_26, %c0_27], %41 {strides = array<i32>} : memref<8x256x1xf32, #tpu.memory_space<vmem>>, vector<1x256x1xf32>,
    %42 = vector.extract_strided_slice %31 {offsets = [0, 0], sizes = [1, 128], strides = [1, 1]} : vector<8x128xf32> to vector<1x128xf32>
    %cst_28 = arith.constant dense<0.000000e+00> : vector<1x128xf32>
    %43 = tpu.matmul %42, %33, %cst_28 {dimension_numbers = #tpu.dot_dimension_numbers<[1], [1], [0], [0], [0, 0, 1, 0], [], []>} : vector<1x128xf32>, vector<128x128xf32>, vector<1x128xf32> -> vector<1x128xf32>
    %c0_29 = arith.constant 0 : index
    %c0_30 = arith.constant 0 : index
    %c0_31 = arith.constant 0 : index
    %44 = vector.load %arg12[%c0_29, %c0_30, %c0_31] : memref<8x1x128xf32, #tpu.memory_space<vmem>>, vector<1x1x128xf32>
    %45 = vector.shape_cast %44 : vector<1x1x128xf32> to vector<1x128xf32>
    %46 = vector.shape_cast %43 : vector<1x128xf32> to vector<1x1x128xf32>
    tpu.vector_store %arg12[%c0_29, %c0_30, %c0_31], %46 {strides = array<i32>} : memref<8x1x128xf32, #tpu.memory_space<vmem>>, vector<1x1x128xf32>,
    %47 = vector.extract_strided_slice %23 {offsets = [0, 128], sizes = [256, 128], strides = [1, 1]} : vector<256x1024xf32> to vector<256x128xf32>
    %48 = vector.extract_strided_slice %29 {offsets = [0, 128], sizes = [128, 128], strides = [1, 1]} : vector<128x1024xf32> to vector<128x128xf32>
    %49 = vector.extract_strided_slice %30 {offsets = [1, 0], sizes = [1, 128], strides = [1, 1]} : vector<8x128xf32> to vector<1x128xf32>
    %50 = vector.broadcast %49 : vector<1x128xf32> to vector<256x128xf32>
    %51 = arith.mulf %47, %50 : vector<256x128xf32>
    %cst_32 = arith.constant dense<0.000000e+00> : vector<256xf32>
    %52 = vector.multi_reduction <add>, %51, %cst_32 [1] : vector<256x128xf32> to vector<256xf32>
    %53 = vector.shape_cast %52 : vector<256xf32> to vector<256x1xf32>
    %c1 = arith.constant 1 : index
    %c0_33 = arith.constant 0 : index
    %c0_34 = arith.constant 0 : index
    %54 = vector.load %arg11[%c1, %c0_33, %c0_34] : memref<8x256x1xf32, #tpu.memory_space<vmem>>, vector<1x256x1xf32>
    %55 = vector.shape_cast %54 : vector<1x256x1xf32> to vector<256x1xf32>
    %56 = vector.shape_cast %53 : vector<256x1xf32> to vector<1x256x1xf32>
    tpu.vector_store %arg11[%c1, %c0_33, %c0_34], %56 {strides = array<i32>} : memref<8x256x1xf32, #tpu.memory_space<vmem>>, vector<1x256x1xf32>,
    %57 = vector.extract_strided_slice %31 {offsets = [1, 0], sizes = [1, 128], strides = [1, 1]} : vector<8x128xf32> to vector<1x128xf32>
    %cst_35 = arith.constant dense<0.000000e+00> : vector<1x128xf32>
    %58 = tpu.matmul %57, %48, %cst_35 {dimension_numbers = #tpu.dot_dimension_numbers<[1], [1], [0], [0], [0, 0, 1, 0], [], []>} : vector<1x128xf32>, vector<128x128xf32>, vector<1x128xf32> -> vector<1x128xf32>
    %c1_36 = arith.constant 1 : index
    %c0_37 = arith.constant 0 : index
    %c0_38 = arith.constant 0 : index
    %59 = vector.load %arg12[%c1_36, %c0_37, %c0_38] : memref<8x1x128xf32, #tpu.memory_space<vmem>>, vector<1x1x128xf32>
    %60 = vector.shape_cast %59 : vector<1x1x128xf32> to vector<1x128xf32>
    %61 = vector.shape_cast %58 : vector<1x128xf32> to vector<1x1x128xf32>
    tpu.vector_store %arg12[%c1_36, %c0_37, %c0_38], %61 {strides = array<i32>} : memref<8x1x128xf32, #tpu.memory_space<vmem>>, vector<1x1x128xf32>,
    %62 = vector.extract_strided_slice %23 {offsets = [0, 256], sizes = [256, 128], strides = [1, 1]} : vector<256x1024xf32> to vector<256x128xf32>
    %63 = vector.extract_strided_slice %29 {offsets = [0, 256], sizes = [128, 128], strides = [1, 1]} : vector<128x1024xf32> to vector<128x128xf32>
    %64 = vector.extract_strided_slice %30 {offsets = [2, 0], sizes = [1, 128], strides = [1, 1]} : vector<8x128xf32> to vector<1x128xf32>
    %65 = vector.broadcast %64 : vector<1x128xf32> to vector<256x128xf32>
    %66 = arith.mulf %62, %65 : vector<256x128xf32>
    %cst_39 = arith.constant dense<0.000000e+00> : vector<256xf32>
    %67 = vector.multi_reduction <add>, %66, %cst_39 [1] : vector<256x128xf32> to vector<256xf32>
    %68 = vector.shape_cast %67 : vector<256xf32> to vector<256x1xf32>
    %c2 = arith.constant 2 : index
    %c0_40 = arith.constant 0 : index
    %c0_41 = arith.constant 0 : index
    %69 = vector.load %arg11[%c2, %c0_40, %c0_41] : memref<8x256x1xf32, #tpu.memory_space<vmem>>, vector<1x256x1xf32>
    %70 = vector.shape_cast %69 : vector<1x256x1xf32> to vector<256x1xf32>
    %71 = vector.shape_cast %68 : vector<256x1xf32> to vector<1x256x1xf32>
    tpu.vector_store %arg11[%c2, %c0_40, %c0_41], %71 {strides = array<i32>} : memref<8x256x1xf32, #tpu.memory_space<vmem>>, vector<1x256x1xf32>,
    %72 = vector.extract_strided_slice %31 {offsets = [2, 0], sizes = [1, 128], strides = [1, 1]} : vector<8x128xf32> to vector<1x128xf32>
    %cst_42 = arith.constant dense<0.000000e+00> : vector<1x128xf32>
    %73 = tpu.matmul %72, %63, %cst_42 {dimension_numbers = #tpu.dot_dimension_numbers<[1], [1], [0], [0], [0, 0, 1, 0], [], []>} : vector<1x128xf32>, vector<128x128xf32>, vector<1x128xf32> -> vector<1x128xf32>
    %c2_43 = arith.constant 2 : index
    %c0_44 = arith.constant 0 : index
    %c0_45 = arith.constant 0 : index
    %74 = vector.load %arg12[%c2_43, %c0_44, %c0_45] : memref<8x1x128xf32, #tpu.memory_space<vmem>>, vector<1x1x128xf32>
    %75 = vector.shape_cast %74 : vector<1x1x128xf32> to vector<1x128xf32>
    %76 = vector.shape_cast %73 : vector<1x128xf32> to vector<1x1x128xf32>
    tpu.vector_store %arg12[%c2_43, %c0_44, %c0_45], %76 {strides = array<i32>} : memref<8x1x128xf32, #tpu.memory_space<vmem>>, vector<1x1x128xf32>,
    %77 = vector.extract_strided_slice %23 {offsets = [0, 384], sizes = [256, 128], strides = [1, 1]} : vector<256x1024xf32> to vector<256x128xf32>
    %78 = vector.extract_strided_slice %29 {offsets = [0, 384], sizes = [128, 128], strides = [1, 1]} : vector<128x1024xf32> to vector<128x128xf32>
    %79 = vector.extract_strided_slice %30 {offsets = [3, 0], sizes = [1, 128], strides = [1, 1]} : vector<8x128xf32> to vector<1x128xf32>
    %80 = vector.broadcast %79 : vector<1x128xf32> to vector<256x128xf32>
    %81 = arith.mulf %77, %80 : vector<256x128xf32>
    %cst_46 = arith.constant dense<0.000000e+00> : vector<256xf32>
    %82 = vector.multi_reduction <add>, %81, %cst_46 [1] : vector<256x128xf32> to vector<256xf32>
    %83 = vector.shape_cast %82 : vector<256xf32> to vector<256x1xf32>
    %c3 = arith.constant 3 : index
    %c0_47 = arith.constant 0 : index
    %c0_48 = arith.constant 0 : index
    %84 = vector.load %arg11[%c3, %c0_47, %c0_48] : memref<8x256x1xf32, #tpu.memory_space<vmem>>, vector<1x256x1xf32>
    %85 = vector.shape_cast %84 : vector<1x256x1xf32> to vector<256x1xf32>
    %86 = vector.shape_cast %83 : vector<256x1xf32> to vector<1x256x1xf32>
    tpu.vector_store %arg11[%c3, %c0_47, %c0_48], %86 {strides = array<i32>} : memref<8x256x1xf32, #tpu.memory_space<vmem>>, vector<1x256x1xf32>,
    %87 = vector.extract_strided_slice %31 {offsets = [3, 0], sizes = [1, 128], strides = [1, 1]} : vector<8x128xf32> to vector<1x128xf32>
    %cst_49 = arith.constant dense<0.000000e+00> : vector<1x128xf32>
    %88 = tpu.matmul %87, %78, %cst_49 {dimension_numbers = #tpu.dot_dimension_numbers<[1], [1], [0], [0], [0, 0, 1, 0], [], []>} : vector<1x128xf32>, vector<128x128xf32>, vector<1x128xf32> -> vector<1x128xf32>
    %c3_50 = arith.constant 3 : index
    %c0_51 = arith.constant 0 : index
    %c0_52 = arith.constant 0 : index
    %89 = vector.load %arg12[%c3_50, %c0_51, %c0_52] : memref<8x1x128xf32, #tpu.memory_space<vmem>>, vector<1x1x128xf32>
    %90 = vector.shape_cast %89 : vector<1x1x128xf32> to vector<1x128xf32>
    %91 = vector.shape_cast %88 : vector<1x128xf32> to vector<1x1x128xf32>
    tpu.vector_store %arg12[%c3_50, %c0_51, %c0_52], %91 {strides = array<i32>} : memref<8x1x128xf32, #tpu.memory_space<vmem>>, vector<1x1x128xf32>,
    %92 = vector.extract_strided_slice %23 {offsets = [0, 512], sizes = [256, 128], strides = [1, 1]} : vector<256x1024xf32> to vector<256x128xf32>
    %93 = vector.extract_strided_slice %29 {offsets = [0, 512], sizes = [128, 128], strides = [1, 1]} : vector<128x1024xf32> to vector<128x128xf32>
    %94 = vector.extract_strided_slice %30 {offsets = [4, 0], sizes = [1, 128], strides = [1, 1]} : vector<8x128xf32> to vector<1x128xf32>
    %95 = vector.broadcast %94 : vector<1x128xf32> to vector<256x128xf32>
    %96 = arith.mulf %92, %95 : vector<256x128xf32>
    %cst_53 = arith.constant dense<0.000000e+00> : vector<256xf32>
    %97 = vector.multi_reduction <add>, %96, %cst_53 [1] : vector<256x128xf32> to vector<256xf32>
    %98 = vector.shape_cast %97 : vector<256xf32> to vector<256x1xf32>
    %c4 = arith.constant 4 : index
    %c0_54 = arith.constant 0 : index
    %c0_55 = arith.constant 0 : index
    %99 = vector.load %arg11[%c4, %c0_54, %c0_55] : memref<8x256x1xf32, #tpu.memory_space<vmem>>, vector<1x256x1xf32>
    %100 = vector.shape_cast %99 : vector<1x256x1xf32> to vector<256x1xf32>
    %101 = vector.shape_cast %98 : vector<256x1xf32> to vector<1x256x1xf32>
    tpu.vector_store %arg11[%c4, %c0_54, %c0_55], %101 {strides = array<i32>} : memref<8x256x1xf32, #tpu.memory_space<vmem>>, vector<1x256x1xf32>,
    %102 = vector.extract_strided_slice %31 {offsets = [4, 0], sizes = [1, 128], strides = [1, 1]} : vector<8x128xf32> to vector<1x128xf32>
    %cst_56 = arith.constant dense<0.000000e+00> : vector<1x128xf32>
    %103 = tpu.matmul %102, %93, %cst_56 {dimension_numbers = #tpu.dot_dimension_numbers<[1], [1], [0], [0], [0, 0, 1, 0], [], []>} : vector<1x128xf32>, vector<128x128xf32>, vector<1x128xf32> -> vector<1x128xf32>
    %c4_57 = arith.constant 4 : index
    %c0_58 = arith.constant 0 : index
    %c0_59 = arith.constant 0 : index
    %104 = vector.load %arg12[%c4_57, %c0_58, %c0_59] : memref<8x1x128xf32, #tpu.memory_space<vmem>>, vector<1x1x128xf32>
    %105 = vector.shape_cast %104 : vector<1x1x128xf32> to vector<1x128xf32>
    %106 = vector.shape_cast %103 : vector<1x128xf32> to vector<1x1x128xf32>
    tpu.vector_store %arg12[%c4_57, %c0_58, %c0_59], %106 {strides = array<i32>} : memref<8x1x128xf32, #tpu.memory_space<vmem>>, vector<1x1x128xf32>,
    %107 = vector.extract_strided_slice %23 {offsets = [0, 640], sizes = [256, 128], strides = [1, 1]} : vector<256x1024xf32> to vector<256x128xf32>
    %108 = vector.extract_strided_slice %29 {offsets = [0, 640], sizes = [128, 128], strides = [1, 1]} : vector<128x1024xf32> to vector<128x128xf32>
    %109 = vector.extract_strided_slice %30 {offsets = [5, 0], sizes = [1, 128], strides = [1, 1]} : vector<8x128xf32> to vector<1x128xf32>
    %110 = vector.broadcast %109 : vector<1x128xf32> to vector<256x128xf32>
    %111 = arith.mulf %107, %110 : vector<256x128xf32>
    %cst_60 = arith.constant dense<0.000000e+00> : vector<256xf32>
    %112 = vector.multi_reduction <add>, %111, %cst_60 [1] : vector<256x128xf32> to vector<256xf32>
    %113 = vector.shape_cast %112 : vector<256xf32> to vector<256x1xf32>
    %c5 = arith.constant 5 : index
    %c0_61 = arith.constant 0 : index
    %c0_62 = arith.constant 0 : index
    %114 = vector.load %arg11[%c5, %c0_61, %c0_62] : memref<8x256x1xf32, #tpu.memory_space<vmem>>, vector<1x256x1xf32>
    %115 = vector.shape_cast %114 : vector<1x256x1xf32> to vector<256x1xf32>
    %116 = vector.shape_cast %113 : vector<256x1xf32> to vector<1x256x1xf32>
    tpu.vector_store %arg11[%c5, %c0_61, %c0_62], %116 {strides = array<i32>} : memref<8x256x1xf32, #tpu.memory_space<vmem>>, vector<1x256x1xf32>,
    %117 = vector.extract_strided_slice %31 {offsets = [5, 0], sizes = [1, 128], strides = [1, 1]} : vector<8x128xf32> to vector<1x128xf32>
    %cst_63 = arith.constant dense<0.000000e+00> : vector<1x128xf32>
    %118 = tpu.matmul %117, %108, %cst_63 {dimension_numbers = #tpu.dot_dimension_numbers<[1], [1], [0], [0], [0, 0, 1, 0], [], []>} : vector<1x128xf32>, vector<128x128xf32>, vector<1x128xf32> -> vector<1x128xf32>
    %c5_64 = arith.constant 5 : index
    %c0_65 = arith.constant 0 : index
    %c0_66 = arith.constant 0 : index
    %119 = vector.load %arg12[%c5_64, %c0_65, %c0_66] : memref<8x1x128xf32, #tpu.memory_space<vmem>>, vector<1x1x128xf32>
    %120 = vector.shape_cast %119 : vector<1x1x128xf32> to vector<1x128xf32>
    %121 = vector.shape_cast %118 : vector<1x128xf32> to vector<1x1x128xf32>
    tpu.vector_store %arg12[%c5_64, %c0_65, %c0_66], %121 {strides = array<i32>} : memref<8x1x128xf32, #tpu.memory_space<vmem>>, vector<1x1x128xf32>,
    %122 = vector.extract_strided_slice %23 {offsets = [0, 768], sizes = [256, 128], strides = [1, 1]} : vector<256x1024xf32> to vector<256x128xf32>
    %123 = vector.extract_strided_slice %29 {offsets = [0, 768], sizes = [128, 128], strides = [1, 1]} : vector<128x1024xf32> to vector<128x128xf32>
    %124 = vector.extract_strided_slice %30 {offsets = [6, 0], sizes = [1, 128], strides = [1, 1]} : vector<8x128xf32> to vector<1x128xf32>
    %125 = vector.broadcast %124 : vector<1x128xf32> to vector<256x128xf32>
    %126 = arith.mulf %122, %125 : vector<256x128xf32>
    %cst_67 = arith.constant dense<0.000000e+00> : vector<256xf32>
    %127 = vector.multi_reduction <add>, %126, %cst_67 [1] : vector<256x128xf32> to vector<256xf32>
    %128 = vector.shape_cast %127 : vector<256xf32> to vector<256x1xf32>
    %c6 = arith.constant 6 : index
    %c0_68 = arith.constant 0 : index
    %c0_69 = arith.constant 0 : index
    %129 = vector.load %arg11[%c6, %c0_68, %c0_69] : memref<8x256x1xf32, #tpu.memory_space<vmem>>, vector<1x256x1xf32>
    %130 = vector.shape_cast %129 : vector<1x256x1xf32> to vector<256x1xf32>
    %131 = vector.shape_cast %128 : vector<256x1xf32> to vector<1x256x1xf32>
    tpu.vector_store %arg11[%c6, %c0_68, %c0_69], %131 {strides = array<i32>} : memref<8x256x1xf32, #tpu.memory_space<vmem>>, vector<1x256x1xf32>,
    %132 = vector.extract_strided_slice %31 {offsets = [6, 0], sizes = [1, 128], strides = [1, 1]} : vector<8x128xf32> to vector<1x128xf32>
    %cst_70 = arith.constant dense<0.000000e+00> : vector<1x128xf32>
    %133 = tpu.matmul %132, %123, %cst_70 {dimension_numbers = #tpu.dot_dimension_numbers<[1], [1], [0], [0], [0, 0, 1, 0], [], []>} : vector<1x128xf32>, vector<128x128xf32>, vector<1x128xf32> -> vector<1x128xf32>
    %c6_71 = arith.constant 6 : index
    %c0_72 = arith.constant 0 : index
    %c0_73 = arith.constant 0 : index
    %134 = vector.load %arg12[%c6_71, %c0_72, %c0_73] : memref<8x1x128xf32, #tpu.memory_space<vmem>>, vector<1x1x128xf32>
    %135 = vector.shape_cast %134 : vector<1x1x128xf32> to vector<1x128xf32>
    %136 = vector.shape_cast %133 : vector<1x128xf32> to vector<1x1x128xf32>
    tpu.vector_store %arg12[%c6_71, %c0_72, %c0_73], %136 {strides = array<i32>} : memref<8x1x128xf32, #tpu.memory_space<vmem>>, vector<1x1x128xf32>,
    %137 = vector.extract_strided_slice %23 {offsets = [0, 896], sizes = [256, 128], strides = [1, 1]} : vector<256x1024xf32> to vector<256x128xf32>
    %138 = vector.extract_strided_slice %29 {offsets = [0, 896], sizes = [128, 128], strides = [1, 1]} : vector<128x1024xf32> to vector<128x128xf32>
    %139 = vector.extract_strided_slice %30 {offsets = [7, 0], sizes = [1, 128], strides = [1, 1]} : vector<8x128xf32> to vector<1x128xf32>
    %140 = vector.broadcast %139 : vector<1x128xf32> to vector<256x128xf32>
    %141 = arith.mulf %137, %140 : vector<256x128xf32>
    %cst_74 = arith.constant dense<0.000000e+00> : vector<256xf32>
    %142 = vector.multi_reduction <add>, %141, %cst_74 [1] : vector<256x128xf32> to vector<256xf32>
    %143 = vector.shape_cast %142 : vector<256xf32> to vector<256x1xf32>
    %c7 = arith.constant 7 : index
    %c0_75 = arith.constant 0 : index
    %c0_76 = arith.constant 0 : index
    %144 = vector.load %arg11[%c7, %c0_75, %c0_76] : memref<8x256x1xf32, #tpu.memory_space<vmem>>, vector<1x256x1xf32>
    %145 = vector.shape_cast %144 : vector<1x256x1xf32> to vector<256x1xf32>
    %146 = vector.shape_cast %143 : vector<256x1xf32> to vector<1x256x1xf32>
    tpu.vector_store %arg11[%c7, %c0_75, %c0_76], %146 {strides = array<i32>} : memref<8x256x1xf32, #tpu.memory_space<vmem>>, vector<1x256x1xf32>,
    %147 = vector.extract_strided_slice %31 {offsets = [7, 0], sizes = [1, 128], strides = [1, 1]} : vector<8x128xf32> to vector<1x128xf32>
    %cst_77 = arith.constant dense<0.000000e+00> : vector<1x128xf32>
    %148 = tpu.matmul %147, %138, %cst_77 {dimension_numbers = #tpu.dot_dimension_numbers<[1], [1], [0], [0], [0, 0, 1, 0], [], []>} : vector<1x128xf32>, vector<128x128xf32>, vector<1x128xf32> -> vector<1x128xf32>
    %c7_78 = arith.constant 7 : index
    %c0_79 = arith.constant 0 : index
    %c0_80 = arith.constant 0 : index
    %149 = vector.load %arg12[%c7_78, %c0_79, %c0_80] : memref<8x1x128xf32, #tpu.memory_space<vmem>>, vector<1x1x128xf32>
    %150 = vector.shape_cast %149 : vector<1x1x128xf32> to vector<1x128xf32>
    %151 = vector.shape_cast %148 : vector<1x128xf32> to vector<1x1x128xf32>
    tpu.vector_store %arg12[%c7_78, %c0_79, %c0_80], %151 {strides = array<i32>} : memref<8x1x128xf32, #tpu.memory_space<vmem>>, vector<1x1x128xf32>,
    %c0_81 = arith.constant 0 : index
    %c0_82 = arith.constant 0 : index
    %152 = vector.load %arg2[%c0_81, %c0_82] : memref<256x512xf32, #tpu.memory_space<vmem>>, vector<256x512xf32>
    %153 = arith.negf %152 : vector<256x512xf32>
    %154 = math.exp %153 : vector<256x512xf32>
    %cst_83 = arith.constant 1.000000e+00 : f32
    %155 = vector.broadcast %cst_83 : f32 to vector<256x512xf32>
    %156 = arith.addf %155, %154 : vector<256x512xf32>
    %157 = arith.divf %155, %156 : vector<256x512xf32>
    %158 = arith.mulf %152, %157 : vector<256x512xf32>
    %159 = arith.truncf %158 : vector<256x512xf32> to vector<256x512xbf16>
    %c0_84 = arith.constant 0 : index
    %c0_85 = arith.constant 0 : index
    %160 = vector.load %arg4[%c0_84, %c0_85] : memref<512x128xbf16, #tpu.memory_space<vmem>>, vector<512x128xbf16>
    %cst_86 = arith.constant dense<0.000000e+00> : vector<256x128xf32>
    %161 = tpu.matmul %159, %160, %cst_86 {dimension_numbers = #tpu.dot_dimension_numbers<[1], [0], [0], [1], [0, 0, 1, 1], [], []>} : vector<256x512xbf16>, vector<512x128xbf16>, vector<256x128xf32> -> vector<256x128xf32>
    %c0_87 = arith.constant 0 : index
    %c0_88 = arith.constant 0 : index
    %162 = vector.load %arg7[%c0_87, %c0_88] : memref<1x128xf32, #tpu.memory_space<vmem>>, vector<1x128xf32>
    %163 = vector.broadcast %162 : vector<1x128xf32> to vector<256x128xf32>
    %164 = arith.addf %161, %163 : vector<256x128xf32>
    %c0_89 = arith.constant 0 : index
    %c0_90 = arith.constant 0 : index
    %165 = vector.load %arg13[%c0_89, %c0_90] : memref<256x128xf32, #tpu.memory_space<vmem>>, vector<256x128xf32>
    tpu.vector_store %arg13[%c0_89, %c0_90], %164 {strides = array<i32>} : memref<256x128xf32, #tpu.memory_space<vmem>>, vector<256x128xf32>,
    return
  }
}

</mosaic_0001>

<bundles_post_ra>
// kernel: tpu_custom_call.1
= control target key start
LH: loop header
LB: loop body
LE: loop exit
PB: predicated region body
PF: predicated region fallthrough
CT: control target
= control target key end

     0   :  { %19 = vsyncpa [#allocation3], 0  ;;  %s14224_s0 = inlined_call_operand.vmem [shape: f32[256,65], index: 0, kind: input, shape index: {}]   ;;  %s14225_s1 = inlined_call_operand.hbm [shape: bf16[256,128], index: 1, kind: input, shape index: {}]   ;;  %s14226_s2 = inlined_call_operand.hbm [shape: f32[256,512], index: 2, kind: input, shape index: {}]   ;;  %s14227_s3 = inlined_call_operand.vmem [shape: bf16[65,1024], index: 3, kind: input, shape index: {}]   ;;  %s14228_s4 = inlined_call_operand.hbm [shape: bf16[512,128], index: 4, kind: input, shape index: {}]   ;;  %s14229_s5 = inlined_call_operand.vmem [shape: f32[8,128], index: 5, kind: input, shape index: {}]   ;;  %s14230_s6 = inlined_call_operand.vmem [shape: f32[8,128], index: 6, kind: input, shape index: {}]   ;;  %s14231_s7 = inlined_call_operand.vmem [shape: f32[1,128], index: 7, kind: input, shape index: {}]   ;;  %s14232_s8 = inlined_call_operand.vmem [shape: f32[256,1], index: 8, kind: output, shape index: {0}]   ;;  %s14233_s9 = inlined_call_operand.vmem [shape: f32[128,1], index: 9, kind: output, shape index: {1}]   ;;  %s14234_s10 = inlined_call_operand.hbm [shape: bf16[256,1024], index: 10, kind: output, shape index: {2}]   ;;  %s14235_s11 = inlined_call_operand.vmem [shape: f32[8,256,1], index: 11, kind: output, shape index: {3}]   ;;  %s14236_s12 = inlined_call_operand.hbm [shape: f32[8,1,128], index: 12, kind: output, shape index: {4}]   ;;  %s14237_s13 = inlined_call_operand.hbm [shape: f32[256,128], index: 13, kind: output, shape index: {5}]  }
   0x1   :  { %20 = vsyncpa [#allocation6], 0 }
   0x2   :  { %21 = vsyncpa [#allocation4], 0 }
   0x3   :  { %22 = vsyncpa [#allocation10], 0  ;;  %s9379_s25 = smov [#allocation5]   ;;  %s9239_s29 = scalar_lea.hbm %s14226_s2, 16384 }
   0x4   :  { %s42_s26 = sshll.u32 %s9379_s25, 4  ;;  %p9240_p0 = scmp.ne.s32.totalorder %s14226_s2, %s9239_s29  ;;  %s43_s26 = int_to_ptr.vmem [resolvable:$true] %s42_s26 }
   0x5   :  { %p9243_p1 = scmp.lt.u32.totalorder %s9239_s29, %s14226_s2 }
   0x7   :  { %p9245_p2 = pnand %p9243_p1, %p9240_p0 }
   0x9   :  { %9248 = shalt.err (!%p9245_p2)
}
   0xa   :  { %s9249_s17 = scalar_lea.vmem %s43_s26, 16384  ;;  %p9254_p4 = scmp.lt.s32.totalorder %s43_s26, %s43_s26 }
   0xb   :  { %p9250_p3 = scmp.ne.s32.totalorder %s43_s26, %s9249_s17  ;;  %p9255_p5 = scmp.lt.s32.totalorder %s9249_s17, %s9249_s17 }
   0xd   :  { %p9256_p6 = por %p9255_p5, %p9254_p4 }
   0xf   :  { %p9257_p7 = pnand %p9256_p6, %p9250_p3 }
  0x11   :  { %9260 = shalt.err (!%p9257_p7)
}
  0x12   :  { %s9380_s18 = smov 512   ;;  %s9381_s19 = smov 32  }
  0x13   :  { %48 = dma.hbm_to_vmem [thread:$0]  %s14226_s2, 16384, %s43_s26, [#allocation6], %s9380_s18, %s9380_s18, %s9381_s19  }
  0x14   :  { %s9382_s22 = smov [#allocation2]   ;;  %s9261_s27 = scalar_lea.hbm %s14225_s1, 2048 }
  0x15   :  { %s30_s23 = sshll.u32 %s9382_s22, 4  ;;  %p9262_p8 = scmp.ne.s32.totalorder %s14225_s1, %s9261_s27  ;;  %s31_s23 = int_to_ptr.vmem [resolvable:$true] %s30_s23 }
  0x16   :  { %p9265_p9 = scmp.lt.u32.totalorder %s9261_s27, %s14225_s1 }
  0x18   :  { %p9267_p10 = pnand %p9265_p9, %p9262_p8 }
  0x1a   :  { %9270 = shalt.err (!%p9267_p10)
}
  0x1b   :  { %s9271_s15 = scalar_lea.vmem %s31_s23, 2048  ;;  %p9276_p12 = scmp.lt.s32.totalorder %s31_s23, %s31_s23 }
  0x1c   :  { %p9272_p11 = scmp.ne.s32.totalorder %s31_s23, %s9271_s15  ;;  %p9277_p13 = scmp.lt.s32.totalorder %s9271_s15, %s9271_s15 }
  0x1e   :  { %p9278_p0 = por %p9277_p13, %p9276_p12 }
  0x20   :  { %p9279_p1 = pnand %p9278_p0, %p9272_p11 }
  0x22   :  { %9282 = shalt.err (!%p9279_p1)
}
  0x23   :  { %s9383_s2 = smov 64   ;;  %s9384_s26 = smov 4  }
  0x24   :  { %36 = dma.hbm_to_vmem [thread:$0]  %s14225_s1, 2048, %s31_s23, [#allocation3], %s9383_s2, %s9383_s2, %s9384_s26  }
  0x25   :  { %s9385_s20 = smov [#allocation7]   ;;  %s9283_s25 = scalar_lea.hbm %s14228_s4, 4096 }
  0x26   :  { %s56_s21 = sshll.u32 %s9385_s20, 4  ;;  %p9284_p2 = scmp.ne.s32.totalorder %s14228_s4, %s9283_s25  ;;  %s57_s21 = int_to_ptr.vmem [resolvable:$true] %s56_s21 }
  0x27   :  { %p9287_p3 = scmp.lt.u32.totalorder %s9283_s25, %s14228_s4 }
  0x29   :  { %p9289_p4 = pnand %p9287_p3, %p9284_p2 }
  0x2b   :  { %9292 = shalt.err (!%p9289_p4)
}
  0x2c   :  { %s9293_s14 = scalar_lea.vmem %s57_s21, 4096  ;;  %p9298_p6 = scmp.lt.s32.totalorder %s57_s21, %s57_s21 }
  0x2d   :  { %p9294_p5 = scmp.ne.s32.totalorder %s57_s21, %s9293_s14  ;;  %p9299_p7 = scmp.lt.s32.totalorder %s9293_s14, %s9293_s14 }
  0x2f   :  { %p9300_p8 = por %p9299_p7, %p9298_p6 }
  0x31   :  { %p9301_p9 = pnand %p9300_p8, %p9294_p5 }
  0x33   :  { %9304 = shalt.err (!%p9301_p9)
}
  0x34   :  { %62 = dma.hbm_to_vmem [thread:$0]  %s14228_s4, 4096, %s57_s21, [#allocation6], %s9383_s2, %s9383_s2, %s9384_s26  }
  0x35   :  { %9371 = dma.done.wait [#allocation3], 2048  }
  0x36   :  { %9372 = vsyncadd [#allocation3], 4294965248 }
  0x37   :  { %9373 = dma.done.wait [#allocation6], 20480  }
  0x38   :  { %9374 = vsyncadd [#allocation6], 4294946816  ;;  %v143_v0 = vld [vmem:[#allocation2 + $0x40] sm:$0xff]   ;;  %v145_v2 = vld [vmem:[#allocation2 + $0x48] sm:$0xff]   ;;  %vm1050_vm0 = vcmask 1040384   ;;  %vm1001_vm1 = vcmask 531456  }
  0x39   :  { %v127_v1 = vld [vmem:[#allocation2] sm:$0xff]   ;;  %v129_v3 = vld [vmem:[#allocation2 + $0x8] sm:$0xff]   ;;  %528 = vxpose.xlu0.c.b16.start [1/8] %v143_v0, 128  ;;  %v147_v4 = vld [vmem:[#allocation2 + $0x50] sm:$0xff]   ;;  %s9391_s24 = smov [#allocation9]  }
  0x3a   :  { %512 = vxpose.xlu1.c.b16.start [1/8] %v127_v1, 128  ;;  %v131_v5 = vld [vmem:[#allocation2 + $0x10] sm:$0xff]   ;;  %v95_v6 = vld [vmem:[%s14224_s0 + $0x80] sm:$0xff]  ;;  %v96_v7 = vld [vmem:[%s14224_s0 + $0x88] sm:$0xff] }
  0x3b   :  { %v149_v8 = vld [vmem:[#allocation2 + $0x58] sm:$0xff]   ;;  %v9517_v9 = vpack.c.bf16 %v96_v7, %v95_v6  ;;  %v79_v10 = vld [vmem:[%s14224_s0] sm:$0xff]  ;;  %v80_v11 = vld [vmem:[%s14224_s0 + $0x8] sm:$0xff] }
  0x3c   :  { %v97_v12 = vld [vmem:[%s14224_s0 + $0x90] sm:$0xff]  ;;  %v9528_v13 = vpack.c.bf16 %v80_v11, %v79_v10  ;;  %v98_v14 = vld [vmem:[%s14224_s0 + $0x98] sm:$0xff]  ;;  %v99_v19 = vld [vmem:[%s14224_s0 + $0xa0] sm:$0xff] }
  0x3d   :  { %529 = vxpose.xlu0.c.b16.cont [2/8] %v145_v2, 128  ;;  %v81_v15 = vld [vmem:[%s14224_s0 + $0x10] sm:$0xff]  ;;  %v82_v16 = vld [vmem:[%s14224_s0 + $0x18] sm:$0xff]  ;;  %7523 = vmatprep.subr.bf16.mxu0 %v9517_v9  ;;  %v9540_v18 = vpack.c.bf16 %v98_v14, %v97_v12  ;;  %v100_v20 = vld [vmem:[%s14224_s0 + $0xa8] sm:$0xff] }
  0x3e   :  { %513 = vxpose.xlu1.c.b16.cont [2/8] %v129_v3, 128  ;;  %v133_v17 = vld [vmem:[#allocation2 + $0x18] sm:$0xff]   ;;  %7524 = vmatpush3.bf16.msra.mxu0 %v9528_v13  ;;  %v9549_v21 = vpack.c.bf16 %v82_v16, %v81_v15  ;;  %v9552_v22 = vpack.c.bf16 %v100_v20, %v99_v19  ;;  %v83_v23 = vld [vmem:[%s14224_s0 + $0x20] sm:$0xff]  ;;  %v84_v24 = vld [vmem:[%s14224_s0 + $0x28] sm:$0xff] }
  0x3f   :  { %7525 = vmatprep.subr.bf16.mxu0 %v9540_v18  ;;  %v101_v25 = vld [vmem:[%s14224_s0 + $0xb0] sm:$0xff]  ;;  %v102_v26 = vld [vmem:[%s14224_s0 + $0xb8] sm:$0xff]  ;;  %v151_v27 = vld [vmem:[#allocation2 + $0x60] sm:$0xff]   ;;  %v9567_v29 = vpack.c.bf16 %v84_v24, %v83_v23 }
  0x40   :  { %v135_v28 = vld [vmem:[#allocation2 + $0x20] sm:$0xff]   ;;  %v153_v30 = vld [vmem:[#allocation2 + $0x68] sm:$0xff]   ;;  %v9570_v31 = vpack.c.bf16 %v102_v26, %v101_v25  ;;  %v85_v32 = vld [vmem:[%s14224_s0 + $0x30] sm:$0xff] }
  0x41   :  { %530 = vxpose.xlu0.c.b16.cont [3/8] %v147_v4, 128  ;;  %v86_v33 = vld [vmem:[%s14224_s0 + $0x38] sm:$0xff]  ;;  %v137_v34 = vld [vmem:[#allocation2 + $0x28] sm:$0xff]   ;;  %v103_v35 = vld [vmem:[%s14224_s0 + $0xc0] sm:$0xff] }
  0x42   :  { %514 = vxpose.xlu1.c.b16.cont [3/8] %v131_v5, 128  ;;  %7526 = vmatpush3.bf16.msra.mxu0 %v9549_v21  ;;  %v104_v36 = vld [vmem:[%s14224_s0 + $0xc8] sm:$0xff]  ;;  %v87_v37 = vld [vmem:[%s14224_s0 + $0x40] sm:$0xff]  ;;  %v9591_v39 = vpack.c.bf16 %v86_v33, %v85_v32  ;;  %v105_v40 = vld [vmem:[%s14224_s0 + $0xd0] sm:$0xff]  ;;  %v14238_v5 = vmov 0  }
  0x43   :  { %7527 = vmatprep.subr.bf16.mxu0 %v9552_v22  ;;  %v88_v38 = vld [vmem:[%s14224_s0 + $0x48] sm:$0xff]  ;;  %v106_v41 = vld [vmem:[%s14224_s0 + $0xd8] sm:$0xff]  ;;  %v155_v42 = vld [vmem:[#allocation2 + $0x70] sm:$0xff]   ;;  %v9600_v44 = vpack.c.bf16 %v104_v36, %v103_v35  ;;  %1139 = vmatprep.mubr.bf16.mxu1 %v14238_v5  ;;  %v9704_v23 = vsel %vm1050_vm0, 65535, %v14238_v5 }
  0x44   :  { %v139_v43 = vld [vmem:[#allocation2 + $0x30] sm:$0xff]   ;;  %v90_v46 = vld [vmem:[%s14224_s0 + $0x58] sm:$0xff]  ;;  %v9609_v47 = vpack.c.bf16 %v88_v38, %v87_v37  ;;  %v107_v48 = vld [vmem:[%s14224_s0 + $0xe0] sm:$0xff]  ;;  %v9618_v52 = vpack.c.bf16 %v106_v41, %v105_v40 }
  0x45   :  { %531 = vxpose.xlu0.c.b16.cont [4/8] %v149_v8, 128  ;;  %v89_v45 = vld [vmem:[%s14224_s0 + $0x50] sm:$0xff]  ;;  %v108_v49 = vld [vmem:[%s14224_s0 + $0xe8] sm:$0xff]  ;;  %v157_v50 = vld [vmem:[#allocation2 + $0x78] sm:$0xff]  }
  0x46   :  { %515 = vxpose.xlu1.c.b16.cont [4/8] %v133_v17, 128  ;;  %7528 = vmatpush3.bf16.msra.mxu0 %v9567_v29  ;;  %v141_v51 = vld [vmem:[#allocation2 + $0x38] sm:$0xff]   ;;  %v91_v53 = vld [vmem:[%s14224_s0 + $0x60] sm:$0xff]  ;;  %v92_v54 = vld [vmem:[%s14224_s0 + $0x68] sm:$0xff]  ;;  %v9627_v55 = vpack.c.bf16 %v90_v46, %v89_v45  ;;  %v9636_v58 = vpack.c.bf16 %v108_v49, %v107_v48 }
  0x47   :  { %7529 = vmatprep.subr.bf16.mxu0 %v9570_v31  ;;  %v109_v56 = vld [vmem:[%s14224_s0 + $0xf0] sm:$0xff]  ;;  %v110_v57 = vld [vmem:[%s14224_s0 + $0xf8] sm:$0xff]  ;;  %v9645_v61 = vpack.c.bf16 %v92_v54, %v91_v53  ;;  %v785_v0 = vld [vmem:[%s14227_s3] sm:$0xff] }
  0x48   :  { %v93_v59 = vld [vmem:[%s14224_s0 + $0x70] sm:$0xff]  ;;  %v94_v60 = vld [vmem:[%s14224_s0 + $0x78] sm:$0xff]  ;;  %v9648_v62 = vpack.c.bf16 %v110_v57, %v109_v56  ;;  %v789_v1 = vld [vmem:[%s14227_s3 + $0x20] sm:$0xff] }
  0x49   :  { %532 = vxpose.xlu0.c.b16.cont [5/8] %v151_v27, 128  ;;  %v9651_v63 = vpack.c.bf16 %v94_v60, %v93_v59  ;;  %v9660_v2 = vcombine.high %v785_v0, %v789_v1  ;;  %v793_v3 = vld [vmem:[%s14227_s3 + $0x40] sm:$0xff]  ;;  %v9670_v6 = vcombine.low %v785_v0, %v789_v1  ;;  %v795_v36 = vld [vmem:[%s14227_s3 + $0x50] sm:$0xff]  ;;  %v786_v45 = vld [vmem:[%s14227_s3 + $0x8] sm:$0xff] }
  0x4a   :  { %516 = vxpose.xlu1.c.b16.cont [5/8] %v135_v28, 128  ;;  %7530 = vmatpush3.bf16.msra.mxu0 %v9591_v39  ;;  %v797_v4 = vld [vmem:[%s14227_s3 + $0x60] sm:$0xff]  ;;  %v787_v28 = vld [vmem:[%s14227_s3 + $0x10] sm:$0xff]  ;;  %v790_v46 = vld [vmem:[%s14227_s3 + $0x28] sm:$0xff] }
  0x4b   :  { %7531 = vmatprep.subr.bf16.mxu0 %v9600_v44  ;;  %v9673_v7 = vcombine.high %v793_v3, %v797_v4  ;;  %8419 = vmatprep.subr.bf16.mxu1 %v9660_v2  ;;  %v801_v8 = vld [vmem:[%s14227_s3 + $0x80] sm:$0xff]  ;;  %v9684_v11 = vcombine.low %v793_v3, %v797_v4  ;;  %v799_v37 = vld [vmem:[%s14227_s3 + $0x70] sm:$0xff] }
  0x4c   :  { %v805_v10 = vld [vmem:[%s14227_s3 + $0xa0] sm:$0xff]  ;;  %8424 = vmatpush1.bf16.msra.mxu1 %v9670_v6  ;;  %v9758_v38 = vcombine.low %v795_v36, %v799_v37  ;;  %v9760_v40 = vcombine.high %v795_v36, %v799_v37  ;;  %v803_v54 = vld [vmem:[%s14227_s3 + $0x90] sm:$0xff]  ;;  %v806_v36 = vld [vmem:[%s14227_s3 + $0xa8] sm:$0xff] }
  0x4d   :  { %533 = vxpose.xlu0.c.b16.cont [6/8] %v153_v30, 128  ;;  %8420 = vmatprep.subr.bf16.mxu1 %v9673_v7  ;;  %v9686_v12 = vcombine.high %v801_v8, %v805_v10  ;;  %v809_v14 = vld [vmem:[%s14227_s3 + $0xc0] sm:$0xff]  ;;  %v9699_v17 = vcombine.low %v801_v8, %v805_v10  ;;  %v791_v30 = vld [vmem:[%s14227_s3 + $0x30] sm:$0xff] }
  0x4e   :  { %517 = vxpose.xlu1.c.b16.cont [6/8] %v137_v34, 128  ;;  %7532 = vmatpush3.bf16.msra.mxu0 %v9609_v47  ;;  %v813_v15 = vld [vmem:[%s14227_s3 + $0xe0] sm:$0xff]  ;;  %v9739_v32 = vcombine.low %v787_v28, %v791_v30  ;;  %v9741_v33 = vcombine.high %v787_v28, %v791_v30  ;;  %v807_v56 = vld [vmem:[%s14227_s3 + $0xb0] sm:$0xff]  ;;  %v798_v28 = vld [vmem:[%s14227_s3 + $0x68] sm:$0xff]  ;;  %v9831_v30 = vcombine.low %v786_v45, %v790_v46 }
  0x4f   :  { %7533 = vmatprep.subr.bf16.mxu0 %v9618_v52  ;;  %v817_v16 = vld [vmem:[%s14227_s3 + $0x100] sm:$0x11]  ;;  %v9701_v19 = vcombine.high %v809_v14, %v813_v15  ;;  %v9708_v24 = vcombine.low %v809_v14, %v813_v15  ;;  %v9796_v57 = vcombine.low %v803_v54, %v807_v56  ;;  %v9798_v59 = vcombine.high %v803_v54, %v807_v56  ;;  %v811_v10 = vld [vmem:[%s14227_s3 + $0xd0] sm:$0xff] }
  0x50   :  { %8425 = vmatpush1.bf16.msra.mxu1 %v9684_v11  ;;  %v6779_v20 = vcombine.high %v817_v16, %v817_v16  ;;  %v6778_v25 = vcombine.low %v817_v16, %v817_v16  ;;  %v815_v14 = vld [vmem:[%s14227_s3 + $0xf0] sm:$0xff] }
  0x51   :  { %534 = vxpose.xlu0.c.b16.cont [7/8] %v155_v42, 128  ;;  %8421 = vmatprep.subr.bf16.mxu1 %v9686_v12  ;;  %v9817_v15 = vcombine.low %v811_v10, %v815_v14  ;;  %v9819_v16 = vcombine.high %v811_v10, %v815_v14  ;;  %v819_v14 = vld [vmem:[%s14227_s3 + $0x110] sm:$0x11] }
  0x52   :  { %518 = vxpose.xlu1.c.b16.cont [7/8] %v139_v43, 128  ;;  %7534 = vmatpush3.bf16.msra.mxu0 %v9627_v55  ;;  %v9711_v26 = vand.u32 %v6779_v20, %v9704_v23  ;;  %v9716_v27 = vand.u32 %v6778_v25, %v9704_v23  ;;  %v794_v25 = vld [vmem:[%s14227_s3 + $0x48] sm:$0xff] }
  0x53   :  { %7535 = vmatprep.subr.bf16.mxu0 %v9636_v58  ;;  %v9845_v37 = vcombine.low %v794_v25, %v798_v28 }
  0x54   :  { %8426 = vmatpush1.bf16.msra.mxu1 %v9699_v17 }
  0x55   :  { %535 = vxpose.xlu0.c.b16.end [8/8] %v157_v50, 128  ;;  %8422 = vmatprep.subr.bf16.mxu1 %v9701_v19  ;;  %v9781_v50 = vcombine.high %v786_v45, %v790_v46  ;;  %v818_v45 = vld [vmem:[%s14227_s3 + $0x108] sm:$0x11] }
  0x56   :  { %519 = vxpose.xlu1.c.b16.end [8/8] %v141_v51, 128  ;;  %7536 = vmatpush3.bf16.msra.mxu0 %v9645_v61 }
  0x57   :  { %7537 = vmatprep.subr.bf16.mxu0 %v9648_v62 }
  0x58   :  { %8427 = vmatpush1.bf16.msra.mxu1 %v9708_v24 }
  0x59   :  { %8423 = vmatprep.subr.bf16.mxu1 %v9711_v26 }
  0x5a   :  { %7538 = vmatpush3.bf16.msra.mxu0 %v9651_v63 }
  0x5b   :  { %1077 = vmatprep.subr.bf16.mxu0 %v9660_v2 }
  0x5c   :  { %8428 = vmatpush1.bf16.msra.mxu1 %v9716_v27 }
  0x5d   :  { %1463 = vmatprep.subr.bf16.mxu1 %v9741_v33 }
  0x5f   :  { %6789 = vmatmul.mubr.msk.bf16.vlgmr.msra.gmra.mrb[0].mxu1 %vm1001_vm1, %v9591_v39 }
  0x60   :  { %1149 = vmatprep.mubr.bf16.mxu1 %v14238_v5  ;;  %1464 = vmatpush1.bf16.msra.mxu1 %v9739_v32 }
  0x61   :  { %1465 = vmatprep.subr.bf16.mxu1 %v9760_v40 }
  0x64   :  { %1466 = vmatpush1.bf16.msra.mxu1 %v9758_v38 }
  0x65   :  { %1467 = vmatprep.subr.bf16.mxu1 %v9798_v59 }
  0x67   :  { %6790 = vmatmul.mubr.msk.bf16.gmra.mrb[4].mxu1 %vm1001_vm1, %v9609_v47 }
  0x68   :  { %1159 = vmatprep.mubr.bf16.mxu1 %v14238_v5  ;;  %1468 = vmatpush1.bf16.msra.mxu1 %v9796_v57 }
  0x69   :  { %1469 = vmatprep.subr.bf16.mxu1 %v9819_v16 }
  0x6c   :  { %1470 = vmatpush1.bf16.msra.mxu1 %v9817_v15 }
  0x6f   :  { %6791 = vmatmul.mubr.msk.bf16.gmra.mrb[8].mxu1 %vm1001_vm1, %v9627_v55 }
  0x70   :  { %1169 = vmatprep.mubr.bf16.mxu1 %v14238_v5 }
  0x77   :  { %6792 = vmatmul.mubr.msk.bf16.gmra.mrb[12].mxu1 %vm1001_vm1, %v9645_v61 }
  0x78   :  { %1179 = vmatprep.mubr.bf16.mxu1 %v14238_v5 }
  0x7f   :  { %6793 = vmatmul.mubr.msk.bf16.gmra.mrb[16].mxu1 %vm1001_vm1, %v9651_v63 }
  0x80   :  { %1189 = vmatprep.mubr.bf16.mxu1 %v14238_v5 }
  0x87   :  { %6794 = vmatmul.mubr.msk.bf16.gmra.mrb[20].mxu1 %vm1001_vm1, %v9517_v9 }
  0x88   :  { %1199 = vmatprep.mubr.bf16.mxu1 %v14238_v5 }
  0x8f   :  { %6795 = vmatmul.mubr.msk.bf16.gmra.mrb[24].mxu1 %vm1001_vm1, %v9540_v18 }
  0x90   :  { %1209 = vmatprep.mubr.bf16.mxu1 %v14238_v5 }
  0x97   :  { %6796 = vmatmul.mubr.msk.bf16.gmra.mrb[28].mxu1 %vm1001_vm1, %v9552_v22 }
  0x98   :  { %1219 = vmatprep.mubr.bf16.mxu1 %v14238_v5 }
  0x9f   :  { %v536_v34 = vpop.trf.xlu0  ;;  %6797 = vmatmul.mubr.msk.bf16.gmra.mrb[32].mxu1 %vm1001_vm1, %v9570_v31 }
  0xa0   :  { %v520_v35 = vpop.trf.xlu1  ;;  %576 = vmatprep.mubr.bf16.mxu0 %v536_v34  ;;  %1229 = vmatprep.mubr.bf16.mxu1 %v14238_v5  ;;  %v9833_v34 = vcombine.high %v794_v25, %v798_v28  ;;  %v6782_v25 = vcombine.low %v819_v14, %v819_v14  ;;  %v6783_v28 = vcombine.high %v819_v14, %v819_v14 }
  0xa1   :  { %577 = vmatmul.mubr.bf16.vlgmr.msra.gmra.mrb[0].mxu0 %v520_v35  ;;  %v802_v35 = vld [vmem:[%s14227_s3 + $0x88] sm:$0xff] }
  0xa2   :  { %1078 = vmatpush1.bf16.msra.mxu0 %v9670_v6  ;;  %v9860_v46 = vcombine.low %v802_v35, %v806_v36 }
  0xa3   :  { %v537_v41 = vpop.trf.xlu0  ;;  %1079 = vmatprep.subr.bf16.mxu0 %v9673_v7 }
  0xa4   :  { %584 = vmatprep.mubr.bf16.mxu0 %v537_v41  ;;  %v521_v42 = vpop.trf.xlu1  ;;  %v9848_v41 = vcombine.high %v802_v35, %v806_v36  ;;  %v804_v35 = vld [vmem:[%s14227_s3 + $0x98] sm:$0xff] }
  0xa5   :  { %v808_v36 = vld [vmem:[%s14227_s3 + $0xb8] sm:$0xff] }
  0xa6   :  { %1080 = vmatpush1.bf16.msra.mxu0 %v9684_v11 }
  0xa7   :  { %v538_v43 = vpop.trf.xlu0  ;;  %1081 = vmatprep.subr.bf16.mxu0 %v9686_v12  ;;  %6798 = vmatmul.mubr.msk.bf16.gmra.mrb[36].mxu1 %vm1001_vm1, %v9600_v44 }
  0xa8   :  { %v522_v48 = vpop.trf.xlu1  ;;  %1239 = vmatprep.mubr.bf16.mxu1 %v14238_v5 }
  0xa9   :  { %585 = vmatmul.mubr.bf16.gmra.mrb[4].mxu0 %v521_v42  ;;  %v810_v42 = vld [vmem:[%s14227_s3 + $0xc8] sm:$0xff] }
  0xaa   :  { %592 = vmatprep.mubr.bf16.mxu0 %v538_v43  ;;  %1082 = vmatpush1.bf16.msra.mxu0 %v9699_v17  ;;  %v814_v43 = vld [vmem:[%s14227_s3 + $0xe8] sm:$0xff] }
  0xab   :  { %1083 = vmatprep.subr.bf16.mxu0 %v9701_v19  ;;  %v539_v49 = vpop.trf.xlu0 }
  0xac   :  { %v523_v51 = vpop.trf.xlu1 }
  0xae   :  { %1084 = vmatpush1.bf16.msra.mxu0 %v9708_v24 }
  0xaf   :  { %1085 = vmatprep.subr.bf16.mxu0 %v9711_v26  ;;  %v540_v53 = vpop.trf.xlu0  ;;  %6799 = vmatmul.mubr.msk.bf16.gmra.mrb[40].mxu1 %vm1001_vm1, %v9618_v52 }
  0xb0   :  { %v524_v60 = vpop.trf.xlu1  ;;  %1249 = vmatprep.mubr.bf16.mxu1 %v14238_v5 }
  0xb1   :  { %593 = vmatmul.mubr.bf16.gmra.mrb[8].mxu0 %v522_v48  ;;  %v9863_v48 = vcombine.high %v810_v42, %v814_v43 }
  0xb2   :  { %600 = vmatprep.mubr.bf16.mxu0 %v539_v49  ;;  %1086 = vmatpush1.bf16.msra.mxu0 %v9716_v27  ;;  %v6781_v49 = vcombine.high %v818_v45, %v818_v45 }
  0xb3   :  { %1270 = vmatprep.subr.bf16.mxu0 %v9781_v50  ;;  %v541_v0 = vpop.trf.xlu0 }
  0xb4   :  { %v525_v1 = vpop.trf.xlu1  ;;  %v9873_v54 = vand.u32 %v6781_v49, %v9704_v23  ;;  %v9928_v49 = vcombine.low %v804_v35, %v808_v36 }
  0xb6   :  { %14509 = vst [vmem:[#allocation20_spill] sm:$0xff] %v9928_v49 }
  0xb7   :  { %v542_v3 = vpop.trf.xlu0  ;;  %6800 = vmatmul.mubr.msk.bf16.gmra.mrb[44].mxu1 %vm1001_vm1, %v9636_v58 }
  0xb8   :  { %1259 = vmatprep.mubr.bf16.mxu1 %v14238_v5  ;;  %v526_v4 = vpop.trf.xlu1 }
  0xb9   :  { %601 = vmatmul.mubr.bf16.gmra.mrb[12].mxu0 %v523_v51  ;;  %v9869_v51 = vcombine.low %v810_v42, %v814_v43  ;;  %v9919_v42 = vcombine.high %v804_v35, %v808_v36  ;;  %v9922_v43 = vand.u32 %v6783_v28, %v9704_v23 }
  0xba   :  { %608 = vmatprep.mubr.bf16.mxu0 %v540_v53  ;;  %v6780_v53 = vcombine.low %v818_v45, %v818_v45  ;;  %v9925_v45 = vand.u32 %v6782_v25, %v9704_v23  ;;  %v9387_v25 = vmov 64  }
  0xbb   :  { %v543_v8 = vpop.trf.xlu0  ;;  %14508 = vst [vmem:[#allocation19_spill] sm:$0xff] %v9919_v42  ;;  %1471 = vmatprep.subr.bf16.mxu1 %v9922_v43  ;;  %8448 = vset.pattern.permute.xlu0 %v9387_v25 }
  0xbc   :  { %v527_v20 = vpop.trf.xlu1  ;;  %v9877_v56 = vand.u32 %v6780_v53, %v9704_v23  ;;  %v812_v53 = vld [vmem:[%s14227_s3 + $0xd8] sm:$0xff]  ;;  %1472 = vmatpush1.bf16.msra.mxu1 %v9925_v45  ;;  %8449 = vset.pattern.permute.xlu1 %v9387_v25 }
  0xbd   :  { %2857 = vmatprep.subr.bf16.mxu1 %v9660_v2 }
  0xbf   :  { %6801 = vmatmul.mubr.msk.bf16.gmra.mrb[48].mxu1 %vm1001_vm1, %v9648_v62 }
  0xc0   :  { %1495 = vmatprep.mubr.bf16.mxu1 %v14238_v5 }
  0xc1   :  { %609 = vmatmul.mubr.bf16.gmra.mrb[16].mxu0 %v524_v60  ;;  %v788_v60 = vld [vmem:[%s14227_s3 + $0x18] sm:$0xff] }
  0xc2   :  { %616 = vmatprep.mubr.bf16.mxu0 %v541_v0  ;;  %v792_v0 = vld [vmem:[%s14227_s3 + $0x38] sm:$0xff] }
  0xc7   :  { %6818 = vmatmul.mubr.msk.bf16.vlgmr.msra.gmra.mrb[52].mxu1 %vm1001_vm1, %v9528_v13 }
  0xc8   :  { %2858 = vmatpush1.bf16.msra.mxu1 %v9670_v6  ;;  %1505 = vmatprep.mubr.bf16.mxu1 %v14238_v5 }
  0xc9   :  { %617 = vmatmul.mubr.bf16.gmra.mrb[20].mxu0 %v525_v1  ;;  %v9890_v1 = vcombine.high %v788_v60, %v792_v0  ;;  %2859 = vmatprep.subr.bf16.mxu1 %v9673_v7 }
  0xca   :  { %624 = vmatprep.mubr.bf16.mxu0 %v542_v3  ;;  %v9892_v3 = vcombine.low %v788_v60, %v792_v0  ;;  %v816_v60 = vld [vmem:[%s14227_s3 + $0xf8] sm:$0xff] }
  0xcb   :  { %v9939_v0 = vcombine.high %v812_v53, %v816_v60 }
  0xcc   :  { %14505 = vst [vmem:[#allocation16_spill] sm:$0xff] %v9892_v3  ;;  %2860 = vmatpush1.bf16.msra.mxu1 %v9684_v11 }
  0xcd   :  { %14510 = vst [vmem:[#allocation21_spill] sm:$0xff] %v9939_v0  ;;  %2861 = vmatprep.subr.bf16.mxu1 %v9686_v12 }
  0xcf   :  { %6819 = vmatmul.mubr.msk.bf16.gmra.mrb[56].mxu1 %vm1001_vm1, %v9549_v21 }
  0xd0   :  { %1515 = vmatprep.mubr.bf16.mxu1 %v14238_v5  ;;  %2862 = vmatpush1.bf16.msra.mxu1 %v9699_v17 }
  0xd1   :  { %625 = vmatmul.mubr.bf16.gmra.mrb[24].mxu0 %v526_v4  ;;  %v796_v4 = vld [vmem:[%s14227_s3 + $0x58] sm:$0xff]  ;;  %2863 = vmatprep.subr.bf16.mxu1 %v9701_v19 }
  0xd2   :  { %632 = vmatprep.mubr.bf16.mxu0 %v543_v8  ;;  %v800_v8 = vld [vmem:[%s14227_s3 + $0x78] sm:$0xff] }
  0xd3   :  { %v9901_v10 = vcombine.high %v796_v4, %v800_v8 }
  0xd4   :  { %2864 = vmatpush1.bf16.msra.mxu1 %v9708_v24 }
  0xd5   :  { %14506 = vst [vmem:[#allocation17_spill] sm:$0xff] %v9901_v10  ;;  %2865 = vmatprep.subr.bf16.mxu1 %v9711_v26 }
  0xd7   :  { %6820 = vmatmul.mubr.msk.bf16.gmra.mrb[60].mxu1 %vm1001_vm1, %v9567_v29 }
  0xd8   :  { %1525 = vmatprep.mubr.bf16.mxu1 %v14238_v5  ;;  %2866 = vmatpush1.bf16.msra.mxu1 %v9716_v27 }
  0xd9   :  { %633 = vmatmul.mubr.bf16.gmra.mrb[28].mxu0 %v527_v20  ;;  %v9910_v20 = vcombine.low %v796_v4, %v800_v8  ;;  %v820_v4 = vld [vmem:[%s14227_s3 + $0x118] sm:$0x11]  ;;  %v9949_v8 = vcombine.low %v812_v53, %v816_v60  ;;  %2970 = vmatprep.subr.bf16.mxu1 %v9781_v50 }
  0xda   :  { %1109 = vmatprep.mubr.bf16.mxu0 %v14238_v5  ;;  %v6785_v14 = vcombine.high %v820_v4, %v820_v4  ;;  %v6784_v28 = vcombine.low %v820_v4, %v820_v4 }
  0xdb   :  { %14507 = vst [vmem:[#allocation18_spill] sm:$0xff] %v9910_v20  ;;  %14511 = vst [vmem:[#allocation22_spill] sm:$0xff] %v9949_v8 }
  0xdc   :  { %v9953_v35 = vand.u32 %v6785_v14, %v9704_v23  ;;  %v9961_v2 = vand.u32 %v6784_v28, %v9704_v23 }
  0xde   :  { %14512 = vst [vmem:[#allocation23_spill] sm:$0xff] %v9953_v35  ;;  %14513 = vst [vmem:[#allocation24_spill] sm:$0xff] %v9961_v2 }
  0xdf   :  { %6821 = vmatmul.mubr.msk.bf16.gmra.mrb[64].mxu1 %vm1001_vm1, %v9591_v39 }
  0xe0   :  { %1535 = vmatprep.mubr.bf16.mxu1 %v14238_v5 }
  0xe1   :  { %6786 = vmatmul.mubr.msk.bf16.vlgmr.msra.gmra.mrb[32].mxu0 %vm1001_vm1, %v9528_v13 }
  0xe2   :  { %1271 = vmatpush1.bf16.msra.mxu0 %v9831_v30  ;;  %1119 = vmatprep.mubr.bf16.mxu0 %v14238_v5 }
  0xe3   :  { %1272 = vmatprep.subr.bf16.mxu0 %v9833_v34 }
  0xe6   :  { %1273 = vmatpush1.bf16.msra.mxu0 %v9845_v37 }
  0xe7   :  { %1274 = vmatprep.subr.bf16.mxu0 %v9848_v41  ;;  %6822 = vmatmul.mubr.msk.bf16.gmra.mrb[68].mxu1 %vm1001_vm1, %v9609_v47 }
  0xe8   :  { %1545 = vmatprep.mubr.bf16.mxu1 %v14238_v5 }
  0xe9   :  { %6787 = vmatmul.mubr.msk.bf16.gmra.mrb[36].mxu0 %vm1001_vm1, %v9549_v21 }
  0xea   :  { %1275 = vmatpush1.bf16.msra.mxu0 %v9860_v46  ;;  %1129 = vmatprep.mubr.bf16.mxu0 %v14238_v5 }
  0xeb   :  { %1276 = vmatprep.subr.bf16.mxu0 %v9863_v48 }
  0xee   :  { %1277 = vmatpush1.bf16.msra.mxu0 %v9869_v51 }
  0xef   :  { %1278 = vmatprep.subr.bf16.mxu0 %v9873_v54  ;;  %6823 = vmatmul.mubr.msk.bf16.gmra.mrb[72].mxu1 %vm1001_vm1, %v9627_v55 }
  0xf0   :  { %1555 = vmatprep.mubr.bf16.mxu1 %v14238_v5 }
  0xf1   :  { %6788 = vmatmul.mubr.msk.bf16.gmra.mrb[40].mxu0 %vm1001_vm1, %v9567_v29 }
  0xf2   :  { %1279 = vmatpush1.bf16.msra.mxu0 %v9877_v56  ;;  %1302 = vmatprep.mubr.bf16.mxu0 %v14238_v5 }
  0xf3   :  { %1656 = vmatprep.subr.bf16.mxu0 %v9890_v1 }
  0xf7   :  { %6824 = vmatmul.mubr.msk.bf16.gmra.mrb[76].mxu1 %vm1001_vm1, %v9645_v61 }
  0xf8   :  { %1565 = vmatprep.mubr.bf16.mxu1 %v14238_v5 }
  0xf9   :  { %6802 = vmatmul.mubr.msk.bf16.vlgmr.msra.gmra.mrb[44].mxu0 %vm1001_vm1, %v9528_v13 }
  0xfa   :  { %1312 = vmatprep.mubr.bf16.mxu0 %v14238_v5  ;;  %1657 = vmatpush1.bf16.msra.mxu0 %v9892_v3 }
  0xfb   :  { %1658 = vmatprep.subr.bf16.mxu0 %v9901_v10 }
  0xfe   :  { %1659 = vmatpush1.bf16.msra.mxu0 %v9910_v20 }
  0xff   :  { %1660 = vmatprep.subr.bf16.mxu0 %v9919_v42  ;;  %6825 = vmatmul.mubr.msk.bf16.gmra.mrb[80].mxu1 %vm1001_vm1, %v9651_v63 }
 0x100   :  { %1575 = vmatprep.mubr.bf16.mxu1 %v14238_v5 }
 0x101   :  { %6803 = vmatmul.mubr.msk.bf16.gmra.mrb[48].mxu0 %vm1001_vm1, %v9549_v21 }
 0x102   :  { %1322 = vmatprep.mubr.bf16.mxu0 %v14238_v5  ;;  %1661 = vmatpush1.bf16.msra.mxu0 %v9928_v49 }
 0x103   :  { %1662 = vmatprep.subr.bf16.mxu0 %v9939_v0 }
 0x106   :  { %1663 = vmatpush1.bf16.msra.mxu0 %v9949_v8 }
 0x107   :  { %1664 = vmatprep.subr.bf16.mxu0 %v9953_v35  ;;  %6826 = vmatmul.mubr.msk.bf16.gmra.mrb[84].mxu1 %vm1001_vm1, %v9517_v9 }
 0x108   :  { %1585 = vmatprep.mubr.bf16.mxu1 %v14238_v5 }
 0x109   :  { %6804 = vmatmul.mubr.msk.bf16.gmra.mrb[52].mxu0 %vm1001_vm1, %v9567_v29 }
 0x10a   :  { %1332 = vmatprep.mubr.bf16.mxu0 %v14238_v5  ;;  %1665 = vmatpush1.bf16.msra.mxu0 %v9961_v2 }
 0x10b   :  { %3083 = vmatprep.subr.bf16.mxu0 %v9741_v33 }
 0x10f   :  { %6827 = vmatmul.mubr.msk.bf16.gmra.mrb[88].mxu1 %vm1001_vm1, %v9540_v18 }
 0x110   :  { %1595 = vmatprep.mubr.bf16.mxu1 %v14238_v5 }
 0x111   :  { %6805 = vmatmul.mubr.msk.bf16.gmra.mrb[56].mxu0 %vm1001_vm1, %v9591_v39 }
 0x112   :  { %1342 = vmatprep.mubr.bf16.mxu0 %v14238_v5 }
 0x117   :  { %6828 = vmatmul.mubr.msk.bf16.gmra.mrb[92].mxu1 %vm1001_vm1, %v9552_v22 }
 0x118   :  { %1605 = vmatprep.mubr.bf16.mxu1 %v14238_v5 }
 0x119   :  { %6806 = vmatmul.mubr.msk.bf16.gmra.mrb[60].mxu0 %vm1001_vm1, %v9609_v47 }
 0x11a   :  { %1352 = vmatprep.mubr.bf16.mxu0 %v14238_v5 }
 0x11f   :  { %6829 = vmatmul.mubr.msk.bf16.gmra.mrb[96].mxu1 %vm1001_vm1, %v9570_v31 }
 0x120   :  { %1615 = vmatprep.mubr.bf16.mxu1 %v14238_v5 }
 0x121   :  { %6807 = vmatmul.mubr.msk.bf16.gmra.mrb[64].mxu0 %vm1001_vm1, %v9627_v55 }
 0x122   :  { %1362 = vmatprep.mubr.bf16.mxu0 %v14238_v5 }
 0x127   :  { %6830 = vmatmul.mubr.msk.bf16.gmra.mrb[100].mxu1 %vm1001_vm1, %v9600_v44 }
 0x128   :  { %1625 = vmatprep.mubr.bf16.mxu1 %v14238_v5 }
 0x129   :  { %6808 = vmatmul.mubr.msk.bf16.gmra.mrb[68].mxu0 %vm1001_vm1, %v9645_v61 }
 0x12a   :  { %1372 = vmatprep.mubr.bf16.mxu0 %v14238_v5 }
 0x12f   :  { %6831 = vmatmul.mubr.msk.bf16.gmra.mrb[104].mxu1 %vm1001_vm1, %v9618_v52 }
 0x130   :  { %1635 = vmatprep.mubr.bf16.mxu1 %v14238_v5 }
 0x131   :  { %6809 = vmatmul.mubr.msk.bf16.gmra.mrb[72].mxu0 %vm1001_vm1, %v9651_v63 }
 0x132   :  { %1382 = vmatprep.mubr.bf16.mxu0 %v14238_v5  ;;  %v10056_v6 = vpop.f32.mrb[0].mxu1 }
 0x133   :  { %14514 = vst [vmem:[#allocation25_spill] sm:$0xff] %v10056_v6  ;;  %v10058_v11 = vpop.f32.mrb[1].mxu1 }
 0x134   :  { %14515 = vst [vmem:[#allocation26_spill] sm:$0xff] %v10058_v11  ;;  %v7419_v17 = vpack.c.bf16 %v10058_v11, %v10056_v6  ;;  %v10064_v19 = vpop.f32.mrb[2].mxu1 }
 0x135   :  { %14516 = vst [vmem:[#allocation27_spill] sm:$0xff] %v10064_v19  ;;  %v10069_v26 = vpop.f32.mrb[3].mxu1 }
 0x136   :  { %14517 = vst [vmem:[#allocation28_spill] sm:$0xff] %v10069_v26  ;;  %2641 = vst [vmem:[#allocation8 + $0xc0] sm:$0xff] %v7419_v17  ;;  %v7423_v33 = vpack.c.bf16 %v10069_v26, %v10064_v19 }
 0x137   :  { %6832 = vmatmul.mubr.msk.bf16.gmra.mrb[108].mxu1 %vm1001_vm1, %v9636_v58 }
 0x138   :  { %1645 = vmatprep.mubr.bf16.mxu1 %v14238_v5  ;;  %2645 = vst [vmem:[#allocation8 + $0xe0] sm:$0xff] %v7423_v33 }
 0x139   :  { %6810 = vmatmul.mubr.msk.bf16.gmra.mrb[76].mxu0 %vm1001_vm1, %v9517_v9 }
 0x13a   :  { %1392 = vmatprep.mubr.bf16.mxu0 %v14238_v5  ;;  %v10082_v36 = vpop.f32.mrb[4].mxu1 }
 0x13b   :  { %14518 = vst [vmem:[#allocation29_spill] sm:$0xff] %v10082_v36  ;;  %v10084_v60 = vpop.f32.mrb[5].mxu1 }
 0x13c   :  { %14519 = vst [vmem:[#allocation30_spill] sm:$0xff] %v10084_v60  ;;  %v10090_v14 = vpop.f32.mrb[6].mxu1 }
 0x13d   :  { %14520 = vst [vmem:[#allocation31_spill] sm:$0xff] %v10090_v14 }
 0x13f   :  { %6833 = vmatmul.mubr.msk.bf16.gmra.mrb[112].mxu1 %vm1001_vm1, %v9648_v62 }
 0x140   :  { %2889 = vmatprep.mubr.bf16.mxu1 %v14238_v5 }
 0x141   :  { %6811 = vmatmul.mubr.msk.bf16.gmra.mrb[80].mxu0 %vm1001_vm1, %v9540_v18 }
 0x142   :  { %1402 = vmatprep.mubr.bf16.mxu0 %v14238_v5 }
 0x149   :  { %6812 = vmatmul.mubr.msk.bf16.gmra.mrb[84].mxu0 %vm1001_vm1, %v9552_v22 }
 0x14a   :  { %1412 = vmatprep.mubr.bf16.mxu0 %v14238_v5 }
 0x151   :  { %6813 = vmatmul.mubr.msk.bf16.gmra.mrb[88].mxu0 %vm1001_vm1, %v9570_v31 }
 0x152   :  { %1422 = vmatprep.mubr.bf16.mxu0 %v14238_v5 }
 0x159   :  { %6814 = vmatmul.mubr.msk.bf16.gmra.mrb[92].mxu0 %vm1001_vm1, %v9600_v44 }
 0x15a   :  { %1432 = vmatprep.mubr.bf16.mxu0 %v14238_v5 }
 0x161   :  { %6815 = vmatmul.mubr.msk.bf16.gmra.mrb[96].mxu0 %vm1001_vm1, %v9618_v52 }
 0x162   :  { %1442 = vmatprep.mubr.bf16.mxu0 %v14238_v5 }
 0x169   :  { %6816 = vmatmul.mubr.msk.bf16.gmra.mrb[100].mxu0 %vm1001_vm1, %v9636_v58 }
 0x16a   :  { %1452 = vmatprep.mubr.bf16.mxu0 %v14238_v5 }
 0x171   :  { %6817 = vmatmul.mubr.msk.bf16.gmra.mrb[104].mxu0 %vm1001_vm1, %v9648_v62 }
 0x172   :  { %1688 = vmatprep.mubr.bf16.mxu0 %v14238_v5 }
 0x174   :  { %v7539_v7 = vpop.f32.mrb[0].mxu0 }
 0x175   :  { %v7540_v12 = vpop.f32.mrb[1].mxu0 }
 0x176   :  { %v10067_v23 = vadd.f32 %v7540_v12, %v7539_v7  ;;  %v7542_v24 = vpop.f32.mrb[2].mxu0 }
 0x177   :  { %v7543_v27 = vpop.f32.mrb[3].mxu0 }
 0x178   :  { %8522 = vrcp.f32 %v10067_v23  ;;  %v10074_v50 = vadd.f32 %v7543_v27, %v7542_v24  ;;  %vm641_vm2 = vcmp.gt.f32.partialorder %v10067_v23, 0.0 }
 0x179   :  { %6834 = vmatmul.mubr.msk.bf16.vlgmr.msra.gmra.mrb[108].mxu0 %vm1001_vm1, %v9528_v13  ;;  %v7427_v13 = vpack.c.bf16 %v10084_v60, %v10082_v36 }
 0x17a   :  { %8524 = vrcp.f32 %v10074_v50  ;;  %1698 = vmatprep.mubr.bf16.mxu0 %v14238_v5  ;;  %3084 = vmatpush1.bf16.msra.mxu0 %v9739_v32  ;;  %vm642_vm3 = vcmp.gt.f32.partialorder %v10074_v50, 0.0 }
 0x17b   :  { %3085 = vmatprep.subr.bf16.mxu0 %v9760_v40  ;;  %v10096_v40 = vpop.f32.mrb[7].mxu1  ;;  %2649 = vst [vmem:[#allocation8 + $0x100] sm:$0xff] %v7427_v13 }
 0x17c   :  { %v7545_v53 = vpop.f32.mrb[4].mxu0  ;;  %14521 = vst [vmem:[#allocation32_spill] sm:$0xff] %v10096_v40  ;;  %v7431_v7 = vpack.c.bf16 %v10096_v40, %v10090_v14 }
 0x17d   :  { %v7546_v4 = vpop.f32.mrb[5].mxu0 }
 0x17e   :  { %v10093_v25 = vadd.f32 %v7546_v4, %v7545_v53  ;;  %v7548_v32 = vpop.f32.mrb[6].mxu0  ;;  %3086 = vmatpush1.bf16.msra.mxu0 %v9758_v38  ;;  %2653 = vst [vmem:[#allocation8 + $0x120] sm:$0xff] %v7431_v7 }
 0x17f   :  { %v7549_v28 = vpop.f32.mrb[7].mxu0  ;;  %3087 = vmatprep.subr.bf16.mxu0 %v9798_v59 }
 0x180   :  { %8526 = vrcp.f32 %v10093_v25  ;;  %v10102_v12 = vadd.f32 %v7549_v28, %v7548_v32  ;;  %vm643_vm4 = vcmp.gt.f32.partialorder %v10093_v25, 0.0 }
 0x181   :  { %6835 = vmatmul.mubr.msk.bf16.gmra.mrb[112].mxu0 %vm1001_vm1, %v9549_v21  ;;  %v10115_v21 = vpop.f32.mrb[8].mxu1 }
 0x182   :  { %v8523_v17 = vpop.eup %8522  ;;  %8528 = vrcp.f32 %v10102_v12  ;;  %1708 = vmatprep.mubr.bf16.mxu0 %v14238_v5  ;;  %3088 = vmatpush1.bf16.msra.mxu0 %v9796_v57  ;;  %14522 = vst [vmem:[#allocation33_spill] sm:$0xff] %v10115_v21  ;;  %v10119_v53 = vpop.f32.mrb[9].mxu1  ;;  %vm644_vm5 = vcmp.gt.f32.partialorder %v10102_v12, 0.0 }
 0x183   :  { %v10110_v38 = vsel %vm641_vm2, %v8523_v17, 0.0  ;;  %3089 = vmatprep.subr.bf16.mxu0 %v9819_v16  ;;  %14523 = vst [vmem:[#allocation34_spill] sm:$0xff] %v10119_v53  ;;  %v7435_v16 = vpack.c.bf16 %v10119_v53, %v10115_v21  ;;  %v10127_v13 = vpop.f32.mrb[10].mxu1 }
 0x184   :  { %v8525_v59 = vpop.eup %8524  ;;  %v7551_v24 = vpop.f32.mrb[8].mxu0  ;;  %2746 = vperm.xlu0 %8448, %v10110_v38   ;;  %14524 = vst [vmem:[#allocation35_spill] sm:$0xff] %v10127_v13 }
 0x185   :  { %v7552_v27 = vpop.f32.mrb[9].mxu0  ;;  %v10117_v33 = vsel %vm642_vm3, %v8525_v59, 0.0  ;;  %v10130_v28 = vpop.f32.mrb[11].mxu1  ;;  %2657 = vst [vmem:[#allocation8 + $0x140] sm:$0xff] %v7435_v16 }
 0x186   :  { %v10121_v4 = vadd.f32 %v7552_v27, %v7551_v24  ;;  %v7554_v57 = vpop.f32.mrb[10].mxu0  ;;  %2750 = vperm.xlu1 %8449, %v10117_v33   ;;  %3090 = vmatpush1.bf16.msra.mxu0 %v9817_v15  ;;  %14525 = vst [vmem:[#allocation36_spill] sm:$0xff] %v10130_v28  ;;  %v7439_v17 = vpack.c.bf16 %v10130_v28, %v10127_v13  ;;  %v10146_v27 = vpop.f32.mrb[12].mxu1 }
 0x187   :  { %v7555_v32 = vpop.f32.mrb[11].mxu0  ;;  %3091 = vmatprep.subr.bf16.mxu0 %v9922_v43  ;;  %14526 = vst [vmem:[#allocation37_spill] sm:$0xff] %v10146_v27 }
 0x188   :  { %8530 = vrcp.f32 %v10121_v4  ;;  %v10133_v7 = vadd.f32 %v7555_v32, %v7554_v57  ;;  %2661 = vst [vmem:[#allocation8 + $0x160] sm:$0xff] %v7439_v17  ;;  %vm645_vm6 = vcmp.gt.f32.partialorder %v10121_v4, 0.0 }
 0x189   :  { %6836 = vmatmul.mubr.msk.bf16.gmra.mrb[116].mxu0 %vm1001_vm1, %v9567_v29  ;;  %v10148_v29 = vpop.f32.mrb[13].mxu1 }
 0x18a   :  { %v8527_v15 = vpop.eup %8526  ;;  %8532 = vrcp.f32 %v10133_v7  ;;  %1718 = vmatprep.mubr.bf16.mxu0 %v14238_v5  ;;  %3092 = vmatpush1.bf16.msra.mxu0 %v9925_v45  ;;  %14527 = vst [vmem:[#allocation38_spill] sm:$0xff] %v10148_v29  ;;  %v7443_v17 = vpack.c.bf16 %v10148_v29, %v10146_v27  ;;  %v10155_v45 = vpop.f32.mrb[14].mxu1  ;;  %vm646_vm7 = vcmp.gt.f32.partialorder %v10133_v7, 0.0 }
 0x18b   :  { %v10143_v43 = vsel %vm643_vm4, %v8527_v15, 0.0  ;;  %14528 = vst [vmem:[#allocation39_spill] sm:$0xff] %v10155_v45  ;;  %v10159_v28 = vpop.f32.mrb[15].mxu1  ;;  %vm383_vm4 = vcmask 7168  }
 0x18c   :  { %v8529_v59 = vpop.eup %8528  ;;  %v7557_v24 = vpop.f32.mrb[12].mxu0  ;;  %2754 = vperm.xlu1 %8449, %v10143_v43   ;;  %14529 = vst [vmem:[#allocation40_spill] sm:$0xff] %v10159_v28  ;;  %2665 = vst [vmem:[#allocation8 + $0x180] sm:$0xff] %v7443_v17 }
 0x18d   :  { %v7558_v57 = vpop.f32.mrb[13].mxu0  ;;  %v10157_v5 = vsel %vm644_vm5, %v8529_v59, 0.0  ;;  %v14530_v59 = vmov 0   ;;  %v10176_v17 = vpop.f32.mrb[16].mxu1 }
 0x18e   :  { %v10150_v16 = vadd.f32 %v7558_v57, %v7557_v24  ;;  %v7560_v32 = vpop.f32.mrb[14].mxu0  ;;  %v7447_v24 = vpack.c.bf16 %v10159_v28, %v10155_v45  ;;  %14531 = vst [vmem:[#allocation41_spill] sm:$0xff] %v10176_v17  ;;  %v10180_v40 = vpop.f32.mrb[17].mxu1 }
 0x18f   :  { %v7561_v15 = vpop.f32.mrb[15].mxu0  ;;  %14532 = vst [vmem:[#allocation42_spill] sm:$0xff] %v10180_v40  ;;  %v10187_v11 = vpop.f32.mrb[18].mxu1 }
 0x190   :  { %8534 = vrcp.f32 %v10150_v16  ;;  %v10162_v53 = vadd.f32 %v7561_v15, %v7560_v32  ;;  %2758 = vperm.xlu1 %8449, %v10157_v5   ;;  %2669 = vst [vmem:[#allocation8 + $0x1a0] sm:$0xff] %v7447_v24  ;;  %v7451_v24 = vpack.c.bf16 %v10180_v40, %v10176_v17  ;;  %14533 = vst [vmem:[#allocation43_spill] sm:$0xff] %v10187_v11  ;;  %vm647_vm8 = vcmp.gt.f32.partialorder %v10150_v16, 0.0 }
 0x191   :  { %6837 = vmatmul.mubr.msk.bf16.gmra.mrb[120].mxu0 %vm1001_vm1, %v9591_v39 }
 0x192   :  { %v8531_v57 = vpop.eup %8530  ;;  %8536 = vrcp.f32 %v10162_v53  ;;  %1728 = vmatprep.mubr.bf16.mxu0 %v14530_v59  ;;  %2673 = vst [vmem:[#allocation8 + $0x1c0] sm:$0xff] %v7451_v24  ;;  %vm648_vm9 = vcmp.gt.f32.partialorder %v10162_v53, 0.0 }
 0x193   :  { %v10172_v29 = vsel %vm645_vm6, %v8531_v57, 0.0 }
 0x194   :  { %v8533_v32 = vpop.eup %8532  ;;  %v7563_v15 = vpop.f32.mrb[16].mxu0  ;;  %2762 = vperm.xlu0 %8448, %v10172_v29  }
 0x195   :  { %v7564_v28 = vpop.f32.mrb[17].mxu0  ;;  %v10178_v39 = vsel %vm646_vm7, %v8533_v32, 0.0  ;;  %v10192_v32 = vpop.f32.mrb[19].mxu1 }
 0x196   :  { %v10182_v60 = vadd.f32 %v7564_v28, %v7563_v15  ;;  %v7566_v26 = vpop.f32.mrb[18].mxu0  ;;  %2766 = vperm.xlu1 %8449, %v10178_v39   ;;  %14534 = vst [vmem:[#allocation44_spill] sm:$0xff] %v10192_v32  ;;  %v7455_v28 = vpack.c.bf16 %v10192_v32, %v10187_v11 }
 0x197   :  { %v7567_v57 = vpop.f32.mrb[19].mxu0 }
 0x198   :  { %8538 = vrcp.f32 %v10182_v60  ;;  %v10190_v45 = vadd.f32 %v7567_v57, %v7566_v26  ;;  %2677 = vst [vmem:[#allocation8 + $0x1e0] sm:$0xff] %v7455_v28  ;;  %vm649_vm10 = vcmp.gt.f32.partialorder %v10182_v60, 0.0 }
 0x199   :  { %6838 = vmatmul.mubr.msk.bf16.gmra.mrb[124].mxu0 %vm1001_vm1, %v9609_v47  ;;  %v10205_v47 = vpop.f32.mrb[20].mxu1 }
 0x19a   :  { %v8535_v15 = vpop.eup %8534  ;;  %8540 = vrcp.f32 %v10190_v45  ;;  %1738 = vmatprep.mubr.bf16.mxu0 %v14530_v59  ;;  %14535 = vst [vmem:[#allocation45_spill] sm:$0xff] %v10205_v47  ;;  %v10209_v11 = vpop.f32.mrb[21].mxu1  ;;  %vm650_vm11 = vcmp.gt.f32.partialorder %v10190_v45, 0.0 }
 0x19b   :  { %v10201_v40 = vsel %vm647_vm8, %v8535_v15, 0.0  ;;  %14536 = vst [vmem:[#allocation46_spill] sm:$0xff] %v10209_v11  ;;  %v7459_v28 = vpack.c.bf16 %v10209_v11, %v10205_v47  ;;  %v10216_v13 = vpop.f32.mrb[22].mxu1 }
 0x19c   :  { %v8537_v26 = vpop.eup %8536  ;;  %v7569_v24 = vpop.f32.mrb[20].mxu0  ;;  %2770 = vperm.xlu0 %8448, %v10201_v40   ;;  %14537 = vst [vmem:[#allocation47_spill] sm:$0xff] %v10216_v13 }
 0x19d   :  { %v7570_v57 = vpop.f32.mrb[21].mxu0  ;;  %v10207_v32 = vsel %vm648_vm9, %v8537_v26, 0.0  ;;  %2681 = vst [vmem:[#allocation8 + $0x200] sm:$0xff] %v7459_v28  ;;  %v10221_v26 = vpop.f32.mrb[23].mxu1 }
 0x19e   :  { %v10211_v17 = vadd.f32 %v7570_v57, %v7569_v24  ;;  %v7572_v27 = vpop.f32.mrb[22].mxu0  ;;  %2774 = vperm.xlu1 %8449, %v10207_v32   ;;  %14538 = vst [vmem:[#allocation48_spill] sm:$0xff] %v10221_v26  ;;  %v7463_v24 = vpack.c.bf16 %v10221_v26, %v10216_v13 }
 0x19f   :  { %v7573_v15 = vpop.f32.mrb[23].mxu0 }
 0x1a0   :  { %8542 = vrcp.f32 %v10211_v17  ;;  %v10219_v21 = vadd.f32 %v7573_v15, %v7572_v27  ;;  %2685 = vst [vmem:[#allocation8 + $0x220] sm:$0xff] %v7463_v24  ;;  %vm651_vm12 = vcmp.gt.f32.partialorder %v10211_v17, 0.0 }
 0x1a1   :  { %6839 = vmatmul.mubr.msk.bf16.gmra.mrb[128].mxu0 %vm1001_vm1, %v9627_v55  ;;  %v10234_v55 = vpop.f32.mrb[24].mxu1 }
 0x1a2   :  { %v8539_v57 = vpop.eup %8538  ;;  %8544 = vrcp.f32 %v10219_v21  ;;  %1748 = vmatprep.mubr.bf16.mxu0 %v14530_v59  ;;  %14539 = vst [vmem:[#allocation49_spill] sm:$0xff] %v10234_v55  ;;  %v10238_v13 = vpop.f32.mrb[25].mxu1  ;;  %vm652_vm13 = vcmp.gt.f32.partialorder %v10219_v21, 0.0 }
 0x1a3   :  { %v10230_v11 = vsel %vm649_vm10, %v8539_v57, 0.0  ;;  %14540 = vst [vmem:[#allocation50_spill] sm:$0xff] %v10238_v13  ;;  %v7467_v24 = vpack.c.bf16 %v10238_v13, %v10234_v55  ;;  %v10245_v36 = vpop.f32.mrb[26].mxu1 }
 0x1a4   :  { %v8541_v27 = vpop.eup %8540  ;;  %v7575_v28 = vpop.f32.mrb[24].mxu0  ;;  %2778 = vperm.xlu0 %8448, %v10230_v11   ;;  %14541 = vst [vmem:[#allocation51_spill] sm:$0xff] %v10245_v36 }
 0x1a5   :  { %v7576_v15 = vpop.f32.mrb[25].mxu0  ;;  %v10236_v26 = vsel %vm650_vm11, %v8541_v27, 0.0  ;;  %2689 = vst [vmem:[#allocation8 + $0x240] sm:$0xff] %v7467_v24  ;;  %v10250_v27 = vpop.f32.mrb[27].mxu1 }
 0x1a6   :  { %v10240_v47 = vadd.f32 %v7576_v15, %v7575_v28  ;;  %v7578_v14 = vpop.f32.mrb[26].mxu0  ;;  %2782 = vperm.xlu1 %8449, %v10236_v26   ;;  %14542 = vst [vmem:[#allocation52_spill] sm:$0xff] %v10250_v27  ;;  %v7471_v28 = vpack.c.bf16 %v10250_v27, %v10245_v36 }
 0x1a7   :  { %v7579_v57 = vpop.f32.mrb[27].mxu0 }
 0x1a8   :  { %8546 = vrcp.f32 %v10240_v47  ;;  %v10248_v19 = vadd.f32 %v7579_v57, %v7578_v14  ;;  %2693 = vst [vmem:[#allocation8 + $0x260] sm:$0xff] %v7471_v28  ;;  %vm653_vm14 = vcmp.gt.f32.partialorder %v10240_v47, 0.0 }
 0x1a9   :  { %6840 = vmatmul.mubr.msk.bf16.gmra.mrb[132].mxu0 %vm1001_vm1, %v9645_v61  ;;  %v10263_v61 = vpop.f32.mrb[28].mxu1 }
 0x1aa   :  { %v8543_v15 = vpop.eup %8542  ;;  %8548 = vrcp.f32 %v10248_v19  ;;  %1758 = vmatprep.mubr.bf16.mxu0 %v14530_v59  ;;  %14543 = vst [vmem:[#allocation53_spill] sm:$0xff] %v10263_v61  ;;  %v10267_v36 = vpop.f32.mrb[29].mxu1  ;;  %vm654_vm15 = vcmp.gt.f32.partialorder %v10248_v19, 0.0 }
 0x1ab   :  { %v10259_v13 = vsel %vm651_vm12, %v8543_v15, 0.0  ;;  %14544 = vst [vmem:[#allocation54_spill] sm:$0xff] %v10267_v36  ;;  %v7475_v28 = vpack.c.bf16 %v10267_v36, %v10263_v61  ;;  %v10274_v2 = vpop.f32.mrb[30].mxu1 }
 0x1ac   :  { %v8545_v14 = vpop.eup %8544  ;;  %v7581_v24 = vpop.f32.mrb[28].mxu0  ;;  %2786 = vperm.xlu0 %8448, %v10259_v13   ;;  %14545 = vst [vmem:[#allocation55_spill] sm:$0xff] %v10274_v2 }
 0x1ad   :  { %v7582_v57 = vpop.f32.mrb[29].mxu0  ;;  %v10265_v27 = vsel %vm652_vm13, %v8545_v14, 0.0  ;;  %2697 = vst [vmem:[#allocation8 + $0x280] sm:$0xff] %v7475_v28  ;;  %v10279_v14 = vpop.f32.mrb[31].mxu1 }
 0x1ae   :  { %v10269_v55 = vadd.f32 %v7582_v57, %v7581_v24  ;;  %v7584_v6 = vpop.f32.mrb[30].mxu0  ;;  %2790 = vperm.xlu1 %8449, %v10265_v27   ;;  %14546 = vst [vmem:[#allocation56_spill] sm:$0xff] %v10279_v14  ;;  %v7479_v24 = vpack.c.bf16 %v10279_v14, %v10274_v2  ;;  %v10292_v28 = vpop.f32.mrb[32].mxu1 }
 0x1af   :  { %v7585_v15 = vpop.f32.mrb[31].mxu0  ;;  %14547 = vst [vmem:[#allocation57_spill] sm:$0xff] %v10292_v28 }
 0x1b0   :  { %8550 = vrcp.f32 %v10269_v55  ;;  %v10277_v35 = vadd.f32 %v7585_v15, %v7584_v6  ;;  %2701 = vst [vmem:[#allocation8 + $0x2a0] sm:$0xff] %v7479_v24  ;;  %v10296_v15 = vpop.f32.mrb[33].mxu1  ;;  %vm655_vm0 = vcmp.gt.f32.partialorder %v10269_v55, 0.0 }
 0x1b1   :  { %6841 = vmatmul.mubr.msk.bf16.gmra.mrb[136].mxu0 %vm1001_vm1, %v9651_v63  ;;  %14548 = vst [vmem:[#allocation58_spill] sm:$0xff] %v10296_v15  ;;  %v7483_v14 = vpack.c.bf16 %v10296_v15, %v10292_v28  ;;  %v10301_v2 = vpop.f32.mrb[34].mxu1 }
 0x1b2   :  { %v8547_v57 = vpop.eup %8546  ;;  %8552 = vrcp.f32 %v10277_v35  ;;  %1768 = vmatprep.mubr.bf16.mxu0 %v14530_v59  ;;  %14549 = vst [vmem:[#allocation59_spill] sm:$0xff] %v10301_v2  ;;  %v10303_v24 = vpop.f32.mrb[35].mxu1  ;;  %vm656_vm2 = vcmp.gt.f32.partialorder %v10277_v35, 0.0 }
 0x1b3   :  { %v10288_v36 = vsel %vm653_vm14, %v8547_v57, 0.0  ;;  %2705 = vst [vmem:[#allocation8 + $0x2c0] sm:$0xff] %v7483_v14  ;;  %14550 = vst [vmem:[#allocation60_spill] sm:$0xff] %v10303_v24  ;;  %v7487_v57 = vpack.c.bf16 %v10303_v24, %v10301_v2  ;;  %v10315_v14 = vpop.f32.mrb[36].mxu1 }
 0x1b4   :  { %v8549_v6 = vpop.eup %8548  ;;  %2794 = vperm.xlu0 %8448, %v10288_v36   ;;  %14552 = vst [vmem:[#allocation62_spill] sm:$0xff] %v10315_v14 }
 0x1b5   :  { %v10294_v63 = vsel %vm654_vm15, %v8549_v6, 0.0  ;;  %2709 = vst [vmem:[#allocation8 + $0x2e0] sm:$0xff] %v7487_v57 }
 0x1b6   :  { %2798 = vperm.xlu1 %8449, %v10294_v63  }
 0x1b9   :  { %6842 = vmatmul.mubr.msk.bf16.gmra.mrb[140].mxu0 %vm1001_vm1, %v9517_v9  ;;  %v10319_v9 = vpop.f32.mrb[37].mxu1 }
 0x1ba   :  { %v8551_v6 = vpop.eup %8550  ;;  %1778 = vmatprep.mubr.bf16.mxu0 %v14530_v59  ;;  %14554 = vst [vmem:[#allocation64_spill] sm:$0xff] %v10319_v9  ;;  %v7491_v24 = vpack.c.bf16 %v10319_v9, %v10315_v14  ;;  %v10324_v2 = vpop.f32.mrb[38].mxu1 }
 0x1bb   :  { %v10311_v61 = vsel %vm655_vm0, %v8551_v6, 0.0  ;;  %14555 = vst [vmem:[#allocation65_spill] sm:$0xff] %v10324_v2  ;;  %v10326_v57 = vpop.f32.mrb[39].mxu1 }
 0x1bc   :  { %14551 = vst [vmem:[#allocation61_spill] sm:$0xff] %v10311_v61  ;;  %v8553_v15 = vpop.eup %8552  ;;  %2802 = vperm.xlu0 %8448, %v10311_v61   ;;  %2713 = vst [vmem:[#allocation8 + $0x300] sm:$0xff] %v7491_v24  ;;  %v7495_v6 = vpack.c.bf16 %v10326_v57, %v10324_v2 }
 0x1bd   :  { %v10317_v28 = vsel %vm656_vm2, %v8553_v15, 0.0  ;;  %14556 = vst [vmem:[#allocation66_spill] sm:$0xff] %v10326_v57  ;;  %v10333_v15 = vpop.f32.mrb[32].mxu0 }
 0x1be   :  { %14553 = vst [vmem:[#allocation63_spill] sm:$0xff] %v10317_v28  ;;  %2806 = vperm.xlu1 %8449, %v10317_v28   ;;  %2717 = vst [vmem:[#allocation8 + $0x320] sm:$0xff] %v7495_v6  ;;  %v10335_v28 = vpop.f32.mrb[40].mxu1  ;;  %v10337_v8 = vpop.f32.mrb[33].mxu0 }
 0x1bf   :  { %14557 = vst [vmem:[#allocation67_spill] sm:$0xff] %v10333_v15  ;;  %14558 = vst [vmem:[#allocation68_spill] sm:$0xff] %v10335_v28  ;;  %v10339_v9 = vpop.f32.mrb[41].mxu1  ;;  %v7395_v24 = vpack.c.bf16 %v10337_v8, %v10333_v15  ;;  %v10345_v14 = vpop.f32.mrb[34].mxu0 }
 0x1c0   :  { %14559 = vst [vmem:[#allocation69_spill] sm:$0xff] %v10337_v8  ;;  %14560 = vst [vmem:[#allocation70_spill] sm:$0xff] %v10339_v9  ;;  %v10347_v57 = vpop.f32.mrb[42].mxu1  ;;  %v10349_v2 = vpop.f32.mrb[35].mxu0 }
 0x1c1   :  { %6843 = vmatmul.mubr.msk.bf16.gmra.mrb[144].mxu0 %vm1001_vm1, %v9540_v18  ;;  %v7499_v18 = vpack.c.bf16 %v10339_v9, %v10335_v28  ;;  %14561 = vst [vmem:[#allocation71_spill] sm:$0xff] %v10345_v14  ;;  %14562 = vst [vmem:[#allocation72_spill] sm:$0xff] %v10347_v57  ;;  %v10351_v6 = vpop.f32.mrb[43].mxu1  ;;  %v7399_v0 = vpack.c.bf16 %v10349_v2, %v10345_v14  ;;  %v10359_v9 = vpop.f32.mrb[36].mxu0 }
 0x1c2   :  { %1788 = vmatprep.mubr.bf16.mxu0 %v14530_v59  ;;  %14563 = vst [vmem:[#allocation73_spill] sm:$0xff] %v10349_v2  ;;  %14564 = vst [vmem:[#allocation74_spill] sm:$0xff] %v10351_v6  ;;  %v7503_v49 = vpack.c.bf16 %v10351_v6, %v10347_v57  ;;  %v10361_v8 = vpop.f32.mrb[44].mxu1  ;;  %v10364_v28 = vpop.f32.mrb[37].mxu0 }
 0x1c3   :  { %2617 = vst [vmem:[#allocation8] sm:$0xff] %v7395_v24  ;;  %2721 = vst [vmem:[#allocation8 + $0x340] sm:$0xff] %v7499_v18  ;;  %v10366_v24 = vpop.f32.mrb[45].mxu1  ;;  %v7403_v18 = vpack.c.bf16 %v10364_v28, %v10359_v9  ;;  %v10372_v2 = vpop.f32.mrb[38].mxu0 }
 0x1c4   :  { %2621 = vst [vmem:[#allocation8 + $0x20] sm:$0xff] %v7399_v0  ;;  %2725 = vst [vmem:[#allocation8 + $0x360] sm:$0xff] %v7503_v49  ;;  %v7507_v6 = vpack.c.bf16 %v10366_v24, %v10361_v8  ;;  %v10376_v49 = vpop.f32.mrb[39].mxu0 }
 0x1c5   :  { %14565 = vst [vmem:[#allocation75_spill] sm:$0xff] %v10359_v9  ;;  %14566 = vst [vmem:[#allocation76_spill] sm:$0xff] %v10361_v8  ;;  %v7407_v57 = vpack.c.bf16 %v10376_v49, %v10372_v2 }
 0x1c6   :  { %14567 = vst [vmem:[#allocation77_spill] sm:$0xff] %v10364_v28  ;;  %14568 = vst [vmem:[#allocation78_spill] sm:$0xff] %v10366_v24  ;;  %v10384_v28 = vpop.f32.mrb[40].mxu0 }
 0x1c7   :  { %14569 = vst [vmem:[#allocation79_spill] sm:$0xff] %v10372_v2  ;;  %14571 = vst [vmem:[#allocation81_spill] sm:$0xff] %v10376_v49  ;;  %v10391_v24 = vpop.f32.mrb[41].mxu0 }
 0x1c8   :  { %2625 = vst [vmem:[#allocation8 + $0x40] sm:$0xff] %v7403_v18  ;;  %2729 = vst [vmem:[#allocation8 + $0x380] sm:$0xff] %v7507_v6  ;;  %v7411_v18 = vpack.c.bf16 %v10391_v24, %v10384_v28  ;;  %v10399_v2 = vpop.f32.mrb[42].mxu0 }
 0x1c9   :  { %6844 = vmatmul.mubr.msk.bf16.gmra.mrb[148].mxu0 %vm1001_vm1, %v9552_v22  ;;  %v10374_v22 = vpop.f32.mrb[46].mxu1  ;;  %14573 = vst [vmem:[#allocation83_spill] sm:$0xff] %v10384_v28  ;;  %2629 = vst [vmem:[#allocation8 + $0x60] sm:$0xff] %v7407_v57 }
 0x1ca   :  { %1798 = vmatprep.mubr.bf16.mxu0 %v14530_v59  ;;  %14570 = vst [vmem:[#allocation80_spill] sm:$0xff] %v10374_v22  ;;  %v10378_v0 = vpop.f32.mrb[47].mxu1  ;;  %14575 = vst [vmem:[#allocation85_spill] sm:$0xff] %v10391_v24 }
 0x1cb   :  { %14572 = vst [vmem:[#allocation82_spill] sm:$0xff] %v10378_v0  ;;  %v7511_v14 = vpack.c.bf16 %v10378_v0, %v10374_v22  ;;  %v10386_v9 = vpop.f32.mrb[48].mxu1  ;;  %14577 = vst [vmem:[#allocation87_spill] sm:$0xff] %v10399_v2  ;;  %v10403_v22 = vpop.f32.mrb[43].mxu0 }
 0x1cc   :  { %14574 = vst [vmem:[#allocation84_spill] sm:$0xff] %v10386_v9  ;;  %v10393_v6 = vpop.f32.mrb[49].mxu1  ;;  %14579 = vst [vmem:[#allocation89_spill] sm:$0xff] %v10403_v22  ;;  %v7415_v8 = vpack.c.bf16 %v10403_v22, %v10399_v2  ;;  %v10411_v28 = vpop.f32.mrb[44].mxu0 }
 0x1cd   :  { %2733 = vst [vmem:[#allocation8 + $0x3a0] sm:$0xff] %v7511_v14  ;;  %14576 = vst [vmem:[#allocation86_spill] sm:$0xff] %v10393_v6  ;;  %v7515_v49 = vpack.c.bf16 %v10393_v6, %v10386_v9  ;;  %v10401_v0 = vpop.f32.mrb[50].mxu1  ;;  %v9130_v14 = vld [vmem:[#allocation2] sm:$0xff]   ;;  %v10418_v9 = vpop.f32.mrb[45].mxu0 }
 0x1ce   :  { %14578 = vst [vmem:[#allocation88_spill] sm:$0xff] %v10401_v0  ;;  %v159_v57 = vunpack.c.l.bf16 %v9130_v14  ;;  %2633 = vst [vmem:[#allocation8 + $0x80] sm:$0xff] %v7411_v18  ;;  %v9131_v18 = vld [vmem:[#allocation2 + $0x8] sm:$0xff]   ;;  %v7396_v2 = vpack.c.bf16 %v10418_v9, %v10411_v28 }
 0x1cf   :  { %2737 = vst [vmem:[#allocation8 + $0x3c0] sm:$0xff] %v7515_v49  ;;  %14581 = vst [vmem:[#allocation91_spill] sm:$0xff] %v10411_v28  ;;  %v161_v49 = vunpack.c.l.bf16 %v9131_v18  ;;  %v162_v15 = vunpack.c.h.bf16 %v9131_v18 }
 0x1d0   :  { %2637 = vst [vmem:[#allocation8 + $0xa0] sm:$0xff] %v7415_v8  ;;  %14583 = vst [vmem:[#allocation93_spill] sm:$0xff] %v10418_v9  ;;  %v160_v8 = vunpack.c.h.bf16 %v9130_v14  ;;  %v9132_v14 = vld [vmem:[#allocation2 + $0x10] sm:$0xff]  }
 0x1d1   :  { %6845 = vmatmul.mubr.msk.bf16.gmra.mrb[152].mxu0 %vm1001_vm1, %v9570_v31  ;;  %v10405_v31 = vpop.f32.mrb[51].mxu1  ;;  %2618 = vst [vmem:[#allocation8 + $0x8] sm:$0xff] %v7396_v2  ;;  %v164_v18 = vunpack.c.h.bf16 %v9132_v14 }
 0x1d2   :  { %1808 = vmatprep.mubr.bf16.mxu0 %v14530_v59  ;;  %14580 = vst [vmem:[#allocation90_spill] sm:$0xff] %v10405_v31  ;;  %v7519_v24 = vpack.c.bf16 %v10405_v31, %v10401_v0  ;;  %v10413_v6 = vpop.f32.mrb[52].mxu1  ;;  %v10426_v0 = vpop.f32.mrb[46].mxu0 }
 0x1d3   :  { %14582 = vst [vmem:[#allocation92_spill] sm:$0xff] %v10413_v6  ;;  %v10420_v22 = vpop.f32.mrb[53].mxu1  ;;  %14585 = vst [vmem:[#allocation95_spill] sm:$0xff] %v10426_v0 }
 0x1d4   :  { %2741 = vst [vmem:[#allocation8 + $0x3e0] sm:$0xff] %v7519_v24  ;;  %14584 = vst [vmem:[#allocation94_spill] sm:$0xff] %v10420_v22  ;;  %v7397_v31 = vpack.c.bf16 %v10420_v22, %v10413_v6  ;;  %v10430_v24 = vpop.f32.mrb[47].mxu0 }
 0x1d5   :  { %14587 = vst [vmem:[#allocation97_spill] sm:$0xff] %v10430_v24  ;;  %v7400_v42 = vpack.c.bf16 %v10430_v24, %v10426_v0  ;;  %v10438_v22 = vpop.f32.mrb[48].mxu0 }
 0x1d6   :  { %2619 = vst [vmem:[#allocation8 + $0x10] sm:$0xff] %v7397_v31  ;;  %14589 = vst [vmem:[#allocation99_spill] sm:$0xff] %v10438_v22  ;;  %v10442_v6 = vpop.f32.mrb[49].mxu0 }
 0x1d7   :  { %14591 = vst [vmem:[#allocation101_spill] sm:$0xff] %v10442_v6  ;;  %2622 = vst [vmem:[#allocation8 + $0x28] sm:$0xff] %v7400_v42  ;;  %v7404_v2 = vpack.c.bf16 %v10442_v6, %v10438_v22  ;;  %v10448_v31 = vpop.f32.mrb[50].mxu0  ;;  %v9133_v6 = vld [vmem:[#allocation2 + $0x18] sm:$0xff]  }
 0x1d8   :  { %14592 = vst [vmem:[#allocation102_spill] sm:$0xff] %v10448_v31 }
 0x1d9   :  { %6846 = vmatmul.mubr.msk.bf16.gmra.mrb[156].mxu0 %vm1001_vm1, %v9600_v44  ;;  %v10428_v44 = vpop.f32.mrb[54].mxu1  ;;  %2626 = vst [vmem:[#allocation8 + $0x48] sm:$0xff] %v7404_v2 }
 0x1da   :  { %1818 = vmatprep.mubr.bf16.mxu0 %v14530_v59  ;;  %14586 = vst [vmem:[#allocation96_spill] sm:$0xff] %v10428_v44 }
 0x1db   :  { %191 = vadd.xlane.f32.xlu0 %v159_v57  ;;  %v10432_v57 = vpop.f32.mrb[55].mxu1 }
 0x1dc   :  { %14588 = vst [vmem:[#allocation98_spill] sm:$0xff] %v10432_v57  ;;  %v7401_v9 = vpack.c.bf16 %v10432_v57, %v10428_v44  ;;  %v10440_v28 = vpop.f32.mrb[56].mxu1  ;;  %v163_v57 = vunpack.c.l.bf16 %v9132_v14  ;;  %v9136_v44 = vld [vmem:[#allocation2 + $0x30] sm:$0xff]  }
 0x1dd   :  { %14590 = vst [vmem:[#allocation100_spill] sm:$0xff] %v10440_v28  ;;  %v171_v20 = vunpack.c.l.bf16 %v9136_v44 }
 0x1de   :  { %2623 = vst [vmem:[#allocation8 + $0x30] sm:$0xff] %v7401_v9  ;;  %v10457_v9 = vpop.f32.mrb[57].mxu1 }
 0x1df   :  { %195 = vadd.xlane.f32.xlu0 %v161_v49  ;;  %v10451_v49 = vpop.f32.mrb[51].mxu0  ;;  %14595 = vst [vmem:[#allocation105_spill] sm:$0xff] %v10457_v9  ;;  %v10463_v0 = vpop.f32.mrb[58].mxu1 }
 0x1e0   :  { %14593 = vst [vmem:[#allocation103_spill] sm:$0xff] %v10451_v49  ;;  %v10455_v42 = vpop.f32.mrb[52].mxu0  ;;  %14597 = vst [vmem:[#allocation107_spill] sm:$0xff] %v10463_v0 }
 0x1e1   :  { %6847 = vmatmul.mubr.msk.bf16.gmra.mrb[160].mxu0 %vm1001_vm1, %v9618_v52  ;;  %v7408_v52 = vpack.c.bf16 %v10451_v49, %v10448_v31  ;;  %14594 = vst [vmem:[#allocation104_spill] sm:$0xff] %v10455_v42  ;;  %v10461_v24 = vpop.f32.mrb[53].mxu0  ;;  %v10469_v49 = vpop.f32.mrb[59].mxu1  ;;  %v165_v31 = vunpack.c.l.bf16 %v9133_v6 }
 0x1e2   :  { %193 = vadd.xlane.f32.xlu1 %v160_v8  ;;  %1828 = vmatprep.mubr.bf16.mxu0 %v14530_v59  ;;  %v7405_v8 = vpack.c.bf16 %v10457_v9, %v10440_v28  ;;  %14596 = vst [vmem:[#allocation106_spill] sm:$0xff] %v10461_v24  ;;  %v7412_v2 = vpack.c.bf16 %v10461_v24, %v10455_v42  ;;  %v10467_v14 = vpop.f32.mrb[54].mxu0  ;;  %14599 = vst [vmem:[#allocation109_spill] sm:$0xff] %v10469_v49  ;;  %v9134_v24 = vld [vmem:[#allocation2 + $0x20] sm:$0xff]  }
 0x1e3   :  { %197 = vadd.xlane.f32.xlu0 %v162_v15  ;;  %2630 = vst [vmem:[#allocation8 + $0x68] sm:$0xff] %v7408_v52  ;;  %v166_v15 = vunpack.c.h.bf16 %v9133_v6  ;;  %14598 = vst [vmem:[#allocation108_spill] sm:$0xff] %v10467_v14  ;;  %v7409_v52 = vpack.c.bf16 %v10469_v49, %v10463_v0  ;;  %v10473_v9 = vpop.f32.mrb[55].mxu0  ;;  %v168_v42 = vunpack.c.h.bf16 %v9134_v24 }
 0x1e4   :  { %2627 = vst [vmem:[#allocation8 + $0x50] sm:$0xff] %v7405_v8  ;;  %14600 = vst [vmem:[#allocation110_spill] sm:$0xff] %v10473_v9  ;;  %v10480_v6 = vpop.f32.mrb[56].mxu0 }
 0x1e5   :  { %2634 = vst [vmem:[#allocation8 + $0x88] sm:$0xff] %v7412_v2  ;;  %2631 = vst [vmem:[#allocation8 + $0x70] sm:$0xff] %v7409_v52  ;;  %v10482_v8 = vpop.f32.mrb[57].mxu0 }
 0x1e6   :  { %201 = vadd.xlane.f32.xlu1 %v164_v18  ;;  %v7416_v18 = vpack.c.bf16 %v10473_v9, %v10467_v14  ;;  %14601 = vst [vmem:[#allocation111_spill] sm:$0xff] %v10480_v6  ;;  %14602 = vst [vmem:[#allocation112_spill] sm:$0xff] %v10482_v8  ;;  %v10484_v2 = vpop.f32.mrb[58].mxu0  ;;  %v10488_v9 = vpop.f32.mrb[60].mxu1 }
 0x1e7   :  { %199 = vadd.xlane.f32.xlu0 %v163_v57  ;;  %v167_v57 = vunpack.c.l.bf16 %v9134_v24  ;;  %14603 = vst [vmem:[#allocation113_spill] sm:$0xff] %v10484_v2  ;;  %v10486_v49 = vpop.f32.mrb[59].mxu0  ;;  %14605 = vst [vmem:[#allocation115_spill] sm:$0xff] %v10488_v9  ;;  %v10492_v14 = vpop.f32.mrb[61].mxu1 }
 0x1e8   :  { %2638 = vst [vmem:[#allocation8 + $0xa8] sm:$0xff] %v7416_v18  ;;  %14604 = vst [vmem:[#allocation114_spill] sm:$0xff] %v10486_v49  ;;  %v10496_v24 = vpop.f32.mrb[62].mxu1  ;;  %v7424_v61 = vpack.c.bf16 %v10486_v49, %v10484_v2 }
 0x1e9   :  { %6848 = vmatmul.mubr.msk.bf16.gmra.mrb[164].mxu0 %vm1001_vm1, %v9636_v58  ;;  %v9135_v58 = vld [vmem:[#allocation2 + $0x28] sm:$0xff]   ;;  %14607 = vst [vmem:[#allocation117_spill] sm:$0xff] %v10492_v14  ;;  %v10500_v0 = vpop.f32.mrb[63].mxu1 }
 0x1ea   :  { %205 = vadd.xlane.f32.xlu1 %v166_v15  ;;  %1838 = vmatprep.mubr.bf16.mxu0 %v14530_v59  ;;  %v170_v15 = vunpack.c.h.bf16 %v9135_v58  ;;  %v169_v18 = vunpack.c.l.bf16 %v9135_v58  ;;  %14610 = vst [vmem:[#allocation120_spill] sm:$0xff] %v10500_v0  ;;  %v7417_v58 = vpack.c.bf16 %v10500_v0, %v10496_v24  ;;  %2646 = vst [vmem:[#allocation8 + $0xe8] sm:$0xff] %v7424_v61 }
 0x1eb   :  { %203 = vadd.xlane.f32.xlu0 %v165_v31 }
 0x1ec   :  { %v10490_v52 = vpop.f32.mrb[60].mxu0  ;;  %2639 = vst [vmem:[#allocation8 + $0xb0] sm:$0xff] %v7417_v58 }
 0x1ed   :  { %14606 = vst [vmem:[#allocation116_spill] sm:$0xff] %v10490_v52  ;;  %v10494_v22 = vpop.f32.mrb[61].mxu0 }
 0x1ee   :  { %209 = vadd.xlane.f32.xlu1 %v168_v42  ;;  %14608 = vst [vmem:[#allocation118_spill] sm:$0xff] %v10494_v22  ;;  %v10498_v31 = vpop.f32.mrb[62].mxu0  ;;  %v7413_v42 = vpack.c.bf16 %v10492_v14, %v10488_v9  ;;  %v10517_v9 = vpop.f32.mrb[64].mxu1 }
 0x1ef   :  { %207 = vadd.xlane.f32.xlu0 %v167_v57  ;;  %14609 = vst [vmem:[#allocation119_spill] sm:$0xff] %v10498_v31  ;;  %v10506_v28 = vpop.f32.mrb[63].mxu0  ;;  %v172_v57 = vunpack.c.h.bf16 %v9136_v44  ;;  %v10523_v44 = vpop.f32.mrb[65].mxu1 }
 0x1f0   :  { %14611 = vst [vmem:[#allocation121_spill] sm:$0xff] %v10506_v28  ;;  %2635 = vst [vmem:[#allocation8 + $0x90] sm:$0xff] %v7413_v42  ;;  %v10527_v58 = vpop.f32.mrb[66].mxu1  ;;  %v7421_v2 = vpack.c.bf16 %v10523_v44, %v10517_v9  ;;  %v7432_v61 = vpack.c.bf16 %v10506_v28, %v10498_v31 }
 0x1f1   :  { %6849 = vmatmul.mubr.msk.bf16.gmra.mrb[168].mxu0 %vm1001_vm1, %v9648_v62  ;;  %v7420_v62 = vpack.c.bf16 %v10482_v8, %v10480_v6  ;;  %14615 = vst [vmem:[#allocation125_spill] sm:$0xff] %v10523_v44  ;;  %v10529_v8 = vpop.f32.mrb[67].mxu1  ;;  %v9138_v6 = vld [vmem:[#allocation2 + $0x40] sm:$0xff]  }
 0x1f2   :  { %213 = vadd.xlane.f32.xlu1 %v170_v15  ;;  %3115 = vmatprep.mubr.bf16.mxu0 %v14530_v59  ;;  %v9137_v15 = vld [vmem:[#allocation2 + $0x38] sm:$0xff]   ;;  %14617 = vst [vmem:[#allocation127_spill] sm:$0xff] %v10529_v8  ;;  %v176_v49 = vunpack.c.h.bf16 %v9138_v6  ;;  %2643 = vst [vmem:[#allocation8 + $0xd0] sm:$0xff] %v7421_v2 }
 0x1f3   :  { %211 = vadd.xlane.f32.xlu0 %v169_v18  ;;  %v174_v3 = vunpack.c.h.bf16 %v9137_v15  ;;  %v173_v18 = vunpack.c.l.bf16 %v9137_v15  ;;  %2642 = vst [vmem:[#allocation8 + $0xc8] sm:$0xff] %v7420_v62  ;;  %v7425_v62 = vpack.c.bf16 %v10529_v8, %v10527_v58  ;;  %2654 = vst [vmem:[#allocation8 + $0x128] sm:$0xff] %v7432_v61  ;;  %v9140_v61 = vld [vmem:[#allocation2 + $0x50] sm:$0xff]  }
 0x1f4   :  { %v10511_v10 = vpop.f32.mrb[64].mxu0 }
 0x1f5   :  { %14612 = vst [vmem:[#allocation122_spill] sm:$0xff] %v10511_v10  ;;  %v10515_v14 = vpop.f32.mrb[65].mxu0  ;;  %2647 = vst [vmem:[#allocation8 + $0xf0] sm:$0xff] %v7425_v62 }
 0x1f6   :  { %14613 = vst [vmem:[#allocation123_spill] sm:$0xff] %v10515_v14  ;;  %217 = vadd.xlane.f32.xlu1 %v172_v57  ;;  %v10521_v0 = vpop.f32.mrb[66].mxu0  ;;  %v7428_v57 = vpack.c.bf16 %v10494_v22, %v10490_v52  ;;  %v10545_v52 = vpop.f32.mrb[68].mxu1 }
 0x1f7   :  { %14614 = vst [vmem:[#allocation124_spill] sm:$0xff] %v10521_v0  ;;  %215 = vadd.xlane.f32.xlu0 %v171_v20  ;;  %v10525_v42 = vpop.f32.mrb[67].mxu0  ;;  %v175_v20 = vunpack.c.l.bf16 %v9138_v6  ;;  %v9139_v6 = vld [vmem:[#allocation2 + $0x48] sm:$0xff]   ;;  %v10549_v8 = vpop.f32.mrb[69].mxu1 }
 0x1f8   :  { %14616 = vst [vmem:[#allocation126_spill] sm:$0xff] %v10525_v42  ;;  %2650 = vst [vmem:[#allocation8 + $0x108] sm:$0xff] %v7428_v57  ;;  %v177_v44 = vunpack.c.l.bf16 %v9139_v6  ;;  %v10553_v28 = vpop.f32.mrb[70].mxu1  ;;  %v7440_v62 = vpack.c.bf16 %v10525_v42, %v10521_v0 }
 0x1f9   :  { %14620 = vst [vmem:[#allocation130_spill] sm:$0xff] %v10549_v8  ;;  %v10557_v31 = vpop.f32.mrb[71].mxu1 }
 0x1fa   :  { %221 = vadd.xlane.f32.xlu1 %v174_v3  ;;  %v7436_v3 = vpack.c.bf16 %v10515_v14, %v10511_v10  ;;  %14622 = vst [vmem:[#allocation132_spill] sm:$0xff] %v10557_v31  ;;  %v180_v14 = vunpack.c.h.bf16 %v9140_v61  ;;  %2662 = vst [vmem:[#allocation8 + $0x168] sm:$0xff] %v7440_v62  ;;  %v7433_v10 = vpack.c.bf16 %v10557_v31, %v10553_v28 }
 0x1fb   :  { %219 = vadd.xlane.f32.xlu0 %v173_v18  ;;  %v178_v18 = vunpack.c.h.bf16 %v9139_v6  ;;  %v179_v6 = vunpack.c.l.bf16 %v9140_v61  ;;  %v9141_v61 = vld [vmem:[#allocation2 + $0x58] sm:$0xff]  }
 0x1fc   :  { %v10539_v15 = vpop.f32.mrb[68].mxu0  ;;  %2658 = vst [vmem:[#allocation8 + $0x148] sm:$0xff] %v7436_v3  ;;  %2655 = vst [vmem:[#allocation8 + $0x130] sm:$0xff] %v7433_v10 }
 0x1fd   :  { %v10543_v22 = vpop.f32.mrb[69].mxu0 }
 0x1fe   :  { %14618 = vst [vmem:[#allocation128_spill] sm:$0xff] %v10543_v22  ;;  %225 = vadd.xlane.f32.xlu1 %v176_v49  ;;  %v10547_v57 = vpop.f32.mrb[70].mxu0  ;;  %v7444_v49 = vpack.c.bf16 %v10543_v22, %v10539_v15 }
 0x1ff   :  { %14619 = vst [vmem:[#allocation129_spill] sm:$0xff] %v10547_v57  ;;  %223 = vadd.xlane.f32.xlu0 %v175_v20  ;;  %v10551_v2 = vpop.f32.mrb[71].mxu0  ;;  %v7429_v20 = vpack.c.bf16 %v10549_v8, %v10545_v52 }
 0x200   :  { %14621 = vst [vmem:[#allocation131_spill] sm:$0xff] %v10551_v2  ;;  %2666 = vst [vmem:[#allocation8 + $0x188] sm:$0xff] %v7444_v49  ;;  %v7448_v42 = vpack.c.bf16 %v10551_v2, %v10547_v57  ;;  %v182_v49 = vunpack.c.h.bf16 %v9141_v61  ;;  %v10577_v2 = vpop.f32.mrb[72].mxu1 }
 0x201   :  { %2651 = vst [vmem:[#allocation8 + $0x110] sm:$0xff] %v7429_v20  ;;  %v181_v20 = vunpack.c.l.bf16 %v9141_v61  ;;  %v10581_v10 = vpop.f32.mrb[73].mxu1 }
 0x202   :  { %229 = vadd.xlane.f32.xlu1 %v178_v18  ;;  %2670 = vst [vmem:[#allocation8 + $0x1a8] sm:$0xff] %v7448_v42  ;;  %14625 = vst [vmem:[#allocation135_spill] sm:$0xff] %v10581_v10  ;;  %v7437_v42 = vpack.c.bf16 %v10581_v10, %v10577_v2 }
 0x203   :  { %227 = vadd.xlane.f32.xlu0 %v177_v44  ;;  %v2747_v3 = vpop.permute.xlu0 %2746 }
 0x204   :  { %v10567_v0 = vpop.f32.mrb[72].mxu0  ;;  %v2809_v62 = vmul.f32 %v10067_v23, %v2747_v3  ;;  %2659 = vst [vmem:[#allocation8 + $0x150] sm:$0xff] %v7437_v42 }
 0x205   :  { %v2751_v18 = vpop.permute.xlu1 %2750  ;;  %v10569_v22 = vpop.f32.mrb[73].mxu0 }
 0x206   :  { %v2810_v44 = vmul.f32 %v10074_v50, %v2751_v18  ;;  %233 = vadd.xlane.f32.xlu1 %v180_v14  ;;  %v7452_v31 = vpack.c.bf16 %v10569_v22, %v10567_v0  ;;  %v10575_v8 = vpop.f32.mrb[74].mxu0  ;;  %v10587_v14 = vpop.f32.mrb[74].mxu1 }
 0x207   :  { %14623 = vst [vmem:[#allocation133_spill] sm:$0xff] %v10575_v8  ;;  %231 = vadd.xlane.f32.xlu0 %v179_v6  ;;  %v10579_v57 = vpop.f32.mrb[75].mxu0  ;;  %v10591_v3 = vpop.f32.mrb[75].mxu1  ;;  %v9142_v6 = vld [vmem:[#allocation2 + $0x60] sm:$0xff]  }
 0x208   :  { %14624 = vst [vmem:[#allocation134_spill] sm:$0xff] %v10579_v57  ;;  %v10583_v23 = vpack.c.bf16 %v2810_v44, %v2809_v62  ;;  %2674 = vst [vmem:[#allocation8 + $0x1c8] sm:$0xff] %v7452_v31  ;;  %v7456_v50 = vpack.c.bf16 %v10579_v57, %v10575_v8  ;;  %v184_v18 = vunpack.c.h.bf16 %v9142_v6  ;;  %v7441_v31 = vpack.c.bf16 %v10591_v3, %v10587_v14 }
 0x209   :  { %14626 = vst [vmem:[#allocation136_spill] sm:$0xff] %v10591_v3  ;;  %v183_v44 = vunpack.c.l.bf16 %v9142_v6  ;;  %v9143_v3 = vld [vmem:[#allocation2 + $0x68] sm:$0xff]  }
 0x20a   :  { %237 = vadd.xlane.f32.xlu1 %v182_v49  ;;  %6978 = vmatmul.mubr.msk.bf16.vlgmr.msra.gmra.mrb[116].mxu1 %vm1001_vm1, %v10583_v23  ;;  %2678 = vst [vmem:[#allocation8 + $0x1e8] sm:$0xff] %v7456_v50  ;;  %2663 = vst [vmem:[#allocation8 + $0x170] sm:$0xff] %v7441_v31  ;;  %v10607_v50 = vpop.f32.mrb[76].mxu1  ;;  %v185_v31 = vunpack.c.l.bf16 %v9143_v3 }
 0x20b   :  { %6994 = vmatmul.mubr.msk.bf16.vlgmr.msra.gmra.mrb[172].mxu0 %vm1001_vm1, %v10583_v23  ;;  %v2755_v62 = vpop.permute.xlu1 %2754  ;;  %235 = vadd.xlane.f32.xlu0 %v181_v20  ;;  %v186_v20 = vunpack.c.h.bf16 %v9143_v3  ;;  %v10613_v6 = vpop.f32.mrb[77].mxu1 }
 0x20c   :  { %2971 = vmatpush1.bf16.msra.mxu1 %v9831_v30  ;;  %2899 = vmatprep.mubr.bf16.mxu1 %v14530_v59  ;;  %v10601_v61 = vpop.f32.mrb[76].mxu0  ;;  %14629 = vst [vmem:[#allocation139_spill] sm:$0xff] %v10613_v6 }
 0x20d   :  { %14627 = vst [vmem:[#allocation137_spill] sm:$0xff] %v10601_v61  ;;  %3125 = vmatprep.mubr.bf16.mxu0 %v14530_v59  ;;  %2972 = vmatprep.subr.bf16.mxu1 %v9833_v34  ;;  %v10605_v49 = vpop.f32.mrb[77].mxu0  ;;  %v2811_v34 = vmul.f32 %v10093_v25, %v2755_v62  ;;  %v9144_v25 = vld [vmem:[#allocation2 + $0x70] sm:$0xff]  }
 0x20e   :  { %14628 = vst [vmem:[#allocation138_spill] sm:$0xff] %v10605_v49  ;;  %241 = vadd.xlane.f32.xlu1 %v184_v18  ;;  %v7460_v42 = vpack.c.bf16 %v10605_v49, %v10601_v61  ;;  %v10611_v30 = vpop.f32.mrb[78].mxu0  ;;  %v10622_v49 = vpop.f32.mrb[78].mxu1 }
 0x20f   :  { %v2759_v10 = vpop.permute.xlu1 %2758  ;;  %239 = vadd.xlane.f32.xlu0 %v183_v44  ;;  %v10615_v57 = vpop.f32.mrb[79].mxu0  ;;  %v7445_v44 = vpack.c.bf16 %v10613_v6, %v10607_v50 }
 0x210   :  { %14630 = vst [vmem:[#allocation140_spill] sm:$0xff] %v10615_v57  ;;  %v2812_v8 = vmul.f32 %v10102_v12, %v2759_v10  ;;  %2973 = vmatpush1.bf16.msra.mxu1 %v9845_v37  ;;  %2682 = vst [vmem:[#allocation8 + $0x208] sm:$0xff] %v7460_v42  ;;  %v7464_v18 = vpack.c.bf16 %v10615_v57, %v10611_v30  ;;  %v10627_v3 = vpop.f32.mrb[79].mxu1  ;;  %v188_v12 = vunpack.c.h.bf16 %v9144_v25  ;;  %v187_v10 = vunpack.c.l.bf16 %v9144_v25 }
 0x211   :  { %2974 = vmatprep.subr.bf16.mxu1 %v9848_v41  ;;  %14631 = vst [vmem:[#allocation141_spill] sm:$0xff] %v10627_v3  ;;  %v7449_v37 = vpack.c.bf16 %v10627_v3, %v10622_v49  ;;  %2667 = vst [vmem:[#allocation8 + $0x190] sm:$0xff] %v7445_v44  ;;  %v10649_v25 = vpop.f32.mrb[80].mxu1 }
 0x212   :  { %v10629_v61 = vpack.c.bf16 %v2812_v8, %v2811_v34  ;;  %245 = vadd.xlane.f32.xlu1 %v186_v20  ;;  %2686 = vst [vmem:[#allocation8 + $0x228] sm:$0xff] %v7464_v18  ;;  %v10654_v6 = vpop.f32.mrb[81].mxu1 }
 0x213   :  { %243 = vadd.xlane.f32.xlu0 %v185_v31  ;;  %v2763_v62 = vpop.permute.xlu0 %2762  ;;  %2671 = vst [vmem:[#allocation8 + $0x1b0] sm:$0xff] %v7449_v37  ;;  %v9145_v31 = vld [vmem:[#allocation2 + $0x78] sm:$0xff]   ;;  %14634 = vst [vmem:[#allocation144_spill] sm:$0xff] %v10654_v6 }
 0x214   :  { %6979 = vmatmul.mubr.msk.bf16.gmra.mrb[120].mxu1 %vm1001_vm1, %v10629_v61  ;;  %6995 = vmatmul.mubr.msk.bf16.gmra.mrb[176].mxu0 %vm1001_vm1, %v10629_v61  ;;  %v10637_v41 = vpop.f32.mrb[80].mxu0  ;;  %v190_v34 = vunpack.c.h.bf16 %v9145_v31  ;;  %v189_v37 = vunpack.c.l.bf16 %v9145_v31 }
 0x215   :  { %v2767_v8 = vpop.permute.xlu1 %2766  ;;  %2909 = vmatprep.mubr.bf16.mxu1 %v14530_v59  ;;  %3135 = vmatprep.mubr.bf16.mxu0 %v14530_v59  ;;  %v10641_v20 = vpop.f32.mrb[81].mxu0 }
 0x216   :  { %v2814_v42 = vmul.f32 %v10133_v7, %v2767_v8  ;;  %249 = vadd.xlane.f32.xlu1 %v188_v12  ;;  %2975 = vmatpush1.bf16.msra.mxu1 %v9860_v46  ;;  %v7468_v18 = vpack.c.bf16 %v10641_v20, %v10637_v41  ;;  %v10647_v44 = vpop.f32.mrb[82].mxu0  ;;  %v2813_v7 = vmul.f32 %v10121_v4, %v2763_v62  ;;  %v10659_v12 = vpop.f32.mrb[82].mxu1 }
 0x217   :  { %14632 = vst [vmem:[#allocation142_spill] sm:$0xff] %v10647_v44  ;;  %247 = vadd.xlane.f32.xlu0 %v187_v10  ;;  %2976 = vmatprep.subr.bf16.mxu1 %v9863_v48  ;;  %v10652_v3 = vpop.f32.mrb[83].mxu0  ;;  %v7453_v8 = vpack.c.bf16 %v10654_v6, %v10649_v25  ;;  %v10663_v57 = vpop.f32.mrb[83].mxu1 }
 0x218   :  { %14633 = vst [vmem:[#allocation143_spill] sm:$0xff] %v10652_v3  ;;  %2690 = vst [vmem:[#allocation8 + $0x248] sm:$0xff] %v7468_v18  ;;  %v7472_v46 = vpack.c.bf16 %v10652_v3, %v10647_v44  ;;  %v10665_v10 = vpack.c.bf16 %v2814_v42, %v2813_v7  ;;  %v7457_v48 = vpack.c.bf16 %v10663_v57, %v10659_v12  ;;  %v10687_v18 = vpop.f32.mrb[84].mxu1 }
 0x219   :  { %14635 = vst [vmem:[#allocation145_spill] sm:$0xff] %v10663_v57  ;;  %2675 = vst [vmem:[#allocation8 + $0x1d0] sm:$0xff] %v7453_v8  ;;  %v10692_v7 = vpop.f32.mrb[85].mxu1 }
 0x21a   :  { %253 = vadd.xlane.f32.xlu1 %v190_v34  ;;  %2977 = vmatpush1.bf16.msra.mxu1 %v9869_v51  ;;  %2694 = vst [vmem:[#allocation8 + $0x268] sm:$0xff] %v7472_v46  ;;  %2679 = vst [vmem:[#allocation8 + $0x1f0] sm:$0xff] %v7457_v48  ;;  %v7461_v8 = vpack.c.bf16 %v10692_v7, %v10687_v18 }
 0x21b   :  { %251 = vadd.xlane.f32.xlu0 %v189_v37  ;;  %2978 = vmatprep.subr.bf16.mxu1 %v9873_v54  ;;  %v2771_v4 = vpop.permute.xlu0 %2770  ;;  %14638 = vst [vmem:[#allocation148_spill] sm:$0xff] %v10692_v7 }
 0x21c   :  { %6980 = vmatmul.mubr.msk.bf16.gmra.mrb[124].mxu1 %vm1001_vm1, %v10665_v10  ;;  %6996 = vmatmul.mubr.msk.bf16.gmra.mrb[180].mxu0 %vm1001_vm1, %v10665_v10  ;;  %v10675_v62 = vpop.f32.mrb[84].mxu0  ;;  %v2815_v46 = vmul.f32 %v10150_v16, %v2771_v4  ;;  %2683 = vst [vmem:[#allocation8 + $0x210] sm:$0xff] %v7461_v8 }
 0x21d   :  { %v2775_v42 = vpop.permute.xlu1 %2774  ;;  %2919 = vmatprep.mubr.bf16.mxu1 %v14530_v59  ;;  %3145 = vmatprep.mubr.bf16.mxu0 %v14530_v59  ;;  %v10679_v51 = vpop.f32.mrb[85].mxu0 }
 0x21e   :  { %v2816_v54 = vmul.f32 %v10162_v53, %v2775_v42  ;;  %2979 = vmatpush1.bf16.msra.mxu1 %v9877_v56  ;;  %v7476_v31 = vpack.c.bf16 %v10679_v51, %v10675_v62  ;;  %v10685_v34 = vpop.f32.mrb[86].mxu0  ;;  %v10697_v56 = vpop.f32.mrb[86].mxu1 }
 0x21f   :  { %14636 = vst [vmem:[#allocation146_spill] sm:$0xff] %v10685_v34  ;;  %3196 = vmatprep.subr.bf16.mxu1 %v9890_v1  ;;  %v10690_v37 = vpop.f32.mrb[87].mxu0  ;;  %v10701_v48 = vpop.f32.mrb[87].mxu1 }
 0x220   :  { %14637 = vst [vmem:[#allocation147_spill] sm:$0xff] %v10690_v37  ;;  %2698 = vst [vmem:[#allocation8 + $0x288] sm:$0xff] %v7476_v31  ;;  %v7480_v53 = vpack.c.bf16 %v10690_v37, %v10685_v34  ;;  %v10703_v42 = vpack.c.bf16 %v2816_v54, %v2815_v46  ;;  %v7465_v1 = vpack.c.bf16 %v10701_v48, %v10697_v56  ;;  %v10722_v8 = vpop.f32.mrb[88].mxu1 }
 0x221   :  { %14639 = vst [vmem:[#allocation149_spill] sm:$0xff] %v10701_v48  ;;  %v10726_v7 = vpop.f32.mrb[89].mxu1 }
 0x222   :  { %2702 = vst [vmem:[#allocation8 + $0x2a8] sm:$0xff] %v7480_v53  ;;  %2687 = vst [vmem:[#allocation8 + $0x230] sm:$0xff] %v7465_v1  ;;  %v10731_v37 = vpop.f32.mrb[90].mxu1 }
 0x223   :  { %v2779_v57 = vpop.permute.xlu0 %2778  ;;  %14642 = vst [vmem:[#allocation152_spill] sm:$0xff] %v10726_v7 }
 0x224   :  { %6981 = vmatmul.mubr.msk.bf16.gmra.mrb[128].mxu1 %vm1001_vm1, %v10703_v42  ;;  %6997 = vmatmul.mubr.msk.bf16.gmra.mrb[184].mxu0 %vm1001_vm1, %v10703_v42  ;;  %v10711_v16 = vpop.f32.mrb[88].mxu0  ;;  %v2817_v1 = vmul.f32 %v10182_v60, %v2779_v57 }
 0x225   :  { %v2783_v4 = vpop.permute.xlu1 %2782  ;;  %2929 = vmatprep.mubr.bf16.mxu1 %v14530_v59  ;;  %3155 = vmatprep.mubr.bf16.mxu0 %v14530_v59  ;;  %v10715_v54 = vpop.f32.mrb[89].mxu0 }
 0x226   :  { %v2818_v31 = vmul.f32 %v10190_v45, %v2783_v4  ;;  %v7484_v46 = vpack.c.bf16 %v10715_v54, %v10711_v16  ;;  %v10720_v53 = vpop.f32.mrb[90].mxu0  ;;  %v7469_v45 = vpack.c.bf16 %v10726_v7, %v10722_v8  ;;  %v10735_v4 = vpop.f32.mrb[91].mxu1 }
 0x227   :  { %14640 = vst [vmem:[#allocation150_spill] sm:$0xff] %v10720_v53  ;;  %v10724_v48 = vpop.f32.mrb[91].mxu0  ;;  %14643 = vst [vmem:[#allocation153_spill] sm:$0xff] %v10735_v4  ;;  %v7473_v3 = vpack.c.bf16 %v10735_v4, %v10731_v37 }
 0x228   :  { %14641 = vst [vmem:[#allocation151_spill] sm:$0xff] %v10724_v48  ;;  %2706 = vst [vmem:[#allocation8 + $0x2c8] sm:$0xff] %v7484_v46  ;;  %v7488_v6 = vpack.c.bf16 %v10724_v48, %v10720_v53  ;;  %v10737_v34 = vpack.c.bf16 %v2818_v31, %v2817_v1 }
 0x229   :  { %2691 = vst [vmem:[#allocation8 + $0x250] sm:$0xff] %v7469_v45  ;;  %2695 = vst [vmem:[#allocation8 + $0x270] sm:$0xff] %v7473_v3  ;;  %v10758_v45 = vpop.f32.mrb[92].mxu1 }
 0x22a   :  { %2710 = vst [vmem:[#allocation8 + $0x2e8] sm:$0xff] %v7488_v6  ;;  %v10764_v4 = vpop.f32.mrb[93].mxu1 }
 0x22b   :  { %723 = vrot.lane.b32.xlu1 %v10117_v33, %s9383_s2  ;;  %v2787_v60 = vpop.permute.xlu0 %2786  ;;  %14646 = vst [vmem:[#allocation156_spill] sm:$0xff] %v10764_v4  ;;  %v7477_v48 = vpack.c.bf16 %v10764_v4, %v10758_v45 }
 0x22c   :  { %6982 = vmatmul.mubr.msk.bf16.gmra.mrb[132].mxu1 %vm1001_vm1, %v10737_v34  ;;  %6998 = vmatmul.mubr.msk.bf16.gmra.mrb[188].mxu0 %vm1001_vm1, %v10737_v34  ;;  %v10747_v57 = vpop.f32.mrb[92].mxu0  ;;  %v2819_v7 = vmul.f32 %v10211_v17, %v2787_v60 }
 0x22d   :  { %v2791_v31 = vpop.permute.xlu1 %2790  ;;  %2939 = vmatprep.mubr.bf16.mxu1 %v14530_v59  ;;  %3165 = vmatprep.mubr.bf16.mxu0 %v14530_v59  ;;  %v10751_v6 = vpop.f32.mrb[93].mxu0  ;;  %2699 = vst [vmem:[#allocation8 + $0x290] sm:$0xff] %v7477_v48 }
 0x22e   :  { %v2820_v33 = vmul.f32 %v10219_v21, %v2791_v31  ;;  %v7492_v46 = vpack.c.bf16 %v10751_v6, %v10747_v57  ;;  %v10756_v1 = vpop.f32.mrb[94].mxu0  ;;  %v10769_v31 = vpop.f32.mrb[94].mxu1 }
 0x22f   :  { %14644 = vst [vmem:[#allocation154_spill] sm:$0xff] %v10756_v1  ;;  %725 = vrot.lane.b32.xlu1 %v10143_v43, %s9383_s2  ;;  %v10762_v3 = vpop.f32.mrb[95].mxu0  ;;  %v10775_v53 = vpop.f32.mrb[95].mxu1 }
 0x230   :  { %14645 = vst [vmem:[#allocation155_spill] sm:$0xff] %v10762_v3  ;;  %2714 = vst [vmem:[#allocation8 + $0x308] sm:$0xff] %v7492_v46  ;;  %v7496_v21 = vpack.c.bf16 %v10762_v3, %v10756_v1  ;;  %v10777_v43 = vpack.c.bf16 %v2820_v33, %v2819_v7  ;;  %v7481_v17 = vpack.c.bf16 %v10775_v53, %v10769_v31 }
 0x231   :  { %721 = vrot.lane.b32.xlu0 %v10110_v38, %s9383_s2  ;;  %14647 = vst [vmem:[#allocation157_spill] sm:$0xff] %v10775_v53 }
 0x232   :  { %2718 = vst [vmem:[#allocation8 + $0x328] sm:$0xff] %v7496_v21  ;;  %2703 = vst [vmem:[#allocation8 + $0x2b0] sm:$0xff] %v7481_v17  ;;  %v10800_v21 = vpop.f32.mrb[96].mxu1 }
 0x233   :  { %727 = vrot.lane.b32.xlu1 %v10157_v5, %s9383_s2  ;;  %v2795_v60 = vpop.permute.xlu0 %2794 }
 0x234   :  { %6983 = vmatmul.mubr.msk.bf16.gmra.mrb[136].mxu1 %vm1001_vm1, %v10777_v43  ;;  %6999 = vmatmul.mubr.msk.bf16.gmra.mrb[192].mxu0 %vm1001_vm1, %v10777_v43  ;;  %v10787_v38 = vpop.f32.mrb[96].mxu0  ;;  %v2821_v53 = vmul.f32 %v10240_v47, %v2795_v60 }
 0x235   :  { %v2799_v7 = vpop.permute.xlu1 %2798  ;;  %729 = vrot.lane.b32.xlu0 %v10172_v29, %s9383_s2  ;;  %2949 = vmatprep.mubr.bf16.mxu1 %v14530_v59  ;;  %v10792_v33 = vpop.f32.mrb[97].mxu0 }
 0x236   :  { %14648 = vst [vmem:[#allocation158_spill] sm:$0xff] %v10792_v33  ;;  %v2822_v5 = vmul.f32 %v10248_v19, %v2799_v7  ;;  %3175 = vmatprep.mubr.bf16.mxu0 %v14530_v59  ;;  %v7500_v48 = vpack.c.bf16 %v10792_v33, %v10787_v38  ;;  %v10798_v46 = vpop.f32.mrb[98].mxu0  ;;  %v10806_v29 = vpop.f32.mrb[97].mxu1 }
 0x237   :  { %14649 = vst [vmem:[#allocation159_spill] sm:$0xff] %v10798_v46  ;;  %731 = vrot.lane.b32.xlu1 %v10178_v39, %s9383_s2  ;;  %v10804_v17 = vpop.f32.mrb[99].mxu0  ;;  %14651 = vst [vmem:[#allocation161_spill] sm:$0xff] %v10806_v29  ;;  %v7485_v7 = vpack.c.bf16 %v10806_v29, %v10800_v21  ;;  %v10813_v4 = vpop.f32.mrb[98].mxu1 }
 0x238   :  { %14650 = vst [vmem:[#allocation160_spill] sm:$0xff] %v10804_v17  ;;  %2722 = vst [vmem:[#allocation8 + $0x348] sm:$0xff] %v7500_v48  ;;  %v7504_v19 = vpack.c.bf16 %v10804_v17, %v10798_v46  ;;  %v10817_v3 = vpop.f32.mrb[99].mxu1  ;;  %v10819_v39 = vpack.c.bf16 %v2822_v5, %v2821_v53 }
 0x239   :  { %733 = vrot.lane.b32.xlu0 %v10201_v40, %s9383_s2  ;;  %14652 = vst [vmem:[#allocation162_spill] sm:$0xff] %v10817_v3  ;;  %2707 = vst [vmem:[#allocation8 + $0x2d0] sm:$0xff] %v7485_v7  ;;  %v7489_v47 = vpack.c.bf16 %v10817_v3, %v10813_v4  ;;  %v10831_v53 = vpop.f32.mrb[100].mxu1 }
 0x23a   :  { %2726 = vst [vmem:[#allocation8 + $0x368] sm:$0xff] %v7504_v19  ;;  %14654 = vst [vmem:[#allocation164_spill] sm:$0xff] %v10831_v53 }
 0x23b   :  { %735 = vrot.lane.b32.xlu1 %v10207_v32, %s9383_s2  ;;  %v2803_v60 = vpop.permute.xlu0 %2802  ;;  %2711 = vst [vmem:[#allocation8 + $0x2f0] sm:$0xff] %v7489_v47  ;;  %v10844_v47 = vpop.f32.mrb[101].mxu1 }
 0x23c   :  { %6984 = vmatmul.mubr.msk.bf16.gmra.mrb[140].mxu1 %vm1001_vm1, %v10819_v39  ;;  %7000 = vmatmul.mubr.msk.bf16.gmra.mrb[196].mxu0 %vm1001_vm1, %v10819_v39  ;;  %v10829_v40 = vpop.f32.mrb[100].mxu0  ;;  %14657 = vst [vmem:[#allocation167_spill] sm:$0xff] %v10844_v47  ;;  %v10852_v29 = vpop.f32.mrb[102].mxu1 }
 0x23d   :  { %14653 = vst [vmem:[#allocation163_spill] sm:$0xff] %v10829_v40  ;;  %v2807_v5 = vpop.permute.xlu1 %2806  ;;  %737 = vrot.lane.b32.xlu0 %v10230_v11, %s9383_s2  ;;  %2959 = vmatprep.mubr.bf16.mxu1 %v14530_v59  ;;  %v10836_v48 = vpop.f32.mrb[101].mxu0  ;;  %v7493_v11 = vpack.c.bf16 %v10844_v47, %v10831_v53  ;;  %14659 = vst [vmem:[#allocation169_spill] sm:$0xff] %v10852_v29  ;;  %v14669_v47 = vld [vmem:[#allocation61_spill] sm:$0xff]  ;;  %v14713_v53 = vld [vmem:[#allocation31_spill] sm:$0xff] }
 0x23e   :  { %14655 = vst [vmem:[#allocation165_spill] sm:$0xff] %v10836_v48  ;;  %v2824_v32 = vmul.f32 %v10277_v35, %v2807_v5  ;;  %3185 = vmatprep.mubr.bf16.mxu0 %v14530_v59  ;;  %v7508_v19 = vpack.c.bf16 %v10836_v48, %v10829_v40  ;;  %v10842_v7 = vpop.f32.mrb[102].mxu0  ;;  %v2823_v35 = vmul.f32 %v10269_v55, %v2803_v60  ;;  %v10857_v17 = vpop.f32.mrb[103].mxu1 }
 0x23f   :  { %14656 = vst [vmem:[#allocation166_spill] sm:$0xff] %v10842_v7  ;;  %739 = vrot.lane.b32.xlu1 %v10236_v26, %s9383_s2  ;;  %v10848_v3 = vpop.f32.mrb[103].mxu0  ;;  %14660 = vst [vmem:[#allocation170_spill] sm:$0xff] %v10857_v17  ;;  %v7497_v26 = vpack.c.bf16 %v10857_v17, %v10852_v29 }
 0x240   :  { %14658 = vst [vmem:[#allocation168_spill] sm:$0xff] %v10848_v3  ;;  %2730 = vst [vmem:[#allocation8 + $0x388] sm:$0xff] %v7508_v19  ;;  %v7512_v5 = vpack.c.bf16 %v10848_v3, %v10842_v7  ;;  %v10863_v46 = vpack.c.bf16 %v2824_v32, %v2823_v35  ;;  %v14680_v3 = vld [vmem:[#allocation18_spill] sm:$0xff]  ;;  %v3311_v7 = vlaneseq }
 0x241   :  { %741 = vrot.lane.b32.xlu0 %v10259_v13, %s9383_s2  ;;  %2715 = vst [vmem:[#allocation8 + $0x310] sm:$0xff] %v7493_v11  ;;  %2719 = vst [vmem:[#allocation8 + $0x330] sm:$0xff] %v7497_v26  ;;  %v10873_v13 = vpop.f32.mrb[104].mxu1 }
 0x242   :  { %2734 = vst [vmem:[#allocation8 + $0x3a8] sm:$0xff] %v7512_v5  ;;  %14662 = vst [vmem:[#allocation172_spill] sm:$0xff] %v10873_v13  ;;  %v10880_v32 = vpop.f32.mrb[105].mxu1 }
 0x243   :  { %743 = vrot.lane.b32.xlu1 %v10265_v27, %s9383_s2  ;;  %14664 = vst [vmem:[#allocation174_spill] sm:$0xff] %v10880_v32  ;;  %v7501_v11 = vpack.c.bf16 %v10880_v32, %v10873_v13  ;;  %v10888_v35 = vpop.f32.mrb[106].mxu1 }
 0x244   :  { %6985 = vmatmul.mubr.msk.bf16.gmra.mrb[144].mxu1 %vm1001_vm1, %v10863_v46  ;;  %7001 = vmatmul.mubr.msk.bf16.gmra.mrb[200].mxu0 %vm1001_vm1, %v10863_v46  ;;  %v10871_v55 = vpop.f32.mrb[104].mxu0  ;;  %14666 = vst [vmem:[#allocation176_spill] sm:$0xff] %v10888_v35  ;;  %v10894_v5 = vpop.f32.mrb[107].mxu1 }
 0x245   :  { %14661 = vst [vmem:[#allocation171_spill] sm:$0xff] %v10871_v55  ;;  %745 = vrot.lane.b32.xlu0 %v10288_v36, %s9383_s2  ;;  %3002 = vmatprep.mubr.bf16.mxu1 %v14530_v59  ;;  %v10878_v60 = vpop.f32.mrb[105].mxu0  ;;  %14668 = vst [vmem:[#allocation178_spill] sm:$0xff] %v10894_v5  ;;  %v7505_v17 = vpack.c.bf16 %v10894_v5, %v10888_v35  ;;  %v10902_v32 = vpop.f32.mrb[108].mxu1 }
 0x246   :  { %14663 = vst [vmem:[#allocation173_spill] sm:$0xff] %v10878_v60  ;;  %v7516_v27 = vpack.c.bf16 %v10878_v60, %v10871_v55  ;;  %v10884_v19 = vpop.f32.mrb[106].mxu0  ;;  %2723 = vst [vmem:[#allocation8 + $0x350] sm:$0xff] %v7501_v11  ;;  %v14673_v11 = vld [vmem:[#allocation16_spill] sm:$0xff]  ;;  %v14714_v60 = vld [vmem:[#allocation33_spill] sm:$0xff] }
 0x247   :  { %14665 = vst [vmem:[#allocation175_spill] sm:$0xff] %v10884_v19  ;;  %747 = vrot.lane.b32.xlu1 %v10294_v63, %s9383_s2  ;;  %v10892_v36 = vpop.f32.mrb[107].mxu0  ;;  %2727 = vst [vmem:[#allocation8 + $0x370] sm:$0xff] %v7505_v17  ;;  %v14676_v17 = vld [vmem:[#allocation17_spill] sm:$0xff] }
 0x248   :  { %14667 = vst [vmem:[#allocation177_spill] sm:$0xff] %v10892_v36  ;;  %2738 = vst [vmem:[#allocation8 + $0x3c8] sm:$0xff] %v7516_v27  ;;  %v7520_v26 = vpack.c.bf16 %v10892_v36, %v10884_v19  ;;  %v10908_v27 = vpop.f32.mrb[109].mxu1 }
 0x249   :  { %749 = vrot.lane.b32.xlu0 %v14669_v47, %s9383_s2  ;;  %14670 = vst [vmem:[#allocation61_spill] sm:$0xff] %v10902_v32  ;;  %14672 = vst [vmem:[#allocation180_spill] sm:$0xff] %v10908_v27  ;;  %v7509_v47 = vpack.c.bf16 %v10908_v27, %v10902_v32  ;;  %v14706_v32 = vld [vmem:[#allocation25_spill] sm:$0xff] }
 0x24a   :  { %2742 = vst [vmem:[#allocation8 + $0x3e8] sm:$0xff] %v7520_v26  ;;  %v10916_v26 = vpop.f32.mrb[110].mxu1 }
 0x24b   :  { %14675 = vst [vmem:[#allocation181_spill] sm:$0xff] %v10916_v26  ;;  %v10923_v36 = vpop.f32.mrb[111].mxu1  ;;  %2731 = vst [vmem:[#allocation8 + $0x390] sm:$0xff] %v7509_v47 }
 0x24c   :  { %6986 = vmatmul.mubr.msk.bf16.vlgmr.msra.gmra.mrb[148].mxu1 %vm1001_vm1, %v10583_v23  ;;  %v10906_v63 = vpop.f32.mrb[108].mxu0  ;;  %14678 = vst [vmem:[#allocation182_spill] sm:$0xff] %v10923_v36 }
 0x24d   :  { %14671 = vst [vmem:[#allocation179_spill] sm:$0xff] %v10906_v63  ;;  %3012 = vmatprep.mubr.bf16.mxu1 %v14530_v59  ;;  %3197 = vmatpush1.bf16.msra.mxu1 %v14673_v11  ;;  %v10912_v29 = vpop.f32.mrb[109].mxu0  ;;  %v7513_v11 = vpack.c.bf16 %v10923_v36, %v10916_v26 }
 0x24e   :  { %14674 = vst [vmem:[#allocation16_spill] sm:$0xff] %v10912_v29  ;;  %3198 = vmatprep.subr.bf16.mxu1 %v14676_v17  ;;  %v7398_v5 = vpack.c.bf16 %v10912_v29, %v10906_v63  ;;  %v10921_v35 = vpop.f32.mrb[110].mxu0  ;;  %v14681_v17 = vld [vmem:[#allocation19_spill] sm:$0xff]  ;;  %v10933_v29 = vpop.f32.mrb[112].mxu1 }
 0x24f   :  { %14677 = vst [vmem:[#allocation17_spill] sm:$0xff] %v10921_v35  ;;  %v10925_v19 = vpop.f32.mrb[111].mxu0  ;;  %2735 = vst [vmem:[#allocation8 + $0x3b0] sm:$0xff] %v7513_v11  ;;  %v10939_v47 = vpop.f32.mrb[113].mxu1 }
 0x250   :  { %14679 = vst [vmem:[#allocation183_spill] sm:$0xff] %v10925_v19  ;;  %2620 = vst [vmem:[#allocation8 + $0x18] sm:$0xff] %v7398_v5  ;;  %v7402_v27 = vpack.c.bf16 %v10925_v19, %v10921_v35  ;;  %v14685_v5 = vld [vmem:[#allocation20_spill] sm:$0xff]  ;;  %v10947_v11 = vpop.f32.mrb[114].mxu1 }
 0x251   :  { %3199 = vmatpush1.bf16.msra.mxu1 %v14680_v3  ;;  %14682 = vst [vmem:[#allocation18_spill] sm:$0xff] %v10933_v29  ;;  %14684 = vst [vmem:[#allocation184_spill] sm:$0xff] %v10939_v47  ;;  %v7517_v3 = vpack.c.bf16 %v10939_v47, %v10933_v29  ;;  %v10954_v36 = vpop.f32.mrb[115].mxu1  ;;  %v14692_v29 = vld [vmem:[#allocation22_spill] sm:$0xff] }
 0x252   :  { %3200 = vmatprep.subr.bf16.mxu1 %v14681_v17  ;;  %2624 = vst [vmem:[#allocation8 + $0x38] sm:$0xff] %v7402_v27  ;;  %14687 = vst [vmem:[#allocation185_spill] sm:$0xff] %v10947_v11  ;;  %v14688_v27 = vld [vmem:[#allocation21_spill] sm:$0xff] }
 0x253   :  { %14690 = vst [vmem:[#allocation186_spill] sm:$0xff] %v10954_v36  ;;  %2739 = vst [vmem:[#allocation8 + $0x3d0] sm:$0xff] %v7517_v3 }
 0x254   :  { %6987 = vmatmul.mubr.msk.bf16.gmra.mrb[152].mxu1 %vm1001_vm1, %v10629_v61  ;;  %v10937_v63 = vpop.f32.mrb[112].mxu0 }
 0x255   :  { %14683 = vst [vmem:[#allocation19_spill] sm:$0xff] %v10937_v63  ;;  %3022 = vmatprep.mubr.bf16.mxu1 %v14530_v59  ;;  %3201 = vmatpush1.bf16.msra.mxu1 %v14685_v5  ;;  %v10943_v19 = vpop.f32.mrb[113].mxu0  ;;  %v7521_v5 = vpack.c.bf16 %v10954_v36, %v10947_v11  ;;  %v14696_v36 = vld [vmem:[#allocation24_spill] sm:$0xff]  ;;  %v14705_v11 = vld [vmem:[#allocation71_spill] sm:$0xff] }
 0x256   :  { %14686 = vst [vmem:[#allocation20_spill] sm:$0xff] %v10943_v19  ;;  %3202 = vmatprep.subr.bf16.mxu1 %v14688_v27  ;;  %v7406_v17 = vpack.c.bf16 %v10943_v19, %v10937_v63  ;;  %v10952_v35 = vpop.f32.mrb[114].mxu0  ;;  %v14693_v27 = vld [vmem:[#allocation23_spill] sm:$0xff]  ;;  %v10964_v19 = vshrl.u32 %v3311_v7, 7 }
 0x257   :  { %14689 = vst [vmem:[#allocation21_spill] sm:$0xff] %v10952_v35  ;;  %v10956_v26 = vpop.f32.mrb[115].mxu0  ;;  %2743 = vst [vmem:[#allocation8 + $0x3f0] sm:$0xff] %v7521_v5 }
 0x258   :  { %14691 = vst [vmem:[#allocation187_spill] sm:$0xff] %v10956_v26  ;;  %2628 = vst [vmem:[#allocation8 + $0x58] sm:$0xff] %v7406_v17  ;;  %v7410_v47 = vpack.c.bf16 %v10956_v26, %v10952_v35  ;;  %v3313_v7 = vsub.s32 0, %v10964_v19  ;;  %v10986_v26 = vld [vmem:[%s14229_s5] sm:$0xff] }
 0x259   :  { %3203 = vmatpush1.bf16.msra.mxu1 %v14692_v29  ;;  %14694 = vst [vmem:[#allocation22_spill] sm:$0xff] %v10964_v19 }
 0x25a   :  { %3204 = vmatprep.subr.bf16.mxu1 %v14693_v27  ;;  %2632 = vst [vmem:[#allocation8 + $0x78] sm:$0xff] %v7410_v47 }
 0x25c   :  { %6988 = vmatmul.mubr.msk.bf16.gmra.mrb[156].mxu1 %vm1001_vm1, %v10665_v10  ;;  %v10968_v3 = vpop.f32.mrb[116].mxu0 }
 0x25d   :  { %14695 = vst [vmem:[#allocation23_spill] sm:$0xff] %v10968_v3  ;;  %3032 = vmatprep.mubr.bf16.mxu1 %v14530_v59  ;;  %3205 = vmatpush1.bf16.msra.mxu1 %v14696_v36  ;;  %v10972_v17 = vpop.f32.mrb[117].mxu0  ;;  %v14411_v36 = vmov 0.0|0.0  }
 0x25e   :  { %14697 = vst [vmem:[#allocation24_spill] sm:$0xff] %v10972_v17  ;;  %v7414_v29 = vpack.c.bf16 %v10972_v17, %v10968_v3  ;;  %v10976_v5 = vpop.f32.mrb[118].mxu0  ;;  %8227 = vmatprep.subr.bf16.mxu0 %v14411_v36  ;;  %8251 = vmatprep.subr.bf16.mxu1 %v14411_v36  ;;  %v10991_v17 = vrot.slane %v10986_v26, %v3313_v7 }
 0x25f   :  { %14698 = vst [vmem:[#allocation188_spill] sm:$0xff] %v10976_v5  ;;  %v10978_v27 = vpop.f32.mrb[119].mxu0 }
 0x260   :  { %14699 = vst [vmem:[#allocation189_spill] sm:$0xff] %v10978_v27  ;;  %2636 = vst [vmem:[#allocation8 + $0x98] sm:$0xff] %v7414_v29  ;;  %v7418_v47 = vpack.c.bf16 %v10978_v27, %v10976_v5  ;;  %v14702_v5 = vld [vmem:[#allocation67_spill] sm:$0xff]  ;;  %v3316_v1 = vmul.f32 %v10991_v17, %v14705_v11  ;;  %v14710_v11 = vld [vmem:[#allocation29_spill] sm:$0xff] }
 0x262   :  { %2640 = vst [vmem:[#allocation8 + $0xb8] sm:$0xff] %v7418_v47  ;;  %v3315_v47 = vmul.f32 %v10991_v17, %v14702_v5  ;;  %v3321_v5 = vmul.f32 %v10991_v17, %v14706_v32  ;;  %v3323_v32 = vmul.f32 %v10991_v17, %v14710_v11  ;;  %v3324_v11 = vmul.f32 %v10991_v17, %v14713_v53  ;;  %v14716_v53 = vld [vmem:[#allocation35_spill] sm:$0xff] }
 0x264   :  { %6989 = vmatmul.mubr.msk.bf16.gmra.mrb[160].mxu1 %vm1001_vm1, %v10703_v42  ;;  %v10995_v29 = vpop.f32.mrb[120].mxu0 }
 0x265   :  { %14700 = vst [vmem:[#allocation190_spill] sm:$0xff] %v10995_v29  ;;  %3042 = vmatprep.mubr.bf16.mxu1 %v14530_v59  ;;  %v10998_v27 = vpop.f32.mrb[121].mxu0 }
 0x266   :  { %14701 = vst [vmem:[#allocation191_spill] sm:$0xff] %v10998_v27  ;;  %v7422_v35 = vpack.c.bf16 %v10998_v27, %v10995_v29  ;;  %v11004_v3 = vpop.f32.mrb[122].mxu0 }
 0x267   :  { %14703 = vst [vmem:[#allocation67_spill] sm:$0xff] %v11004_v3  ;;  %v11006_v36 = vpop.f32.mrb[123].mxu0 }
 0x268   :  { %14704 = vst [vmem:[#allocation192_spill] sm:$0xff] %v11006_v36  ;;  %3347 = vadd.xlane.f32.xlu0 %v3315_v47  ;;  %v192_v7 = vpop.xlane.xlu0 %191  ;;  %2644 = vst [vmem:[#allocation8 + $0xd8] sm:$0xff] %v7422_v35  ;;  %v7426_v63 = vpack.c.bf16 %v11006_v36, %v11004_v3  ;;  %v14708_v35 = vld [vmem:[#allocation27_spill] sm:$0xff] }
 0x269   :  { %8554 = vrcp.f32 %v192_v7  ;;  %v3322_v36 = vmul.f32 %v10991_v17, %v14708_v35  ;;  %vm255_vm3 = vcmp.gt.f32.partialorder %v192_v7, 0.0 }
 0x26a   :  { %2648 = vst [vmem:[#allocation8 + $0xf8] sm:$0xff] %v7426_v63 }
 0x26b   :  { %3349 = vadd.xlane.f32.xlu1 %v3316_v1 }
 0x26c   :  { %3359 = vadd.xlane.f32.xlu0 %v3321_v5  ;;  %6990 = vmatmul.mubr.msk.bf16.gmra.mrb[164].mxu1 %vm1001_vm1, %v10737_v34  ;;  %v196_v27 = vpop.xlane.xlu0 %195  ;;  %v11016_v47 = vpop.f32.mrb[124].mxu0 }
 0x26d   :  { %14707 = vst [vmem:[#allocation71_spill] sm:$0xff] %v11016_v47  ;;  %8556 = vrcp.f32 %v196_v27  ;;  %3052 = vmatprep.mubr.bf16.mxu1 %v14530_v59  ;;  %v11021_v3 = vpop.f32.mrb[125].mxu0  ;;  %vm257_vm5 = vcmp.gt.f32.partialorder %v196_v27, 0.0 }
 0x26e   :  { %14709 = vst [vmem:[#allocation25_spill] sm:$0xff] %v11021_v3  ;;  %v7430_v1 = vpack.c.bf16 %v11021_v3, %v11016_v47  ;;  %v11027_v63 = vpop.f32.mrb[126].mxu0  ;;  %v3325_v3 = vmul.f32 %v10991_v17, %v14714_v60  ;;  %v3326_v60 = vmul.f32 %v10991_v17, %v14716_v53 }
 0x26f   :  { %14711 = vst [vmem:[#allocation27_spill] sm:$0xff] %v11027_v63  ;;  %3361 = vadd.xlane.f32.xlu1 %v3322_v36  ;;  %v194_v5 = vpop.xlane.xlu1 %193  ;;  %v11029_v29 = vpop.f32.mrb[127].mxu0 }
 0x270   :  { %14712 = vst [vmem:[#allocation29_spill] sm:$0xff] %v11029_v29  ;;  %8558 = vrcp.f32 %v194_v5  ;;  %3363 = vadd.xlane.f32.xlu0 %v3323_v32  ;;  %v198_v13 = vpop.xlane.xlu0 %197  ;;  %2652 = vst [vmem:[#allocation8 + $0x118] sm:$0xff] %v7430_v1  ;;  %v7434_v35 = vpack.c.bf16 %v11029_v29, %v11027_v63  ;;  %vm256_vm6 = vcmp.gt.f32.partialorder %v194_v5, 0.0 }
 0x271   :  { %8560 = vrcp.f32 %v198_v13  ;;  %vm258_vm7 = vcmp.gt.f32.partialorder %v198_v13, 0.0 }
 0x272   :  { %2656 = vst [vmem:[#allocation8 + $0x138] sm:$0xff] %v7434_v35 }
 0x273   :  { %v8555_v36 = vpop.eup %8554  ;;  %3365 = vadd.xlane.f32.xlu1 %v3324_v11  ;;  %v202_v47 = vpop.xlane.xlu1 %201 }
 0x274   :  { %v351_v55 = vsel %vm255_vm3, %v8555_v36, 0.0  ;;  %8562 = vrcp.f32 %v202_v47  ;;  %3367 = vadd.xlane.f32.xlu0 %v3325_v3  ;;  %6991 = vmatmul.mubr.msk.bf16.gmra.mrb[168].mxu1 %vm1001_vm1, %v10777_v43  ;;  %v200_v32 = vpop.xlane.xlu0 %199  ;;  %v11039_v7 = vpop.f32.mrb[128].mxu0  ;;  %v14718_v3 = vld [vmem:[#allocation37_spill] sm:$0xff]  ;;  %vm260_vm8 = vcmp.gt.f32.partialorder %v202_v47, 0.0  ;;  %v14729_v47 = vld [vmem:[#allocation47_spill] sm:$0xff] }
 0x275   :  { %14715 = vst [vmem:[#allocation31_spill] sm:$0xff] %v11039_v7  ;;  %384 = vst.msk [vmem:[%s14232_s8] sm:$0xff] %vm383_vm4, %v351_v55  ;;  %8564 = vrcp.f32 %v200_v32  ;;  %3062 = vmatprep.mubr.bf16.mxu1 %v14530_v59  ;;  %v11048_v1 = vpop.f32.mrb[129].mxu0  ;;  %v3327_v35 = vmul.f32 %v10991_v17, %v14718_v3  ;;  %vm259_vm9 = vcmp.gt.f32.partialorder %v200_v32, 0.0 }
 0x276   :  { %14717 = vst [vmem:[#allocation33_spill] sm:$0xff] %v11048_v1  ;;  %v7438_v11 = vpack.c.bf16 %v11048_v1, %v11039_v7  ;;  %v11054_v36 = vpop.f32.mrb[130].mxu0 }
 0x277   :  { %14719 = vst [vmem:[#allocation35_spill] sm:$0xff] %v11054_v36  ;;  %v8557_v29 = vpop.eup %8556  ;;  %3369 = vadd.xlane.f32.xlu1 %v3326_v60  ;;  %v206_v55 = vpop.xlane.xlu1 %205  ;;  %v14721_v60 = vld [vmem:[#allocation39_spill] sm:$0xff] }
 0x278   :  { %v11056_v27 = vpop.f32.mrb[131].mxu0  ;;  %v353_v63 = vsel %vm257_vm5, %v8557_v29, 0.0  ;;  %8566 = vrcp.f32 %v206_v55  ;;  %3371 = vadd.xlane.f32.xlu0 %v3327_v35  ;;  %v204_v53 = vpop.xlane.xlu0 %203  ;;  %2660 = vst [vmem:[#allocation8 + $0x158] sm:$0xff] %v7438_v11  ;;  %v3328_v3 = vmul.f32 %v10991_v17, %v14721_v60  ;;  %v14722_v29 = vld [vmem:[#allocation41_spill] sm:$0xff]  ;;  %vm262_vm10 = vcmp.gt.f32.partialorder %v206_v55, 0.0 }
 0x279   :  { %14720 = vst [vmem:[#allocation37_spill] sm:$0xff] %v11056_v27  ;;  %v7442_v48 = vpack.c.bf16 %v11056_v27, %v11054_v36  ;;  %386 = vst.msk [vmem:[%s14232_s8 + $0x10] sm:$0xff] %vm383_vm4, %v353_v63  ;;  %8568 = vrcp.f32 %v204_v53  ;;  %v3329_v5 = vmul.f32 %v10991_v17, %v14722_v29  ;;  %vm261_vm11 = vcmp.gt.f32.partialorder %v204_v53, 0.0 }
 0x27a   :  { %v8559_v1 = vpop.eup %8558 }
 0x27b   :  { %2664 = vst [vmem:[#allocation8 + $0x178] sm:$0xff] %v7442_v48  ;;  %v8561_v35 = vpop.eup %8560  ;;  %v352_v11 = vsel %vm256_vm6, %v8559_v1, 0.0  ;;  %3373 = vadd.xlane.f32.xlu1 %v3328_v3  ;;  %v11068_v7 = vpop.xlane.xlu1 %209  ;;  %v14724_v1 = vld [vmem:[#allocation43_spill] sm:$0xff] }
 0x27c   :  { %385 = vst.msk [vmem:[%s14232_s8 + $0x8] sm:$0xff] %vm383_vm4, %v352_v11  ;;  %v354_v13 = vsel %vm258_vm7, %v8561_v35, 0.0  ;;  %8570 = vrcp.f32 %v11068_v7  ;;  %3375 = vadd.xlane.f32.xlu0 %v3329_v5  ;;  %6992 = vmatmul.mubr.msk.bf16.gmra.mrb[172].mxu1 %vm1001_vm1, %v10819_v39  ;;  %v208_v63 = vpop.xlane.xlu0 %207  ;;  %v11077_v48 = vpop.f32.mrb[132].mxu0  ;;  %v3330_v60 = vmul.f32 %v10991_v17, %v14724_v1  ;;  %v14726_v5 = vld [vmem:[#allocation45_spill] sm:$0xff]  ;;  %vm264_vm12 = vcmp.gt.f32.partialorder %v11068_v7, 0.0  ;;  %v14737_v7 = vld [vmem:[#allocation55_spill] sm:$0xff] }
 0x27d   :  { %14723 = vst [vmem:[#allocation39_spill] sm:$0xff] %v11077_v48  ;;  %387 = vst.msk [vmem:[%s14232_s8 + $0x18] sm:$0xff] %vm383_vm4, %v354_v13  ;;  %8572 = vrcp.f32 %v208_v63  ;;  %3072 = vmatprep.mubr.bf16.mxu1 %v14530_v59  ;;  %v11086_v3 = vpop.f32.mrb[133].mxu0  ;;  %v3331_v35 = vmul.f32 %v10991_v17, %v14726_v5  ;;  %vm263_vm13 = vcmp.gt.f32.partialorder %v208_v63, 0.0 }
 0x27e   :  { %14725 = vst [vmem:[#allocation41_spill] sm:$0xff] %v11086_v3  ;;  %v8563_v29 = vpop.eup %8562  ;;  %v7446_v11 = vpack.c.bf16 %v11086_v3, %v11077_v48  ;;  %v11092_v27 = vpop.f32.mrb[134].mxu0 }
 0x27f   :  { %14727 = vst [vmem:[#allocation43_spill] sm:$0xff] %v11092_v27  ;;  %v8565_v36 = vpop.eup %8564  ;;  %v356_v32 = vsel %vm260_vm8, %v8563_v29, 0.0  ;;  %3377 = vadd.xlane.f32.xlu1 %v3330_v60  ;;  %v214_v13 = vpop.xlane.xlu1 %213  ;;  %v3332_v60 = vmul.f32 %v10991_v17, %v14729_v47  ;;  %v14732_v47 = vld [vmem:[#allocation51_spill] sm:$0xff] }
 0x280   :  { %v11095_v44 = vpop.f32.mrb[135].mxu0  ;;  %389 = vst.msk [vmem:[%s14232_s8 + $0x28] sm:$0xff] %vm383_vm4, %v356_v32  ;;  %v355_v1 = vsel %vm259_vm9, %v8565_v36, 0.0  ;;  %8574 = vrcp.f32 %v214_v13  ;;  %3379 = vadd.xlane.f32.xlu0 %v3331_v35  ;;  %v212_v5 = vpop.xlane.xlu0 %211  ;;  %2668 = vst [vmem:[#allocation8 + $0x198] sm:$0xff] %v7446_v11  ;;  %v14730_v36 = vld [vmem:[#allocation49_spill] sm:$0xff]  ;;  %vm266_vm14 = vcmp.gt.f32.partialorder %v214_v13, 0.0 }
 0x281   :  { %14728 = vst [vmem:[#allocation45_spill] sm:$0xff] %v11095_v44  ;;  %v7450_v3 = vpack.c.bf16 %v11095_v44, %v11092_v27  ;;  %388 = vst.msk [vmem:[%s14232_s8 + $0x20] sm:$0xff] %vm383_vm4, %v355_v1  ;;  %8576 = vrcp.f32 %v212_v5  ;;  %v3333_v55 = vmul.f32 %v10991_v17, %v14730_v36  ;;  %vm265_vm15 = vcmp.gt.f32.partialorder %v212_v5, 0.0 }
 0x282   :  { %v8567_v29 = vpop.eup %8566 }
 0x283   :  { %2672 = vst [vmem:[#allocation8 + $0x1b8] sm:$0xff] %v7450_v3  ;;  %v8569_v35 = vpop.eup %8568  ;;  %v358_v11 = vsel %vm262_vm10, %v8567_v29, 0.0  ;;  %3381 = vadd.xlane.f32.xlu1 %v3332_v60  ;;  %v11111_v32 = vpop.xlane.xlu1 %217  ;;  %v3334_v60 = vmul.f32 %v10991_v17, %v14732_v47 }
 0x284   :  { %391 = vst.msk [vmem:[%s14232_s8 + $0x38] sm:$0xff] %vm383_vm4, %v358_v11  ;;  %v357_v53 = vsel %vm261_vm11, %v8569_v35, 0.0  ;;  %8578 = vrcp.f32 %v11111_v32  ;;  %3383 = vadd.xlane.f32.xlu0 %v3333_v55  ;;  %6993 = vmatmul.mubr.msk.bf16.gmra.mrb[176].mxu1 %vm1001_vm1, %v10863_v46  ;;  %v216_v3 = vpop.xlane.xlu0 %215  ;;  %v11121_v1 = vpop.f32.mrb[136].mxu0  ;;  %v14734_v55 = vld [vmem:[#allocation53_spill] sm:$0xff]  ;;  %vm268_vm0 = vcmp.gt.f32.partialorder %v11111_v32, 0.0 }
 0x285   :  { %14731 = vst [vmem:[#allocation47_spill] sm:$0xff] %v11121_v1  ;;  %390 = vst.msk [vmem:[%s14232_s8 + $0x30] sm:$0xff] %vm383_vm4, %v357_v53  ;;  %8580 = vrcp.f32 %v216_v3  ;;  %3228 = vmatprep.mubr.bf16.mxu1 %v14530_v59  ;;  %v11130_v29 = vpop.f32.mrb[137].mxu0  ;;  %v3335_v35 = vmul.f32 %v10991_v17, %v14734_v55  ;;  %vm267_vm2 = vcmp.gt.f32.partialorder %v216_v3, 0.0  ;;  %v14745_v32 = vld [vmem:[#allocation65_spill] sm:$0xff] }
 0x286   :  { %14733 = vst [vmem:[#allocation49_spill] sm:$0xff] %v11130_v29  ;;  %v8571_v36 = vpop.eup %8570  ;;  %v7454_v11 = vpack.c.bf16 %v11130_v29, %v11121_v1  ;;  %v11136_v44 = vpop.f32.mrb[138].mxu0  ;;  %v3931_v1 = vsub.s32 3, %v10964_v19 }
 0x287   :  { %14735 = vst [vmem:[#allocation51_spill] sm:$0xff] %v11136_v44  ;;  %v8573_v27 = vpop.eup %8572  ;;  %v360_v63 = vsel %vm264_vm12, %v8571_v36, 0.0  ;;  %3385 = vadd.xlane.f32.xlu1 %v3334_v60  ;;  %v222_v53 = vpop.xlane.xlu1 %221  ;;  %v3336_v60 = vmul.f32 %v10991_v17, %v14737_v7  ;;  %v14740_v7 = vld [vmem:[#allocation59_spill] sm:$0xff] }
 0x288   :  { %v11140_v47 = vpop.f32.mrb[139].mxu0  ;;  %393 = vst.msk [vmem:[%s14232_s8 + $0x48] sm:$0xff] %vm383_vm4, %v360_v63  ;;  %v359_v48 = vsel %vm263_vm13, %v8573_v27, 0.0  ;;  %8582 = vrcp.f32 %v222_v53  ;;  %3387 = vadd.xlane.f32.xlu0 %v3335_v35  ;;  %v220_v55 = vpop.xlane.xlu0 %219  ;;  %2676 = vst [vmem:[#allocation8 + $0x1d8] sm:$0xff] %v7454_v11  ;;  %v14738_v27 = vld [vmem:[#allocation57_spill] sm:$0xff]  ;;  %vm270_vm3 = vcmp.gt.f32.partialorder %v222_v53, 0.0 }
 0x289   :  { %14736 = vst [vmem:[#allocation53_spill] sm:$0xff] %v11140_v47  ;;  %v7458_v29 = vpack.c.bf16 %v11140_v47, %v11136_v44  ;;  %392 = vst.msk [vmem:[%s14232_s8 + $0x40] sm:$0xff] %vm383_vm4, %v359_v48  ;;  %8584 = vrcp.f32 %v220_v55  ;;  %v3337_v13 = vmul.f32 %v10991_v17, %v14738_v27  ;;  %vm269_vm5 = vcmp.gt.f32.partialorder %v220_v55, 0.0 }
 0x28a   :  { %v8575_v36 = vpop.eup %8574 }
 0x28b   :  { %2680 = vst [vmem:[#allocation8 + $0x1f8] sm:$0xff] %v7458_v29  ;;  %v8577_v35 = vpop.eup %8576  ;;  %v362_v11 = vsel %vm266_vm14, %v8575_v36, 0.0  ;;  %3389 = vadd.xlane.f32.xlu1 %v3336_v60  ;;  %v11156_v63 = vpop.xlane.xlu1 %225  ;;  %v3338_v60 = vmul.f32 %v10991_v17, %v14740_v7  ;;  %vm9389_vm14 = vmmov 0  }
 0x28c   :  { %395 = vst.msk [vmem:[%s14232_s8 + $0x58] sm:$0xff] %vm383_vm4, %v362_v11  ;;  %v361_v48 = vsel %vm265_vm15, %v8577_v35, 0.0  ;;  %8586 = vrcp.f32 %v11156_v63  ;;  %3391 = vadd.xlane.f32.xlu0 %v3337_v13  ;;  %7002 = vmatmul.mubr.msk.bf16.vlgmr.msra.gmra.mrb[180].mxu1 %vm1001_vm1, %v10583_v23  ;;  %v224_v5 = vpop.xlane.xlu0 %223  ;;  %v11166_v29 = vpop.f32.mrb[140].mxu0  ;;  %v14742_v13 = vld [vmem:[#allocation62_spill] sm:$0xff]  ;;  %vm272_vm6 = vcmp.gt.f32.partialorder %v11156_v63, 0.0  ;;  %v14753_v63 = vld [vmem:[#allocation80_spill] sm:$0xff] }
 0x28d   :  { %14739 = vst [vmem:[#allocation55_spill] sm:$0xff] %v11166_v29  ;;  %394 = vst.msk [vmem:[%s14232_s8 + $0x50] sm:$0xff] %vm383_vm4, %v361_v48  ;;  %8588 = vrcp.f32 %v224_v5  ;;  %3238 = vmatprep.mubr.bf16.mxu1 %v14530_v59  ;;  %v11175_v36 = vpop.f32.mrb[141].mxu0  ;;  %v3339_v23 = vmul.f32 %v10991_v17, %v14742_v13  ;;  %vm271_vm7 = vcmp.gt.f32.partialorder %v224_v5, 0.0 }
 0x28e   :  { %14741 = vst [vmem:[#allocation57_spill] sm:$0xff] %v11175_v36  ;;  %v8579_v27 = vpop.eup %8578  ;;  %v7462_v35 = vpack.c.bf16 %v11175_v36, %v11166_v29  ;;  %v11181_v11 = vpop.f32.mrb[142].mxu0 }
 0x28f   :  { %14743 = vst [vmem:[#allocation59_spill] sm:$0xff] %v11181_v11  ;;  %v8581_v7 = vpop.eup %8580  ;;  %v364_v47 = vsel %vm268_vm0, %v8579_v27, 0.0  ;;  %3393 = vadd.xlane.f32.xlu1 %v3338_v60  ;;  %v230_v3 = vpop.xlane.xlu1 %229  ;;  %v3340_v60 = vmul.f32 %v10991_v17, %v14745_v32  ;;  %v14746_v27 = vld [vmem:[#allocation68_spill] sm:$0xff] }
 0x290   :  { %v11185_v48 = vpop.f32.mrb[143].mxu0  ;;  %397 = vst.msk [vmem:[%s14232_s8 + $0x68] sm:$0xff] %vm383_vm4, %v364_v47  ;;  %v363_v44 = vsel %vm267_vm2, %v8581_v7, 0.0  ;;  %8590 = vrcp.f32 %v230_v3  ;;  %3395 = vadd.xlane.f32.xlu0 %v3339_v23  ;;  %v228_v13 = vpop.xlane.xlu0 %227  ;;  %2684 = vst [vmem:[#allocation8 + $0x218] sm:$0xff] %v7462_v35  ;;  %v3341_v53 = vmul.f32 %v10991_v17, %v14746_v27  ;;  %v14750_v27 = vld [vmem:[#allocation76_spill] sm:$0xff]  ;;  %vm274_vm8 = vcmp.gt.f32.partialorder %v230_v3, 0.0 }
 0x291   :  { %14744 = vst [vmem:[#allocation62_spill] sm:$0xff] %v11185_v48  ;;  %v7466_v36 = vpack.c.bf16 %v11185_v48, %v11181_v11  ;;  %396 = vst.msk [vmem:[%s14232_s8 + $0x60] sm:$0xff] %vm383_vm4, %v363_v44  ;;  %8592 = vrcp.f32 %v228_v13  ;;  %v3516_v48 = vsub.s32 1, %v10964_v19  ;;  %vm273_vm9 = vcmp.gt.f32.partialorder %v228_v13, 0.0 }
 0x292   :  { %v8583_v47 = vpop.eup %8582 }
 0x293   :  { %2688 = vst [vmem:[#allocation8 + $0x238] sm:$0xff] %v7466_v36  ;;  %v8585_v23 = vpop.eup %8584  ;;  %v366_v35 = vsel %vm270_vm3, %v8583_v47, 0.0  ;;  %3397 = vadd.xlane.f32.xlu1 %v3340_v60  ;;  %v11201_v7 = vpop.xlane.xlu1 %233  ;;  %v14748_v36 = vld [vmem:[#allocation72_spill] sm:$0xff] }
 0x294   :  { %399 = vst.msk [vmem:[%s14232_s8 + $0x78] sm:$0xff] %vm383_vm4, %v366_v35  ;;  %v365_v32 = vsel %vm269_vm5, %v8585_v23, 0.0  ;;  %8594 = vrcp.f32 %v11201_v7  ;;  %3399 = vadd.xlane.f32.xlu0 %v3341_v53  ;;  %7003 = vmatmul.mubr.msk.bf16.gmra.mrb[184].mxu1 %vm1001_vm1, %v10629_v61  ;;  %v11211_v44 = vpop.xlane.xlu0 %231  ;;  %v11213_v55 = vpop.f32.mrb[144].mxu0  ;;  %v3342_v60 = vmul.f32 %v10991_v17, %v14748_v36  ;;  %v3343_v53 = vmul.f32 %v10991_v17, %v14750_v27 }
 0x295   :  { %14747 = vst [vmem:[#allocation65_spill] sm:$0xff] %v11213_v55  ;;  %398 = vst.msk [vmem:[%s14232_s8 + $0x70] sm:$0xff] %vm383_vm4, %v365_v32  ;;  %8596 = vrcp.f32 %v11211_v44  ;;  %3248 = vmatprep.mubr.bf16.mxu1 %v14530_v59  ;;  %v11223_v47 = vpop.f32.mrb[145].mxu0  ;;  %vm276_vm10 = vcmp.gt.f32.partialorder %v11201_v7, 0.0  ;;  %vm275_vm11 = vcmp.gt.f32.partialorder %v11211_v44, 0.0 }
 0x296   :  { %14749 = vst [vmem:[#allocation68_spill] sm:$0xff] %v11223_v47  ;;  %v8587_v61 = vpop.eup %8586  ;;  %v7470_v23 = vpack.c.bf16 %v11223_v47, %v11213_v55  ;;  %v11229_v35 = vpop.f32.mrb[146].mxu0 }
 0x297   :  { %14751 = vst [vmem:[#allocation72_spill] sm:$0xff] %v11229_v35  ;;  %v8589_v36 = vpop.eup %8588  ;;  %v368_v5 = vsel %vm272_vm6, %v8587_v61, 0.0  ;;  %3401 = vadd.xlane.f32.xlu1 %v3342_v60  ;;  %v238_v32 = vpop.xlane.xlu1 %237  ;;  %v3344_v60 = vmul.f32 %v10991_v17, %v14753_v63 }
 0x298   :  { %v11234_v11 = vpop.f32.mrb[147].mxu0  ;;  %401 = vst.msk [vmem:[%s14232_s8 + $0x88] sm:$0xff] %vm383_vm4, %v368_v5  ;;  %v367_v27 = vsel %vm271_vm7, %v8589_v36, 0.0  ;;  %8598 = vrcp.f32 %v238_v32  ;;  %3403 = vadd.xlane.f32.xlu0 %v3343_v53  ;;  %v236_v47 = vpop.xlane.xlu0 %235  ;;  %2692 = vst [vmem:[#allocation8 + $0x258] sm:$0xff] %v7470_v23  ;;  %v14754_v36 = vld [vmem:[#allocation84_spill] sm:$0xff]  ;;  %vm278_vm12 = vcmp.gt.f32.partialorder %v238_v32, 0.0 }
 0x299   :  { %14752 = vst [vmem:[#allocation76_spill] sm:$0xff] %v11234_v11  ;;  %v7474_v55 = vpack.c.bf16 %v11234_v11, %v11229_v35  ;;  %400 = vst.msk [vmem:[%s14232_s8 + $0x80] sm:$0xff] %vm383_vm4, %v367_v27  ;;  %8600 = vrcp.f32 %v236_v47  ;;  %v3345_v3 = vmul.f32 %v10991_v17, %v14754_v36  ;;  %v11253_v11 = vrot.slane %v10986_v26, %v3516_v48  ;;  %v14756_v48 = vld [vmem:[#allocation88_spill] sm:$0xff]  ;;  %v14762_v32 = vld [vmem:[#allocation26_spill] sm:$0xff] }
 0x29a   :  { %v8591_v61 = vpop.eup %8590  ;;  %v3346_v63 = vmul.f32 %v10991_v17, %v14756_v48  ;;  %vm277_vm13 = vcmp.gt.f32.partialorder %v236_v47, 0.0 }
 0x29b   :  { %2696 = vst [vmem:[#allocation8 + $0x278] sm:$0xff] %v7474_v55  ;;  %v8593_v53 = vpop.eup %8592  ;;  %v370_v23 = vsel %vm274_vm8, %v8591_v61, 0.0  ;;  %3405 = vadd.xlane.f32.xlu1 %v3344_v60  ;;  %v11250_v5 = vpop.xlane.xlu1 %241  ;;  %v14758_v61 = vld [vmem:[#allocation69_spill] sm:$0xff] }
 0x29c   :  { %403 = vst.msk [vmem:[%s14232_s8 + $0x98] sm:$0xff] %vm383_vm4, %v370_v23  ;;  %v369_v13 = vsel %vm273_vm9, %v8593_v53, 0.0  ;;  %8602 = vrcp.f32 %v11250_v5  ;;  %3407 = vadd.xlane.f32.xlu0 %v3345_v3  ;;  %7004 = vmatmul.mubr.msk.bf16.gmra.mrb[188].mxu1 %vm1001_vm1, %v10665_v10  ;;  %v11263_v55 = vpop.xlane.xlu0 %239  ;;  %v11265_v27 = vpop.f32.mrb[148].mxu0  ;;  %v3518_v36 = vmul.f32 %v11253_v11, %v14758_v61  ;;  %vm280_vm15 = vcmp.gt.f32.partialorder %v11250_v5, 0.0 }
 0x29d   :  { %14755 = vst [vmem:[#allocation80_spill] sm:$0xff] %v11265_v27  ;;  %402 = vst.msk [vmem:[%s14232_s8 + $0x90] sm:$0xff] %vm383_vm4, %v369_v13  ;;  %8604 = vrcp.f32 %v11263_v55  ;;  %3258 = vmatprep.mubr.bf16.mxu1 %v14530_v59  ;;  %v11276_v60 = vpop.f32.mrb[149].mxu0  ;;  %vm279_vm0 = vcmp.gt.f32.partialorder %v11263_v55, 0.0 }
 0x29e   :  { %14757 = vst [vmem:[#allocation84_spill] sm:$0xff] %v11276_v60  ;;  %v8595_v10 = vpop.eup %8594  ;;  %v7478_v3 = vpack.c.bf16 %v11276_v60, %v11265_v27  ;;  %v11282_v53 = vpop.f32.mrb[150].mxu0  ;;  %v9146_v27 = vld [vmem:[%s14229_s5] sm:$0xff] }
 0x29f   :  { %14759 = vst [vmem:[#allocation88_spill] sm:$0xff] %v11282_v53  ;;  %v8597_v23 = vpop.eup %8596  ;;  %v372_v13 = vsel %vm276_vm10, %v8595_v10, 0.0  ;;  %3409 = vadd.xlane.f32.xlu1 %v3346_v63  ;;  %v11286_v44 = vpop.xlane.xlu1 %245  ;;  %v14761_v63 = vld [vmem:[#allocation73_spill] sm:$0xff] }
 0x2a0   :  { %v11288_v48 = vpop.f32.mrb[151].mxu0  ;;  %405 = vst.msk [vmem:[%s14232_s8 + $0xa8] sm:$0xff] %vm383_vm4, %v372_v13  ;;  %v371_v61 = vsel %vm275_vm11, %v8597_v23, 0.0  ;;  %8606 = vrcp.f32 %v11286_v44  ;;  %3550 = vadd.xlane.f32.xlu0 %v3518_v36  ;;  %v244_v60 = vpop.xlane.xlu0 %243  ;;  %2700 = vst [vmem:[#allocation8 + $0x298] sm:$0xff] %v7478_v3  ;;  %v3519_v10 = vmul.f32 %v11253_v11, %v14761_v63  ;;  %v3524_v13 = vmul.f32 %v11253_v11, %v14762_v32  ;;  %v14764_v63 = vld [vmem:[#allocation28_spill] sm:$0xff] }
 0x2a1   :  { %14760 = vst [vmem:[#allocation69_spill] sm:$0xff] %v11288_v48  ;;  %v7482_v7 = vpack.c.bf16 %v11288_v48, %v11282_v53  ;;  %404 = vst.msk [vmem:[%s14232_s8 + $0xa0] sm:$0xff] %vm383_vm4, %v371_v61  ;;  %8608 = vrcp.f32 %v244_v60  ;;  %v14451_v48 = vmov 0.0   ;;  %vm282_vm2 = vcmp.gt.f32.partialorder %v11286_v44, 0.0 }
 0x2a2   :  { %v8599_v23 = vpop.eup %8598  ;;  %7979 = vmatprep.mubr.msk.f32.mxu0 %vm9389_vm14, %v14451_v48  ;;  %vm281_vm3 = vcmp.gt.f32.partialorder %v244_v60, 0.0 }
 0x2a3   :  { %2704 = vst [vmem:[#allocation8 + $0x2b8] sm:$0xff] %v7482_v7  ;;  %v8601_v36 = vpop.eup %8600  ;;  %v374_v3 = vsel %vm278_vm12, %v8599_v23, 0.0  ;;  %3552 = vadd.xlane.f32.xlu1 %v3519_v10  ;;  %v11305_v35 = vpop.xlane.xlu1 %249  ;;  %v3525_v10 = vmul.f32 %v11253_v11, %v14764_v63 }
 0x2a4   :  { %407 = vst.msk [vmem:[%s14232_s8 + $0xb8] sm:$0xff] %vm383_vm4, %v374_v3  ;;  %v373_v47 = vsel %vm277_vm13, %v8601_v36, 0.0  ;;  %8610 = vrcp.f32 %v11305_v35  ;;  %3562 = vadd.xlane.f32.xlu0 %v3524_v13  ;;  %7005 = vmatmul.mubr.msk.bf16.gmra.mrb[192].mxu1 %vm1001_vm1, %v10703_v42  ;;  %v248_v61 = vpop.xlane.xlu0 %247  ;;  %v11317_v7 = vpop.f32.mrb[152].mxu0  ;;  %v14766_v42 = vld [vmem:[#allocation30_spill] sm:$0xff]  ;;  %vm284_vm5 = vcmp.gt.f32.partialorder %v11305_v35, 0.0 }
 0x2a5   :  { %14763 = vst [vmem:[#allocation73_spill] sm:$0xff] %v11317_v7  ;;  %406 = vst.msk [vmem:[%s14232_s8 + $0xb0] sm:$0xff] %vm383_vm4, %v373_v47  ;;  %8612 = vrcp.f32 %v248_v61  ;;  %3268 = vmatprep.mubr.bf16.mxu1 %v14530_v59  ;;  %v11327_v23 = vpop.f32.mrb[153].mxu0  ;;  %v3526_v13 = vmul.f32 %v11253_v11, %v14766_v42  ;;  %vm283_vm6 = vcmp.gt.f32.partialorder %v248_v61, 0.0 }
 0x2a6   :  { %14765 = vst [vmem:[#allocation26_spill] sm:$0xff] %v11327_v23  ;;  %v8603_v32 = vpop.eup %8602  ;;  %v7486_v36 = vpack.c.bf16 %v11327_v23, %v11317_v7  ;;  %v11333_v3 = vpop.f32.mrb[154].mxu0 }
 0x2a7   :  { %14767 = vst [vmem:[#allocation28_spill] sm:$0xff] %v11333_v3  ;;  %v8605_v47 = vpop.eup %8604  ;;  %v376_v55 = vsel %vm280_vm15, %v8603_v32, 0.0  ;;  %3564 = vadd.xlane.f32.xlu1 %v3525_v10  ;;  %v254_v48 = vpop.xlane.xlu1 %253  ;;  %v14769_v10 = vld [vmem:[#allocation32_spill] sm:$0xff] }
 0x2a8   :  { %v11337_v63 = vpop.f32.mrb[155].mxu0  ;;  %409 = vst.msk [vmem:[%s14232_s8 + $0xc8] sm:$0xff] %vm383_vm4, %v376_v55  ;;  %v375_v53 = vsel %vm279_vm0, %v8605_v47, 0.0  ;;  %8614 = vrcp.f32 %v254_v48  ;;  %3566 = vadd.xlane.f32.xlu0 %v3526_v13  ;;  %v252_v42 = vpop.xlane.xlu0 %251  ;;  %2708 = vst [vmem:[#allocation8 + $0x2d8] sm:$0xff] %v7486_v36  ;;  %v3527_v32 = vmul.f32 %v11253_v11, %v14769_v10  ;;  %v14770_v55 = vld [vmem:[#allocation34_spill] sm:$0xff]  ;;  %v14772_v10 = vld [vmem:[#allocation36_spill] sm:$0xff] }
 0x2a9   :  { %14768 = vst [vmem:[#allocation30_spill] sm:$0xff] %v11337_v63  ;;  %v7490_v5 = vpack.c.bf16 %v11337_v63, %v11333_v3  ;;  %408 = vst.msk [vmem:[%s14232_s8 + $0xc0] sm:$0xff] %vm383_vm4, %v375_v53  ;;  %8616 = vrcp.f32 %v252_v42  ;;  %v3528_v44 = vmul.f32 %v11253_v11, %v14770_v55  ;;  %vm286_vm7 = vcmp.gt.f32.partialorder %v254_v48, 0.0  ;;  %v14777_v48 = vld [vmem:[#allocation40_spill] sm:$0xff]  ;;  %v14816_v3 = vld [vmem:[#allocation77_spill] sm:$0xff] }
 0x2aa   :  { %v8607_v47 = vpop.eup %8606  ;;  %vm285_vm8 = vcmp.gt.f32.partialorder %v252_v42, 0.0 }
 0x2ab   :  { %2712 = vst [vmem:[#allocation8 + $0x2f8] sm:$0xff] %v7490_v5  ;;  %v8609_v13 = vpop.eup %8608  ;;  %v378_v36 = vsel %vm282_vm2, %v8607_v47, 0.0  ;;  %3568 = vadd.xlane.f32.xlu1 %v3527_v32  ;;  %v724_v23 = vpop.permute.xlu1 %723  ;;  %v14774_v47 = vld [vmem:[#allocation38_spill] sm:$0xff] }
 0x2ac   :  { %411 = vst.msk [vmem:[%s14232_s8 + $0xd8] sm:$0xff] %vm383_vm4, %v378_v36  ;;  %v377_v53 = vsel %vm281_vm3, %v8609_v13, 0.0  ;;  %770 = vst.msk [vmem:[%s14233_s9 + $0x8] sm:$0xff] %vm383_vm4, %v724_v23  ;;  %3570 = vadd.xlane.f32.xlu0 %v3528_v44  ;;  %7006 = vmatmul.mubr.msk.bf16.gmra.mrb[196].mxu1 %vm1001_vm1, %v10737_v34  ;;  %v722_v60 = vpop.permute.xlu0 %721  ;;  %v11365_v5 = vpop.f32.mrb[156].mxu0  ;;  %v3529_v23 = vmul.f32 %v11253_v11, %v14772_v10  ;;  %v3530_v55 = vmul.f32 %v11253_v11, %v14774_v47 }
 0x2ad   :  { %14771 = vst [vmem:[#allocation32_spill] sm:$0xff] %v11365_v5  ;;  %410 = vst.msk [vmem:[%s14232_s8 + $0xd0] sm:$0xff] %vm383_vm4, %v377_v53  ;;  %3278 = vmatprep.mubr.bf16.mxu1 %v14530_v59  ;;  %v11378_v34 = vpop.f32.mrb[157].mxu0 }
 0x2ae   :  { %769 = vst.msk [vmem:[%s14233_s9] sm:$0xff] %vm383_vm4, %v722_v60  ;;  %14773 = vst [vmem:[#allocation34_spill] sm:$0xff] %v11378_v34  ;;  %v8611_v32 = vpop.eup %8610  ;;  %v7494_v44 = vpack.c.bf16 %v11378_v34, %v11365_v5  ;;  %v11384_v61 = vpop.f32.mrb[158].mxu0  ;;  %v14805_v34 = vld [vmem:[#allocation78_spill] sm:$0xff] }
 0x2af   :  { %14775 = vst [vmem:[#allocation36_spill] sm:$0xff] %v11384_v61  ;;  %v8613_v13 = vpop.eup %8612  ;;  %v380_v36 = vsel %vm284_vm5, %v8611_v32, 0.0  ;;  %3572 = vadd.xlane.f32.xlu1 %v3529_v23  ;;  %v726_v53 = vpop.permute.xlu1 %725  ;;  %v3531_v23 = vmul.f32 %v11253_v11, %v14777_v48 }
 0x2b0   :  { %v11388_v60 = vpop.f32.mrb[159].mxu0  ;;  %413 = vst.msk [vmem:[%s14232_s8 + $0xe8] sm:$0xff] %vm383_vm4, %v380_v36  ;;  %v379_v10 = vsel %vm283_vm6, %v8613_v13, 0.0  ;;  %771 = vst.msk [vmem:[%s14233_s9 + $0x10] sm:$0xff] %vm383_vm4, %v726_v53  ;;  %3574 = vadd.xlane.f32.xlu0 %v3530_v55  ;;  %v730_v47 = vpop.permute.xlu0 %729  ;;  %v14778_v55 = vld [vmem:[#allocation42_spill] sm:$0xff] }
 0x2b1   :  { %14776 = vst [vmem:[#allocation38_spill] sm:$0xff] %v11388_v60  ;;  %2716 = vst [vmem:[#allocation8 + $0x318] sm:$0xff] %v7494_v44  ;;  %v7498_v35 = vpack.c.bf16 %v11388_v60, %v11384_v61  ;;  %v3532_v44 = vmul.f32 %v11253_v11, %v14778_v55 }
 0x2b2   :  { %412 = vst.msk [vmem:[%s14232_s8 + $0xe0] sm:$0xff] %vm383_vm4, %v379_v10  ;;  %773 = vst.msk [vmem:[%s14233_s9 + $0x20] sm:$0xff] %vm383_vm4, %v730_v47  ;;  %v8615_v32 = vpop.eup %8614 }
 0x2b3   :  { %2720 = vst [vmem:[#allocation8 + $0x338] sm:$0xff] %v7498_v35  ;;  %v8617_v13 = vpop.eup %8616  ;;  %v382_v36 = vsel %vm286_vm7, %v8615_v32, 0.0  ;;  %3576 = vadd.xlane.f32.xlu1 %v3531_v23  ;;  %v728_v53 = vpop.permute.xlu1 %727  ;;  %v14780_v35 = vld [vmem:[#allocation44_spill] sm:$0xff] }
 0x2b4   :  { %415 = vst.msk [vmem:[%s14232_s8 + $0xf8] sm:$0xff] %vm383_vm4, %v382_v36  ;;  %v381_v42 = vsel %vm285_vm8, %v8617_v13, 0.0  ;;  %772 = vst.msk [vmem:[%s14233_s9 + $0x18] sm:$0xff] %vm383_vm4, %v728_v53  ;;  %3578 = vadd.xlane.f32.xlu0 %v3532_v44  ;;  %7007 = vmatmul.mubr.msk.bf16.gmra.mrb[200].mxu1 %vm1001_vm1, %v10777_v43  ;;  %v734_v10 = vpop.permute.xlu0 %733  ;;  %v11422_v47 = vpop.f32.mrb[160].mxu0  ;;  %v3533_v48 = vmul.f32 %v11253_v11, %v14780_v35  ;;  %v14782_v43 = vld [vmem:[#allocation46_spill] sm:$0xff] }
 0x2b5   :  { %14779 = vst [vmem:[#allocation40_spill] sm:$0xff] %v11422_v47  ;;  %414 = vst.msk [vmem:[%s14232_s8 + $0xf0] sm:$0xff] %vm383_vm4, %v381_v42  ;;  %3288 = vmatprep.mubr.bf16.mxu1 %v14530_v59  ;;  %v11435_v23 = vpop.f32.mrb[161].mxu0  ;;  %v3534_v32 = vmul.f32 %v11253_v11, %v14782_v43 }
 0x2b6   :  { %775 = vst.msk [vmem:[%s14233_s9 + $0x30] sm:$0xff] %vm383_vm4, %v734_v10  ;;  %14781 = vst [vmem:[#allocation42_spill] sm:$0xff] %v11435_v23  ;;  %v7502_v55 = vpack.c.bf16 %v11435_v23, %v11422_v47  ;;  %v11441_v44 = vpop.f32.mrb[162].mxu0  ;;  %v14785_v10 = vld [vmem:[#allocation48_spill] sm:$0xff] }
 0x2b7   :  { %14783 = vst [vmem:[#allocation44_spill] sm:$0xff] %v11441_v44  ;;  %3580 = vadd.xlane.f32.xlu1 %v3533_v48  ;;  %v732_v13 = vpop.permute.xlu1 %731  ;;  %v11443_v36 = vpop.f32.mrb[163].mxu0  ;;  %v3535_v35 = vmul.f32 %v11253_v11, %v14785_v10  ;;  %v14786_v48 = vld [vmem:[#allocation50_spill] sm:$0xff] }
 0x2b8   :  { %14784 = vst [vmem:[#allocation46_spill] sm:$0xff] %v11443_v36  ;;  %774 = vst.msk [vmem:[%s14233_s9 + $0x28] sm:$0xff] %vm383_vm4, %v732_v13  ;;  %3582 = vadd.xlane.f32.xlu0 %v3534_v32  ;;  %v738_v53 = vpop.permute.xlu0 %737  ;;  %v7506_v42 = vpack.c.bf16 %v11443_v36, %v11441_v44  ;;  %v3536_v43 = vmul.f32 %v11253_v11, %v14786_v48 }
 0x2b9   :  { %2724 = vst [vmem:[#allocation8 + $0x358] sm:$0xff] %v7502_v55  ;;  %777 = vst.msk [vmem:[%s14233_s9 + $0x40] sm:$0xff] %vm383_vm4, %v738_v53  ;;  %v14788_v53 = vld [vmem:[#allocation52_spill] sm:$0xff] }
 0x2ba   :  { %2728 = vst [vmem:[#allocation8 + $0x378] sm:$0xff] %v7506_v42  ;;  %v3537_v42 = vmul.f32 %v11253_v11, %v14788_v53  ;;  %v14793_v53 = vld [vmem:[#allocation56_spill] sm:$0xff] }
 0x2bb   :  { %3584 = vadd.xlane.f32.xlu1 %v3535_v35  ;;  %v736_v13 = vpop.permute.xlu1 %735  ;;  %v14790_v35 = vld [vmem:[#allocation54_spill] sm:$0xff] }
 0x2bc   :  { %776 = vst.msk [vmem:[%s14233_s9 + $0x38] sm:$0xff] %vm383_vm4, %v736_v13  ;;  %3586 = vadd.xlane.f32.xlu0 %v3536_v43  ;;  %7008 = vmatmul.mubr.msk.bf16.gmra.mrb[204].mxu1 %vm1001_vm1, %v10819_v39  ;;  %v742_v32 = vpop.permute.xlu0 %741  ;;  %v11465_v55 = vpop.f32.mrb[164].mxu0  ;;  %v3538_v48 = vmul.f32 %v11253_v11, %v14790_v35  ;;  %v3539_v35 = vmul.f32 %v11253_v11, %v14793_v53  ;;  %v14796_v53 = vld [vmem:[#allocation60_spill] sm:$0xff] }
 0x2bd   :  { %14787 = vst [vmem:[#allocation48_spill] sm:$0xff] %v11465_v55  ;;  %779 = vst.msk [vmem:[%s14233_s9 + $0x50] sm:$0xff] %vm383_vm4, %v742_v32  ;;  %3298 = vmatprep.mubr.bf16.mxu1 %v14530_v59  ;;  %v11474_v10 = vpop.f32.mrb[165].mxu0 }
 0x2be   :  { %14789 = vst [vmem:[#allocation50_spill] sm:$0xff] %v11474_v10  ;;  %v7510_v39 = vpack.c.bf16 %v11474_v10, %v11465_v55  ;;  %v11480_v43 = vpop.f32.mrb[166].mxu0  ;;  %v14818_v55 = vld [vmem:[#allocation83_spill] sm:$0xff] }
 0x2bf   :  { %14791 = vst [vmem:[#allocation52_spill] sm:$0xff] %v11480_v43  ;;  %3588 = vadd.xlane.f32.xlu1 %v3537_v42  ;;  %v740_v13 = vpop.permute.xlu1 %739  ;;  %v11482_v36 = vpop.f32.mrb[167].mxu0  ;;  %v14794_v42 = vld [vmem:[#allocation58_spill] sm:$0xff] }
 0x2c0   :  { %14792 = vst [vmem:[#allocation54_spill] sm:$0xff] %v11482_v36  ;;  %778 = vst.msk [vmem:[%s14233_s9 + $0x48] sm:$0xff] %vm383_vm4, %v740_v13  ;;  %3590 = vadd.xlane.f32.xlu0 %v3538_v48  ;;  %v746_v59 = vpop.permute.xlu0 %745  ;;  %v7514_v32 = vpack.c.bf16 %v11482_v36, %v11480_v43  ;;  %v3540_v60 = vmul.f32 %v11253_v11, %v14794_v42 }
 0x2c1   :  { %2732 = vst [vmem:[#allocation8 + $0x398] sm:$0xff] %v7510_v39  ;;  %781 = vst.msk [vmem:[%s14233_s9 + $0x60] sm:$0xff] %vm383_vm4, %v746_v59  ;;  %v3541_v59 = vmul.f32 %v11253_v11, %v14796_v53 }
 0x2c2   :  { %2736 = vst [vmem:[#allocation8 + $0x3b8] sm:$0xff] %v7514_v32 }
 0x2c3   :  { %3592 = vadd.xlane.f32.xlu1 %v3539_v35  ;;  %v744_v13 = vpop.permute.xlu1 %743  ;;  %v14798_v35 = vmov 0.0  }
 0x2c4   :  { %780 = vst.msk [vmem:[%s14233_s9 + $0x58] sm:$0xff] %vm383_vm4, %v744_v13  ;;  %3594 = vadd.xlane.f32.xlu0 %v3540_v60  ;;  %7009 = vmatmul.mubr.msk.bf16.gmra.mrb[208].mxu1 %vm1001_vm1, %v10863_v46  ;;  %v750_v48 = vpop.permute.xlu0 %749  ;;  %v11504_v39 = vpop.f32.mrb[168].mxu0  ;;  %v14799_v60 = vld [vmem:[#allocation64_spill] sm:$0xff] }
 0x2c5   :  { %14795 = vst [vmem:[#allocation56_spill] sm:$0xff] %v11504_v39  ;;  %783 = vst.msk [vmem:[%s14233_s9 + $0x70] sm:$0xff] %vm383_vm4, %v750_v48  ;;  %v11512_v32 = vpop.f32.mrb[169].mxu0  ;;  %8014 = vmatprep.mubr.msk.f32.mxu1 %vm9389_vm14, %v14798_v35  ;;  %v3542_v42 = vmul.f32 %v11253_v11, %v14799_v60  ;;  %v14802_v60 = vld [vmem:[#allocation66_spill] sm:$0xff] }
 0x2c6   :  { %14797 = vst [vmem:[#allocation58_spill] sm:$0xff] %v11512_v32  ;;  %v7518_v46 = vpack.c.bf16 %v11512_v32, %v11504_v39  ;;  %v11520_v13 = vpop.f32.mrb[170].mxu0  ;;  %v3543_v63 = vmul.f32 %v11253_v11, %v14802_v60  ;;  %v14803_v32 = vld [vmem:[#allocation70_spill] sm:$0xff] }
 0x2c7   :  { %14800 = vst [vmem:[#allocation60_spill] sm:$0xff] %v11520_v13  ;;  %3596 = vadd.xlane.f32.xlu1 %v3541_v59  ;;  %v748_v53 = vpop.permute.xlu1 %747  ;;  %v11522_v36 = vpop.f32.mrb[171].mxu0  ;;  %v3544_v10 = vmul.f32 %v11253_v11, %v14803_v32  ;;  %v14804_v59 = vld [vmem:[#allocation74_spill] sm:$0xff] }
 0x2c8   :  { %14801 = vst [vmem:[#allocation64_spill] sm:$0xff] %v11522_v36  ;;  %782 = vst.msk [vmem:[%s14233_s9 + $0x68] sm:$0xff] %vm383_vm4, %v748_v53  ;;  %3598 = vadd.xlane.f32.xlu0 %v3542_v42  ;;  %v7522_v48 = vpack.c.bf16 %v11522_v36, %v11520_v13  ;;  %v3545_v23 = vmul.f32 %v11253_v11, %v14804_v59  ;;  %v3546_v53 = vmul.f32 %v11253_v11, %v14805_v34  ;;  %v14807_v60 = vld [vmem:[#allocation86_spill] sm:$0xff] }
 0x2c9   :  { %2740 = vst [vmem:[#allocation8 + $0x3d8] sm:$0xff] %v7518_v46  ;;  %v4138_v42 = vsub.s32 4, %v10964_v19  ;;  %v14806_v46 = vld [vmem:[#allocation82_spill] sm:$0xff]  ;;  %v3548_v13 = vmul.f32 %v11253_v11, %v14807_v60 }
 0x2ca   :  { %2744 = vst [vmem:[#allocation8 + $0x3f8] sm:$0xff] %v7522_v48  ;;  %v3547_v36 = vmul.f32 %v11253_v11, %v14806_v46  ;;  %v14809_v48 = vld [vmem:[#allocation92_spill] sm:$0xff] }
 0x2cb   :  { %3600 = vadd.xlane.f32.xlu1 %v3543_v63  ;;  %v11544_v32 = vrot.slane %v10986_v26, %v4138_v42  ;;  %v14808_v63 = vld [vmem:[#allocation90_spill] sm:$0xff]  ;;  %v14812_v26 = vld [vmem:[#allocation107_spill] sm:$0xff] }
 0x2cc   :  { %3602 = vadd.xlane.f32.xlu0 %v3544_v10  ;;  %v3549_v10 = vmul.f32 %v11253_v11, %v14808_v63  ;;  %v14813_v42 = vld [vmem:[#allocation115_spill] sm:$0xff] }
 0x2cd   :  { %v4140_v34 = vmul.f32 %v11544_v32, %v14809_v48  ;;  %v4144_v60 = vmul.f32 %v11544_v32, %v14813_v42  ;;  %v4146_v44 = vmul.f32 %v11544_v32, %v10517_v9  ;;  %v4156_v40 = vmul.f32 %v11544_v32, %v10687_v18 }
 0x2cf   :  { %3604 = vadd.xlane.f32.xlu1 %v3545_v23  ;;  %v14810_v23 = vld [vmem:[#allocation96_spill] sm:$0xff] }
 0x2d0   :  { %3606 = vadd.xlane.f32.xlu0 %v3546_v53  ;;  %v4141_v59 = vmul.f32 %v11544_v32, %v14810_v23  ;;  %v14811_v53 = vld [vmem:[#allocation100_spill] sm:$0xff] }
 0x2d1   :  { %v4142_v46 = vmul.f32 %v11544_v32, %v14811_v53 }
 0x2d3   :  { %3608 = vadd.xlane.f32.xlu1 %v3547_v36  ;;  %v4143_v36 = vmul.f32 %v11544_v32, %v14812_v26 }
 0x2d4   :  { %3610 = vadd.xlane.f32.xlu0 %v3548_v13 }
 0x2d7   :  { %3612 = vadd.xlane.f32.xlu1 %v3549_v10 }
 0x2d8   :  { %4172 = vadd.xlane.f32.xlu0 %v4140_v34 }
 0x2db   :  { %4174 = vadd.xlane.f32.xlu1 %v4141_v59  ;;  %v4145_v59 = vmul.f32 %v11544_v32, %v10496_v24  ;;  %v4147_v24 = vmul.f32 %v11544_v32, %v10527_v58  ;;  %v4150_v58 = vmul.f32 %v11544_v32, %v10577_v2  ;;  %v4152_v2 = vmul.f32 %v11544_v32, %v10607_v50 }
 0x2dc   :  { %4176 = vadd.xlane.f32.xlu0 %v4142_v46 }
 0x2dd   :  { %v2891_v13 = vpop.f32.mrb[116].mxu1 }
 0x2de   :  { %v11558_v63 = vpop.f32.mrb[172].mxu0  ;;  %v2893_v48 = vpop.f32.mrb[117].mxu1 }
 0x2df   :  { %v11560_v10 = vpop.f32.mrb[173].mxu0  ;;  %4178 = vadd.xlane.f32.xlu1 %v4143_v36  ;;  %v2895_v34 = vpop.f32.mrb[118].mxu1 }
 0x2e0   :  { %v8228_v23 = vpack.c.bf16 %v2895_v34, %v2891_v13  ;;  %v11562_v43 = vpop.f32.mrb[174].mxu0  ;;  %v2897_v53 = vpop.f32.mrb[119].mxu1  ;;  %4180 = vadd.xlane.f32.xlu0 %v4144_v60  ;;  %v14814_v13 = vmov 0.0|0.0   ;;  %v4148_v60 = vmul.f32 %v11544_v32, %v10545_v52 }
 0x2e1   :  { %v8252_v26 = vpack.c.bf16 %v2897_v53, %v2893_v48  ;;  %v11568_v42 = vpop.f32.mrb[175].mxu0 }
 0x2e2   :  { %8229 = vmatpush3.bf16.xpose.msra.mxu0 %v8228_v23 }
 0x2e3   :  { %4182 = vadd.xlane.f32.xlu1 %v4145_v59  ;;  %8253 = vmatpush3.bf16.xpose.msra.mxu1 %v8252_v26 }
 0x2e4   :  { %4184 = vadd.xlane.f32.xlu0 %v4146_v44  ;;  %8230 = vmatprep.subr.bf16.mxu0 %v14814_v13  ;;  %v4149_v44 = vmul.f32 %v11544_v32, %v10553_v28  ;;  %v4151_v28 = vmul.f32 %v11544_v32, %v10587_v14 }
 0x2e5   :  { %8254 = vmatprep.subr.bf16.mxu1 %v14814_v13 }
 0x2e7   :  { %4186 = vadd.xlane.f32.xlu1 %v4147_v24  ;;  %v2901_v48 = vpop.f32.mrb[120].mxu1  ;;  %v11580_v9 = vpop.f32.mrb[176].mxu0 }
 0x2e8   :  { %v2903_v34 = vpop.f32.mrb[121].mxu1  ;;  %v11582_v53 = vpop.f32.mrb[177].mxu0  ;;  %4188 = vadd.xlane.f32.xlu0 %v4148_v60 }
 0x2e9   :  { %v2905_v23 = vpop.f32.mrb[122].mxu1  ;;  %v11586_v59 = vpop.f32.mrb[178].mxu0 }
 0x2ea   :  { %v8231_v26 = vpack.c.bf16 %v2905_v23, %v2901_v48  ;;  %v2907_v24 = vpop.f32.mrb[123].mxu1  ;;  %v11592_v36 = vpop.f32.mrb[179].mxu0 }
 0x2eb   :  { %v8255_v46 = vpack.c.bf16 %v2907_v24, %v2903_v34  ;;  %4190 = vadd.xlane.f32.xlu1 %v4149_v44  ;;  %v4153_v44 = vmul.f32 %v11544_v32, %v10622_v49 }
 0x2ec   :  { %8232 = vmatpush3.bf16.xpose.msra.mxu0 %v8231_v26  ;;  %4192 = vadd.xlane.f32.xlu0 %v4150_v58  ;;  %v14815_v58 = vld [vmem:[#allocation75_spill] sm:$0xff] }
 0x2ed   :  { %8256 = vmatpush3.bf16.xpose.msra.mxu1 %v8255_v46  ;;  %8233 = vmatprep.subr.bf16.mxu0 %v14814_v13  ;;  %v3317_v26 = vmul.f32 %v10991_v17, %v14815_v58  ;;  %v14817_v58 = vld [vmem:[#allocation79_spill] sm:$0xff] }
 0x2ee   :  { %8257 = vmatprep.subr.bf16.mxu1 %v14814_v13 }
 0x2ef   :  { %4194 = vadd.xlane.f32.xlu1 %v4151_v28  ;;  %v2911_v48 = vpop.f32.mrb[124].mxu1  ;;  %v11602_v34 = vpop.f32.mrb[180].mxu0  ;;  %v3319_v28 = vmul.f32 %v10991_v17, %v14818_v55 }
 0x2f0   :  { %v2913_v23 = vpop.f32.mrb[125].mxu1  ;;  %v11604_v24 = vpop.f32.mrb[181].mxu0  ;;  %4196 = vadd.xlane.f32.xlu0 %v4152_v2 }
 0x2f1   :  { %v2915_v14 = vpop.f32.mrb[126].mxu1  ;;  %v11608_v46 = vpop.f32.mrb[182].mxu0 }
 0x2f2   :  { %v8234_v50 = vpack.c.bf16 %v2915_v14, %v2911_v48  ;;  %v2917_v60 = vpop.f32.mrb[127].mxu1  ;;  %v11614_v52 = vpop.f32.mrb[183].mxu0  ;;  %v3520_v48 = vmul.f32 %v11253_v11, %v14816_v3 }
 0x2f3   :  { %v8258_v61 = vpack.c.bf16 %v2917_v60, %v2913_v23  ;;  %4198 = vadd.xlane.f32.xlu1 %v4153_v44 }
 0x2f4   :  { %8235 = vmatpush3.bf16.xpose.msra.mxu0 %v8234_v50  ;;  %3351 = vadd.xlane.f32.xlu0 %v3317_v26  ;;  %v3318_v26 = vmul.f32 %v10991_v17, %v14817_v58 }
 0x2f5   :  { %8259 = vmatpush3.bf16.xpose.msra.mxu1 %v8258_v61  ;;  %v3348_v49 = vpop.xlane.xlu0 %3347  ;;  %8236 = vmatprep.subr.bf16.mxu0 %v14814_v13 }
 0x2f6   :  { %3411 = vst.msk [vmem:[%s14235_s11] sm:$0xff] %vm383_vm4, %v3348_v49  ;;  %8260 = vmatprep.subr.bf16.mxu1 %v14814_v13 }
 0x2f7   :  { %v2921_v60 = vpop.f32.mrb[128].mxu1  ;;  %v11626_v23 = vpop.f32.mrb[184].mxu0 }
 0x2f8   :  { %v3350_v44 = vpop.xlane.xlu1 %3349  ;;  %v2923_v14 = vpop.f32.mrb[129].mxu1  ;;  %3554 = vadd.xlane.f32.xlu0 %v3520_v48 }
 0x2f9   :  { %3412 = vst.msk [vmem:[%s14235_s11 + $0x8] sm:$0xff] %vm383_vm4, %v3350_v44  ;;  %v11632_v61 = vpop.f32.mrb[185].mxu0  ;;  %v2925_v3 = vpop.f32.mrb[130].mxu1 }
 0x2fa   :  { %v8237_v50 = vpack.c.bf16 %v2925_v3, %v2921_v60  ;;  %v11636_v49 = vpop.f32.mrb[186].mxu0  ;;  %v3360_v2 = vpop.xlane.xlu0 %3359 }
 0x2fb   :  { %3417 = vst.msk [vmem:[%s14235_s11 + $0x30] sm:$0xff] %vm383_vm4, %v3360_v2  ;;  %v2927_v48 = vpop.f32.mrb[131].mxu1  ;;  %v11644_v44 = vpop.f32.mrb[187].mxu0  ;;  %v4154_v2 = vmul.f32 %v11544_v32, %v10649_v25 }
 0x2fc   :  { %v8261_v39 = vpack.c.bf16 %v2927_v48, %v2923_v14  ;;  %v3362_v58 = vpop.xlane.xlu1 %3361  ;;  %8238 = vmatpush3.bf16.xpose.msra.mxu0 %v8237_v50  ;;  %3353 = vadd.xlane.f32.xlu0 %v3318_v26 }
 0x2fd   :  { %3418 = vst.msk [vmem:[%s14235_s11 + $0x38] sm:$0xff] %vm383_vm4, %v3362_v58  ;;  %8239 = vmatprep.subr.bf16.mxu0 %v14814_v13 }
 0x2fe   :  { %8262 = vmatpush3.bf16.xpose.msra.mxu1 %v8261_v39  ;;  %v3364_v60 = vpop.xlane.xlu0 %3363 }
 0x2ff   :  { %3419 = vst.msk [vmem:[%s14235_s11 + $0x40] sm:$0xff] %vm383_vm4, %v3364_v60  ;;  %v2931_v14 = vpop.f32.mrb[132].mxu1  ;;  %v11659_v3 = vpop.f32.mrb[188].mxu0  ;;  %8263 = vmatprep.subr.bf16.mxu1 %v14814_v13 }
 0x300   :  { %v3366_v26 = vpop.xlane.xlu1 %3365  ;;  %v2933_v50 = vpop.f32.mrb[133].mxu1  ;;  %4200 = vadd.xlane.f32.xlu0 %v4154_v2 }
 0x301   :  { %3420 = vst.msk [vmem:[%s14235_s11 + $0x48] sm:$0xff] %vm383_vm4, %v3366_v26  ;;  %v11666_v25 = vpop.f32.mrb[189].mxu0  ;;  %v2935_v39 = vpop.f32.mrb[134].mxu1 }
 0x302   :  { %v8240_v48 = vpack.c.bf16 %v2935_v39, %v2931_v14  ;;  %v11668_v58 = vpop.f32.mrb[190].mxu0  ;;  %v3368_v60 = vpop.xlane.xlu0 %3367  ;;  %v14819_v39 = vld [vmem:[#allocation63_spill] sm:$0xff] }
 0x303   :  { %3421 = vst.msk [vmem:[%s14235_s11 + $0x50] sm:$0xff] %vm383_vm4, %v3368_v60  ;;  %v2937_v2 = vpop.f32.mrb[135].mxu1  ;;  %v11678_v26 = vpop.f32.mrb[191].mxu0  ;;  %v14820_v60 = vld [vmem:[#allocation85_spill] sm:$0xff] }
 0x304   :  { %v8264_v5 = vpack.c.bf16 %v2937_v2, %v2933_v50  ;;  %751 = vrot.lane.b32.xlu1 %v14819_v39, %s9383_s2  ;;  %v3370_v7 = vpop.xlane.xlu1 %3369  ;;  %8241 = vmatpush3.bf16.xpose.msra.mxu0 %v8240_v48  ;;  %v3522_v50 = vmul.f32 %v11253_v11, %v14820_v60  ;;  %v3724_v2 = vsub.s32 2, %v10964_v19  ;;  %v11732_v19 = vrot.slane %v9146_v27, %v3931_v1 }
 0x305   :  { %3422 = vst.msk [vmem:[%s14235_s11 + $0x58] sm:$0xff] %vm383_vm4, %v3370_v7  ;;  %3355 = vadd.xlane.f32.xlu0 %v3319_v28  ;;  %8242 = vmatprep.subr.bf16.mxu0 %v14814_v13 }
 0x306   :  { %8265 = vmatpush3.bf16.xpose.msra.mxu1 %v8264_v5  ;;  %v3372_v55 = vpop.xlane.xlu0 %3371  ;;  %v11710_v29 = vrot.slane %v9146_v27, %v3724_v2 }
 0x307   :  { %3423 = vst.msk [vmem:[%s14235_s11 + $0x60] sm:$0xff] %vm383_vm4, %v3372_v55  ;;  %v2941_v48 = vpop.f32.mrb[136].mxu1  ;;  %v11696_v39 = vpop.f32.mrb[192].mxu0  ;;  %8266 = vmatprep.subr.bf16.mxu1 %v14814_v13 }
 0x308   :  { %v3374_v7 = vpop.xlane.xlu1 %3373  ;;  %v2943_v28 = vpop.f32.mrb[137].mxu1 }
 0x309   :  { %3424 = vst.msk [vmem:[%s14235_s11 + $0x68] sm:$0xff] %vm383_vm4, %v3374_v7  ;;  %v11703_v5 = vpop.f32.mrb[193].mxu0  ;;  %3558 = vadd.xlane.f32.xlu0 %v3522_v50  ;;  %v2945_v60 = vpop.f32.mrb[138].mxu1 }
 0x30a   :  { %14821 = vst [vmem:[#allocation66_spill] sm:$0xff] %v11703_v5  ;;  %v8243_v14 = vpack.c.bf16 %v2945_v60, %v2941_v48  ;;  %v11705_v47 = vpop.f32.mrb[194].mxu0  ;;  %v3376_v55 = vpop.xlane.xlu0 %3375  ;;  %v14830_v5 = vld [vmem:[#allocation99_spill] sm:$0xff] }
 0x30b   :  { %3425 = vst.msk [vmem:[%s14235_s11 + $0x70] sm:$0xff] %vm383_vm4, %v3376_v55  ;;  %v2947_v50 = vpop.f32.mrb[139].mxu1  ;;  %v11721_v48 = vpop.f32.mrb[195].mxu0  ;;  %v14823_v55 = vld [vmem:[#allocation91_spill] sm:$0xff] }
 0x30c   :  { %14822 = vst [vmem:[#allocation70_spill] sm:$0xff] %v11721_v48  ;;  %v8267_v60 = vpack.c.bf16 %v2947_v50, %v2943_v28  ;;  %v3378_v33 = vpop.xlane.xlu1 %3377  ;;  %8244 = vmatpush3.bf16.xpose.msra.mxu0 %v8243_v14  ;;  %v3726_v7 = vmul.f32 %v11710_v29, %v14823_v55  ;;  %v14826_v55 = vld [vmem:[#allocation93_spill] sm:$0xff] }
 0x30d   :  { %3426 = vst.msk [vmem:[%s14235_s11 + $0x78] sm:$0xff] %vm383_vm4, %v3378_v33  ;;  %4204 = vadd.xlane.f32.xlu0 %v4156_v40  ;;  %8245 = vmatprep.subr.bf16.mxu0 %v14814_v13  ;;  %v3933_v2 = vmul.f32 %v11732_v19, %v14826_v55 }
 0x30e   :  { %8268 = vmatpush3.bf16.xpose.msra.mxu1 %v8267_v60  ;;  %v3380_v18 = vpop.xlane.xlu0 %3379 }
 0x30f   :  { %3427 = vst.msk [vmem:[%s14235_s11 + $0x80] sm:$0xff] %vm383_vm4, %v3380_v18  ;;  %v2951_v14 = vpop.f32.mrb[140].mxu1  ;;  %v11738_v28 = vpop.f32.mrb[196].mxu0  ;;  %8269 = vmatprep.subr.bf16.mxu1 %v14814_v13 }
 0x310   :  { %14824 = vst [vmem:[#allocation74_spill] sm:$0xff] %v11738_v28  ;;  %v3382_v33 = vpop.xlane.xlu1 %3381  ;;  %v2953_v40 = vpop.f32.mrb[141].mxu1 }
 0x311   :  { %3428 = vst.msk [vmem:[%s14235_s11 + $0x88] sm:$0xff] %vm383_vm4, %v3382_v33  ;;  %v11745_v50 = vpop.f32.mrb[197].mxu0  ;;  %3758 = vadd.xlane.f32.xlu0 %v3726_v7  ;;  %v2955_v1 = vpop.f32.mrb[142].mxu1 }
 0x312   :  { %14825 = vst [vmem:[#allocation78_spill] sm:$0xff] %v11745_v50  ;;  %v8246_v27 = vpack.c.bf16 %v2955_v1, %v2951_v14  ;;  %v11747_v60 = vpop.f32.mrb[198].mxu0  ;;  %v3384_v18 = vpop.xlane.xlu0 %3383  ;;  %v3728_v50 = vmul.f32 %v11710_v29, %v14830_v5 }
 0x313   :  { %3429 = vst.msk [vmem:[%s14235_s11 + $0x90] sm:$0xff] %vm383_vm4, %v3384_v18  ;;  %v2957_v33 = vpop.f32.mrb[143].mxu1  ;;  %v11757_v48 = vpop.f32.mrb[199].mxu0  ;;  %v4158_v18 = vmul.f32 %v11544_v32, %v10722_v8 }
 0x314   :  { %14827 = vst [vmem:[#allocation82_spill] sm:$0xff] %v11757_v48  ;;  %v8270_v7 = vpack.c.bf16 %v2957_v33, %v2953_v40  ;;  %v3386_v1 = vpop.xlane.xlu1 %3385  ;;  %8247 = vmatpush3.bf16.xpose.msra.mxu0 %v8246_v27 }
 0x315   :  { %3430 = vst.msk [vmem:[%s14235_s11 + $0x98] sm:$0xff] %vm383_vm4, %v3386_v1  ;;  %3965 = vadd.xlane.f32.xlu0 %v3933_v2  ;;  %8248 = vmatprep.subr.bf16.mxu0 %v14814_v13 }
 0x316   :  { %8271 = vmatpush3.bf16.xpose.msra.mxu1 %v8270_v7  ;;  %v3388_v55 = vpop.xlane.xlu0 %3387 }
 0x317   :  { %3431 = vst.msk [vmem:[%s14235_s11 + $0xa0] sm:$0xff] %vm383_vm4, %v3388_v55  ;;  %v2961_v40 = vpop.f32.mrb[144].mxu1  ;;  %v11772_v27 = vpop.f32.mrb[200].mxu0  ;;  %8272 = vmatprep.subr.bf16.mxu1 %v14814_v13 }
 0x318   :  { %14828 = vst [vmem:[#allocation86_spill] sm:$0xff] %v11772_v27  ;;  %v3390_v33 = vpop.xlane.xlu1 %3389  ;;  %v2963_v1 = vpop.f32.mrb[145].mxu1 }
 0x319   :  { %3432 = vst.msk [vmem:[%s14235_s11 + $0xa8] sm:$0xff] %vm383_vm4, %v3390_v33  ;;  %v11779_v2 = vpop.f32.mrb[201].mxu0  ;;  %4208 = vadd.xlane.f32.xlu0 %v4158_v18  ;;  %v2965_v8 = vpop.f32.mrb[146].mxu1 }
 0x31a   :  { %14829 = vst [vmem:[#allocation90_spill] sm:$0xff] %v11779_v2  ;;  %v8249_v7 = vpack.c.bf16 %v2965_v8, %v2961_v40  ;;  %v11781_v14 = vpop.f32.mrb[202].mxu0  ;;  %v3392_v55 = vpop.xlane.xlu0 %3391 }
 0x31b   :  { %3433 = vst.msk [vmem:[%s14235_s11 + $0xb0] sm:$0xff] %vm383_vm4, %v3392_v55  ;;  %v2967_v33 = vpop.f32.mrb[147].mxu1  ;;  %v11791_v28 = vpop.f32.mrb[203].mxu0  ;;  %v11803_v55 = vld [vmem:[%s14230_s6] sm:$0xff] }
 0x31c   :  { %14831 = vst [vmem:[#allocation92_spill] sm:$0xff] %v11791_v28  ;;  %v8273_v18 = vpack.c.bf16 %v2967_v33, %v2963_v1  ;;  %v3394_v8 = vpop.xlane.xlu1 %3393  ;;  %8250 = vmatpush3.bf16.xpose.msra.mxu0 %v8249_v7  ;;  %v14832_v1 = vld [vmem:[#allocation101_spill] sm:$0xff]  ;;  %v3648_v40 = vrot.slane %v11803_v55, 1 }
 0x31d   :  { %3434 = vst.msk [vmem:[%s14235_s11 + $0xb8] sm:$0xff] %vm383_vm4, %v3394_v8  ;;  %3762 = vadd.xlane.f32.xlu0 %v3728_v50  ;;  %8275 = vmatprep.subr.bf16.mxu0 %v14814_v13  ;;  %v3935_v33 = vmul.f32 %v11732_v19, %v14832_v1 }
 0x31e   :  { %8274 = vmatpush3.bf16.xpose.msra.mxu1 %v8273_v18  ;;  %v3396_v5 = vpop.xlane.xlu0 %3395 }
 0x31f   :  { %3435 = vst.msk [vmem:[%s14235_s11 + $0xc0] sm:$0xff] %vm383_vm4, %v3396_v5  ;;  %v3004_v7 = vpop.f32.mrb[148].mxu1  ;;  %8299 = vmatprep.subr.bf16.mxu1 %v14814_v13  ;;  %v4160_v5 = vmul.f32 %v11544_v32, %v10758_v45  ;;  %v14833_v45 = vld [vmem:[#allocation81_spill] sm:$0xff] }
 0x320   :  { %v3398_v50 = vpop.xlane.xlu1 %3397  ;;  %v3006_v8 = vpop.f32.mrb[149].mxu1 }
 0x321   :  { %3436 = vst.msk [vmem:[%s14235_s11 + $0xc8] sm:$0xff] %vm383_vm4, %v3398_v50  ;;  %3969 = vadd.xlane.f32.xlu0 %v3935_v33  ;;  %v3008_v18 = vpop.f32.mrb[150].mxu1  ;;  %v3521_v33 = vmul.f32 %v11253_v11, %v14833_v45  ;;  %v14835_v45 = vld [vmem:[#allocation106_spill] sm:$0xff] }
 0x322   :  { %v8276_v1 = vpack.c.bf16 %v3008_v18, %v3004_v7  ;;  %v3400_v48 = vpop.xlane.xlu0 %3399  ;;  %v3010_v2 = vpop.f32.mrb[151].mxu1 }
 0x323   :  { %3437 = vst.msk [vmem:[%s14235_s11 + $0xd0] sm:$0xff] %vm383_vm4, %v3400_v48  ;;  %v8300_v28 = vpack.c.bf16 %v3010_v2, %v3006_v8  ;;  %7980 = vmatmul.mubr.f32.vlgmr.msra.gmra.mrb[204].mxu0 %v11803_v55  ;;  %v14834_v2 = vld [vmem:[#allocation104_spill] sm:$0xff]  ;;  %v4155_v8 = vmul.f32 %v11544_v32, %v10659_v12  ;;  %v14836_v12 = vld [vmem:[#allocation87_spill] sm:$0xff] }
 0x324   :  { %v3402_v27 = vpop.xlane.xlu1 %3401  ;;  %8277 = vmatpush3.bf16.xpose.msra.mxu0 %v8276_v1  ;;  %8049 = vmatprep.mubr.msk.f32.mxu0 %vm9389_vm14, %v14798_v35  ;;  %v3730_v7 = vmul.f32 %v11710_v29, %v14834_v2 }
 0x325   :  { %3438 = vst.msk [vmem:[%s14235_s11 + $0xd8] sm:$0xff] %vm383_vm4, %v3402_v27  ;;  %4212 = vadd.xlane.f32.xlu0 %v4160_v5  ;;  %8015 = vmatmul.mubr.f32.vlgmr.msra.gmra.mrb[212].mxu1 %v3648_v40 }
 0x326   :  { %8301 = vmatpush3.bf16.xpose.msra.mxu1 %v8300_v28  ;;  %v3404_v48 = vpop.xlane.xlu0 %3403  ;;  %8278 = vmatprep.subr.bf16.mxu0 %v14814_v13 }
 0x327   :  { %3439 = vst.msk [vmem:[%s14235_s11 + $0xe0] sm:$0xff] %vm383_vm4, %v3404_v48  ;;  %v3014_v50 = vpop.f32.mrb[152].mxu1  ;;  %8302 = vmatprep.subr.bf16.mxu1 %v14814_v13  ;;  %8084 = vmatprep.mubr.msk.f32.mxu1 %vm9389_vm14, %v14798_v35  ;;  %v3937_v48 = vmul.f32 %v11732_v19, %v14835_v45 }
 0x328   :  { %3556 = vadd.xlane.f32.xlu1 %v3521_v33  ;;  %v3406_v27 = vpop.xlane.xlu1 %3405  ;;  %v3016_v28 = vpop.f32.mrb[153].mxu1 }
 0x329   :  { %3440 = vst.msk [vmem:[%s14235_s11 + $0xe8] sm:$0xff] %vm383_vm4, %v3406_v27  ;;  %3766 = vadd.xlane.f32.xlu0 %v3730_v7  ;;  %v3018_v40 = vpop.f32.mrb[154].mxu1  ;;  %v3320_v7 = vmul.f32 %v10991_v17, %v14836_v12  ;;  %v4162_v27 = vmul.f32 %v11544_v32, %v10800_v21 }
 0x32a   :  { %v8279_v18 = vpack.c.bf16 %v3018_v40, %v3014_v50  ;;  %v3408_v1 = vpop.xlane.xlu0 %3407  ;;  %v3020_v5 = vpop.f32.mrb[155].mxu1 }
 0x32b   :  { %3441 = vst.msk [vmem:[%s14235_s11 + $0xf0] sm:$0xff] %vm383_vm4, %v3408_v1  ;;  %v8303_v33 = vpack.c.bf16 %v3020_v5, %v3016_v28 }
 0x32c   :  { %4202 = vadd.xlane.f32.xlu1 %v4155_v8  ;;  %v3410_v2 = vpop.xlane.xlu1 %3409  ;;  %8280 = vmatpush3.bf16.xpose.msra.mxu0 %v8279_v18  ;;  %v14837_v18 = vld [vmem:[#allocation89_spill] sm:$0xff] }
 0x32d   :  { %3442 = vst.msk [vmem:[%s14235_s11 + $0xf8] sm:$0xff] %vm383_vm4, %v3410_v2  ;;  %3973 = vadd.xlane.f32.xlu0 %v3937_v48  ;;  %8281 = vmatprep.subr.bf16.mxu0 %v14814_v13  ;;  %v3523_v21 = vmul.f32 %v11253_v11, %v14837_v18  ;;  %v14838_v48 = vld [vmem:[#allocation111_spill] sm:$0xff]  ;;  %v4157_v11 = vmul.f32 %v11544_v32, %v10697_v56 }
 0x32e   :  { %8304 = vmatpush3.bf16.xpose.msra.mxu1 %v8303_v33  ;;  %v3551_v50 = vpop.xlane.xlu0 %3550  ;;  %v3732_v33 = vmul.f32 %v11710_v29, %v14838_v48 }
 0x32f   :  { %7010 = vst.msk [vmem:[%s14235_s11 + $0x100] sm:$0xff] %vm383_vm4, %v3551_v50  ;;  %v3024_v28 = vpop.f32.mrb[156].mxu1  ;;  %8305 = vmatprep.subr.bf16.mxu1 %v14814_v13  ;;  %v14839_v50 = vld [vmem:[#allocation112_spill] sm:$0xff] }
 0x330   :  { %3357 = vadd.xlane.f32.xlu1 %v3320_v7  ;;  %v3553_v40 = vpop.xlane.xlu1 %3552  ;;  %v3026_v8 = vpop.f32.mrb[157].mxu1 }
 0x331   :  { %7011 = vst.msk [vmem:[%s14235_s11 + $0x108] sm:$0xff] %vm383_vm4, %v3553_v40  ;;  %4216 = vadd.xlane.f32.xlu0 %v4162_v27  ;;  %v3028_v17 = vpop.f32.mrb[158].mxu1  ;;  %v3939_v27 = vmul.f32 %v11732_v19, %v14839_v50  ;;  %v14843_v50 = vld [vmem:[#allocation118_spill] sm:$0xff] }
 0x332   :  { %v8282_v1 = vpack.c.bf16 %v3028_v17, %v3024_v28  ;;  %v3563_v5 = vpop.xlane.xlu0 %3562  ;;  %v3030_v45 = vpop.f32.mrb[159].mxu1  ;;  %v14840_v17 = vld [vmem:[#allocation95_spill] sm:$0xff] }
 0x333   :  { %7016 = vst.msk [vmem:[%s14235_s11 + $0x130] sm:$0xff] %vm383_vm4, %v3563_v5  ;;  %v8306_v2 = vpack.c.bf16 %v3030_v45, %v3026_v8  ;;  %v3727_v18 = vmul.f32 %v11710_v29, %v14840_v17  ;;  %v14841_v45 = vld [vmem:[#allocation116_spill] sm:$0xff]  ;;  %v4159_v17 = vmul.f32 %v11544_v32, %v10731_v37  ;;  %v14845_v37 = vld [vmem:[#allocation102_spill] sm:$0xff] }
 0x334   :  { %3560 = vadd.xlane.f32.xlu1 %v3523_v21  ;;  %v3565_v12 = vpop.xlane.xlu1 %3564  ;;  %8283 = vmatpush3.bf16.xpose.msra.mxu0 %v8282_v1  ;;  %v3734_v48 = vmul.f32 %v11710_v29, %v14841_v45 }
 0x335   :  { %7017 = vst.msk [vmem:[%s14235_s11 + $0x138] sm:$0xff] %vm383_vm4, %v3565_v12  ;;  %3770 = vadd.xlane.f32.xlu0 %v3732_v33  ;;  %8284 = vmatprep.subr.bf16.mxu0 %v14814_v13  ;;  %v14842_v12 = vld [vmem:[#allocation97_spill] sm:$0xff] }
 0x336   :  { %8307 = vmatpush3.bf16.xpose.msra.mxu1 %v8306_v2  ;;  %v3567_v7 = vpop.xlane.xlu0 %3566 }
 0x337   :  { %7018 = vst.msk [vmem:[%s14235_s11 + $0x140] sm:$0xff] %vm383_vm4, %v3567_v7  ;;  %v3034_v28 = vpop.f32.mrb[160].mxu1  ;;  %8308 = vmatprep.subr.bf16.mxu1 %v14814_v13 }
 0x338   :  { %4206 = vadd.xlane.f32.xlu1 %v4157_v11  ;;  %v3569_v40 = vpop.xlane.xlu1 %3568  ;;  %v3036_v8 = vpop.f32.mrb[161].mxu1  ;;  %v3934_v11 = vmul.f32 %v11732_v19, %v14842_v12 }
 0x339   :  { %7019 = vst.msk [vmem:[%s14235_s11 + $0x148] sm:$0xff] %vm383_vm4, %v3569_v40  ;;  %3977 = vadd.xlane.f32.xlu0 %v3939_v27  ;;  %v3038_v56 = vpop.f32.mrb[162].mxu1  ;;  %v3941_v27 = vmul.f32 %v11732_v19, %v14843_v50 }
 0x33a   :  { %v8285_v21 = vpack.c.bf16 %v3038_v56, %v3034_v28  ;;  %v3571_v1 = vpop.xlane.xlu0 %3570  ;;  %v3040_v5 = vpop.f32.mrb[163].mxu1 }
 0x33b   :  { %7020 = vst.msk [vmem:[%s14235_s11 + $0x150] sm:$0xff] %vm383_vm4, %v3571_v1  ;;  %v8309_v33 = vpack.c.bf16 %v3040_v5, %v3036_v8  ;;  %v14844_v5 = vld [vmem:[#allocation122_spill] sm:$0xff] }
 0x33c   :  { %3760 = vadd.xlane.f32.xlu1 %v3727_v18  ;;  %v3573_v2 = vpop.xlane.xlu1 %3572  ;;  %8286 = vmatpush3.bf16.xpose.msra.mxu0 %v8285_v21  ;;  %v3736_v45 = vmul.f32 %v11710_v29, %v14844_v5 }
 0x33d   :  { %7021 = vst.msk [vmem:[%s14235_s11 + $0x158] sm:$0xff] %vm383_vm4, %v3573_v2  ;;  %3774 = vadd.xlane.f32.xlu0 %v3734_v48  ;;  %8287 = vmatprep.subr.bf16.mxu0 %v14814_v13  ;;  %v3729_v2 = vmul.f32 %v11710_v29, %v14845_v37 }
 0x33e   :  { %8310 = vmatpush3.bf16.xpose.msra.mxu1 %v8309_v33  ;;  %v3575_v7 = vpop.xlane.xlu0 %3574 }
 0x33f   :  { %7022 = vst.msk [vmem:[%s14235_s11 + $0x160] sm:$0xff] %vm383_vm4, %v3575_v7  ;;  %v3044_v28 = vpop.f32.mrb[164].mxu1  ;;  %8311 = vmatprep.subr.bf16.mxu1 %v14814_v13 }
 0x340   :  { %3967 = vadd.xlane.f32.xlu1 %v3934_v11  ;;  %v3577_v40 = vpop.xlane.xlu1 %3576  ;;  %v3046_v8 = vpop.f32.mrb[165].mxu1  ;;  %v14846_v11 = vld [vmem:[#allocation123_spill] sm:$0xff] }
 0x341   :  { %7023 = vst.msk [vmem:[%s14235_s11 + $0x168] sm:$0xff] %vm383_vm4, %v3577_v40  ;;  %3981 = vadd.xlane.f32.xlu0 %v3941_v27  ;;  %v3048_v56 = vpop.f32.mrb[166].mxu1  ;;  %v3943_v7 = vmul.f32 %v11732_v19, %v14846_v11 }
 0x342   :  { %v8288_v18 = vpack.c.bf16 %v3048_v56, %v3044_v28  ;;  %v3579_v21 = vpop.xlane.xlu0 %3578  ;;  %v3050_v1 = vpop.f32.mrb[167].mxu1 }
 0x343   :  { %7024 = vst.msk [vmem:[%s14235_s11 + $0x170] sm:$0xff] %vm383_vm4, %v3579_v21  ;;  %v8312_v48 = vpack.c.bf16 %v3050_v1, %v3046_v8  ;;  %v14847_v8 = vld [vmem:[#allocation103_spill] sm:$0xff]  ;;  %v3738_v1 = vmul.f32 %v11710_v29, %v10539_v15  ;;  %v4161_v15 = vmul.f32 %v11544_v32, %v10769_v31 }
 0x344   :  { %4210 = vadd.xlane.f32.xlu1 %v4159_v17  ;;  %v3581_v33 = vpop.xlane.xlu1 %3580  ;;  %8289 = vmatpush3.bf16.xpose.msra.mxu0 %v8288_v18  ;;  %v3936_v56 = vmul.f32 %v11732_v19, %v14847_v8  ;;  %v3740_v8 = vmul.f32 %v11710_v29, %v10567_v0 }
 0x345   :  { %7025 = vst.msk [vmem:[%s14235_s11 + $0x178] sm:$0xff] %vm383_vm4, %v3581_v33  ;;  %3778 = vadd.xlane.f32.xlu0 %v3736_v45  ;;  %8290 = vmatprep.subr.bf16.mxu0 %v14814_v13  ;;  %v14848_v33 = vld [vmem:[#allocation128_spill] sm:$0xff] }
 0x346   :  { %8313 = vmatpush3.bf16.xpose.msra.mxu1 %v8312_v48  ;;  %v3583_v12 = vpop.xlane.xlu0 %3582  ;;  %v3945_v37 = vmul.f32 %v11732_v19, %v14848_v33 }
 0x347   :  { %7026 = vst.msk [vmem:[%s14235_s11 + $0x180] sm:$0xff] %vm383_vm4, %v3583_v12  ;;  %v3054_v50 = vpop.f32.mrb[168].mxu1  ;;  %8314 = vmatprep.subr.bf16.mxu1 %v14814_v13 }
 0x348   :  { %3764 = vadd.xlane.f32.xlu1 %v3729_v2  ;;  %v3585_v27 = vpop.xlane.xlu1 %3584  ;;  %v3056_v28 = vpop.f32.mrb[169].mxu1 }
 0x349   :  { %7027 = vst.msk [vmem:[%s14235_s11 + $0x188] sm:$0xff] %vm383_vm4, %v3585_v27  ;;  %3985 = vadd.xlane.f32.xlu0 %v3943_v7  ;;  %v3058_v40 = vpop.f32.mrb[170].mxu1  ;;  %v14849_v7 = vld [vmem:[#allocation108_spill] sm:$0xff] }
 0x34a   :  { %v8291_v17 = vpack.c.bf16 %v3058_v40, %v3054_v50  ;;  %v3587_v18 = vpop.xlane.xlu0 %3586  ;;  %v3060_v21 = vpop.f32.mrb[171].mxu1  ;;  %v3731_v50 = vmul.f32 %v11710_v29, %v14849_v7 }
 0x34b   :  { %7028 = vst.msk [vmem:[%s14235_s11 + $0x190] sm:$0xff] %vm383_vm4, %v3587_v18  ;;  %v8315_v5 = vpack.c.bf16 %v3060_v21, %v3056_v28  ;;  %v14850_v18 = vld [vmem:[#allocation110_spill] sm:$0xff] }
 0x34c   :  { %3971 = vadd.xlane.f32.xlu1 %v3936_v56  ;;  %v3589_v45 = vpop.xlane.xlu1 %3588  ;;  %8292 = vmatpush3.bf16.xpose.msra.mxu0 %v8291_v17  ;;  %v3938_v0 = vmul.f32 %v11732_v19, %v14850_v18 }
 0x34d   :  { %7029 = vst.msk [vmem:[%s14235_s11 + $0x198] sm:$0xff] %vm383_vm4, %v3589_v45  ;;  %3782 = vadd.xlane.f32.xlu0 %v3738_v1  ;;  %8293 = vmatprep.subr.bf16.mxu0 %v14814_v13  ;;  %v3947_v1 = vmul.f32 %v11732_v19, %v10569_v22  ;;  %v4163_v22 = vmul.f32 %v11544_v32, %v10813_v4  ;;  %v14852_v4 = vld [vmem:[#allocation113_spill] sm:$0xff] }
 0x34e   :  { %8316 = vmatpush3.bf16.xpose.msra.mxu1 %v8315_v5  ;;  %v3591_v48 = vpop.xlane.xlu0 %3590 }
 0x34f   :  { %7030 = vst.msk [vmem:[%s14235_s11 + $0x1a0] sm:$0xff] %vm383_vm4, %v3591_v48  ;;  %v3064_v2 = vpop.f32.mrb[172].mxu1  ;;  %8317 = vmatprep.subr.bf16.mxu1 %v14814_v13 }
 0x350   :  { %4214 = vadd.xlane.f32.xlu1 %v4161_v15  ;;  %v3593_v12 = vpop.xlane.xlu1 %3592  ;;  %v3066_v11 = vpop.f32.mrb[173].mxu1 }
 0x351   :  { %7031 = vst.msk [vmem:[%s14235_s11 + $0x1a8] sm:$0xff] %vm383_vm4, %v3593_v12  ;;  %3989 = vadd.xlane.f32.xlu0 %v3945_v37  ;;  %v3068_v31 = vpop.f32.mrb[174].mxu1  ;;  %v14851_v12 = vld [vmem:[#allocation137_spill] sm:$0xff] }
 0x352   :  { %v8294_v27 = vpack.c.bf16 %v3068_v31, %v3064_v2  ;;  %v3595_v28 = vpop.xlane.xlu0 %3594  ;;  %v3070_v40 = vpop.f32.mrb[175].mxu1 }
 0x353   :  { %7032 = vst.msk [vmem:[%s14235_s11 + $0x1b0] sm:$0xff] %vm383_vm4, %v3595_v28  ;;  %v8318_v56 = vpack.c.bf16 %v3070_v40, %v3066_v11  ;;  %v3742_v11 = vmul.f32 %v11710_v29, %v14851_v12  ;;  %v14853_v28 = vld [vmem:[#allocation138_spill] sm:$0xff]  ;;  %v4969_v12 = vld [vmem:[#allocation5 + $0x28] sm:$0xff] }
 0x354   :  { %3768 = vadd.xlane.f32.xlu1 %v3731_v50  ;;  %v3597_v17 = vpop.xlane.xlu1 %3596  ;;  %8295 = vmatpush3.bf16.xpose.msra.mxu0 %v8294_v27  ;;  %v3733_v50 = vmul.f32 %v11710_v29, %v14852_v4  ;;  %v3949_v40 = vmul.f32 %v11732_v19, %v14853_v28  ;;  %v14856_v4 = vld [vmem:[#allocation119_spill] sm:$0xff] }
 0x355   :  { %7033 = vst.msk [vmem:[%s14235_s11 + $0x1b8] sm:$0xff] %vm383_vm4, %v3597_v17  ;;  %3786 = vadd.xlane.f32.xlu0 %v3740_v8  ;;  %8296 = vmatprep.subr.bf16.mxu0 %v14814_v13 }
 0x356   :  { %8319 = vmatpush3.bf16.xpose.msra.mxu1 %v8318_v56  ;;  %v3599_v21 = vpop.xlane.xlu0 %3598  ;;  %v3855_v56 = vrot.slane %v11803_v55, 2 }
 0x357   :  { %7034 = vst.msk [vmem:[%s14235_s11 + $0x1c0] sm:$0xff] %vm383_vm4, %v3599_v21  ;;  %v3074_v5 = vpop.f32.mrb[176].mxu1  ;;  %8320 = vmatprep.subr.bf16.mxu1 %v14814_v13  ;;  %v4062_v21 = vrot.slane %v11803_v55, 3 }
 0x358   :  { %3975 = vadd.xlane.f32.xlu1 %v3938_v0  ;;  %v3601_v45 = vpop.xlane.xlu1 %3600  ;;  %v3076_v15 = vpop.f32.mrb[177].mxu1 }
 0x359   :  { %7035 = vst.msk [vmem:[%s14235_s11 + $0x1c8] sm:$0xff] %vm383_vm4, %v3601_v45  ;;  %3993 = vadd.xlane.f32.xlu0 %v3947_v1  ;;  %v3078_v48 = vpop.f32.mrb[178].mxu1  ;;  %v14854_v1 = vld [vmem:[#allocation114_spill] sm:$0xff]  ;;  %v4992_v45 = vld [vmem:[#allocation5 + $0xe0] sm:$0xff] }
 0x35a   :  { %v8297_v33 = vpack.c.bf16 %v3078_v48, %v3074_v5  ;;  %v3603_v37 = vpop.xlane.xlu0 %3602  ;;  %v3080_v2 = vpop.f32.mrb[179].mxu1  ;;  %v3940_v5 = vmul.f32 %v11732_v19, %v14854_v1 }
 0x35b   :  { %7036 = vst.msk [vmem:[%s14235_s11 + $0x1d0] sm:$0xff] %vm383_vm4, %v3603_v37  ;;  %v8321_v31 = vpack.c.bf16 %v3080_v2, %v3076_v15  ;;  %v14855_v37 = vpack.c.bf16 %v11562_v43, %v11558_v63  ;;  %v4965_v2 = vld [vmem:[#allocation5 + $0x8] sm:$0xff]  ;;  %v14857_v43 = vpack.c.bf16 %v11568_v42, %v11560_v10  ;;  %v4971_v10 = vld [vmem:[#allocation5 + $0x38] sm:$0xff] }
 0x35c   :  { %4218 = vadd.xlane.f32.xlu1 %v4163_v22  ;;  %v3605_v7 = vpop.xlane.xlu1 %3604  ;;  %8298 = vmatpush3.bf16.xpose.msra.mxu0 %v8297_v33  ;;  %v3744_v22 = vmul.f32 %v11710_v29, %v10637_v41  ;;  %v7235_v41 = vmul.f32 -1.442695, %v4965_v2 }
 0x35d   :  { %7037 = vst.msk [vmem:[%s14235_s11 + $0x1d8] sm:$0xff] %vm383_vm4, %v3605_v7  ;;  %3790 = vadd.xlane.f32.xlu0 %v3742_v11  ;;  %8323 = vmatprep.subr.bf16.mxu0 %v14814_v13  ;;  %v7239_v11 = vmul.f32 -1.442695, %v4969_v12  ;;  %v4968_v7 = vld [vmem:[#allocation5 + $0x20] sm:$0xff] }
 0x35e   :  { %8322 = vmatpush3.bf16.xpose.msra.mxu1 %v8321_v31  ;;  %v3607_v27 = vpop.xlane.xlu0 %3606  ;;  %v4964_v31 = vld [vmem:[#allocation5] sm:$0xff]  ;;  %v7238_v28 = vmul.f32 -1.442695, %v4968_v7  ;;  %8618 = vpow2.f32 %v7235_v41  ;;  %v3746_v7 = vmul.f32 %v11710_v29, %v10675_v62 }
 0x35f   :  { %7038 = vst.msk [vmem:[%s14235_s11 + $0x1e0] sm:$0xff] %vm383_vm4, %v3607_v27  ;;  %v12023_v8 = vpop.f32.mrb[180].mxu1  ;;  %8347 = vmatprep.subr.bf16.mxu1 %v14814_v13  ;;  %v7234_v27 = vmul.f32 -1.442695, %v4964_v31  ;;  %8620 = vpow2.f32 %v7239_v11 }
 0x360   :  { %3772 = vadd.xlane.f32.xlu1 %v3733_v50  ;;  %v3609_v17 = vpop.xlane.xlu1 %3608  ;;  %v12027_v18 = vpop.f32.mrb[181].mxu1  ;;  %v3735_v50 = vmul.f32 %v11710_v29, %v14856_v4  ;;  %v14884_v4 = vld [vmem:[#allocation142_spill] sm:$0xff] }
 0x361   :  { %7039 = vst.msk [vmem:[%s14235_s11 + $0x1e8] sm:$0xff] %vm383_vm4, %v3609_v17  ;;  %3997 = vadd.xlane.f32.xlu0 %v3949_v40  ;;  %v12033_v0 = vpop.f32.mrb[182].mxu1  ;;  %v4967_v40 = vld [vmem:[#allocation5 + $0x18] sm:$0xff]  ;;  %8622 = vpow2.f32 %v7234_v27  ;;  %v4977_v27 = vld [vmem:[#allocation5 + $0x68] sm:$0xff] }
 0x362   :  { %v3611_v15 = vpop.xlane.xlu0 %3610  ;;  %v12040_v48 = vpop.f32.mrb[183].mxu1  ;;  %v7237_v42 = vmul.f32 -1.442695, %v4967_v40  ;;  %8624 = vpow2.f32 %v7238_v28  ;;  %v7247_v28 = vmul.f32 -1.442695, %v4977_v27  ;;  %v4972_v40 = vld [vmem:[#allocation5 + $0x40] sm:$0xff] }
 0x363   :  { %7040 = vst.msk [vmem:[%s14235_s11 + $0x1f0] sm:$0xff] %vm383_vm4, %v3611_v15  ;;  %8050 = vmatmul.mubr.f32.vlgmr.msra.gmra.mrb[206].mxu0 %v3855_v56  ;;  %v3951_v56 = vmul.f32 %v11732_v19, %v10641_v20  ;;  %v7241_v20 = vmul.f32 -1.442695, %v4971_v10  ;;  %v4970_v15 = vld [vmem:[#allocation5 + $0x30] sm:$0xff]  ;;  %v14860_v10 = vld [vmem:[#allocation124_spill] sm:$0xff] }
 0x364   :  { %3979 = vadd.xlane.f32.xlu1 %v3940_v5  ;;  %v3613_v33 = vpop.xlane.xlu1 %3612  ;;  %8325 = vmatpush3.bf16.xpose.msra.mxu0 %v14855_v37  ;;  %v4966_v5 = vld [vmem:[#allocation5 + $0x10] sm:$0xff]  ;;  %v7240_v31 = vmul.f32 -1.442695, %v4970_v15  ;;  %8626 = vpow2.f32 %v7237_v42 }
 0x365   :  { %7041 = vst.msk [vmem:[%s14235_s11 + $0x1f8] sm:$0xff] %vm383_vm4, %v3613_v33  ;;  %3794 = vadd.xlane.f32.xlu0 %v3744_v22  ;;  %8085 = vmatmul.mubr.f32.vlgmr.msra.gmra.mrb[214].mxu1 %v4062_v21  ;;  %v7236_v33 = vmul.f32 -1.442695, %v4966_v5  ;;  %v14858_v37 = vld [vmem:[#allocation121_spill] sm:$0xff]  ;;  %8628 = vpow2.f32 %v7241_v20  ;;  %v4975_v20 = vld [vmem:[#allocation5 + $0x58] sm:$0xff]  ;;  %v3953_v5 = vmul.f32 %v11732_v19, %v10679_v51 }
 0x366   :  { %8349 = vmatpush3.bf16.xpose.msra.mxu1 %v14857_v43  ;;  %v4173_v63 = vpop.xlane.xlu0 %4172  ;;  %8326 = vmatprep.subr.bf16.mxu0 %v14814_v13  ;;  %v3942_v2 = vmul.f32 %v11732_v19, %v14858_v37  ;;  %v14859_v43 = vpack.c.bf16 %v11586_v59, %v11580_v9  ;;  %v3737_v9 = vmul.f32 %v11710_v29, %v14860_v10 }
 0x367   :  { %7106 = vst.msk [vmem:[%s14235_s11 + $0x400] sm:$0xff] %vm383_vm4, %v4173_v63  ;;  %v12069_v17 = vpop.f32.mrb[184].mxu1  ;;  %8350 = vmatprep.subr.bf16.mxu1 %v14814_v13  ;;  %8119 = vmatprep.mubr.msk.f32.mxu0 %vm9389_vm14, %v14798_v35  ;;  %v4973_v63 = vld [vmem:[#allocation5 + $0x48] sm:$0xff]  ;;  %8630 = vpow2.f32 %v7236_v33  ;;  %v14861_v59 = vpack.c.bf16 %v11592_v36, %v11582_v53 }
 0x368   :  { %3776 = vadd.xlane.f32.xlu1 %v3735_v50  ;;  %v4175_v21 = vpop.xlane.xlu1 %4174  ;;  %v12074_v1 = vpop.f32.mrb[185].mxu1  ;;  %8154 = vmatprep.mubr.msk.f32.mxu1 %vm9389_vm14, %v14798_v35  ;;  %v7243_v62 = vmul.f32 -1.442695, %v4973_v63  ;;  %8632 = vpow2.f32 %v7240_v31  ;;  %v14862_v31 = vld [vmem:[#allocation126_spill] sm:$0xff] }
 0x369   :  { %7107 = vst.msk [vmem:[%s14235_s11 + $0x408] sm:$0xff] %vm383_vm4, %v4175_v21  ;;  %4001 = vadd.xlane.f32.xlu0 %v3951_v56  ;;  %v12082_v22 = vpop.f32.mrb[186].mxu1  ;;  %v4976_v56 = vld [vmem:[#allocation5 + $0x60] sm:$0xff]  ;;  %v7242_v21 = vmul.f32 -1.442695, %v4972_v40  ;;  %v8619_v37 = vpop.eup %8618 }
 0x36a   :  { %v4177_v41 = vpop.xlane.xlu0 %4176  ;;  %v12088_v11 = vpop.f32.mrb[187].mxu1  ;;  %8634 = vpow2.f32 %v7243_v62  ;;  %v7246_v33 = vmul.f32 -1.442695, %v4976_v56  ;;  %v5477_v27 = vadd.f32 1.0, %v8619_v37 }
 0x36b   :  { %7108 = vst.msk [vmem:[%s14235_s11 + $0x410] sm:$0xff] %vm383_vm4, %v4177_v41  ;;  %8636 = vpow2.f32 %v7247_v28  ;;  %v8621_v41 = vpop.eup %8620  ;;  %v3748_v28 = vmul.f32 %v11710_v29, %v10711_v16 }
 0x36c   :  { %3983 = vadd.xlane.f32.xlu1 %v3942_v2  ;;  %v4179_v50 = vpop.xlane.xlu1 %4178  ;;  %8328 = vmatpush3.bf16.xpose.msra.mxu0 %v14859_v43  ;;  %8638 = vpow2.f32 %v7242_v21  ;;  %v7245_v2 = vmul.f32 -1.442695, %v4975_v20  ;;  %v8623_v62 = vpop.eup %8622  ;;  %v5481_v56 = vadd.f32 1.0, %v8621_v41  ;;  %v3955_v41 = vmul.f32 %v11732_v19, %v10715_v54 }
 0x36d   :  { %7109 = vst.msk [vmem:[%s14235_s11 + $0x418] sm:$0xff] %vm383_vm4, %v4179_v50  ;;  %3798 = vadd.xlane.f32.xlu0 %v3746_v7  ;;  %8329 = vmatprep.subr.bf16.mxu0 %v14814_v13  ;;  %v3944_v7 = vmul.f32 %v11732_v19, %v14862_v31  ;;  %v8625_v10 = vpop.eup %8624  ;;  %8640 = vpow2.f32 %v7246_v33 }
 0x36e   :  { %8352 = vmatpush3.bf16.xpose.msra.mxu1 %v14861_v59  ;;  %v4181_v42 = vpop.xlane.xlu0 %4180  ;;  %v14863_v59 = vpack.c.bf16 %v11608_v46, %v11602_v34  ;;  %v8627_v21 = vpop.eup %8626  ;;  %v5480_v16 = vadd.f32 1.0, %v8625_v10  ;;  %8642 = vpow2.f32 %v7245_v2  ;;  %v14865_v34 = vpack.c.bf16 %v11614_v52, %v11604_v24  ;;  %v14866_v10 = vld [vmem:[#allocation131_spill] sm:$0xff] }
 0x36f   :  { %7110 = vst.msk [vmem:[%s14235_s11 + $0x420] sm:$0xff] %vm383_vm4, %v4181_v42  ;;  %v12117_v15 = vpop.f32.mrb[188].mxu1  ;;  %8353 = vmatprep.subr.bf16.mxu1 %v14814_v13  ;;  %v5476_v42 = vadd.f32 1.0, %v8623_v62  ;;  %v8629_v20 = vpop.eup %8628  ;;  %8644 = vrcp.f32 %v5477_v27  ;;  %v5479_v33 = vadd.f32 1.0, %v8627_v21 }
 0x370   :  { %3780 = vadd.xlane.f32.xlu1 %v3737_v9  ;;  %v4183_v36 = vpop.xlane.xlu1 %4182  ;;  %v12120_v53 = vpop.f32.mrb[189].mxu1  ;;  %8646 = vrcp.f32 %v5481_v56  ;;  %v5483_v31 = vadd.f32 1.0, %v8629_v20 }
 0x371   :  { %7111 = vst.msk [vmem:[%s14235_s11 + $0x428] sm:$0xff] %vm383_vm4, %v4183_v36  ;;  %4005 = vadd.xlane.f32.xlu0 %v3953_v5  ;;  %v12126_v51 = vpop.f32.mrb[190].mxu1  ;;  %v14864_v5 = vld [vmem:[#allocation129_spill] sm:$0xff]  ;;  %v8631_v37 = vpop.eup %8630  ;;  %8648 = vrcp.f32 %v5476_v42 }
 0x372   :  { %v4185_v43 = vpop.xlane.xlu0 %4184  ;;  %v12132_v63 = vpop.f32.mrb[191].mxu1  ;;  %v3739_v36 = vmul.f32 %v11710_v29, %v14864_v5  ;;  %8650 = vrcp.f32 %v5480_v16 }
 0x373   :  { %7112 = vst.msk [vmem:[%s14235_s11 + $0x430] sm:$0xff] %vm383_vm4, %v4185_v43  ;;  %v8633_v52 = vpop.eup %8632  ;;  %v5478_v43 = vadd.f32 1.0, %v8631_v37  ;;  %8652 = vrcp.f32 %v5479_v33  ;;  %v14867_v33 = vpack.c.bf16 %v11636_v49, %v11626_v23  ;;  %v14869_v49 = vpack.c.bf16 %v11644_v44, %v11632_v61  ;;  %v4980_v44 = vld [vmem:[#allocation5 + $0x80] sm:$0xff] }
 0x374   :  { %3987 = vadd.xlane.f32.xlu1 %v3944_v7  ;;  %v4187_v9 = vpop.xlane.xlu1 %4186  ;;  %8331 = vmatpush3.bf16.xpose.msra.mxu0 %v14863_v59  ;;  %v8635_v27 = vpop.eup %8634  ;;  %v5482_v62 = vadd.f32 1.0, %v8633_v52  ;;  %8654 = vrcp.f32 %v5483_v31  ;;  %v4981_v52 = vld [vmem:[#allocation5 + $0x88] sm:$0xff]  ;;  %v4986_v59 = vld [vmem:[#allocation5 + $0xb0] sm:$0xff] }
 0x375   :  { %7113 = vst.msk [vmem:[%s14235_s11 + $0x438] sm:$0xff] %vm383_vm4, %v4187_v9  ;;  %3802 = vadd.xlane.f32.xlu0 %v3748_v28  ;;  %8332 = vmatprep.subr.bf16.mxu0 %v14814_v13  ;;  %v4979_v28 = vld [vmem:[#allocation5 + $0x78] sm:$0xff]  ;;  %v8637_v56 = vpop.eup %8636  ;;  %v3946_v9 = vmul.f32 %v11732_v19, %v14866_v10  ;;  %v5485_v20 = vadd.f32 1.0, %v8635_v27  ;;  %8656 = vrcp.f32 %v5478_v43  ;;  %v14868_v27 = vld [vmem:[#allocation133_spill] sm:$0xff] }
 0x376   :  { %8355 = vmatpush3.bf16.xpose.msra.mxu1 %v14865_v34  ;;  %v4189_v46 = vpop.xlane.xlu0 %4188  ;;  %v8639_v5 = vpop.eup %8638  ;;  %v5489_v34 = vadd.f32 1.0, %v8637_v56  ;;  %8658 = vrcp.f32 %v5482_v62  ;;  %v3741_v23 = vmul.f32 %v11710_v29, %v14868_v27  ;;  %v4985_v56 = vld [vmem:[#allocation5 + $0xa8] sm:$0xff]  ;;  %v3957_v62 = vmul.f32 %v11732_v19, %v10751_v6  ;;  %v14871_v27 = vld [vmem:[#allocation134_spill] sm:$0xff] }
 0x377   :  { %7114 = vst.msk [vmem:[%s14235_s11 + $0x440] sm:$0xff] %vm383_vm4, %v4189_v46  ;;  %v12161_v2 = vpop.f32.mrb[192].mxu1  ;;  %8356 = vmatprep.subr.bf16.mxu1 %v14814_v13  ;;  %v4974_v46 = vld [vmem:[#allocation5 + $0x50] sm:$0xff]  ;;  %v5484_v31 = vadd.f32 1.0, %v8639_v5  ;;  %8660 = vrcp.f32 %v5485_v20  ;;  %v7251_v6 = vmul.f32 -1.442695, %v4981_v52 }
 0x378   :  { %3784 = vadd.xlane.f32.xlu1 %v3739_v36  ;;  %v4191_v24 = vpop.xlane.xlu1 %4190  ;;  %v12164_v7 = vpop.f32.mrb[193].mxu1  ;;  %v3750_v36 = vmul.f32 %v11710_v29, %v10747_v57  ;;  %v4978_v57 = vld [vmem:[#allocation5 + $0x70] sm:$0xff]  ;;  %8662 = vrcp.f32 %v5489_v34 }
 0x379   :  { %7115 = vst.msk [vmem:[%s14235_s11 + $0x448] sm:$0xff] %vm383_vm4, %v4191_v24  ;;  %4009 = vadd.xlane.f32.xlu0 %v3955_v41  ;;  %v12170_v54 = vpop.f32.mrb[194].mxu1  ;;  %v7249_v41 = vmul.f32 -1.442695, %v4979_v28  ;;  %v12194_v24 = vpop.eup %8640  ;;  %v7244_v28 = vmul.f32 -1.442695, %v4974_v46 }
 0x37a   :  { %v4193_v42 = vpop.xlane.xlu0 %4192  ;;  %v12176_v21 = vpop.f32.mrb[195].mxu1  ;;  %v7248_v61 = vmul.f32 -1.442695, %v4978_v57  ;;  %v4982_v52 = vld [vmem:[#allocation5 + $0x90] sm:$0xff] }
 0x37b   :  { %7116 = vst.msk [vmem:[%s14235_s11 + $0x450] sm:$0xff] %vm383_vm4, %v4193_v42  ;;  %v12201_v10 = vpop.eup %8642  ;;  %8664 = vpow2.f32 %v7249_v41  ;;  %v3948_v41 = vmul.f32 %v11732_v19, %v14871_v27 }
 0x37c   :  { %3991 = vadd.xlane.f32.xlu1 %v3946_v9  ;;  %v4195_v37 = vpop.xlane.xlu1 %4194  ;;  %8334 = vmatpush3.bf16.xpose.msra.mxu0 %v14867_v33  ;;  %v12212_v42 = vpop.eup %8644  ;;  %8666 = vrcp.f32 %v5484_v31  ;;  %v4983_v33 = vld [vmem:[#allocation5 + $0x98] sm:$0xff]  ;;  %v3752_v31 = vmul.f32 %v11710_v29, %v10787_v38 }
 0x37d   :  { %7117 = vst.msk [vmem:[%s14235_s11 + $0x458] sm:$0xff] %vm383_vm4, %v4195_v37  ;;  %3806 = vadd.xlane.f32.xlu0 %v3750_v36  ;;  %8335 = vmatprep.subr.bf16.mxu0 %v14814_v13  ;;  %v4984_v36 = vld [vmem:[#allocation5 + $0xa0] sm:$0xff]  ;;  %v12216_v46 = vpop.eup %8646  ;;  %v7255_v37 = vmul.f32 -1.442695, %v4985_v56  ;;  %8668 = vpow2.f32 %v7244_v28  ;;  %v7253_v38 = vmul.f32 -1.442695, %v4983_v33 }
 0x37e   :  { %8358 = vmatpush3.bf16.xpose.msra.mxu1 %v14869_v49  ;;  %v4197_v43 = vpop.xlane.xlu0 %4196  ;;  %v12224_v57 = vpop.eup %8648  ;;  %8670 = vpow2.f32 %v7248_v61  ;;  %v7254_v27 = vmul.f32 -1.442695, %v4984_v36  ;;  %v7252_v33 = vmul.f32 -1.442695, %v4982_v52 }
 0x37f   :  { %7118 = vst.msk [vmem:[%s14235_s11 + $0x460] sm:$0xff] %vm383_vm4, %v4197_v43  ;;  %v12209_v9 = vpop.f32.mrb[196].mxu1  ;;  %8359 = vmatprep.subr.bf16.mxu1 %v14814_v13  ;;  %14870 = vst [vmem:[#allocation96_spill] sm:$0xff] %v12224_v57  ;;  %v7250_v43 = vmul.f32 -1.442695, %v4980_v44  ;;  %v14873_v44 = vpack.c.bf16 %v11668_v58, %v11659_v3  ;;  %8672 = vpow2.f32 %v7251_v6  ;;  %v3743_v3 = vmul.f32 %v11710_v29, %v10611_v30  ;;  %v14911_v57 = vld [vmem:[#allocation90_spill] sm:$0xff] }
 0x380   :  { %3788 = vadd.xlane.f32.xlu1 %v3741_v23  ;;  %v4199_v20 = vpop.xlane.xlu1 %4198  ;;  %v12214_v5 = vpop.f32.mrb[197].mxu1  ;;  %8674 = vpow2.f32 %v7255_v37  ;;  %v14875_v58 = vpack.c.bf16 %v11678_v26, %v11666_v25  ;;  %v7256_v30 = vmul.f32 -1.442695, %v4986_v59  ;;  %v4989_v25 = vld [vmem:[#allocation5 + $0xc8] sm:$0xff] }
 0x381   :  { %7119 = vst.msk [vmem:[%s14235_s11 + $0x468] sm:$0xff] %vm383_vm4, %v4199_v20  ;;  %4013 = vadd.xlane.f32.xlu0 %v3957_v62  ;;  %v12222_v34 = vpop.f32.mrb[198].mxu1  ;;  %v4987_v20 = vld [vmem:[#allocation5 + $0xb8] sm:$0xff]  ;;  %v12232_v62 = vpop.eup %8650  ;;  %8676 = vpow2.f32 %v7250_v43  ;;  %v5488_v43 = vadd.f32 1.0, %v12194_v24  ;;  %v14880_v59 = vld [vmem:[#allocation140_spill] sm:$0xff] }
 0x382   :  { %v3352_v23 = vpop.xlane.xlu0 %3351  ;;  %v12230_v49 = vpop.f32.mrb[199].mxu1  ;;  %14872 = vst [vmem:[#allocation100_spill] sm:$0xff] %v12232_v62  ;;  %v7257_v61 = vmul.f32 -1.442695, %v4987_v20  ;;  %8678 = vpow2.f32 %v7254_v27  ;;  %v7259_v24 = vmul.f32 -1.442695, %v4989_v25 }
 0x383   :  { %3413 = vst.msk [vmem:[%s14235_s11 + $0x10] sm:$0xff] %vm383_vm4, %v3352_v23  ;;  %v12242_v16 = vpop.eup %8652  ;;  %v14877_v23 = vld [vmem:[#allocation158_spill] sm:$0xff]  ;;  %8680 = vpow2.f32 %v7253_v38 }
 0x384   :  { %3995 = vadd.xlane.f32.xlu1 %v3948_v41  ;;  %v752_v28 = vpop.permute.xlu1 %751  ;;  %8337 = vmatpush3.bf16.xpose.msra.mxu0 %v14873_v44  ;;  %v12247_v40 = vpop.eup %8654  ;;  %v5487_v44 = vadd.f32 1.0, %v12201_v10  ;;  %8682 = vpow2.f32 %v7257_v61  ;;  %v3745_v10 = vmul.f32 %v11710_v29, %v14884_v4 }
 0x385   :  { %784 = vst.msk [vmem:[%s14233_s9 + $0x78] sm:$0xff] %vm383_vm4, %v752_v28  ;;  %3810 = vadd.xlane.f32.xlu0 %v3752_v31  ;;  %8338 = vmatprep.subr.bf16.mxu0 %v14814_v13  ;;  %v12254_v36 = vpop.eup %8656  ;;  %v3959_v31 = vmul.f32 %v11732_v19, %v14877_v23  ;;  %8684 = vpow2.f32 %v7252_v33  ;;  %v14883_v33 = vpack.c.bf16 %v11705_v47, %v11696_v39  ;;  %v14888_v39 = vld [vmem:[#allocation165_spill] sm:$0xff] }
 0x386   :  { %14874 = vst [vmem:[#allocation107_spill] sm:$0xff] %v12254_v36  ;;  %8361 = vmatpush3.bf16.xpose.msra.mxu1 %v14875_v58  ;;  %v3555_v6 = vpop.xlane.xlu0 %3554  ;;  %v12261_v41 = vpop.eup %8658  ;;  %v4993_v58 = vld [vmem:[#allocation5 + $0xe8] sm:$0xff]  ;;  %8686 = vpow2.f32 %v7256_v30  ;;  %v14886_v30 = vld [vmem:[#allocation66_spill] sm:$0xff] }
 0x387   :  { %14876 = vst [vmem:[#allocation115_spill] sm:$0xff] %v12261_v41  ;;  %7012 = vst.msk [vmem:[%s14235_s11 + $0x110] sm:$0xff] %vm383_vm4, %v3555_v6  ;;  %v12269_v37 = vpop.f32.mrb[200].mxu1  ;;  %8362 = vmatprep.subr.bf16.mxu1 %v14814_v13  ;;  %v12272_v26 = vpop.eup %8660  ;;  %v3950_v6 = vmul.f32 %v11732_v19, %v14880_v59  ;;  %8688 = vrcp.f32 %v5488_v43  ;;  %v7263_v25 = vmul.f32 -1.442695, %v4993_v58  ;;  %v3961_v43 = vmul.f32 %v11732_v19, %v14888_v39 }
 0x388   :  { %14878 = vst [vmem:[#allocation75_spill] sm:$0xff] %v12272_v26  ;;  %3792 = vadd.xlane.f32.xlu1 %v3743_v3  ;;  %v12274_v52 = vpop.f32.mrb[201].mxu1  ;;  %v12277_v20 = vpop.eup %8662  ;;  %8690 = vrcp.f32 %v5487_v44 }
 0x389   :  { %14879 = vst [vmem:[#allocation77_spill] sm:$0xff] %v12277_v20  ;;  %4017 = vadd.xlane.f32.xlu0 %v3959_v31  ;;  %v12279_v28 = vpop.f32.mrb[202].mxu1  ;;  %v8665_v27 = vpop.eup %8664  ;;  %v14882_v31 = vld [vmem:[#allocation163_spill] sm:$0xff]  ;;  %8692 = vpow2.f32 %v7259_v24 }
 0x38a   :  { %v3354_v23 = vpop.xlane.xlu0 %3353  ;;  %v12286_v56 = vpop.f32.mrb[203].mxu1  ;;  %v3754_v50 = vmul.f32 %v11710_v29, %v14882_v31  ;;  %v5491_v61 = vadd.f32 1.0, %v8665_v27  ;;  %v14885_v27 = vld [vmem:[#allocation70_spill] sm:$0xff] }
 0x38b   :  { %v12288_v38 = vpop.eup %8666  ;;  %3414 = vst.msk [vmem:[%s14235_s11 + $0x18] sm:$0xff] %vm383_vm4, %v3354_v23  ;;  %v14887_v12 = vpack.c.bf16 %v14885_v27, %v14886_v30  ;;  %v14889_v27 = vld [vmem:[#allocation143_spill] sm:$0xff] }
 0x38c   :  { %14881 = vst [vmem:[#allocation79_spill] sm:$0xff] %v12288_v38  ;;  %v8669_v59 = vpop.eup %8668  ;;  %3999 = vadd.xlane.f32.xlu1 %v3950_v6  ;;  %8340 = vmatpush3.bf16.xpose.msra.mxu0 %v14883_v33  ;;  %8694 = vrcp.f32 %v5491_v61  ;;  %v3952_v30 = vmul.f32 %v11732_v19, %v14889_v27 }
 0x38d   :  { %v8671_v3 = vpop.eup %8670  ;;  %3814 = vadd.xlane.f32.xlu0 %v3754_v50  ;;  %8341 = vmatprep.subr.bf16.mxu0 %v14814_v13  ;;  %v5486_v31 = vadd.f32 1.0, %v8669_v59  ;;  %8696 = vpow2.f32 %v7263_v25  ;;  %v14890_v25 = vld [vmem:[#allocation171_spill] sm:$0xff] }
 0x38e   :  { %v8673_v23 = vpop.eup %8672  ;;  %8364 = vmatpush3.bf16.xpose.msra.mxu1 %v14887_v12  ;;  %v4201_v6 = vpop.xlane.xlu0 %4200  ;;  %v5490_v55 = vadd.f32 1.0, %v8671_v3  ;;  %v3756_v39 = vmul.f32 %v11710_v29, %v14890_v25 }
 0x38f   :  { %v8675_v47 = vpop.eup %8674  ;;  %7120 = vst.msk [vmem:[%s14235_s11 + $0x470] sm:$0xff] %vm383_vm4, %v4201_v6  ;;  %v12313_v50 = vpop.f32.mrb[204].mxu1  ;;  %8365 = vmatprep.subr.bf16.mxu1 %v14814_v13  ;;  %v5493_v4 = vadd.f32 1.0, %v8673_v23  ;;  %8698 = vrcp.f32 %v5486_v31  ;;  %v14895_v31 = vld [vmem:[#allocation82_spill] sm:$0xff] }
 0x390   :  { %v8677_v44 = vpop.eup %8676  ;;  %3796 = vadd.xlane.f32.xlu1 %v3745_v10  ;;  %v12316_v12 = vpop.f32.mrb[205].mxu1  ;;  %v5497_v58 = vadd.f32 1.0, %v8675_v47  ;;  %8700 = vrcp.f32 %v5490_v55  ;;  %v14891_v55 = vld [vmem:[#allocation74_spill] sm:$0xff] }
 0x391   :  { %v8679_v3 = vpop.eup %8678  ;;  %4021 = vadd.xlane.f32.xlu0 %v3961_v43  ;;  %v12318_v24 = vpop.f32.mrb[206].mxu1  ;;  %v5492_v59 = vadd.f32 1.0, %v8677_v44  ;;  %8702 = vrcp.f32 %v5493_v4  ;;  %v4988_v44 = vld [vmem:[#allocation5 + $0xc0] sm:$0xff]  ;;  %v14894_v4 = vld [vmem:[#allocation146_spill] sm:$0xff] }
 0x392   :  { %v8681_v33 = vpop.eup %8680  ;;  %v3356_v23 = vpop.xlane.xlu0 %3355  ;;  %v5496_v10 = vadd.f32 1.0, %v8679_v3  ;;  %v14892_v3 = vpack.c.bf16 %v11747_v60, %v14891_v55  ;;  %8704 = vrcp.f32 %v5497_v58  ;;  %v7258_v58 = vmul.f32 -1.442695, %v4988_v44 }
 0x393   :  { %v12324_v6 = vpop.f32.mrb[207].mxu1  ;;  %v8683_v47 = vpop.eup %8682  ;;  %3415 = vst.msk [vmem:[%s14235_s11 + $0x20] sm:$0xff] %vm383_vm4, %v3356_v23  ;;  %v5495_v43 = vadd.f32 1.0, %v8681_v33  ;;  %8706 = vrcp.f32 %v5492_v59  ;;  %v3747_v33 = vmul.f32 %v11710_v29, %v14894_v4  ;;  %v4990_v4 = vld [vmem:[#allocation5 + $0xd0] sm:$0xff] }
 0x394   :  { %v8685_v27 = vpop.eup %8684  ;;  %4003 = vadd.xlane.f32.xlu1 %v3952_v30  ;;  %8343 = vmatpush3.bf16.xpose.msra.mxu0 %v14892_v3  ;;  %v5499_v61 = vadd.f32 1.0, %v8683_v47  ;;  %v14896_v30 = vld [vmem:[#allocation78_spill] sm:$0xff]  ;;  %8708 = vrcp.f32 %v5496_v10  ;;  %v7262_v3 = vmul.f32 -1.442695, %v4992_v45 }
 0x395   :  { %v8687_v25 = vpop.eup %8686  ;;  %3818 = vadd.xlane.f32.xlu0 %v3756_v39  ;;  %8344 = vmatprep.subr.bf16.mxu0 %v14814_v13  ;;  %v5494_v23 = vadd.f32 1.0, %v8685_v27  ;;  %v14897_v41 = vpack.c.bf16 %v14895_v31, %v14896_v30  ;;  %v4991_v47 = vld [vmem:[#allocation5 + $0xd8] sm:$0xff]  ;;  %v14899_v39 = vld [vmem:[#allocation173_spill] sm:$0xff]  ;;  %8710 = vrcp.f32 %v5495_v43  ;;  %v14901_v43 = vld [vmem:[#allocation147_spill] sm:$0xff] }
 0x396   :  { %v12338_v38 = vpop.eup %8688  ;;  %v3559_v60 = vpop.xlane.xlu0 %3558  ;;  %v3963_v59 = vmul.f32 %v11732_v19, %v14899_v39  ;;  %v4995_v31 = vld [vmem:[#allocation5 + $0xf8] sm:$0xff]  ;;  %8712 = vrcp.f32 %v5499_v61  ;;  %v4997_v61 = vld [vmem:[#allocation5 + $0x108] sm:$0xff] }
 0x397   :  { %14893 = vst [vmem:[#allocation83_spill] sm:$0xff] %v12338_v38  ;;  %8367 = vmatpush3.bf16.xpose.msra.mxu1 %v14897_v41  ;;  %v12345_v55 = vpop.eup %8690  ;;  %7014 = vst.msk [vmem:[%s14235_s11 + $0x120] sm:$0xff] %vm383_vm4, %v3559_v60  ;;  %v12353_v27 = vpop.f32.mrb[208].mxu1  ;;  %v5498_v41 = vadd.f32 1.0, %v8687_v25  ;;  %8714 = vrcp.f32 %v5494_v23  ;;  %v7261_v60 = vmul.f32 -1.442695, %v4991_v47  ;;  %v3954_v25 = vmul.f32 %v11732_v19, %v14901_v43 }
 0x398   :  { %14898 = vst [vmem:[#allocation63_spill] sm:$0xff] %v12345_v55  ;;  %8368 = vmatprep.subr.bf16.mxu1 %v14814_v13  ;;  %v12356_v10 = vpop.eup %8692  ;;  %3800 = vadd.xlane.f32.xlu1 %v3747_v33  ;;  %v12358_v44 = vpop.f32.mrb[209].mxu1  ;;  %v4994_v38 = vld [vmem:[#allocation5 + $0xf0] sm:$0xff]  ;;  %8716 = vpow2.f32 %v7258_v58  ;;  %v7265_v45 = vmul.f32 -1.442695, %v4995_v31  ;;  %v5001_v33 = vld [vmem:[#allocation5 + $0x128] sm:$0xff] }
 0x399   :  { %v12360_v30 = vpop.eup %8694  ;;  %4025 = vadd.xlane.f32.xlu0 %v3963_v59  ;;  %v12362_v39 = vpop.f32.mrb[210].mxu1  ;;  %v14903_v59 = vld [vmem:[#allocation164_spill] sm:$0xff]  ;;  %8718 = vrcp.f32 %v5498_v41  ;;  %v7260_v43 = vmul.f32 -1.442695, %v4990_v4  ;;  %v14905_v58 = vld [vmem:[#allocation86_spill] sm:$0xff]  ;;  %v5000_v41 = vld [vmem:[#allocation5 + $0x120] sm:$0xff] }
 0x39a   :  { %14900 = vst [vmem:[#allocation85_spill] sm:$0xff] %v12360_v30  ;;  %v8697_v55 = vpop.eup %8696  ;;  %v4205_v36 = vpop.xlane.xlu0 %4204  ;;  %v4164_v23 = vmul.f32 %v11544_v32, %v14903_v59  ;;  %v14906_v31 = vpack.c.bf16 %v11781_v14, %v14905_v58  ;;  %8720 = vpow2.f32 %v7262_v3  ;;  %v7264_v59 = vmul.f32 -1.442695, %v4994_v38  ;;  %v14909_v47 = vld [vmem:[#allocation150_spill] sm:$0xff] }
 0x39b   :  { %v12368_v20 = vpop.f32.mrb[211].mxu1  ;;  %v12370_v30 = vpop.eup %8698  ;;  %7122 = vst.msk [vmem:[%s14235_s11 + $0x480] sm:$0xff] %vm383_vm4, %v4205_v36  ;;  %8722 = vpow2.f32 %v7261_v60  ;;  %v7267_v36 = vmul.f32 -1.442695, %v4997_v61  ;;  %v7271_v38 = vmul.f32 -1.442695, %v5001_v33 }
 0x39c   :  { %14902 = vst [vmem:[#allocation91_spill] sm:$0xff] %v12370_v30  ;;  %v12380_v26 = vpop.eup %8700  ;;  %4007 = vadd.xlane.f32.xlu1 %v3954_v25  ;;  %8346 = vmatpush3.bf16.xpose.msra.mxu0 %v14906_v31  ;;  %v4996_v30 = vld [vmem:[#allocation5 + $0x100] sm:$0xff]  ;;  %v3749_v25 = vmul.f32 %v11710_v29, %v14909_v47  ;;  %8724 = vpow2.f32 %v7265_v45  ;;  %v4999_v58 = vld [vmem:[#allocation5 + $0x118] sm:$0xff]  ;;  %v7270_v45 = vmul.f32 -1.442695, %v5000_v41 }
 0x39d   :  { %14904 = vst [vmem:[#allocation93_spill] sm:$0xff] %v12380_v26  ;;  %v12385_v62 = vpop.eup %8702  ;;  %4220 = vadd.xlane.f32.xlu0 %v4164_v23  ;;  %8371 = vmatprep.subr.bf16.mxu0 %v14814_v13  ;;  %v14910_v26 = vld [vmem:[#allocation92_spill] sm:$0xff]  ;;  %v12406_v61 = vld [vmem:[%s14230_s6] sm:$0xff]  ;;  %8726 = vpow2.f32 %v7260_v43  ;;  %s6692_s6 = sshll.u32 %s9391_s24, 4  ;;  %s6693_s6 = int_to_ptr.vmem [resolvable:$true] %s6692_s6 }
 0x39e   :  { %14907 = vst [vmem:[#allocation99_spill] sm:$0xff] %v12385_v62  ;;  %v12388_v4 = vpop.eup %8704  ;;  %v14912_v14 = vpack.c.bf16 %v14910_v26, %v14911_v57  ;;  %v3759_v3 = vpop.xlane.xlu0 %3758  ;;  %v14914_v23 = vld [vmem:[#allocation172_spill] sm:$0xff]  ;;  %v4269_v57 = vrot.slane %v12406_v61, 4  ;;  %v7266_v26 = vmul.f32 -1.442695, %v4996_v30  ;;  %8728 = vpow2.f32 %v7264_v59  ;;  %v14919_v59 = vld [vmem:[#allocation22_spill] sm:$0xff]  ;;  %p9310_p11 = scmp.lt.s32.totalorder %s6693_s6, %s6693_s6 }
 0x39f   :  { %14908 = vst [vmem:[#allocation101_spill] sm:$0xff] %v12388_v4  ;;  %v12395_v31 = vpop.eup %8706  ;;  %v4166_v60 = vmul.f32 %v11544_v32, %v14914_v23  ;;  %7042 = vst.msk [vmem:[%s14235_s11 + $0x200] sm:$0xff] %vm383_vm4, %v3759_v3  ;;  %8730 = vpow2.f32 %v7267_v36  ;;  %v5003_v3 = vld [vmem:[#allocation5 + $0x138] sm:$0xff]  ;;  %v7269_v23 = vmul.f32 -1.442695, %v4999_v58  ;;  %v14917_v4 = vld [vmem:[#allocation151_spill] sm:$0xff] }
 0x3a0   :  { %8370 = vmatpush3.bf16.xpose.msra.mxu1 %v14912_v14  ;;  %14913 = vst [vmem:[#allocation81_spill] sm:$0xff] %v12395_v31  ;;  %v12410_v33 = vpop.eup %8708  ;;  %3804 = vadd.xlane.f32.xlu1 %v3749_v25  ;;  %v4476_v14 = vrot.slane %v12406_v61, 5  ;;  %v3956_v62 = vmul.f32 %v11732_v19, %v14917_v4  ;;  %v5501_v30 = vadd.f32 1.0, %v12356_v10  ;;  %8732 = vpow2.f32 %v7271_v38  ;;  %v4998_v4 = vld [vmem:[#allocation5 + $0x110] sm:$0xff] }
 0x3a1   :  { %8395 = vmatprep.subr.bf16.mxu1 %v14814_v13  ;;  %14915 = vst [vmem:[#allocation104_spill] sm:$0xff] %v12410_v33  ;;  %v12412_v47 = vpop.eup %8710  ;;  %4224 = vadd.xlane.f32.xlu0 %v4166_v60  ;;  %v4345_v41 = vsub.s32 5, %v14919_v59  ;;  %v14920_v33 = vld [vmem:[#allocation61_spill] sm:$0xff]  ;;  %v5505_v36 = vadd.f32 1.0, %v8697_v55  ;;  %8734 = vpow2.f32 %v7266_v26  ;;  %v14921_v10 = vpack.c.bf16 %v12033_v0, %v12023_v8  ;;  %v12443_v26 = vld [vmem:[%s14229_s5] sm:$0xff] }
 0x3a2   :  { %v12415_v31 = vpop.eup %8712  ;;  %v3966_v43 = vpop.xlane.xlu0 %3965  ;;  %v4168_v60 = vmul.f32 %v11544_v32, %v14920_v33  ;;  %8736 = vpow2.f32 %v7270_v45  ;;  %v7273_v38 = vmul.f32 -1.442695, %v5003_v3  ;;  %v7268_v8 = vmul.f32 -1.442695, %v4998_v4  ;;  %v14925_v4 = vld [vmem:[#allocation155_spill] sm:$0xff] }
 0x3a3   :  { %14916 = vst [vmem:[#allocation106_spill] sm:$0xff] %v12415_v31  ;;  %v12420_v25 = vpop.eup %8714  ;;  %7074 = vst.msk [vmem:[%s14235_s11 + $0x300] sm:$0xff] %vm383_vm4, %v3966_v43  ;;  %8120 = vmatmul.mubr.f32.vlgmr.msra.gmra.mrb[208].mxu0 %v4269_v57  ;;  %8738 = vpow2.f32 %v7269_v23  ;;  %v14922_v43 = vld [vmem:[#allocation154_spill] sm:$0xff]  ;;  %v14923_v57 = vpack.c.bf16 %v12040_v48, %v12027_v18  ;;  %v12446_v45 = vrot.slane %v12443_v26, %v4345_v41 }
 0x3a4   :  { %14918 = vst [vmem:[#allocation87_spill] sm:$0xff] %v12420_v25  ;;  %v8717_v58 = vpop.eup %8716  ;;  %4011 = vadd.xlane.f32.xlu1 %v3956_v62  ;;  %8373 = vmatpush3.bf16.xpose.msra.mxu0 %v14921_v10  ;;  %v3751_v55 = vmul.f32 %v11710_v29, %v14922_v43  ;;  %8740 = vrcp.f32 %v5501_v30 }
 0x3a5   :  { %v12432_v25 = vpop.eup %8718  ;;  %4228 = vadd.xlane.f32.xlu0 %v4168_v60  ;;  %v5500_v33 = vadd.f32 1.0, %v8717_v58  ;;  %8374 = vmatprep.subr.bf16.mxu0 %v14814_v13  ;;  %8742 = vrcp.f32 %v5505_v36  ;;  %v3958_v58 = vmul.f32 %v11732_v19, %v14925_v4  ;;  %v5005_v4 = vld [vmem:[#allocation5 + $0x148] sm:$0xff] }
 0x3a6   :  { %v8721_v31 = vpop.eup %8720  ;;  %v4209_v62 = vpop.xlane.xlu0 %4208  ;;  %8189 = vmatprep.mubr.msk.f32.mxu0 %vm9389_vm14, %v14798_v35  ;;  %8744 = vpow2.f32 %v7273_v38 }
 0x3a7   :  { %8155 = vmatmul.mubr.f32.vlgmr.msra.gmra.mrb[216].mxu1 %v4476_v14  ;;  %v8723_v0 = vpop.eup %8722  ;;  %v14924_v14 = vld [vmem:[#allocation18_spill] sm:$0xff]  ;;  %7124 = vst.msk [vmem:[%s14235_s11 + $0x490] sm:$0xff] %vm383_vm4, %v4209_v62  ;;  %v5504_v18 = vadd.f32 1.0, %v8721_v31  ;;  %8746 = vrcp.f32 %v5500_v33  ;;  %v14927_v33 = vpack.c.bf16 %v12082_v22, %v12069_v17 }
 0x3a8   :  { %8397 = vmatpush3.bf16.xpose.msra.mxu1 %v14923_v57  ;;  %v4170_v3 = vmul.f32 %v11544_v32, %v14924_v14  ;;  %v8725_v48 = vpop.eup %8724  ;;  %3808 = vadd.xlane.f32.xlu1 %v3751_v55  ;;  %v5503_v23 = vadd.f32 1.0, %v8723_v0  ;;  %8748 = vpow2.f32 %v7268_v8  ;;  %v14926_v31 = vld [vmem:[#allocation94_spill] sm:$0xff]  ;;  %v5002_v0 = vld [vmem:[#allocation5 + $0x130] sm:$0xff] }
 0x3a9   :  { %8398 = vmatprep.subr.bf16.mxu1 %v14814_v13  ;;  %8224 = vmatprep.mubr.msk.f32.mxu1 %vm9389_vm14, %v14798_v35  ;;  %v8727_v30 = vpop.eup %8726  ;;  %v5507_v41 = vadd.f32 1.0, %v8725_v48  ;;  %v4347_v55 = vmul.f32 %v12446_v45, %v14926_v31  ;;  %8750 = vrcp.f32 %v5504_v18  ;;  %v14929_v48 = vpack.c.bf16 %v12088_v11, %v12074_v1  ;;  %v5009_v11 = vld [vmem:[#allocation5 + $0x168] sm:$0xff] }
 0x3aa   :  { %4232 = vadd.xlane.f32.xlu0 %v4170_v3  ;;  %v8729_v60 = vpop.eup %8728  ;;  %v3763_v10 = vpop.xlane.xlu0 %3762  ;;  %v5502_v43 = vadd.f32 1.0, %v8727_v30  ;;  %8752 = vrcp.f32 %v5503_v23  ;;  %v14928_v3 = vld [vmem:[#allocation159_spill] sm:$0xff]  ;;  %v14930_v23 = vld [vmem:[#allocation105_spill] sm:$0xff]  ;;  %v7272_v1 = vmul.f32 -1.442695, %v5002_v0 }
 0x3ab   :  { %v8731_v36 = vpop.eup %8730  ;;  %7044 = vst.msk [vmem:[%s14235_s11 + $0x210] sm:$0xff] %vm383_vm4, %v3763_v10  ;;  %v5506_v35 = vadd.f32 1.0, %v8729_v60  ;;  %8754 = vrcp.f32 %v5507_v41  ;;  %v3753_v18 = vmul.f32 %v11710_v29, %v14928_v3  ;;  %v4349_v60 = vmul.f32 %v12446_v45, %v14930_v23  ;;  %v5007_v3 = vld [vmem:[#allocation5 + $0x158] sm:$0xff] }
 0x3ac   :  { %v8733_v38 = vpop.eup %8732  ;;  %4015 = vadd.xlane.f32.xlu1 %v3958_v58  ;;  %8376 = vmatpush3.bf16.xpose.msra.mxu0 %v14927_v33  ;;  %v5509_v57 = vadd.f32 1.0, %v8731_v36  ;;  %8756 = vrcp.f32 %v5502_v43  ;;  %v5004_v36 = vld [vmem:[#allocation5 + $0x140] sm:$0xff]  ;;  %v7275_v33 = vmul.f32 -1.442695, %v5005_v4 }
 0x3ad   :  { %v8735_v62 = vpop.eup %8734  ;;  %8377 = vmatprep.subr.bf16.mxu0 %v14814_v13  ;;  %v5513_v8 = vadd.f32 1.0, %v8733_v38  ;;  %8758 = vrcp.f32 %v5506_v35 }
 0x3ae   :  { %4379 = vadd.xlane.f32.xlu0 %v4347_v55  ;;  %v8737_v14 = vpop.eup %8736  ;;  %v3970_v30 = vpop.xlane.xlu0 %3969  ;;  %v5508_v17 = vadd.f32 1.0, %v8735_v62  ;;  %8760 = vrcp.f32 %v5509_v57  ;;  %v14931_v55 = vld [vmem:[#allocation160_spill] sm:$0xff]  ;;  %v5008_v62 = vld [vmem:[#allocation5 + $0x160] sm:$0xff]  ;;  %v14932_v57 = vld [vmem:[#allocation117_spill] sm:$0xff] }
 0x3af   :  { %v8739_v22 = vpop.eup %8738  ;;  %7076 = vst.msk [vmem:[%s14235_s11 + $0x310] sm:$0xff] %vm383_vm4, %v3970_v30  ;;  %v5512_v41 = vadd.f32 1.0, %v8737_v14  ;;  %8762 = vrcp.f32 %v5513_v8  ;;  %v3960_v38 = vmul.f32 %v11732_v19, %v14931_v55  ;;  %v4351_v0 = vmul.f32 %v12446_v45, %v14932_v57  ;;  %v5017_v57 = vld [vmem:[#allocation5 + $0x1a8] sm:$0xff] }
 0x3b0   :  { %8400 = vmatpush3.bf16.xpose.msra.mxu1 %v14929_v48  ;;  %v12483_v58 = vpop.eup %8740  ;;  %3812 = vadd.xlane.f32.xlu1 %v3753_v18  ;;  %v5511_v43 = vadd.f32 1.0, %v8739_v22  ;;  %8764 = vrcp.f32 %v5508_v17  ;;  %v7279_v8 = vmul.f32 -1.442695, %v5009_v11  ;;  %v14933_v48 = vpack.c.bf16 %v12126_v51, %v12117_v15  ;;  %v5011_v17 = vld [vmem:[#allocation5 + $0x178] sm:$0xff] }
 0x3b1   :  { %8401 = vmatprep.subr.bf16.mxu1 %v14814_v13  ;;  %v12485_v10 = vpop.eup %8742  ;;  %8766 = vrcp.f32 %v5512_v41  ;;  %v7274_v30 = vmul.f32 -1.442695, %v5004_v36  ;;  %v5006_v41 = vld [vmem:[#allocation5 + $0x150] sm:$0xff]  ;;  %v14934_v11 = vld [vmem:[#allocation166_spill] sm:$0xff]  ;;  %v14935_v15 = vpack.c.bf16 %v12132_v63, %v12120_v53  ;;  %v5013_v53 = vld [vmem:[#allocation5 + $0x188] sm:$0xff] }
 0x3b2   :  { %4383 = vadd.xlane.f32.xlu0 %v4349_v60  ;;  %v12487_v31 = vpop.eup %8744  ;;  %v4213_v35 = vpop.xlane.xlu0 %4212  ;;  %8768 = vpow2.f32 %v7272_v1  ;;  %v7278_v60 = vmul.f32 -1.442695, %v5008_v62  ;;  %v3755_v55 = vmul.f32 %v11710_v29, %v14934_v11  ;;  %v7277_v1 = vmul.f32 -1.442695, %v5007_v3  ;;  %v14937_v11 = vld [vmem:[#allocation168_spill] sm:$0xff] }
 0x3b3   :  { %v12491_v14 = vpop.eup %8746  ;;  %7126 = vst.msk [vmem:[%s14235_s11 + $0x4a0] sm:$0xff] %vm383_vm4, %v4213_v35  ;;  %8770 = vrcp.f32 %v5511_v43  ;;  %v5010_v43 = vld [vmem:[#allocation5 + $0x170] sm:$0xff]  ;;  %v7281_v62 = vmul.f32 -1.442695, %v5011_v17 }
 0x3b4   :  { %v8749_v18 = vpop.eup %8748  ;;  %4019 = vadd.xlane.f32.xlu1 %v3960_v38  ;;  %8379 = vmatpush3.bf16.xpose.msra.mxu0 %v14933_v48  ;;  %8772 = vpow2.f32 %v7275_v33  ;;  %v14936_v38 = vld [vmem:[#allocation125_spill] sm:$0xff]  ;;  %v7276_v33 = vmul.f32 -1.442695, %v5006_v41  ;;  %v7280_v48 = vmul.f32 -1.442695, %v5010_v43  ;;  %v14938_v41 = vld [vmem:[#allocation130_spill] sm:$0xff] }
 0x3b5   :  { %v12502_v22 = vpop.eup %8750  ;;  %v3557_v23 = vpop.xlane.xlu1 %3556  ;;  %8380 = vmatprep.subr.bf16.mxu0 %v14814_v13  ;;  %v4353_v35 = vmul.f32 %v12446_v45, %v14936_v38  ;;  %8774 = vpow2.f32 %v7279_v8  ;;  %v5515_v38 = vadd.f32 1.0, %v12487_v31 }
 0x3b6   :  { %4387 = vadd.xlane.f32.xlu0 %v4351_v0  ;;  %v12505_v4 = vpop.eup %8752  ;;  %7013 = vst.msk [vmem:[%s14235_s11 + $0x118] sm:$0xff] %vm383_vm4, %v3557_v23  ;;  %v3767_v51 = vpop.xlane.xlu0 %3766  ;;  %8776 = vpow2.f32 %v7274_v30  ;;  %v7283_v30 = vmul.f32 -1.442695, %v5013_v53 }
 0x3b7   :  { %v12516_v36 = vpop.eup %8754  ;;  %7046 = vst.msk [vmem:[%s14235_s11 + $0x220] sm:$0xff] %vm383_vm4, %v3767_v51  ;;  %8778 = vpow2.f32 %v7278_v60  ;;  %v7287_v60 = vmul.f32 -1.442695, %v5017_v57  ;;  %v5012_v51 = vld [vmem:[#allocation5 + $0x180] sm:$0xff] }
 0x3b8   :  { %8403 = vmatpush3.bf16.xpose.msra.mxu1 %v14935_v15  ;;  %v12525_v63 = vpop.eup %8756  ;;  %3816 = vadd.xlane.f32.xlu1 %v3755_v55  ;;  %v3962_v15 = vmul.f32 %v11732_v19, %v14937_v11  ;;  %8780 = vpow2.f32 %v7277_v1  ;;  %v4355_v55 = vmul.f32 %v12446_v45, %v14938_v41  ;;  %v14939_v1 = vpack.c.bf16 %v12170_v54, %v12161_v2  ;;  %v14940_v11 = vld [vmem:[#allocation175_spill] sm:$0xff] }
 0x3b9   :  { %8404 = vmatprep.subr.bf16.mxu1 %v14814_v13  ;;  %v12527_v0 = vpop.eup %8758  ;;  %v4203_v3 = vpop.xlane.xlu1 %4202  ;;  %8782 = vpow2.f32 %v7281_v62  ;;  %v5016_v62 = vld [vmem:[#allocation5 + $0x1a0] sm:$0xff]  ;;  %v14941_v2 = vpack.c.bf16 %v12176_v21, %v12164_v7  ;;  %v7282_v31 = vmul.f32 -1.442695, %v5012_v51  ;;  %v14943_v51 = vld [vmem:[#allocation177_spill] sm:$0xff] }
 0x3ba   :  { %4391 = vadd.xlane.f32.xlu0 %v4353_v35  ;;  %v12529_v23 = vpop.eup %8760  ;;  %7121 = vst.msk [vmem:[%s14235_s11 + $0x478] sm:$0xff] %vm383_vm4, %v4203_v3  ;;  %v3974_v8 = vpop.xlane.xlu0 %3973  ;;  %8784 = vpow2.f32 %v7276_v33  ;;  %v5510_v3 = vadd.f32 1.0, %v8749_v18  ;;  %v14942_v18 = vld [vmem:[#allocation135_spill] sm:$0xff]  ;;  %v7286_v7 = vmul.f32 -1.442695, %v5016_v62 }
 0x3bb   :  { %v12537_v17 = vpop.eup %8762  ;;  %7078 = vst.msk [vmem:[%s14235_s11 + $0x320] sm:$0xff] %vm383_vm4, %v3974_v8  ;;  %8786 = vpow2.f32 %v7280_v48  ;;  %v4357_v48 = vmul.f32 %v12446_v45, %v14942_v18 }
 0x3bc   :  { %v12545_v43 = vpop.eup %8764  ;;  %4023 = vadd.xlane.f32.xlu1 %v3962_v15  ;;  %8382 = vmatpush3.bf16.xpose.msra.mxu0 %v14939_v1  ;;  %v3757_v15 = vmul.f32 %v11710_v29, %v14940_v11  ;;  %8788 = vpow2.f32 %v7283_v30  ;;  %v3964_v1 = vmul.f32 %v11732_v19, %v14943_v51  ;;  %v14945_v11 = vpack.c.bf16 %v12222_v34, %v12209_v9 }
 0x3bd   :  { %v12551_v35 = vpop.eup %8766  ;;  %v3358_v53 = vpop.xlane.xlu1 %3357  ;;  %8383 = vmatprep.subr.bf16.mxu0 %v14814_v13  ;;  %8790 = vpow2.f32 %v7287_v60  ;;  %v14947_v9 = vpack.c.bf16 %v12230_v49, %v12214_v5 }
 0x3be   :  { %4395 = vadd.xlane.f32.xlu0 %v4355_v55  ;;  %v8769_v57 = vpop.eup %8768  ;;  %3416 = vst.msk [vmem:[%s14235_s11 + $0x28] sm:$0xff] %vm383_vm4, %v3358_v53  ;;  %v4217_v54 = vpop.xlane.xlu0 %4216  ;;  %8792 = vrcp.f32 %v5515_v38  ;;  %v14944_v38 = vld [vmem:[#allocation139_spill] sm:$0xff] }
 0x3bf   :  { %v12563_v33 = vpop.eup %8770  ;;  %7128 = vst.msk [vmem:[%s14235_s11 + $0x4b0] sm:$0xff] %vm383_vm4, %v4217_v54  ;;  %v5514_v29 = vadd.f32 1.0, %v8769_v57  ;;  %8794 = vrcp.f32 %v5510_v3  ;;  %v4359_v62 = vmul.f32 %v12446_v45, %v14944_v38  ;;  %v14949_v38 = vld [vmem:[#allocation176_spill] sm:$0xff] }
 0x3c0   :  { %8406 = vmatpush3.bf16.xpose.msra.mxu1 %v14941_v2  ;;  %v8773_v8 = vpop.eup %8772  ;;  %3820 = vadd.xlane.f32.xlu1 %v3757_v15  ;;  %8796 = vpow2.f32 %v7282_v31 }
 0x3c1   :  { %8407 = vmatprep.subr.bf16.mxu1 %v14814_v13  ;;  %v8775_v21 = vpop.eup %8774  ;;  %v3561_v30 = vpop.xlane.xlu1 %3560  ;;  %v5517_v41 = vadd.f32 1.0, %v8773_v8  ;;  %8798 = vrcp.f32 %v5514_v29 }
 0x3c2   :  { %4399 = vadd.xlane.f32.xlu0 %v4357_v48  ;;  %v8777_v55 = vpop.eup %8776  ;;  %7015 = vst.msk [vmem:[%s14235_s11 + $0x128] sm:$0xff] %vm383_vm4, %v3561_v30  ;;  %v3771_v53 = vpop.xlane.xlu0 %3770  ;;  %v5521_v60 = vadd.f32 1.0, %v8775_v21  ;;  %8800 = vpow2.f32 %v7286_v7  ;;  %v14946_v48 = vld [vmem:[#allocation169_spill] sm:$0xff]  ;;  %v14948_v21 = vld [vmem:[#allocation144_spill] sm:$0xff] }
 0x3c3   :  { %v8779_v57 = vpop.eup %8778  ;;  %7048 = vst.msk [vmem:[%s14235_s11 + $0x230] sm:$0xff] %vm383_vm4, %v3771_v53  ;;  %v5516_v3 = vadd.f32 1.0, %v8777_v55  ;;  %8802 = vrcp.f32 %v5517_v41  ;;  %v4165_v29 = vmul.f32 %v11544_v32, %v14946_v48  ;;  %v4361_v30 = vmul.f32 %v12446_v45, %v14948_v21  ;;  %v5015_v55 = vld [vmem:[#allocation5 + $0x198] sm:$0xff] }
 0x3c4   :  { %v8781_v19 = vpop.eup %8780  ;;  %4027 = vadd.xlane.f32.xlu1 %v3964_v1  ;;  %8385 = vmatpush3.bf16.xpose.msra.mxu0 %v14945_v11  ;;  %v5520_v15 = vadd.f32 1.0, %v8779_v57  ;;  %8804 = vrcp.f32 %v5521_v60  ;;  %v5019_v60 = vld [vmem:[#allocation5 + $0x1b8] sm:$0xff]  ;;  %v5014_v11 = vld [vmem:[#allocation5 + $0x190] sm:$0xff] }
 0x3c5   :  { %v8783_v2 = vpop.eup %8782  ;;  %v4207_v54 = vpop.xlane.xlu1 %4206  ;;  %8386 = vmatprep.subr.bf16.mxu0 %v14814_v13  ;;  %v5519_v31 = vadd.f32 1.0, %v8781_v19  ;;  %8806 = vrcp.f32 %v5516_v3  ;;  %v7285_v19 = vmul.f32 -1.442695, %v5015_v55  ;;  %v7284_v21 = vmul.f32 -1.442695, %v5014_v11  ;;  %v14952_v55 = vld [vmem:[#allocation181_spill] sm:$0xff] }
 0x3c6   :  { %4403 = vadd.xlane.f32.xlu0 %v4359_v62  ;;  %v8785_v18 = vpop.eup %8784  ;;  %7123 = vst.msk [vmem:[%s14235_s11 + $0x488] sm:$0xff] %vm383_vm4, %v4207_v54  ;;  %v3978_v34 = vpop.xlane.xlu0 %3977  ;;  %v5523_v8 = vadd.f32 1.0, %v8783_v2  ;;  %8808 = vrcp.f32 %v5520_v15  ;;  %v4167_v62 = vmul.f32 %v11544_v32, %v14949_v38  ;;  %v14950_v2 = vld [vmem:[#allocation148_spill] sm:$0xff] }
 0x3c7   :  { %v8787_v7 = vpop.eup %8786  ;;  %7080 = vst.msk [vmem:[%s14235_s11 + $0x330] sm:$0xff] %vm383_vm4, %v3978_v34  ;;  %v5518_v41 = vadd.f32 1.0, %v8785_v18  ;;  %8810 = vrcp.f32 %v5519_v31  ;;  %v4363_v54 = vmul.f32 %v12446_v45, %v14950_v2  ;;  %v5018_v18 = vld [vmem:[#allocation5 + $0x1b0] sm:$0xff]  ;;  %v5021_v34 = vld [vmem:[#allocation5 + $0x1c8] sm:$0xff] }
 0x3c8   :  { %8409 = vmatpush3.bf16.xpose.msra.mxu1 %v14947_v9  ;;  %v8789_v51 = vpop.eup %8788  ;;  %4222 = vadd.xlane.f32.xlu1 %v4165_v29  ;;  %v5522_v5 = vadd.f32 1.0, %v8787_v7  ;;  %8812 = vrcp.f32 %v5523_v8  ;;  %v14951_v29 = vpack.c.bf16 %v12279_v28, %v12269_v37  ;;  %v7289_v9 = vmul.f32 -1.442695, %v5019_v60 }
 0x3c9   :  { %8410 = vmatprep.subr.bf16.mxu1 %v14814_v13  ;;  %v8791_v49 = vpop.eup %8790  ;;  %v3761_v1 = vpop.xlane.xlu1 %3760  ;;  %v5525_v53 = vadd.f32 1.0, %v8789_v51  ;;  %8814 = vrcp.f32 %v5518_v41  ;;  %v4169_v51 = vmul.f32 %v11544_v32, %v14952_v55  ;;  %v14953_v37 = vpack.c.bf16 %v12286_v56, %v12274_v52  ;;  %v5024_v56 = vld [vmem:[#allocation5 + $0x1e0] sm:$0xff]  ;;  %v14956_v55 = vld [vmem:[#allocation156_spill] sm:$0xff] }
 0x3ca   :  { %4407 = vadd.xlane.f32.xlu0 %v4361_v30  ;;  %v12604_v57 = vpop.eup %8792  ;;  %7043 = vst.msk [vmem:[%s14235_s11 + $0x208] sm:$0xff] %vm383_vm4, %v3761_v1  ;;  %v3775_v3 = vpop.xlane.xlu0 %3774  ;;  %v5529_v31 = vadd.f32 1.0, %v8791_v49  ;;  %8816 = vrcp.f32 %v5522_v5  ;;  %v5025_v30 = vld [vmem:[#allocation5 + $0x1e8] sm:$0xff]  ;;  %v7288_v5 = vmul.f32 -1.442695, %v5018_v18  ;;  %v5020_v49 = vld [vmem:[#allocation5 + $0x1c0] sm:$0xff] }
 0x3cb   :  { %v12612_v15 = vpop.eup %8794  ;;  %7050 = vst.msk [vmem:[%s14235_s11 + $0x240] sm:$0xff] %vm383_vm4, %v3775_v3  ;;  %8818 = vrcp.f32 %v5525_v53  ;;  %v14954_v53 = vld [vmem:[#allocation152_spill] sm:$0xff]  ;;  %v7291_v38 = vmul.f32 -1.442695, %v5021_v34  ;;  %v5023_v3 = vld [vmem:[#allocation5 + $0x1d8] sm:$0xff] }
 0x3cc   :  { %v12620_v48 = vpop.eup %8796  ;;  %4226 = vadd.xlane.f32.xlu1 %v4167_v62  ;;  %8388 = vmatpush3.bf16.xpose.msra.mxu0 %v14951_v29  ;;  %8820 = vpow2.f32 %v7285_v19  ;;  %v4365_v60 = vmul.f32 %v12446_v45, %v14954_v53  ;;  %v7295_v62 = vmul.f32 -1.442695, %v5025_v30  ;;  %v7290_v2 = vmul.f32 -1.442695, %v5020_v49  ;;  %v14955_v29 = vld [vmem:[#allocation185_spill] sm:$0xff] }
 0x3cd   :  { %v12625_v8 = vpop.eup %8798  ;;  %v3968_v7 = vpop.xlane.xlu1 %3967  ;;  %8389 = vmatprep.subr.bf16.mxu0 %v14814_v13  ;;  %8822 = vrcp.f32 %v5529_v31  ;;  %v4171_v31 = vmul.f32 %v11544_v32, %v14955_v29  ;;  %v7294_v34 = vmul.f32 -1.442695, %v5024_v56  ;;  %v7293_v32 = vmul.f32 -1.442695, %v5023_v3  ;;  %v5026_v53 = vld [vmem:[#allocation5 + $0x1f0] sm:$0xff]  ;;  %v14958_v56 = vld [vmem:[#allocation98_spill] sm:$0xff] }
 0x3ce   :  { %4411 = vadd.xlane.f32.xlu0 %v4363_v54  ;;  %v8801_v41 = vpop.eup %8800  ;;  %7075 = vst.msk [vmem:[%s14235_s11 + $0x308] sm:$0xff] %vm383_vm4, %v3968_v7  ;;  %v3982_v28 = vpop.xlane.xlu0 %3981  ;;  %8824 = vpow2.f32 %v7289_v9  ;;  %v5027_v54 = vld [vmem:[#allocation5 + $0x1f8] sm:$0xff]  ;;  %v5022_v7 = vld [vmem:[#allocation5 + $0x1d0] sm:$0xff]  ;;  %v4348_v3 = vmul.f32 %v12446_v45, %v14958_v56 }
 0x3cf   :  { %v12637_v1 = vpop.eup %8802  ;;  %7082 = vst.msk [vmem:[%s14235_s11 + $0x340] sm:$0xff] %vm383_vm4, %v3982_v28  ;;  %8826 = vpow2.f32 %v7284_v21  ;;  %v4367_v21 = vmul.f32 %v12446_v45, %v14956_v55  ;;  %v7297_v28 = vmul.f32 -1.442695, %v5027_v54  ;;  %v5528_v29 = vadd.f32 1.0, %v8801_v41 }
 0x3d0   :  { %8412 = vmatpush3.bf16.xpose.msra.mxu1 %v14953_v37  ;;  %v12646_v52 = vpop.eup %8804  ;;  %4230 = vadd.xlane.f32.xlu1 %v4169_v51  ;;  %8828 = vpow2.f32 %v7288_v5  ;;  %v14957_v37 = vpack.c.bf16 %v12318_v24, %v12313_v50  ;;  %v14959_v50 = vpack.c.bf16 %v12324_v6, %v12316_v12  ;;  %v5029_v12 = vld [vmem:[#allocation5 + $0x208] sm:$0xff] }
 0x3d1   :  { %8413 = vmatprep.subr.bf16.mxu1 %v14814_v13  ;;  %v12648_v19 = vpop.eup %8806  ;;  %v4211_v11 = vpop.xlane.xlu1 %4210  ;;  %8830 = vpow2.f32 %v7291_v38  ;;  %v7299_v41 = vmul.f32 -1.442695, %v5029_v12 }
 0x3d2   :  { %4415 = vadd.xlane.f32.xlu0 %v4365_v60  ;;  %v12650_v18 = vpop.eup %8808  ;;  %7125 = vst.msk [vmem:[%s14235_s11 + $0x498] sm:$0xff] %vm383_vm4, %v4211_v11  ;;  %v3779_v9 = vpop.xlane.xlu0 %3778  ;;  %8832 = vpow2.f32 %v7295_v62  ;;  %v7292_v60 = vmul.f32 -1.442695, %v5022_v7  ;;  %v5524_v62 = vadd.f32 1.0, %v12620_v48  ;;  %v7296_v48 = vmul.f32 -1.442695, %v5026_v53 }
 0x3d3   :  { %v12658_v30 = vpop.eup %8810  ;;  %7052 = vst.msk [vmem:[%s14235_s11 + $0x250] sm:$0xff] %vm383_vm4, %v3779_v9  ;;  %8834 = vpow2.f32 %v7290_v2  ;;  %v14960_v2 = vld [vmem:[#allocation161_spill] sm:$0xff]  ;;  %v8476_v53 = vld [vmem:[#allocation7 + $0xc0] sm:$0xff]  }
 0x3d4   :  { %v12666_v51 = vpop.eup %8812  ;;  %4234 = vadd.xlane.f32.xlu1 %v4171_v31  ;;  %8391 = vmatpush3.bf16.xpose.msra.mxu0 %v14957_v37  ;;  %8836 = vpow2.f32 %v7294_v34  ;;  %v4369_v54 = vmul.f32 %v12446_v45, %v14960_v2  ;;  %v8474_v34 = vld [vmem:[#allocation7 + $0x40] sm:$0xff]  }
 0x3d5   :  { %v12671_v5 = vpop.eup %8814  ;;  %v3765_v49 = vpop.xlane.xlu1 %3764  ;;  %8392 = vmatprep.subr.bf16.mxu0 %v14814_v13  ;;  %8838 = vpow2.f32 %v7293_v32 }
 0x3d6   :  { %4419 = vadd.xlane.f32.xlu0 %v4367_v21  ;;  %v12674_v38 = vpop.eup %8816  ;;  %7045 = vst.msk [vmem:[%s14235_s11 + $0x218] sm:$0xff] %vm383_vm4, %v3765_v49  ;;  %v3986_v24 = vpop.xlane.xlu0 %3985  ;;  %8840 = vpow2.f32 %v7297_v28  ;;  %v14961_v21 = vld [vmem:[#allocation109_spill] sm:$0xff]  ;;  %v14962_v28 = vld [vmem:[#allocation167_spill] sm:$0xff] }
 0x3d7   :  { %v12686_v11 = vpop.eup %8818  ;;  %7084 = vst.msk [vmem:[%s14235_s11 + $0x350] sm:$0xff] %vm383_vm4, %v3986_v24  ;;  %8842 = vpow2.f32 %v7292_v60  ;;  %v4350_v37 = vmul.f32 %v12446_v45, %v14961_v21  ;;  %v4371_v49 = vmul.f32 %v12446_v45, %v14962_v28  ;;  %v8475_v28 = vld [vmem:[#allocation7] sm:$0xff]  }
 0x3d8   :  { %8415 = vmatpush3.bf16.xpose.msra.mxu1 %v14959_v50  ;;  %v8821_v6 = vpop.eup %8820  ;;  %4381 = vadd.xlane.f32.xlu1 %v4348_v3  ;;  %8844 = vrcp.f32 %v5524_v62  ;;  %v14963_v3 = vpack.c.bf16 %v12362_v39, %v12353_v27  ;;  %v14964_v62 = vld [vmem:[#allocation120_spill] sm:$0xff]  ;;  %v14966_v27 = vpack.c.bf16 %v12368_v20, %v12358_v44 }
 0x3d9   :  { %8416 = vmatprep.subr.bf16.mxu1 %v14814_v13  ;;  %v12695_v31 = vpop.eup %8822  ;;  %v3972_v9 = vpop.xlane.xlu1 %3971  ;;  %v5527_v7 = vadd.f32 1.0, %v8821_v6  ;;  %8846 = vrcp.f32 %v5528_v29  ;;  %v4352_v2 = vmul.f32 %v12446_v45, %v14964_v62  ;;  %v14965_v29 = vld [vmem:[#allocation174_spill] sm:$0xff] }
 0x3da   :  { %4423 = vadd.xlane.f32.xlu0 %v4369_v54  ;;  %v8825_v55 = vpop.eup %8824  ;;  %7077 = vst.msk [vmem:[%s14235_s11 + $0x318] sm:$0xff] %vm383_vm4, %v3972_v9  ;;  %v3783_v13 = vpop.xlane.xlu0 %3782  ;;  %8848 = vpow2.f32 %v7296_v48  ;;  %v4373_v9 = vmul.f32 %v12446_v45, %v14965_v29  ;;  %v4683_v48 = vrot.slane %v12406_v61, 6  ;;  %v9152_v29 = vld [vmem:[#allocation5 + $0x38] sm:$0xff] }
 0x3db   :  { %v8827_v32 = vpop.eup %8826  ;;  %7054 = vst.msk [vmem:[%s14235_s11 + $0x260] sm:$0xff] %vm383_vm4, %v3783_v13  ;;  %v5531_v60 = vadd.f32 1.0, %v8825_v55  ;;  %8850 = vrcp.f32 %v5527_v7  ;;  %v9149_v7 = vld [vmem:[#allocation5 + $0x8] sm:$0xff] }
 0x3dc   :  { %v8829_v56 = vpop.eup %8828  ;;  %4385 = vadd.xlane.f32.xlu1 %v4350_v37  ;;  %8394 = vmatpush3.bf16.xpose.msra.mxu0 %v14963_v3  ;;  %v5526_v50 = vadd.f32 1.0, %v8827_v32  ;;  %8852 = vpow2.f32 %v7299_v41  ;;  %v12729_v21 = vmul.f32 %v9149_v7, %v12212_v42  ;;  %v9150_v37 = vld [vmem:[#allocation5 + $0x28] sm:$0xff]  ;;  %v14967_v32 = vld [vmem:[#allocation127_spill] sm:$0xff]  ;;  %v4890_v3 = vrot.slane %v12406_v61, 7 }
 0x3dd   :  { %v8831_v24 = vpop.eup %8830  ;;  %v4215_v54 = vpop.xlane.xlu1 %4214  ;;  %7723 = vmatprep.subr.bf16.mxu0 %v8474_v34  ;;  %v5530_v12 = vadd.f32 1.0, %v8829_v56  ;;  %v12732_v20 = vmul.f32 %v9150_v37, %v12216_v46  ;;  %8854 = vrcp.f32 %v5531_v60  ;;  %v4354_v41 = vmul.f32 %v12446_v45, %v14967_v32  ;;  %v5032_v32 = vld [vmem:[#allocation5 + $0x220] sm:$0xff] }
 0x3de   :  { %4427 = vadd.xlane.f32.xlu0 %v4371_v49  ;;  %v8833_v6 = vpop.eup %8832  ;;  %7127 = vst.msk [vmem:[%s14235_s11 + $0x4a8] sm:$0xff] %vm383_vm4, %v4215_v54  ;;  %v3990_v39 = vpop.xlane.xlu0 %3989  ;;  %v5533_v55 = vadd.f32 1.0, %v8831_v24  ;;  %8856 = vrcp.f32 %v5526_v50  ;;  %v5033_v24 = vld [vmem:[#allocation5 + $0x228] sm:$0xff]  ;;  %v9151_v54 = vld [vmem:[#allocation5 + $0x18] sm:$0xff] }
 0x3df   :  { %v8835_v34 = vpop.eup %8834  ;;  %7086 = vst.msk [vmem:[%s14235_s11 + $0x360] sm:$0xff] %vm383_vm4, %v3990_v39  ;;  %v5537_v44 = vadd.f32 1.0, %v8833_v6  ;;  %8858 = vrcp.f32 %v5530_v12  ;;  %v8478_v50 = vld [vmem:[#allocation7 + $0x48] sm:$0xff]   ;;  %v12743_v6 = vmul.f32 %v9151_v54, %v12242_v16  ;;  %v5989_v16 = vpack.c.bf16 %v12732_v20, %v12729_v21  ;;  %v5031_v21 = vld [vmem:[#allocation5 + $0x218] sm:$0xff] }
 0x3e0   :  { %8418 = vmatpush3.bf16.xpose.msra.mxu1 %v14966_v27  ;;  %v8837_v13 = vpop.eup %8836  ;;  %4389 = vadd.xlane.f32.xlu1 %v4352_v2  ;;  %v5532_v49 = vadd.f32 1.0, %v8835_v34  ;;  %v8477_v2 = vld [vmem:[#allocation7 + $0x80] sm:$0xff]   ;;  %8860 = vrcp.f32 %v5533_v55  ;;  %v14968_v27 = vld [vmem:[#allocation180_spill] sm:$0xff] }
 0x3e1   :  { %7835 = vmatprep.subr.bf16.mxu1 %v8476_v53  ;;  %v8839_v56 = vpop.eup %8838  ;;  %v4552_v53 = vsub.s32 6, %v14919_v59  ;;  %v3769_v42 = vpop.xlane.xlu1 %3768  ;;  %v5536_v46 = vadd.f32 1.0, %v8837_v13  ;;  %v4375_v39 = vmul.f32 %v12446_v45, %v14968_v27  ;;  %v8480_v34 = vld [vmem:[#allocation7 + $0xc8] sm:$0xff]   ;;  %8862 = vrcp.f32 %v5537_v44 }
 0x3e2   :  { %4431 = vadd.xlane.f32.xlu0 %v4373_v9  ;;  %v8841_v60 = vpop.eup %8840  ;;  %7047 = vst.msk [vmem:[%s14235_s11 + $0x228] sm:$0xff] %vm383_vm4, %v3769_v42  ;;  %v3787_v62 = vpop.xlane.xlu0 %3786  ;;  %v12746_v9 = vmul.f32 %v9152_v29, %v12247_v40  ;;  %v5535_v61 = vadd.f32 1.0, %v8839_v56  ;;  %v5028_v40 = vld [vmem:[#allocation5 + $0x200] sm:$0xff]  ;;  %v8479_v55 = vld [vmem:[#allocation7 + $0x8] sm:$0xff]   ;;  %8864 = vrcp.f32 %v5532_v49  ;;  %v7303_v13 = vmul.f32 -1.442695, %v5033_v24 }
 0x3e3   :  { %v8843_v12 = vpop.eup %8842  ;;  %7056 = vst.msk [vmem:[%s14235_s11 + $0x270] sm:$0xff] %vm383_vm4, %v3787_v62  ;;  %8190 = vmatmul.mubr.f32.vlgmr.msra.gmra.mrb[210].mxu0 %v4683_v48  ;;  %v5539_v7 = vadd.f32 1.0, %v8841_v60  ;;  %v8482_v48 = vld [vmem:[#allocation7 + $0x50] sm:$0xff]   ;;  %8866 = vrcp.f32 %v5536_v46  ;;  %v14971_v44 = vld [vmem:[#allocation132_spill] sm:$0xff]  ;;  %v5035_v46 = vld [vmem:[#allocation5 + $0x238] sm:$0xff]  ;;  %v12773_v54 = vrot.slane %v12443_v26, %v4552_v53 }
 0x3e4   :  { %v12756_v37 = vpop.eup %8844  ;;  %4393 = vadd.xlane.f32.xlu1 %v4354_v41  ;;  %7724 = vmatpush3.bf16.msra.mxu0 %v8475_v28  ;;  %v5534_v62 = vadd.f32 1.0, %v8843_v12  ;;  %v4356_v60 = vmul.f32 %v12446_v45, %v14971_v44  ;;  %v8481_v28 = vld [vmem:[#allocation7 + $0x88] sm:$0xff]   ;;  %v5991_v49 = vpack.c.bf16 %v12746_v9, %v12743_v6  ;;  %8868 = vrcp.f32 %v5535_v61  ;;  %v5030_v6 = vld [vmem:[#allocation5 + $0x210] sm:$0xff]  ;;  %v14976_v44 = vld [vmem:[#allocation179_spill] sm:$0xff] }
 0x3e5   :  { %14969 = vst [vmem:[#allocation89_spill] sm:$0xff] %v12756_v37  ;;  %v12758_v56 = vpop.eup %8846  ;;  %v3976_v42 = vpop.xlane.xlu1 %3975  ;;  %7725 = vmatprep.subr.bf16.mxu0 %v8478_v50  ;;  %v14972_v29 = vld [vmem:[#allocation184_spill] sm:$0xff]  ;;  %6347 = vmatprep.mubr.bf16.mxu0 %v5989_v16  ;;  %8870 = vrcp.f32 %v5539_v7  ;;  %v7302_v50 = vmul.f32 -1.442695, %v5032_v32  ;;  %v8483_v26 = vld [vmem:[#allocation7 + $0x10] sm:$0xff]  }
 0x3e6   :  { %14970 = vst [vmem:[#allocation111_spill] sm:$0xff] %v12758_v56  ;;  %4435 = vadd.xlane.f32.xlu0 %v4375_v39  ;;  %v12760_v20 = vpop.eup %8848  ;;  %7079 = vst.msk [vmem:[%s14235_s11 + $0x328] sm:$0xff] %vm383_vm4, %v3976_v42  ;;  %v3994_v41 = vpop.xlane.xlu0 %3993  ;;  %v4377_v12 = vmul.f32 %v12446_v45, %v14972_v29  ;;  %8872 = vpow2.f32 %v7303_v13  ;;  %v7301_v53 = vmul.f32 -1.442695, %v5031_v21  ;;  %v5034_v61 = vld [vmem:[#allocation5 + $0x230] sm:$0xff]  ;;  %v5037_v16 = vld [vmem:[#allocation5 + $0x248] sm:$0xff] }
 0x3e7   :  { %8225 = vmatmul.mubr.f32.vlgmr.msra.gmra.mrb[218].mxu1 %v4890_v3  ;;  %v7298_v3 = vmul.f32 -1.442695, %v5028_v40  ;;  %v12770_v24 = vpop.eup %8850  ;;  %7088 = vst.msk [vmem:[%s14235_s11 + $0x370] sm:$0xff] %vm383_vm4, %v3994_v41  ;;  %v8486_v40 = vld [vmem:[#allocation7 + $0x58] sm:$0xff]   ;;  %8874 = vrcp.f32 %v5534_v62  ;;  %v14974_v32 = vld [vmem:[#allocation136_spill] sm:$0xff]  ;;  %v8485_v13 = vld [vmem:[#allocation7 + $0x90] sm:$0xff]  }
 0x3e8   :  { %7836 = vmatpush3.bf16.msra.mxu1 %v8477_v2  ;;  %v8484_v2 = vld [vmem:[#allocation7 + $0xd0] sm:$0xff]   ;;  %v12781_v9 = vpop.eup %8852  ;;  %4397 = vadd.xlane.f32.xlu1 %v4356_v60  ;;  %v4358_v42 = vmul.f32 %v12446_v45, %v14974_v32  ;;  %v5041_v21 = vld [vmem:[#allocation5 + $0x268] sm:$0xff]  ;;  %v4554_v60 = vmul.f32 %v12773_v54, %v14976_v44  ;;  %v8488_v41 = vld [vmem:[#allocation7 + $0xd8] sm:$0xff]  }
 0x3e9   :  { %7837 = vmatprep.subr.bf16.mxu1 %v8480_v34  ;;  %7726 = vmatpush3.bf16.msra.mxu0 %v8479_v55  ;;  %v12783_v27 = vpop.eup %8854  ;;  %v4219_v39 = vpop.xlane.xlu1 %4218  ;;  %v7305_v34 = vmul.f32 -1.442695, %v5035_v46  ;;  %8876 = vpow2.f32 %v7298_v3  ;;  %v5036_v46 = vld [vmem:[#allocation5 + $0x240] sm:$0xff]  ;;  %v7307_v3 = vmul.f32 -1.442695, %v5037_v16 }
 0x3ea   :  { %4439 = vadd.xlane.f32.xlu0 %v4377_v12  ;;  %7727 = vmatprep.subr.bf16.mxu0 %v8482_v48  ;;  %v12785_v7 = vpop.eup %8856  ;;  %7129 = vst.msk [vmem:[%s14235_s11 + $0x4b8] sm:$0xff] %vm383_vm4, %v4219_v39  ;;  %v3791_v55 = vpop.xlane.xlu0 %3790  ;;  %v7300_v48 = vmul.f32 -1.442695, %v5030_v6  ;;  %8878 = vpow2.f32 %v7302_v50  ;;  %v5040_v12 = vld [vmem:[#allocation5 + $0x260] sm:$0xff]  ;;  %v14980_v50 = vld [vmem:[#allocation141_spill] sm:$0xff] }
 0x3eb   :  { %14973 = vst [vmem:[#allocation112_spill] sm:$0xff] %v12785_v7  ;;  %6508 = vmatprep.mubr.bf16.mxu1 %v5991_v49  ;;  %v12793_v62 = vpop.eup %8858  ;;  %7058 = vst.msk [vmem:[%s14235_s11 + $0x280] sm:$0xff] %vm383_vm4, %v3791_v55  ;;  %v8487_v49 = vld [vmem:[#allocation7 + $0x18] sm:$0xff]   ;;  %8880 = vpow2.f32 %v7301_v53  ;;  %v8490_v32 = vld [vmem:[#allocation7 + $0x60] sm:$0xff]   ;;  %v7306_v16 = vmul.f32 -1.442695, %v5036_v46 }
 0x3ec   :  { %7838 = vmatpush3.bf16.msra.mxu1 %v8481_v28  ;;  %14975 = vst [vmem:[#allocation95_spill] sm:$0xff] %v12793_v62  ;;  %v7304_v28 = vmul.f32 -1.442695, %v5034_v61  ;;  %v12801_v29 = vpop.eup %8860  ;;  %4401 = vadd.xlane.f32.xlu1 %v4358_v42  ;;  %8882 = vpow2.f32 %v7305_v34  ;;  %v4360_v61 = vmul.f32 %v12446_v45, %v14980_v50  ;;  %v8489_v53 = vld [vmem:[#allocation7 + $0x98] sm:$0xff]   ;;  %v7310_v44 = vmul.f32 -1.442695, %v5040_v12 }
 0x3ed   :  { %7839 = vmatprep.subr.bf16.mxu1 %v8484_v2  ;;  %14977 = vst [vmem:[#allocation116_spill] sm:$0xff] %v12801_v29  ;;  %7728 = vmatpush3.bf16.msra.mxu0 %v8483_v26  ;;  %v12803_v6 = vpop.eup %8862  ;;  %v3773_v39 = vpop.xlane.xlu1 %3772  ;;  %v7311_v2 = vmul.f32 -1.442695, %v5041_v21  ;;  %8884 = vpow2.f32 %v7300_v48  ;;  %v8492_v21 = vld [vmem:[#allocation7 + $0xe0] sm:$0xff]   ;;  %v5538_v46 = vadd.f32 1.0, %v12760_v20  ;;  %v9156_v62 = vld [vmem:[#allocation5 + $0x48] sm:$0xff] }
 0x3ee   :  { %14978 = vst [vmem:[#allocation97_spill] sm:$0xff] %v12803_v6  ;;  %4586 = vadd.xlane.f32.xlu0 %v4554_v60  ;;  %7729 = vmatprep.subr.bf16.mxu0 %v8486_v40  ;;  %v12805_v55 = vpop.eup %8864  ;;  %7049 = vst.msk [vmem:[%s14235_s11 + $0x238] sm:$0xff] %vm383_vm4, %v3773_v39  ;;  %v3998_v26 = vpop.xlane.xlu0 %3997  ;;  %v14982_v40 = vld [vmem:[#allocation19_spill] sm:$0xff]  ;;  %8886 = vpow2.f32 %v7304_v28  ;;  %v5039_v60 = vld [vmem:[#allocation5 + $0x258] sm:$0xff] }
 0x3ef   :  { %14979 = vst [vmem:[#allocation118_spill] sm:$0xff] %v12805_v55  ;;  %v12813_v42 = vpop.eup %8866  ;;  %v4556_v34 = vmul.f32 %v12773_v54, %v14982_v40  ;;  %7090 = vst.msk [vmem:[%s14235_s11 + $0x380] sm:$0xff] %vm383_vm4, %v3998_v26  ;;  %v8491_v48 = vld [vmem:[#allocation7 + $0x20] sm:$0xff]   ;;  %8888 = vpow2.f32 %v7307_v3  ;;  %v8494_v40 = vld [vmem:[#allocation7 + $0x68] sm:$0xff]   ;;  %v7309_v3 = vmul.f32 -1.442695, %v5039_v60 }
 0x3f0   :  { %7840 = vmatpush3.bf16.msra.mxu1 %v8485_v13  ;;  %14981 = vst [vmem:[#allocation122_spill] sm:$0xff] %v12813_v42  ;;  %v12821_v13 = vpop.eup %8868  ;;  %4405 = vadd.xlane.f32.xlu1 %v4360_v61  ;;  %8890 = vpow2.f32 %v7311_v2  ;;  %v5043_v28 = vld [vmem:[#allocation5 + $0x278] sm:$0xff]  ;;  %v14985_v26 = vld [vmem:[#allocation145_spill] sm:$0xff]  ;;  %v14987_v61 = vld [vmem:[#allocation23_spill] sm:$0xff] }
 0x3f1   :  { %7841 = vmatprep.subr.bf16.mxu1 %v8488_v41  ;;  %14983 = vst [vmem:[#allocation102_spill] sm:$0xff] %v12821_v13  ;;  %7730 = vmatpush3.bf16.msra.mxu0 %v8487_v49  ;;  %v12824_v39 = vpop.eup %8870  ;;  %v3980_v50 = vpop.xlane.xlu1 %3979  ;;  %v5541_v41 = vadd.f32 1.0, %v12781_v9  ;;  %v4362_v42 = vmul.f32 %v12446_v45, %v14985_v26  ;;  %v8493_v49 = vld [vmem:[#allocation7 + $0xa0] sm:$0xff]   ;;  %8892 = vpow2.f32 %v7306_v16  ;;  %v4558_v9 = vmul.f32 %v12773_v54, %v14987_v61  ;;  %v8496_v2 = vld [vmem:[#allocation7 + $0xe8] sm:$0xff]   ;;  %v14996_v6 = vld [vmem:[#allocation77_spill] sm:$0xff] }
 0x3f2   :  { %14984 = vst [vmem:[#allocation123_spill] sm:$0xff] %v12824_v39  ;;  %4590 = vadd.xlane.f32.xlu0 %v4556_v34  ;;  %7731 = vmatprep.subr.bf16.mxu0 %v8490_v32  ;;  %v8873_v12 = vpop.eup %8872  ;;  %7081 = vst.msk [vmem:[%s14235_s11 + $0x338] sm:$0xff] %vm383_vm4, %v3980_v50  ;;  %v3795_v20 = vpop.xlane.xlu0 %3794  ;;  %8894 = vpow2.f32 %v7310_v44  ;;  %v7313_v16 = vmul.f32 -1.442695, %v5043_v28  ;;  %v4759_v26 = vsub.s32 7, %v14919_v59  ;;  %v14995_v7 = vld [vmem:[#allocation75_spill] sm:$0xff] }
 0x3f3   :  { %v12833_v32 = vpop.eup %8874  ;;  %7060 = vst.msk [vmem:[%s14235_s11 + $0x290] sm:$0xff] %vm383_vm4, %v3795_v20  ;;  %v5545_v34 = vadd.f32 1.0, %v8873_v12  ;;  %8896 = vrcp.f32 %v5538_v46 }
 0x3f4   :  { %7842 = vmatpush3.bf16.msra.mxu1 %v8489_v53  ;;  %14986 = vst [vmem:[#allocation103_spill] sm:$0xff] %v12833_v32  ;;  %v8877_v50 = vpop.eup %8876  ;;  %4409 = vadd.xlane.f32.xlu1 %v4362_v42  ;;  %v8495_v53 = vld [vmem:[#allocation7 + $0x28] sm:$0xff]   ;;  %v8498_v32 = vld [vmem:[#allocation7 + $0x70] sm:$0xff]   ;;  %8898 = vrcp.f32 %v5541_v41 }
 0x3f5   :  { %7843 = vmatprep.subr.bf16.mxu1 %v8492_v21  ;;  %7732 = vmatpush3.bf16.msra.mxu0 %v8491_v48  ;;  %v8879_v60 = vpop.eup %8878  ;;  %v3777_v61 = vpop.xlane.xlu1 %3776  ;;  %v5540_v55 = vadd.f32 1.0, %v8877_v50  ;;  %v14988_v21 = vld [vmem:[#allocation149_spill] sm:$0xff]  ;;  %v8497_v48 = vld [vmem:[#allocation7 + $0xa8] sm:$0xff]   ;;  %8900 = vpow2.f32 %v7309_v3 }
 0x3f6   :  { %4594 = vadd.xlane.f32.xlu0 %v4558_v9  ;;  %7733 = vmatprep.subr.bf16.mxu0 %v8494_v40  ;;  %v8881_v20 = vpop.eup %8880  ;;  %v4364_v12 = vmul.f32 %v12446_v45, %v14988_v21  ;;  %7051 = vst.msk [vmem:[%s14235_s11 + $0x248] sm:$0xff] %vm383_vm4, %v3777_v61  ;;  %v4002_v42 = vpop.xlane.xlu0 %4001  ;;  %v5544_v59 = vadd.f32 1.0, %v8879_v60  ;;  %v14989_v40 = vld [vmem:[#allocation190_spill] sm:$0xff]  ;;  %v8500_v9 = vld [vmem:[#allocation7 + $0xf0] sm:$0xff]   ;;  %8902 = vrcp.f32 %v5545_v34 }
 0x3f7   :  { %v3509_v44 = vpop.f32.mrb[204].mxu0  ;;  %v8883_v46 = vpop.eup %8882  ;;  %v4560_v41 = vmul.f32 %v12773_v54, %v14989_v40  ;;  %7092 = vst.msk [vmem:[%s14235_s11 + $0x390] sm:$0xff] %vm383_vm4, %v4002_v42  ;;  %v8499_v3 = vld [vmem:[#allocation7 + $0x30] sm:$0xff]   ;;  %8904 = vpow2.f32 %v7313_v16  ;;  %v9153_v40 = vld [vmem:[%s14229_s5] sm:$0xff] }
 0x3f8   :  { %7844 = vmatpush3.bf16.msra.mxu1 %v8493_v49  ;;  %3513 = vst [vmem:[#allocation9] sm:$0x1] %v3509_v44  ;;  %v7981_v28 = vpop.f32.mrb[205].mxu0  ;;  %v5543_v49 = vadd.f32 1.0, %v8881_v20  ;;  %v8885_v50 = vpop.eup %8884  ;;  %4413 = vadd.xlane.f32.xlu1 %v4364_v12  ;;  %v5547_v60 = vadd.f32 1.0, %v8883_v46  ;;  %v12857_v39 = vrot.slane %v9153_v40, %v4759_v26  ;;  %v14990_v42 = vld [vmem:[#allocation153_spill] sm:$0xff]  ;;  %8906 = vrcp.f32 %v5540_v55 }
 0x3f9   :  { %7845 = vmatprep.subr.bf16.mxu1 %v8496_v2  ;;  %v3716_v61 = vpop.f32.mrb[212].mxu1  ;;  %7734 = vmatpush3.bf16.msra.mxu0 %v8495_v53  ;;  %v8887_v21 = vpop.eup %8886  ;;  %v4366_v2 = vmul.f32 %v12446_v45, %v14990_v42  ;;  %v8502_v12 = vld [vmem:[#allocation7 + $0x78] sm:$0xff]   ;;  %v5542_v53 = vadd.f32 1.0, %v8885_v50  ;;  %v14991_v16 = vld [vmem:[#allocation71_spill] sm:$0xff]  ;;  %v14992_v28 = vld [vmem:[#allocation157_spill] sm:$0xff]  ;;  %8908 = vrcp.f32 %v5544_v59 }
 0x3fa   :  { %3721 = vst [vmem:[#allocation9 + $0x1] sm:$0x1] %v3716_v61  ;;  %4598 = vadd.xlane.f32.xlu0 %v4560_v41  ;;  %v3984_v34 = vpop.xlane.xlu1 %3983  ;;  %v8016_v20 = vpop.f32.mrb[213].mxu1  ;;  %7735 = vmatprep.subr.bf16.mxu0 %v8498_v32  ;;  %v4562_v46 = vmul.f32 %v12773_v54, %v14991_v16  ;;  %v4368_v13 = vmul.f32 %v12446_v45, %v14992_v28  ;;  %v8501_v41 = vld [vmem:[#allocation7 + $0xb0] sm:$0xff]   ;;  %v5546_v32 = vadd.f32 1.0, %v8887_v21  ;;  %v8504_v55 = vld [vmem:[#allocation7 + $0xf8] sm:$0xff]   ;;  %8910 = vrcp.f32 %v5543_v49 }
 0x3fb   :  { %v8889_v44 = vpop.eup %8888  ;;  %7083 = vst.msk [vmem:[%s14235_s11 + $0x348] sm:$0xff] %vm383_vm4, %v3984_v34  ;;  %v3799_v26 = vpop.xlane.xlu0 %3798  ;;  %v9154_v50 = vld [vmem:[#allocation5] sm:$0xff]  ;;  %v14993_v40 = vld [vmem:[#allocation96_spill] sm:$0xff]  ;;  %v5038_v59 = vld [vmem:[#allocation5 + $0x250] sm:$0xff]  ;;  %8912 = vrcp.f32 %v5547_v60 }
 0x3fc   :  { %7846 = vmatpush3.bf16.msra.mxu1 %v8497_v48  ;;  %v8891_v61 = vpop.eup %8890  ;;  %7062 = vst.msk [vmem:[%s14235_s11 + $0x2a0] sm:$0xff] %vm383_vm4, %v3799_v26  ;;  %v12874_v42 = vmul.f32 %v9154_v50, %v14993_v40  ;;  %v9155_v20 = vld [vmem:[#allocation5 + $0x20] sm:$0xff]  ;;  %v14994_v16 = vld [vmem:[#allocation100_spill] sm:$0xff]  ;;  %v5549_v48 = vadd.f32 1.0, %v8889_v44  ;;  %4417 = vadd.xlane.f32.xlu1 %v4366_v2  ;;  %v8503_v28 = vld [vmem:[#allocation7 + $0x38] sm:$0xff]   ;;  %v12880_v26 = vmul.f32 %v9156_v62, %v14995_v7  ;;  %8914 = vrcp.f32 %v5542_v53 }
 0x3fd   :  { %7847 = vmatprep.subr.bf16.mxu1 %v8500_v9  ;;  %v12877_v34 = vmul.f32 %v9155_v20, %v14994_v16  ;;  %v8893_v21 = vpop.eup %8892  ;;  %7736 = vmatpush3.bf16.msra.mxu0 %v8499_v3  ;;  %v9157_v9 = vld [vmem:[#allocation5 + $0x68] sm:$0xff]  ;;  %v5553_v50 = vadd.f32 1.0, %v8891_v61  ;;  %v9158_v49 = vld [vmem:[#allocation5 + $0x10] sm:$0xff]  ;;  %v14997_v44 = vld [vmem:[#allocation107_spill] sm:$0xff]  ;;  %8916 = vrcp.f32 %v5546_v32  ;;  %v7308_v53 = vmul.f32 -1.442695, %v5038_v59 }
 0x3fe   :  { %v12883_v29 = vmul.f32 %v9157_v9, %v14996_v6  ;;  %v8895_v40 = vpop.eup %8894  ;;  %4602 = vadd.xlane.f32.xlu0 %v4562_v46  ;;  %v3781_v20 = vpop.xlane.xlu1 %3780  ;;  %7737 = vmatprep.subr.bf16.mxu0 %v8502_v12  ;;  %v12886_v16 = vmul.f32 %v9158_v49, %v14997_v44  ;;  %v9159_v3 = vld [vmem:[#allocation5 + $0x30] sm:$0xff]  ;;  %v14998_v2 = vld [vmem:[#allocation115_spill] sm:$0xff]  ;;  %v5548_v7 = vadd.f32 1.0, %v8893_v21  ;;  %v8505_v60 = vld [vmem:[#allocation7 + $0xb8] sm:$0xff]   ;;  %8918 = vrcp.f32 %v5549_v48 }
 0x3ff   :  { %v12889_v56 = vmul.f32 %v9159_v3, %v14998_v2  ;;  %v5042_v62 = vld [vmem:[#allocation5 + $0x270] sm:$0xff]  ;;  %v12891_v37 = vpop.eup %8896  ;;  %7053 = vst.msk [vmem:[%s14235_s11 + $0x258] sm:$0xff] %vm383_vm4, %v3781_v20  ;;  %v4006_v6 = vpop.xlane.xlu0 %4005  ;;  %v9160_v12 = vld [vmem:[#allocation5 + $0x58] sm:$0xff]  ;;  %v15000_v46 = vld [vmem:[#allocation63_spill] sm:$0xff]  ;;  %v5552_v20 = vadd.f32 1.0, %v8895_v40  ;;  %8920 = vrcp.f32 %v5553_v50 }
 0x400   :  { %14999 = vst [vmem:[#allocation128_spill] sm:$0xff] %v12891_v37  ;;  %7848 = vmatpush3.bf16.msra.mxu1 %v8501_v41  ;;  %v12898_v61 = vmul.f32 %v9160_v12, %v15000_v46  ;;  %v9161_v9 = vld [vmem:[#allocation5 + $0x78] sm:$0xff]  ;;  %v15001_v49 = vld [vmem:[#allocation85_spill] sm:$0xff]  ;;  %v5045_v21 = vld [vmem:[#allocation5 + $0x288] sm:$0xff]  ;;  %v12903_v3 = vpop.eup %8898  ;;  %v5988_v41 = vpack.c.bf16 %v12877_v34, %v12874_v42  ;;  %4421 = vadd.xlane.f32.xlu1 %v4368_v13  ;;  %8922 = vrcp.f32 %v5548_v7 }
 0x401   :  { %v12901_v44 = vmul.f32 %v9161_v9, %v15001_v49  ;;  %15002 = vst [vmem:[#allocation108_spill] sm:$0xff] %v12903_v3  ;;  %v15003_v2 = vld [vmem:[#allocation31_spill] sm:$0xff]  ;;  %7094 = vst.msk [vmem:[%s14235_s11 + $0x3a0] sm:$0xff] %vm383_vm4, %v4006_v6  ;;  %7849 = vmatprep.subr.bf16.mxu1 %v8504_v55  ;;  %v5049_v12 = vld [vmem:[#allocation5 + $0x2a8] sm:$0xff]  ;;  %v12913_v32 = vpop.eup %8900  ;;  %7738 = vmatpush3.bf16.msra.mxu0 %v8503_v28  ;;  %v5993_v9 = vpack.c.bf16 %v12883_v29, %v12880_v26  ;;  %v7312_v49 = vmul.f32 -1.442695, %v5042_v62 }
 0x402   :  { %v4564_v37 = vmul.f32 %v12773_v54, %v15003_v2  ;;  %v15004_v59 = vld [vmem:[#allocation162_spill] sm:$0xff]  ;;  %v5044_v6 = vld [vmem:[#allocation5 + $0x280] sm:$0xff]  ;;  %v12919_v55 = vpop.eup %8902  ;;  %v3988_v34 = vpop.xlane.xlu1 %3987  ;;  %v5990_v48 = vpack.c.bf16 %v12889_v56, %v12886_v16  ;;  %v7315_v13 = vmul.f32 -1.442695, %v5045_v21  ;;  %8924 = vpow2.f32 %v7308_v53  ;;  %v5050_v3 = vld [vmem:[#allocation5 + $0x2b0] sm:$0xff] }
 0x403   :  { %v4370_v46 = vmul.f32 %v12446_v45, %v15004_v59  ;;  %15005 = vst [vmem:[#allocation110_spill] sm:$0xff] %v12919_v55  ;;  %v15006_v2 = vld [vmem:[#allocation170_spill] sm:$0xff]  ;;  %v5048_v28 = vld [vmem:[#allocation5 + $0x2a0] sm:$0xff]  ;;  %v12927_v40 = vpop.eup %8904  ;;  %7085 = vst.msk [vmem:[%s14235_s11 + $0x358] sm:$0xff] %vm383_vm4, %v3988_v34  ;;  %v3803_v50 = vpop.xlane.xlu0 %3802  ;;  %v7319_v56 = vmul.f32 -1.442695, %v5049_v12  ;;  %8926 = vrcp.f32 %v5552_v20 }
 0x404   :  { %v12923_v42 = vmul.f32 %v12446_v45, %v15006_v2  ;;  %4606 = vadd.xlane.f32.xlu0 %v4564_v37  ;;  %v15007_v29 = vld [vmem:[#allocation39_spill] sm:$0xff]  ;;  %7850 = vmatpush3.bf16.msra.mxu1 %v8505_v60  ;;  %v5995_v37 = vpack.c.bf16 %v12901_v44, %v12898_v61  ;;  %v5047_v16 = vld [vmem:[#allocation5 + $0x298] sm:$0xff]  ;;  %v12937_v7 = vpop.eup %8906  ;;  %7064 = vst.msk [vmem:[%s14235_s11 + $0x2b0] sm:$0xff] %vm383_vm4, %v3803_v50  ;;  %v7314_v61 = vmul.f32 -1.442695, %v5044_v6  ;;  %v9164_v12 = vld [vmem:[#allocation5 + $0x88] sm:$0xff]  ;;  %8928 = vpow2.f32 %v7312_v49 }
 0x405   :  { %v4566_v26 = vmul.f32 %v12773_v54, %v15007_v29  ;;  %15008 = vst [vmem:[#allocation137_spill] sm:$0xff] %v12937_v7  ;;  %6348 = vmatmul.mubr.bf16.vlgmr.msra.gmra.mrb[212].mxu0 %v5988_v41  ;;  %v9162_v62 = vld [vmem:[#allocation5 + $0x40] sm:$0xff]  ;;  %v12949_v44 = vld [vmem:[#allocation5 + $0x2b8] sm:$0xff]  ;;  %v12951_v53 = vpop.eup %8908  ;;  %4425 = vadd.xlane.f32.xlu1 %v4370_v46  ;;  %v9165_v41 = vld [vmem:[#allocation5 + $0xa8] sm:$0xff]  ;;  %8930 = vpow2.f32 %v7315_v13 }
 0x406   :  { %v15009_v21 = vld [vmem:[#allocation79_spill] sm:$0xff]  ;;  %15011 = vst [vmem:[#allocation113_spill] sm:$0xff] %v12949_v44  ;;  %15012 = vst [vmem:[#allocation138_spill] sm:$0xff] %v12951_v53  ;;  %6355 = vmatprep.mubr.bf16.mxu0 %v5993_v9  ;;  %v15014_v7 = vld [vmem:[#allocation101_spill] sm:$0xff]  ;;  %v3785_v20 = vpop.xlane.xlu1 %3784  ;;  %8932 = vpow2.f32 %v7319_v56 }
 0x407   :  { %v12944_v59 = vmul.f32 %v9162_v62, %v15009_v21  ;;  %v9163_v60 = vld [vmem:[#allocation5 + $0x60] sm:$0xff]  ;;  %v12957_v62 = vmul.f32 %v9165_v41, %v15014_v7  ;;  %v7318_v21 = vmul.f32 -1.442695, %v5048_v28  ;;  %6509 = vmatmul.mubr.bf16.vlgmr.msra.gmra.mrb[220].mxu1 %v5990_v48  ;;  %v9166_v6 = vld [vmem:[#allocation5 + $0x50] sm:$0xff]  ;;  %7055 = vst.msk [vmem:[%s14235_s11 + $0x268] sm:$0xff] %vm383_vm4, %v3785_v20  ;;  %v4010_v49 = vpop.xlane.xlu0 %4009  ;;  %v9168_v48 = vld [vmem:[#allocation5 + $0x98] sm:$0xff]  ;;  %8934 = vpow2.f32 %v7314_v61 }
 0x408   :  { %v15010_v2 = vld [vmem:[#allocation83_spill] sm:$0xff]  ;;  %4610 = vadd.xlane.f32.xlu0 %v4566_v26  ;;  %v9167_v9 = vld [vmem:[#allocation5 + $0x70] sm:$0xff]  ;;  %6516 = vmatprep.mubr.bf16.mxu1 %v5995_v37  ;;  %v12972_v28 = vmul.f32 %v9168_v48, %v12412_v47  ;;  %v9169_v26 = vld [vmem:[#allocation5 + $0xb8] sm:$0xff]  ;;  %7096 = vst.msk [vmem:[%s14235_s11 + $0x3b0] sm:$0xff] %vm383_vm4, %v4010_v49 }
 0x409   :  { %v12947_v34 = vmul.f32 %v9163_v60, %v15010_v2  ;;  %v15013_v29 = vld [vmem:[#allocation99_spill] sm:$0xff]  ;;  %v5046_v60 = vld [vmem:[#allocation5 + $0x290] sm:$0xff]  ;;  %v12959_v2 = vpop.eup %8910  ;;  %v5053_v13 = vld [vmem:[#allocation5 + $0x2c8] sm:$0xff]  ;;  %4429 = vadd.xlane.f32.xlu1 %v12923_v42  ;;  %8936 = vpow2.f32 %v7318_v21  ;;  %v5551_v21 = vadd.f32 1.0, %v12913_v32 }
 0x40a   :  { %v12954_v50 = vmul.f32 %v9164_v12, %v15013_v29  ;;  %v15015_v53 = vld [vmem:[#allocation91_spill] sm:$0xff]  ;;  %v15016_v55 = vld [vmem:[#allocation93_spill] sm:$0xff]  ;;  %v7317_v29 = vmul.f32 -1.442695, %v5047_v16  ;;  %v12965_v7 = vpop.eup %8912  ;;  %v7316_v37 = vmul.f32 -1.442695, %v5046_v60 }
 0x40b   :  { %v12962_v46 = vmul.f32 %v9166_v6, %v15015_v53  ;;  %v5874_v12 = vmul.f32 %v9167_v9, %v15016_v55  ;;  %v15017_v53 = vld [vmem:[#allocation106_spill] sm:$0xff]  ;;  %v7321_v55 = vmul.f32 -1.442695, %v12949_v44  ;;  %v12978_v16 = vpop.eup %8914  ;;  %v15018_v6 = vld [vmem:[#allocation47_spill] sm:$0xff]  ;;  %v5992_v47 = vpack.c.bf16 %v12947_v34, %v12944_v59  ;;  %v3992_v59 = vpop.xlane.xlu1 %3991  ;;  %v13000_v61 = vld [vmem:[#allocation5 + $0x2e8] sm:$0xff] }
 0x40c   :  { %v12975_v41 = vmul.f32 %v9169_v26, %v15017_v53  ;;  %v4568_v9 = vmul.f32 %v12773_v54, %v15018_v6  ;;  %v12988_v20 = vpop.eup %8916  ;;  %v15019_v56 = vld [vmem:[#allocation178_spill] sm:$0xff]  ;;  %v5997_v26 = vpack.c.bf16 %v12957_v62, %v12954_v50  ;;  %v7320_v53 = vmul.f32 -1.442695, %v5050_v3  ;;  %v15021_v42 = vld [vmem:[#allocation55_spill] sm:$0xff]  ;;  %7087 = vst.msk [vmem:[%s14235_s11 + $0x368] sm:$0xff] %vm383_vm4, %v3992_v59  ;;  %v3807_v3 = vpop.xlane.xlu0 %3806 }
 0x40d   :  { %v4374_v48 = vmul.f32 %v12446_v45, %v15019_v56  ;;  %v12995_v6 = vpop.eup %8918  ;;  %v15020_v49 = vld [vmem:[#allocation182_spill] sm:$0xff]  ;;  %v5994_v34 = vpack.c.bf16 %v5874_v12, %v12962_v46  ;;  %8938 = vpow2.f32 %v7317_v29  ;;  %v7323_v60 = vmul.f32 -1.442695, %v5053_v13  ;;  %7066 = vst.msk [vmem:[%s14235_s11 + $0x2c0] sm:$0xff] %vm383_vm4, %v3807_v3  ;;  %6356 = vmatmul.mubr.bf16.gmra.mrb[216].mxu0 %v5992_v47  ;;  %v9170_v12 = vld [vmem:[#allocation5 + $0x80] sm:$0xff]  ;;  %v15023_v29 = vld [vmem:[#allocation81_spill] sm:$0xff] }
 0x40e   :  { %v4376_v44 = vmul.f32 %v12446_v45, %v15020_v49  ;;  %4614 = vadd.xlane.f32.xlu0 %v4568_v9  ;;  %v13002_v56 = vpop.eup %8920  ;;  %v4570_v50 = vmul.f32 %v12773_v54, %v15021_v42  ;;  %v5999_v62 = vpack.c.bf16 %v12975_v41, %v12972_v28  ;;  %8940 = vpow2.f32 %v7321_v55  ;;  %v9171_v9 = vld [vmem:[#allocation5 + $0xa0] sm:$0xff]  ;;  %v15024_v49 = vld [vmem:[#allocation104_spill] sm:$0xff]  ;;  %6363 = vmatprep.mubr.bf16.mxu0 %v5997_v26 }
 0x40f   :  { %v13013_v46 = vpop.eup %8922  ;;  %v13020_v13 = vmul.f32 %v9170_v12, %v15023_v29  ;;  %v5880_v59 = vmul.f32 %v9171_v9, %v15024_v49  ;;  %v5555_v28 = vadd.f32 1.0, %v12927_v40  ;;  %8942 = vpow2.f32 %v7316_v37  ;;  %v5052_v32 = vld [vmem:[#allocation5 + $0x2c0] sm:$0xff]  ;;  %4433 = vadd.xlane.f32.xlu1 %v4374_v48  ;;  %v9172_v55 = vld [vmem:[#allocation5 + $0xc8] sm:$0xff]  ;;  %6517 = vmatmul.mubr.bf16.gmra.mrb[224].mxu1 %v5994_v34  ;;  %v3789_v29 = vpop.xlane.xlu1 %3788  ;;  %v9174_v40 = vld [vmem:[#allocation5 + $0x90] sm:$0xff] }
 0x410   :  { %15022 = vst [vmem:[#allocation114_spill] sm:$0xff] %v13013_v46  ;;  %v8925_v41 = vpop.eup %8924  ;;  %v5885_v42 = vmul.f32 %v9172_v55, %v12483_v58  ;;  %v9173_v46 = vld [vmem:[#allocation5 + $0xe8] sm:$0xff]  ;;  %8944 = vpow2.f32 %v7320_v53  ;;  %v7327_v3 = vmul.f32 -1.442695, %v13000_v61  ;;  %v15025_v37 = vld [vmem:[#allocation87_spill] sm:$0xff]  ;;  %v9175_v49 = vld [vmem:[#allocation5 + $0xb0] sm:$0xff]  ;;  %6524 = vmatprep.mubr.bf16.mxu1 %v5999_v62 }
 0x411   :  { %v5889_v47 = vmul.f32 %v9173_v46, %v12485_v10  ;;  %v13027_v12 = vpop.eup %8926  ;;  %v5878_v9 = vmul.f32 %v9174_v40, %v15025_v37  ;;  %v5882_v48 = vmul.f32 %v9175_v49, %v12432_v25  ;;  %v5550_v26 = vadd.f32 1.0, %v8925_v41  ;;  %7057 = vst.msk [vmem:[%s14235_s11 + $0x278] sm:$0xff] %vm383_vm4, %v3789_v29  ;;  %v4014_v10 = vpop.xlane.xlu0 %4013  ;;  %v9176_v53 = vld [vmem:[#allocation5 + $0xd8] sm:$0xff]  ;;  %v15026_v41 = vld [vmem:[#allocation65_spill] sm:$0xff] }
 0x412   :  { %4618 = vadd.xlane.f32.xlu0 %v4570_v50  ;;  %8946 = vpow2.f32 %v7323_v60  ;;  %v8929_v58 = vpop.eup %8928  ;;  %v13036_v34 = vmul.f32 %v9176_v53, %v12505_v4  ;;  %v9177_v50 = vld [vmem:[#allocation5 + $0xf8] sm:$0xff]  ;;  %v7322_v55 = vmul.f32 -1.442695, %v5052_v32  ;;  %v4572_v60 = vmul.f32 %v12773_v54, %v15026_v41  ;;  %7098 = vst.msk [vmem:[%s14235_s11 + $0x3c0] sm:$0xff] %vm383_vm4, %v4014_v10  ;;  %v15027_v40 = vld [vmem:[#allocation17_spill] sm:$0xff]  ;;  %v9181_v41 = vld [vmem:[#allocation5 + $0x128] sm:$0xff] }
 0x413   :  { %v5891_v46 = vmul.f32 %v9177_v50, %v12516_v36  ;;  %8948 = vrcp.f32 %v5551_v21  ;;  %v8931_v25 = vpop.eup %8930  ;;  %v5996_v62 = vpack.c.bf16 %v5880_v59, %v13020_v13  ;;  %v5554_v29 = vadd.f32 1.0, %v8929_v58  ;;  %4437 = vadd.xlane.f32.xlu1 %v4376_v44  ;;  %v15028_v49 = vld [vmem:[#allocation186_spill] sm:$0xff]  ;;  %v3996_v50 = vpop.xlane.xlu1 %3995 }
 0x414   :  { %8950 = vrcp.f32 %v5555_v28  ;;  %v8933_v4 = vpop.eup %8932  ;;  %v13048_v37 = vmul.f32 %v12773_v54, %v15027_v40  ;;  %v6001_v36 = vpack.c.bf16 %v5889_v47, %v5885_v42  ;;  %v5557_v21 = vadd.f32 1.0, %v8931_v25  ;;  %v15029_v28 = vld [vmem:[#allocation80_spill] sm:$0xff]  ;;  %7089 = vst.msk [vmem:[%s14235_s11 + $0x378] sm:$0xff] %vm383_vm4, %v3996_v50  ;;  %v9183_v40 = vld [vmem:[#allocation5 + $0xf0] sm:$0xff] }
 0x415   :  { %8952 = vpow2.f32 %v7327_v3  ;;  %v8935_v32 = vpop.eup %8934  ;;  %v4378_v53 = vmul.f32 %v12446_v45, %v15028_v49  ;;  %v5998_v10 = vpack.c.bf16 %v5882_v48, %v5878_v9  ;;  %v5561_v13 = vadd.f32 1.0, %v8933_v4  ;;  %v3811_v44 = vpop.xlane.xlu0 %3810  ;;  %6364 = vmatmul.mubr.bf16.gmra.mrb[220].mxu0 %v5996_v62  ;;  %v9178_v3 = vld [vmem:[#allocation5 + $0xc0] sm:$0xff]  ;;  %v9182_v4 = vld [vmem:[#allocation5 + $0xd0] sm:$0xff]  ;;  %v9184_v49 = vld [vmem:[#allocation5 + $0x118] sm:$0xff] }
 0x416   :  { %4622 = vadd.xlane.f32.xlu0 %v4572_v60  ;;  %8954 = vrcp.f32 %v5550_v26  ;;  %v8937_v59 = vpop.eup %8936  ;;  %v4574_v58 = vmul.f32 %v12773_v54, %v15029_v28  ;;  %v6003_v42 = vpack.c.bf16 %v5891_v46, %v13036_v34  ;;  %v5556_v47 = vadd.f32 1.0, %v8935_v32  ;;  %7068 = vst.msk [vmem:[%s14235_s11 + $0x2d0] sm:$0xff] %vm383_vm4, %v3811_v44  ;;  %v9179_v48 = vld [vmem:[#allocation5 + $0xe0] sm:$0xff]  ;;  %6371 = vmatprep.mubr.bf16.mxu0 %v6001_v36  ;;  %v9180_v46 = vld [vmem:[#allocation5 + $0x108] sm:$0xff]  ;;  %v15031_v44 = vld [vmem:[#allocation21_spill] sm:$0xff] }
 0x417   :  { %8956 = vpow2.f32 %v7322_v55  ;;  %v8939_v45 = vpop.eup %8938  ;;  %v13064_v9 = vmul.f32 %v9178_v3, %v12491_v14  ;;  %v13067_v26 = vmul.f32 %v9179_v48, %v12502_v22  ;;  %v5560_v25 = vadd.f32 1.0, %v8937_v59  ;;  %4441 = vadd.xlane.f32.xlu1 %v4378_v53  ;;  %6525 = vmatmul.mubr.bf16.gmra.mrb[228].mxu1 %v5998_v10  ;;  %v3793_v22 = vpop.xlane.xlu1 %3792  ;;  %v13081_v32 = vld [vmem:[#allocation5 + $0x2e0] sm:$0xff]  ;;  %v9185_v53 = vld [vmem:[#allocation5 + $0x138] sm:$0xff]  ;;  %v15032_v48 = vld [vmem:[#allocation188_spill] sm:$0xff] }
 0x418   :  { %8958 = vrcp.f32 %v5554_v29  ;;  %v8941_v34 = vpop.eup %8940  ;;  %v13070_v55 = vmul.f32 %v9180_v46, %v12529_v23  ;;  %v13073_v60 = vmul.f32 %v9181_v41, %v12537_v17  ;;  %v5559_v14 = vadd.f32 1.0, %v8939_v45  ;;  %7059 = vst.msk [vmem:[%s14235_s11 + $0x288] sm:$0xff] %vm383_vm4, %v3793_v22  ;;  %6532 = vmatprep.mubr.bf16.mxu1 %v6003_v42  ;;  %v13111_v3 = vld [vmem:[#allocation5 + $0x2f8] sm:$0xff]  ;;  %v13121_v46 = vld [vmem:[#allocation5 + $0x2d0] sm:$0xff]  ;;  %v15033_v41 = vld [vmem:[#allocation32_spill] sm:$0xff] }
 0x419   :  { %8960 = vrcp.f32 %v5557_v21  ;;  %v8943_v62 = vpop.eup %8942  ;;  %v13076_v29 = vmul.f32 %v9182_v4, %v12525_v63  ;;  %v13079_v36 = vmul.f32 %v9183_v40, %v12527_v0  ;;  %v5563_v23 = vadd.f32 1.0, %v8941_v34  ;;  %v4018_v21 = vpop.xlane.xlu0 %4017  ;;  %v13134_v4 = vld [vmem:[#allocation5 + $0x2f0] sm:$0xff]  ;;  %v9186_v40 = vld [vmem:[#allocation5 + $0x100] sm:$0xff] }
 0x41a   :  { %4626 = vadd.xlane.f32.xlu0 %v4574_v58  ;;  %8962 = vrcp.f32 %v5561_v13  ;;  %v8945_v17 = vpop.eup %8944  ;;  %v13088_v63 = vmul.f32 %v9184_v49, %v12563_v33  ;;  %v13091_v0 = vmul.f32 %v9185_v53, %v12604_v57  ;;  %v5558_v50 = vadd.f32 1.0, %v8943_v62  ;;  %v15030_v13 = vld [vmem:[#allocation73_spill] sm:$0xff]  ;;  %7100 = vst.msk [vmem:[%s14235_s11 + $0x3d0] sm:$0xff] %vm383_vm4, %v4018_v21  ;;  %v13101_v58 = vld [vmem:[#allocation5 + $0x2d8] sm:$0xff]  ;;  %v13149_v49 = vld [vmem:[#allocation5 + $0x308] sm:$0xff] }
 0x41b   :  { %8964 = vrcp.f32 %v5556_v47  ;;  %v4576_v59 = vmul.f32 %v12773_v54, %v15030_v13  ;;  %v6000_v28 = vpack.c.bf16 %v13067_v26, %v13064_v9  ;;  %v5562_v33 = vadd.f32 1.0, %v8945_v17  ;;  %4588 = vadd.xlane.f32.xlu1 %v13048_v37  ;;  %v9188_v53 = vld [vmem:[#allocation5 + $0x148] sm:$0xff] }
 0x41c   :  { %v8947_v10 = vpop.eup %8946  ;;  %8966 = vrcp.f32 %v5560_v25  ;;  %v4557_v42 = vmul.f32 %v12773_v54, %v15031_v44  ;;  %v6005_v47 = vpack.c.bf16 %v13073_v60, %v13070_v55  ;;  %v7326_v45 = vmul.f32 -1.442695, %v13081_v32  ;;  %v4000_v25 = vpop.xlane.xlu1 %3999 }
 0x41d   :  { %v13103_v57 = vpop.eup %8948  ;;  %8968 = vrcp.f32 %v5559_v14  ;;  %v13117_v26 = vmul.f32 %v12773_v54, %v15032_v48  ;;  %v6002_v34 = vpack.c.bf16 %v13079_v36, %v13076_v29  ;;  %v5565_v37 = vadd.f32 1.0, %v8947_v10  ;;  %7091 = vst.msk [vmem:[%s14235_s11 + $0x388] sm:$0xff] %vm383_vm4, %v4000_v25  ;;  %v3815_v14 = vpop.xlane.xlu0 %3814  ;;  %6372 = vmatmul.mubr.bf16.gmra.mrb[224].mxu0 %v6000_v28  ;;  %v13160_v10 = vld [vmem:[#allocation5 + $0x328] sm:$0xff]  ;;  %v9190_v28 = vld [vmem:[#allocation5 + $0x110] sm:$0xff] }
 0x41e   :  { %v13113_v9 = vpop.eup %8950  ;;  %4630 = vadd.xlane.f32.xlu0 %v4576_v59  ;;  %8970 = vrcp.f32 %v5563_v23  ;;  %v4578_v60 = vmul.f32 %v12773_v54, %v15033_v41  ;;  %v6007_v62 = vpack.c.bf16 %v13091_v0, %v13088_v63  ;;  %v7325_v22 = vmul.f32 -1.442695, %v13101_v58  ;;  %7070 = vst.msk [vmem:[%s14235_s11 + $0x2e0] sm:$0xff] %vm383_vm4, %v3815_v14  ;;  %v9187_v23 = vld [vmem:[#allocation5 + $0x120] sm:$0xff]  ;;  %6379 = vmatprep.mubr.bf16.mxu0 %v6005_v47 }
 0x41f   :  { %v13123_v55 = vpop.eup %8952  ;;  %8972 = vrcp.f32 %v5558_v50  ;;  %v13143_v36 = vmul.f32 %v9186_v40, %v12545_v43  ;;  %v13146_v17 = vmul.f32 %v9187_v23, %v12551_v35  ;;  %v7329_v21 = vmul.f32 -1.442695, %v13111_v3  ;;  %4592 = vadd.xlane.f32.xlu1 %v4557_v42  ;;  %v9189_v50 = vld [vmem:[#allocation5 + $0x168] sm:$0xff]  ;;  %6533 = vmatmul.mubr.bf16.gmra.mrb[232].mxu1 %v6002_v34  ;;  %v13171_v42 = vld [vmem:[#allocation5 + $0x300] sm:$0xff] }
 0x420   :  { %v13136_v29 = vpop.eup %8954  ;;  %8974 = vrcp.f32 %v5562_v33  ;;  %v13154_v0 = vmul.f32 %v9188_v53, %v12637_v1  ;;  %v13157_v43 = vmul.f32 %v9189_v50, %v12646_v52  ;;  %v7324_v35 = vmul.f32 -1.442695, %v13121_v46  ;;  %v3797_v59 = vpop.xlane.xlu1 %3796  ;;  %v9191_v1 = vld [vmem:[#allocation5 + $0x130] sm:$0xff]  ;;  %15034 = vst [vmem:[#allocation119_spill] sm:$0xff] %v13171_v42  ;;  %6540 = vmatprep.mubr.bf16.mxu1 %v6007_v62  ;;  %v13199_v62 = vld [vmem:[#allocation5 + $0x318] sm:$0xff]  ;;  %v15037_v40 = vld [vmem:[#allocation67_spill] sm:$0xff] }
 0x421   :  { %v13151_v63 = vpop.eup %8956  ;;  %8976 = vpow2.f32 %v7326_v45  ;;  %v13165_v33 = vmul.f32 %v9190_v28, %v12612_v15  ;;  %v13168_v44 = vmul.f32 %v9191_v1, %v12625_v8  ;;  %v7328_v52 = vmul.f32 -1.442695, %v13134_v4  ;;  %7061 = vst.msk [vmem:[%s14235_s11 + $0x298] sm:$0xff] %vm383_vm4, %v3797_v59  ;;  %v4022_v45 = vpop.xlane.xlu0 %4021  ;;  %v9192_v15 = vld [vmem:[#allocation5 + $0x158] sm:$0xff] }
 0x422   :  { %v13162_v13 = vpop.eup %8958  ;;  %4634 = vadd.xlane.f32.xlu0 %v4578_v60  ;;  %8978 = vrcp.f32 %v5565_v37  ;;  %v13180_v48 = vmul.f32 %v9192_v15, %v12658_v30  ;;  %v9193_v8 = vld [vmem:[#allocation5 + $0x178] sm:$0xff]  ;;  %v7331_v34 = vmul.f32 -1.442695, %v13149_v49  ;;  %v13186_v37 = vld [vmem:[#allocation5 + $0x320] sm:$0xff]  ;;  %v15036_v60 = vld [vmem:[#allocation40_spill] sm:$0xff]  ;;  %7102 = vst.msk [vmem:[%s14235_s11 + $0x3e0] sm:$0xff] %vm383_vm4, %v4022_v45  ;;  %v6004_v30 = vpack.c.bf16 %v13146_v17, %v13143_v36 }
 0x423   :  { %v13173_v47 = vpop.eup %8960  ;;  %v13183_v25 = vmul.f32 %v9193_v8, %v12666_v51  ;;  %8980 = vpow2.f32 %v7325_v22  ;;  %15035 = vst [vmem:[#allocation121_spill] sm:$0xff] %v13186_v37  ;;  %v4580_v14 = vmul.f32 %v12773_v54, %v15036_v60  ;;  %v7335_v51 = vmul.f32 -1.442695, %v13160_v10  ;;  %4596 = vadd.xlane.f32.xlu1 %v13117_v26  ;;  %v13209_v59 = vld [vmem:[#allocation5 + $0x338] sm:$0xff]  ;;  %v15038_v17 = vld [vmem:[#allocation27_spill] sm:$0xff] }
 0x424   :  { %v13188_v41 = vpop.eup %8962  ;;  %8982 = vpow2.f32 %v7329_v21  ;;  %v4561_v23 = vmul.f32 %v12773_v54, %v15037_v40  ;;  %v6009_v53 = vpack.c.bf16 %v13157_v43, %v13154_v0  ;;  %v7330_v50 = vmul.f32 -1.442695, %v13171_v42  ;;  %v4004_v28 = vpop.xlane.xlu1 %4003  ;;  %v15039_v0 = vld [vmem:[#allocation48_spill] sm:$0xff]  ;;  %v9195_v60 = vld [vmem:[#allocation5 + $0x160] sm:$0xff] }
 0x425   :  { %v13201_v22 = vpop.eup %8964  ;;  %8984 = vpow2.f32 %v7324_v35  ;;  %v4563_v21 = vmul.f32 %v12773_v54, %v15038_v17  ;;  %v6006_v1 = vpack.c.bf16 %v13168_v44, %v13165_v33  ;;  %v7334_v26 = vmul.f32 -1.442695, %v13186_v37  ;;  %7093 = vst.msk [vmem:[%s14235_s11 + $0x398] sm:$0xff] %vm383_vm4, %v4004_v28  ;;  %v3819_v35 = vpop.xlane.xlu0 %3818  ;;  %6380 = vmatmul.mubr.bf16.gmra.mrb[228].mxu0 %v6004_v30  ;;  %v9196_v40 = vld [vmem:[#allocation5 + $0x188] sm:$0xff]  ;;  %v15071_v37 = vld [vmem:[#allocation191_spill] sm:$0xff] }
 0x426   :  { %v13211_v36 = vpop.eup %8966  ;;  %4638 = vadd.xlane.f32.xlu0 %v4580_v14  ;;  %8986 = vpow2.f32 %v7328_v52  ;;  %v4582_v43 = vmul.f32 %v12773_v54, %v15039_v0  ;;  %v6011_v15 = vpack.c.bf16 %v13183_v25, %v13180_v48  ;;  %v7333_v33 = vmul.f32 -1.442695, %v13199_v62  ;;  %7072 = vst.msk [vmem:[%s14235_s11 + $0x2f0] sm:$0xff] %vm383_vm4, %v3819_v35  ;;  %v9194_v52 = vld [vmem:[#allocation5 + $0x140] sm:$0xff]  ;;  %v13240_v25 = vld [vmem:[#allocation5 + $0x310] sm:$0xff]  ;;  %6387 = vmatprep.mubr.bf16.mxu0 %v6009_v53  ;;  %v9197_v30 = vld [vmem:[#allocation5 + $0x1a8] sm:$0xff] }
 0x427   :  { %v13218_v45 = vpop.eup %8968  ;;  %8988 = vpow2.f32 %v7331_v34  ;;  %v13236_v8 = vmul.f32 %v9194_v52, %v12648_v19  ;;  %v5904_v14 = vmul.f32 %v9195_v60, %v12650_v18  ;;  %v7337_v48 = vmul.f32 -1.442695, %v13209_v59  ;;  %15040 = vst [vmem:[#allocation124_spill] sm:$0xff] %v13240_v25  ;;  %4600 = vadd.xlane.f32.xlu1 %v4561_v23  ;;  %6541 = vmatmul.mubr.bf16.gmra.mrb[236].mxu1 %v6006_v1  ;;  %v9198_v0 = vld [vmem:[#allocation5 + $0x150] sm:$0xff] }
 0x428   :  { %v13229_v44 = vpop.eup %8970  ;;  %8990 = vpow2.f32 %v7335_v51  ;;  %v13245_v17 = vmul.f32 %v9196_v40, %v12686_v11  ;;  %v5913_v19 = vmul.f32 %v9197_v30, %v12695_v31  ;;  %v5569_v28 = vadd.f32 1.0, %v13123_v55  ;;  %v3801_v51 = vpop.xlane.xlu1 %3800  ;;  %v9199_v23 = vld [vmem:[#allocation5 + $0x170] sm:$0xff]  ;;  %6548 = vmatprep.mubr.bf16.mxu1 %v6011_v15  ;;  %v15043_v30 = vld [vmem:[#allocation16_spill] sm:$0xff] }
 0x429   :  { %v13242_v34 = vpop.eup %8972  ;;  %8992 = vpow2.f32 %v7330_v50  ;;  %v5902_v35 = vmul.f32 %v9198_v0, %v12671_v5  ;;  %v5906_v53 = vmul.f32 %v9199_v23, %v12674_v38  ;;  %v5564_v11 = vadd.f32 1.0, %v13151_v63  ;;  %v13254_v52 = vld [vmem:[#allocation5 + $0x330] sm:$0xff]  ;;  %7063 = vst.msk [vmem:[%s14235_s11 + $0x2a8] sm:$0xff] %vm383_vm4, %v3801_v51  ;;  %v4026_v55 = vpop.xlane.xlu0 %4025  ;;  %v9200_v50 = vld [vmem:[#allocation5 + $0x198] sm:$0xff]  ;;  %v15044_v23 = vld [vmem:[#allocation35_spill] sm:$0xff] }
 0x42a   :  { %v13249_v18 = vpop.eup %8974  ;;  %4642 = vadd.xlane.f32.xlu0 %v4582_v43  ;;  %8994 = vpow2.f32 %v7334_v26  ;;  %15041 = vst [vmem:[#allocation126_spill] sm:$0xff] %v13254_v52  ;;  %v5911_v1 = vmul.f32 %v9200_v50, %v12770_v24  ;;  %v9201_v5 = vld [vmem:[#allocation5 + $0x1b8] sm:$0xff]  ;;  %v7332_v38 = vmul.f32 -1.442695, %v13240_v25  ;;  %v15042_v26 = vld [vmem:[#allocation56_spill] sm:$0xff]  ;;  %7104 = vst.msk [vmem:[%s14235_s11 + $0x3f0] sm:$0xff] %vm383_vm4, %v4026_v55  ;;  %v6008_v15 = vpack.c.bf16 %v5904_v14, %v13236_v8 }
 0x42b   :  { %v8977_v31 = vpop.eup %8976  ;;  %v5915_v43 = vmul.f32 %v9201_v5, %v12783_v27  ;;  %8996 = vpow2.f32 %v7333_v33  ;;  %v4584_v60 = vmul.f32 %v12773_v54, %v15042_v26  ;;  %v4761_v27 = vmul.f32 %v12857_v39, %v15043_v30  ;;  %4604 = vadd.xlane.f32.xlu1 %v4563_v21  ;;  %v9203_v26 = vld [vmem:[#allocation5 + $0x1a0] sm:$0xff]  ;;  %v15065_v25 = vld [vmem:[#allocation110_spill] sm:$0xff] }
 0x42c   :  { %v13263_v63 = vpop.eup %8978  ;;  %v5568_v40 = vadd.f32 1.0, %v8977_v31  ;;  %8998 = vpow2.f32 %v7337_v48  ;;  %v6013_v33 = vpack.c.bf16 %v5913_v19, %v13245_v17  ;;  %v7336_v51 = vmul.f32 -1.442695, %v13254_v52  ;;  %v4008_v55 = vpop.xlane.xlu1 %4007  ;;  %v15045_v48 = vld [vmem:[#allocation43_spill] sm:$0xff]  ;;  %v15064_v52 = vld [vmem:[#allocation108_spill] sm:$0xff] }
 0x42d   :  { %v8981_v24 = vpop.eup %8980  ;;  %9000 = vrcp.f32 %v5569_v28  ;;  %v4565_v50 = vmul.f32 %v12773_v54, %v15044_v23  ;;  %v6010_v5 = vpack.c.bf16 %v5906_v53, %v5902_v35  ;;  %v4567_v31 = vmul.f32 %v12773_v54, %v15045_v48  ;;  %7095 = vst.msk [vmem:[%s14235_s11 + $0x3a8] sm:$0xff] %vm383_vm4, %v4008_v55  ;;  %v4221_v21 = vpop.xlane.xlu0 %4220  ;;  %6388 = vmatmul.mubr.bf16.gmra.mrb[232].mxu0 %v6008_v15  ;;  %v9202_v35 = vld [vmem:[#allocation5 + $0x180] sm:$0xff]  ;;  %v15046_v53 = vld [vmem:[#allocation89_spill] sm:$0xff]  ;;  %v9205_v23 = vld [vmem:[#allocation5 + $0x1e8] sm:$0xff] }
 0x42e   :  { %v8983_v0 = vpop.eup %8982  ;;  %4646 = vadd.xlane.f32.xlu0 %v4584_v60  ;;  %9002 = vrcp.f32 %v5564_v11  ;;  %v5567_v8 = vadd.f32 1.0, %v8981_v24  ;;  %v6015_v17 = vpack.c.bf16 %v5915_v43, %v5911_v1  ;;  %7130 = vst.msk [vmem:[%s14235_s11 + $0x4c0] sm:$0xff] %vm383_vm4, %v4221_v21  ;;  %v13289_v11 = vmul.f32 %v9202_v35, %v15046_v53  ;;  %v15047_v60 = vld [vmem:[#allocation111_spill] sm:$0xff]  ;;  %6395 = vmatprep.mubr.bf16.mxu0 %v6013_v33  ;;  %v9204_v43 = vld [vmem:[#allocation5 + $0x1c8] sm:$0xff]  ;;  %v15049_v55 = vld [vmem:[#allocation97_spill] sm:$0xff] }
 0x42f   :  { %v8985_v14 = vpop.eup %8984  ;;  %v5571_v19 = vadd.f32 1.0, %v8983_v0  ;;  %9004 = vpow2.f32 %v7332_v38  ;;  %v13292_v24 = vmul.f32 %v9203_v26, %v15047_v60  ;;  %4608 = vadd.xlane.f32.xlu1 %v4565_v50  ;;  %v15048_v38 = vld [vmem:[#allocation116_spill] sm:$0xff]  ;;  %v13298_v15 = vmul.f32 %v9205_v23, %v15049_v55  ;;  %6549 = vmatmul.mubr.bf16.gmra.mrb[240].mxu1 %v6010_v5  ;;  %v9206_v53 = vld [vmem:[#allocation5 + $0x190] sm:$0xff]  ;;  %v15051_v33 = vld [vmem:[#allocation95_spill] sm:$0xff] }
 0x430   :  { %v8987_v28 = vpop.eup %8986  ;;  %9006 = vrcp.f32 %v5568_v40  ;;  %v5566_v30 = vadd.f32 1.0, %v8985_v14  ;;  %v13295_v0 = vmul.f32 %v9204_v43, %v15048_v38  ;;  %v3805_v35 = vpop.xlane.xlu1 %3804  ;;  %v15050_v40 = vld [vmem:[#allocation112_spill] sm:$0xff]  ;;  %v9207_v50 = vld [vmem:[#allocation5 + $0x1b0] sm:$0xff]  ;;  %6556 = vmatprep.mubr.bf16.mxu1 %v6015_v17  ;;  %v15052_v5 = vld [vmem:[#allocation102_spill] sm:$0xff] }
 0x431   :  { %v8989_v1 = vpop.eup %8988  ;;  %v5570_v48 = vadd.f32 1.0, %v8987_v28  ;;  %9008 = vpow2.f32 %v7336_v51  ;;  %v13301_v14 = vmul.f32 %v9206_v53, %v15050_v40  ;;  %v13304_v26 = vmul.f32 %v9207_v50, %v15051_v33  ;;  %7065 = vst.msk [vmem:[%s14235_s11 + $0x2b8] sm:$0xff] %vm383_vm4, %v3805_v35  ;;  %v4225_v51 = vpop.xlane.xlu0 %4224  ;;  %v9209_v38 = vld [vmem:[#allocation5 + $0x1f8] sm:$0xff]  ;;  %v15053_v23 = vld [vmem:[#allocation123_spill] sm:$0xff]  ;;  %v13324_v50 = vld [vmem:[#allocation5 + $0x348] sm:$0xff] }
 0x432   :  { %v8991_v21 = vpop.eup %8990  ;;  %4793 = vadd.xlane.f32.xlu0 %v4761_v27  ;;  %9010 = vrcp.f32 %v5567_v8  ;;  %v5573_v60 = vadd.f32 1.0, %v8989_v1  ;;  %v9208_v27 = vld [vmem:[#allocation5 + $0x1d8] sm:$0xff]  ;;  %v13314_v55 = vmul.f32 %v9209_v38, %v15053_v23  ;;  %v15054_v1 = vld [vmem:[#allocation20_spill] sm:$0xff]  ;;  %7132 = vst.msk [vmem:[%s14235_s11 + $0x4d0] sm:$0xff] %vm383_vm4, %v4225_v51  ;;  %v6012_v17 = vpack.c.bf16 %v13292_v24, %v13289_v11  ;;  %15055 = vst [vmem:[#allocation129_spill] sm:$0xff] %v13324_v50 }
 0x433   :  { %v8993_v43 = vpop.eup %8992  ;;  %v13311_v28 = vmul.f32 %v9208_v27, %v15052_v5  ;;  %9012 = vrcp.f32 %v5571_v19  ;;  %v5577_v53 = vadd.f32 1.0, %v8991_v21  ;;  %v4763_v40 = vmul.f32 %v12857_v39, %v15054_v1  ;;  %v15056_v27 = vld [vmem:[#allocation24_spill] sm:$0xff]  ;;  %4612 = vadd.xlane.f32.xlu1 %v4567_v31  ;;  %v15057_v23 = vld [vmem:[#allocation51_spill] sm:$0xff] }
 0x434   :  { %v8995_v8 = vpop.eup %8994  ;;  %9014 = vrcp.f32 %v5566_v30  ;;  %v5572_v35 = vadd.f32 1.0, %v8993_v43  ;;  %v4765_v19 = vmul.f32 %v12857_v39, %v15056_v27  ;;  %v6017_v21 = vpack.c.bf16 %v13298_v15, %v13295_v0  ;;  %v4012_v11 = vpop.xlane.xlu1 %4011  ;;  %v13334_v43 = vld [vmem:[#allocation5 + $0x368] sm:$0xff]  ;;  %v15059_v31 = vld [vmem:[#allocation59_spill] sm:$0xff] }
 0x435   :  { %v8997_v33 = vpop.eup %8996  ;;  %9016 = vrcp.f32 %v5570_v48  ;;  %v5576_v5 = vadd.f32 1.0, %v8995_v8  ;;  %v4569_v51 = vmul.f32 %v12773_v54, %v15057_v23  ;;  %v6014_v24 = vpack.c.bf16 %v13304_v26, %v13301_v14  ;;  %15058 = vst [vmem:[#allocation131_spill] sm:$0xff] %v13334_v43  ;;  %7097 = vst.msk [vmem:[%s14235_s11 + $0x3b8] sm:$0xff] %vm383_vm4, %v4012_v11  ;;  %v4229_v15 = vpop.xlane.xlu0 %4228  ;;  %v13347_v26 = vld [vmem:[#allocation5 + $0x340] sm:$0xff]  ;;  %6396 = vmatmul.mubr.bf16.gmra.mrb[236].mxu0 %v6012_v17  ;;  %v15062_v23 = vld [vmem:[#allocation122_spill] sm:$0xff] }
 0x436   :  { %v8999_v38 = vpop.eup %8998  ;;  %4797 = vadd.xlane.f32.xlu0 %v4763_v40  ;;  %9018 = vrcp.f32 %v5573_v60  ;;  %v5575_v30 = vadd.f32 1.0, %v8997_v33  ;;  %v4571_v0 = vmul.f32 %v12773_v54, %v15059_v31  ;;  %v6019_v48 = vpack.c.bf16 %v13314_v55, %v13311_v28  ;;  %15060 = vst [vmem:[#allocation133_spill] sm:$0xff] %v13347_v26  ;;  %7134 = vst.msk [vmem:[%s14235_s11 + $0x4e0] sm:$0xff] %vm383_vm4, %v4229_v15  ;;  %v9210_v8 = vld [vmem:[#allocation5 + $0x1c0] sm:$0xff]  ;;  %v15061_v40 = vld [vmem:[#allocation118_spill] sm:$0xff] }
 0x437   :  { %v13336_v1 = vpop.eup %9000  ;;  %9020 = vrcp.f32 %v5577_v53  ;;  %v7339_v14 = vmul.f32 -1.442695, %v13324_v50  ;;  %v13356_v33 = vmul.f32 %v9210_v8, %v15061_v40  ;;  %v9211_v27 = vld [vmem:[#allocation5 + $0x1e0] sm:$0xff]  ;;  %v5579_v55 = vadd.f32 1.0, %v8999_v38  ;;  %4616 = vadd.xlane.f32.xlu1 %v4569_v51  ;;  %6403 = vmatprep.mubr.bf16.mxu0 %v6017_v21  ;;  %v9212_v31 = vld [vmem:[#allocation5 + $0x208] sm:$0xff]  ;;  %v9214_v51 = vld [vmem:[#allocation5 + $0x1d0] sm:$0xff] }
 0x438   :  { %v13349_v60 = vpop.eup %9002  ;;  %v13359_v28 = vmul.f32 %v9211_v27, %v15062_v23  ;;  %9022 = vrcp.f32 %v5572_v35  ;;  %v13361_v53 = vld [vmem:[#allocation5 + $0x360] sm:$0xff]  ;;  %v13366_v15 = vmul.f32 %v9212_v31, %v15064_v52  ;;  %v9213_v17 = vld [vmem:[#allocation5 + $0x228] sm:$0xff]  ;;  %v7343_v40 = vmul.f32 -1.442695, %v13334_v43  ;;  %v13372_v27 = vld [vmem:[#allocation5 + $0x358] sm:$0xff]  ;;  %6557 = vmatmul.mubr.bf16.gmra.mrb[244].mxu1 %v6014_v24  ;;  %v3809_v38 = vpop.xlane.xlu1 %3808 }
 0x439   :  { %15063 = vst [vmem:[#allocation134_spill] sm:$0xff] %v13361_v53  ;;  %v13363_v11 = vpop.eup %9004  ;;  %v13369_v8 = vmul.f32 %v9213_v17, %v15065_v25  ;;  %9024 = vrcp.f32 %v5576_v5  ;;  %15066 = vst [vmem:[#allocation158_spill] sm:$0xff] %v13372_v27  ;;  %v15067_v21 = vld [vmem:[#allocation103_spill] sm:$0xff]  ;;  %v9215_v52 = vld [vmem:[#allocation5 + $0x1f0] sm:$0xff]  ;;  %v7338_v25 = vmul.f32 -1.442695, %v13347_v26  ;;  %6564 = vmatprep.mubr.bf16.mxu1 %v6019_v48 }
 0x43a   :  { %v13374_v35 = vpop.eup %9006  ;;  %4801 = vadd.xlane.f32.xlu0 %v4765_v19  ;;  %v13377_v23 = vmul.f32 %v9214_v51, %v15067_v21  ;;  %v15068_v31 = vld [vmem:[#allocation128_spill] sm:$0xff]  ;;  %9026 = vrcp.f32 %v5575_v30  ;;  %v13383_v5 = vld [vmem:[#allocation5 + $0x378] sm:$0xff]  ;;  %7067 = vst.msk [vmem:[%s14235_s11 + $0x2c8] sm:$0xff] %vm383_vm4, %v3809_v38  ;;  %v4233_v19 = vpop.xlane.xlu0 %4232  ;;  %v13398_v26 = vld [vmem:[#allocation5 + $0x350] sm:$0xff]  ;;  %v4767_v38 = vmul.f32 %v12857_v39, %v15071_v37  ;;  %v7341_v48 = vmul.f32 -1.442695, %v13372_v27 }
 0x43b   :  { %v13380_v50 = vmul.f32 %v9215_v52, %v15068_v31  ;;  %15069 = vst [vmem:[#allocation140_spill] sm:$0xff] %v13383_v5  ;;  %v13385_v17 = vpop.eup %9008  ;;  %v3923_v24 = vpop.f32.mrb[206].mxu0  ;;  %v9216_v51 = vld [vmem:[#allocation5 + $0x218] sm:$0xff]  ;;  %9028 = vpow2.f32 %v7339_v14  ;;  %v7342_v31 = vmul.f32 -1.442695, %v13361_v53  ;;  %15070 = vst [vmem:[#allocation163_spill] sm:$0xff] %v13398_v26  ;;  %4620 = vadd.xlane.f32.xlu1 %v4571_v0 }
 0x43c   :  { %v13392_v21 = vmul.f32 %v9216_v51, %v12959_v2  ;;  %v9217_v52 = vld [vmem:[#allocation5 + $0x238] sm:$0xff]  ;;  %v13400_v43 = vpop.eup %9010  ;;  %7136 = vst.msk [vmem:[%s14235_s11 + $0x4f0] sm:$0xff] %vm383_vm4, %v4233_v19  ;;  %3928 = vst [vmem:[#allocation9 + $0x2] sm:$0x1] %v3923_v24  ;;  %v8051_v2 = vpop.f32.mrb[207].mxu0  ;;  %9030 = vrcp.f32 %v5579_v55  ;;  %v13411_v14 = vld [vmem:[#allocation5 + $0x370] sm:$0xff]  ;;  %v6021_v19 = vpack.c.bf16 %v13369_v8, %v13366_v15 }
 0x43d   :  { %v13395_v30 = vmul.f32 %v9217_v52, %v12965_v7  ;;  %v6016_v7 = vpack.c.bf16 %v13359_v28, %v13356_v33  ;;  %15072 = vst [vmem:[#allocation142_spill] sm:$0xff] %v13411_v14  ;;  %v13413_v51 = vpop.eup %9012  ;;  %v15073_v52 = vld [vmem:[#allocation25_spill] sm:$0xff]  ;;  %v4130_v53 = vpop.f32.mrb[214].mxu1  ;;  %9032 = vpow2.f32 %v7343_v40  ;;  %v7345_v24 = vmul.f32 -1.442695, %v13383_v5  ;;  %v13420_v2 = vld [vmem:[#allocation5 + $0x388] sm:$0xff] }
 0x43e   :  { %v4769_v37 = vmul.f32 %v12857_v39, %v15073_v52  ;;  %v13422_v33 = vpop.eup %9014  ;;  %v15074_v28 = vld [vmem:[#allocation72_spill] sm:$0xff]  ;;  %4135 = vst [vmem:[#allocation9 + $0x3] sm:$0x1] %v4130_v53  ;;  %4805 = vadd.xlane.f32.xlu0 %v4767_v38  ;;  %v4016_v27 = vpop.xlane.xlu1 %4015  ;;  %v6018_v0 = vpack.c.bf16 %v13380_v50, %v13377_v23  ;;  %9034 = vpow2.f32 %v7338_v25  ;;  %v7340_v15 = vmul.f32 -1.442695, %v13398_v26  ;;  %v9218_v25 = vld [vmem:[#allocation5 + $0x200] sm:$0xff] }
 0x43f   :  { %v4573_v55 = vmul.f32 %v12773_v54, %v15074_v28  ;;  %v8086_v42 = vpop.f32.mrb[215].mxu1  ;;  %v13429_v8 = vld [vmem:[#allocation5 + $0x3a8] sm:$0xff]  ;;  %v13431_v40 = vpop.eup %9016  ;;  %7099 = vst.msk [vmem:[%s14235_s11 + $0x3c8] sm:$0xff] %vm383_vm4, %v4016_v27  ;;  %9036 = vpow2.f32 %v7342_v31  ;;  %v7344_v50 = vmul.f32 -1.442695, %v13411_v14  ;;  %6404 = vmatmul.mubr.bf16.gmra.mrb[240].mxu0 %v6016_v7  ;;  %v15077_v38 = vld [vmem:[#allocation137_spill] sm:$0xff] }
 0x440   :  { %15075 = vst [vmem:[#allocation70_spill] sm:$0xff] %v13429_v8  ;;  %v15076_v52 = vld [vmem:[#allocation88_spill] sm:$0xff]  ;;  %v4380_v53 = vpop.xlane.xlu0 %4379  ;;  %v6023_v42 = vpack.c.bf16 %v13395_v30, %v13392_v21  ;;  %v13442_v23 = vpop.eup %9018  ;;  %v13449_v28 = vmul.f32 %v9218_v25, %v15077_v38  ;;  %v9219_v27 = vld [vmem:[#allocation5 + $0x220] sm:$0xff]  ;;  %9038 = vpow2.f32 %v7341_v48  ;;  %v7347_v21 = vmul.f32 -1.442695, %v13420_v2  ;;  %6411 = vmatprep.mubr.bf16.mxu0 %v6021_v19  ;;  %6565 = vmatmul.mubr.bf16.gmra.mrb[248].mxu1 %v6018_v0  ;;  %v9224_v0 = vld [vmem:[#allocation5 + $0x258] sm:$0xff] }
 0x441   :  { %v4575_v5 = vmul.f32 %v12773_v54, %v15076_v52  ;;  %7138 = vst.msk [vmem:[%s14235_s11 + $0x500] sm:$0xff] %vm383_vm4, %v4380_v53  ;;  %v15078_v52 = vld [vmem:[#allocation138_spill] sm:$0xff]  ;;  %v13455_v30 = vpop.eup %9020  ;;  %4624 = vadd.xlane.f32.xlu1 %v4573_v55  ;;  %v9220_v31 = vld [vmem:[#allocation5 + $0x248] sm:$0xff]  ;;  %9040 = vpow2.f32 %v7345_v24  ;;  %v7351_v25 = vmul.f32 -1.442695, %v13429_v8  ;;  %v13464_v38 = vld [vmem:[#allocation5 + $0x380] sm:$0xff] }
 0x442   :  { %v13452_v26 = vmul.f32 %v9219_v27, %v15078_v52  ;;  %v13458_v14 = vmul.f32 %v9220_v31, %v12995_v6  ;;  %v9221_v7 = vld [vmem:[#allocation5 + $0x268] sm:$0xff]  ;;  %15079 = vst [vmem:[#allocation66_spill] sm:$0xff] %v13464_v38  ;;  %v13466_v48 = vpop.eup %9022  ;;  %4809 = vadd.xlane.f32.xlu0 %v4769_v37  ;;  %v3813_v27 = vpop.xlane.xlu1 %3812  ;;  %v9222_v55 = vld [vmem:[#allocation5 + $0x210] sm:$0xff]  ;;  %v5574_v31 = vadd.f32 1.0, %v13363_v11  ;;  %9042 = vpow2.f32 %v7340_v15  ;;  %6572 = vmatprep.mubr.bf16.mxu1 %v6023_v42  ;;  %v13484_v15 = vld [vmem:[#allocation5 + $0x3a0] sm:$0xff] }
 0x443   :  { %v13461_v53 = vmul.f32 %v9221_v7, %v13002_v56  ;;  %v5926_v19 = vmul.f32 %v9222_v55, %v12978_v16  ;;  %v9223_v52 = vld [vmem:[#allocation5 + $0x230] sm:$0xff]  ;;  %v13471_v56 = vld [vmem:[#allocation5 + $0x398] sm:$0xff]  ;;  %v13473_v24 = vpop.eup %9024  ;;  %7069 = vst.msk [vmem:[%s14235_s11 + $0x2d8] sm:$0xff] %vm383_vm4, %v3813_v27  ;;  %v13480_v16 = vmul.f32 %v9224_v0, %v13103_v57  ;;  %v5578_v11 = vadd.f32 1.0, %v13385_v17  ;;  %15080 = vst [vmem:[#allocation165_spill] sm:$0xff] %v13484_v15 }
 0x444   :  { %v5930_v6 = vmul.f32 %v9223_v52, %v12988_v20  ;;  %v4384_v37 = vpop.xlane.xlu0 %4383  ;;  %v9225_v7 = vld [vmem:[#allocation5 + $0x278] sm:$0xff]  ;;  %9044 = vpow2.f32 %v7344_v50  ;;  %v13486_v55 = vpop.eup %9026  ;;  %v15081_v52 = vld [vmem:[#allocation33_spill] sm:$0xff]  ;;  %v6020_v57 = vpack.c.bf16 %v13452_v26, %v13449_v28  ;;  %v7349_v0 = vmul.f32 -1.442695, %v13471_v56 }
 0x445   :  { %v5939_v20 = vmul.f32 %v9225_v7, %v13113_v9  ;;  %v4771_v8 = vmul.f32 %v12857_v39, %v15081_v52  ;;  %7140 = vst.msk [vmem:[%s14235_s11 + $0x510] sm:$0xff] %vm383_vm4, %v4384_v37  ;;  %9046 = vpow2.f32 %v7347_v21  ;;  %v7346_v9 = vmul.f32 -1.442695, %v13464_v38  ;;  %v9029_v17 = vpop.eup %9028  ;;  %v15082_v42 = vld [vmem:[#allocation41_spill] sm:$0xff]  ;;  %4628 = vadd.xlane.f32.xlu1 %v4575_v5  ;;  %v15083_v37 = vld [vmem:[#allocation28_spill] sm:$0xff] }
 0x446   :  { %v4773_v50 = vmul.f32 %v12857_v39, %v15082_v42  ;;  %v6025_v27 = vpack.c.bf16 %v13461_v53, %v13458_v14  ;;  %9048 = vpow2.f32 %v7351_v25  ;;  %v13502_v7 = vpop.eup %9030  ;;  %v4577_v52 = vmul.f32 %v12773_v54, %v15083_v37  ;;  %v4020_v26 = vpop.xlane.xlu1 %4019  ;;  %v15084_v42 = vld [vmem:[#allocation36_spill] sm:$0xff]  ;;  %v9227_v37 = vld [vmem:[#allocation5 + $0x260] sm:$0xff] }
 0x447   :  { %4813 = vadd.xlane.f32.xlu0 %v4771_v8  ;;  %v6022_v28 = vpack.c.bf16 %v5930_v6, %v5926_v19  ;;  %9050 = vrcp.f32 %v5574_v31  ;;  %v7350_v21 = vmul.f32 -1.442695, %v13484_v15  ;;  %v9033_v38 = vpop.eup %9032  ;;  %v4579_v5 = vmul.f32 %v12773_v54, %v15084_v42  ;;  %7101 = vst.msk [vmem:[%s14235_s11 + $0x3d8] sm:$0xff] %vm383_vm4, %v4020_v26  ;;  %6412 = vmatmul.mubr.bf16.gmra.mrb[244].mxu0 %v6020_v57  ;;  %v9226_v19 = vld [vmem:[#allocation5 + $0x240] sm:$0xff]  ;;  %v15085_v6 = vld [vmem:[#allocation114_spill] sm:$0xff] }
 0x448   :  { %v4388_v14 = vpop.xlane.xlu0 %4387  ;;  %v6027_v53 = vpack.c.bf16 %v5939_v20, %v13480_v16  ;;  %9052 = vrcp.f32 %v5578_v11  ;;  %v5581_v25 = vadd.f32 1.0, %v9029_v17  ;;  %v9035_v8 = vpop.eup %9034  ;;  %v5932_v31 = vmul.f32 %v9226_v19, %v15085_v6  ;;  %6419 = vmatprep.mubr.bf16.mxu0 %v6025_v27  ;;  %v9228_v16 = vld [vmem:[#allocation5 + $0x288] sm:$0xff]  ;;  %v9230_v6 = vld [vmem:[#allocation5 + $0x250] sm:$0xff] }
 0x449   :  { %7142 = vst.msk [vmem:[%s14235_s11 + $0x520] sm:$0xff] %vm383_vm4, %v4388_v14  ;;  %v5936_v42 = vmul.f32 %v9227_v37, %v13027_v12  ;;  %v5585_v15 = vadd.f32 1.0, %v9033_v38  ;;  %9054 = vpow2.f32 %v7346_v9  ;;  %v9037_v26 = vpop.eup %9036  ;;  %4632 = vadd.xlane.f32.xlu1 %v4577_v52  ;;  %v13521_v20 = vmul.f32 %v9228_v16, %v13173_v47  ;;  %v9229_v11 = vld [vmem:[#allocation5 + $0x2a8] sm:$0xff]  ;;  %6573 = vmatmul.mubr.bf16.gmra.mrb[252].mxu1 %v6022_v28  ;;  %v9231_v38 = vld [vmem:[#allocation5 + $0x270] sm:$0xff] }
 0x44a   :  { %v5945_v17 = vmul.f32 %v9229_v11, %v13188_v41  ;;  %v5580_v14 = vadd.f32 1.0, %v9035_v8  ;;  %9056 = vpow2.f32 %v7349_v0  ;;  %v9039_v57 = vpop.eup %9038  ;;  %v3817_v19 = vpop.xlane.xlu1 %3816  ;;  %v5934_v12 = vmul.f32 %v9230_v6, %v13136_v29  ;;  %6580 = vmatprep.mubr.bf16.mxu1 %v6027_v53  ;;  %v9232_v41 = vld [vmem:[#allocation5 + $0x298] sm:$0xff]  ;;  %v15086_v0 = vld [vmem:[#allocation113_spill] sm:$0xff] }
 0x44b   :  { %4817 = vadd.xlane.f32.xlu0 %v4773_v50  ;;  %v5938_v9 = vmul.f32 %v9231_v38, %v13162_v13  ;;  %v5584_v27 = vadd.f32 1.0, %v9037_v26  ;;  %9058 = vpow2.f32 %v7350_v21  ;;  %v9041_v52 = vpop.eup %9040  ;;  %7071 = vst.msk [vmem:[%s14235_s11 + $0x2e8] sm:$0xff] %vm383_vm4, %v3817_v19  ;;  %v13531_v50 = vmul.f32 %v9232_v41, %v13218_v45  ;;  %v15087_v21 = vld [vmem:[#allocation49_spill] sm:$0xff] }
 0x44c   :  { %v4392_v47 = vpop.xlane.xlu0 %4391  ;;  %v13535_v29 = vmul.f32 %v13229_v44, %v15086_v0  ;;  %9060 = vrcp.f32 %v5581_v25  ;;  %v5583_v13 = vadd.f32 1.0, %v9039_v57  ;;  %v9043_v28 = vpop.eup %9042  ;;  %v4775_v8 = vmul.f32 %v12857_v39, %v15087_v21  ;;  %v15088_v26 = vld [vmem:[#allocation57_spill] sm:$0xff]  ;;  %v15089_v57 = vld [vmem:[#allocation68_spill] sm:$0xff] }
 0x44d   :  { %7144 = vst.msk [vmem:[%s14235_s11 + $0x530] sm:$0xff] %vm383_vm4, %v4392_v47  ;;  %v6024_v53 = vpack.c.bf16 %v5936_v42, %v5932_v31  ;;  %9062 = vrcp.f32 %v5585_v15  ;;  %v5587_v37 = vadd.f32 1.0, %v9041_v52  ;;  %v4777_v16 = vmul.f32 %v12857_v39, %v15088_v26  ;;  %4636 = vadd.xlane.f32.xlu1 %v4579_v5  ;;  %v13550_v31 = vld [vmem:[#allocation5 + $0x3b8] sm:$0xff]  ;;  %v15090_v52 = vld [vmem:[#allocation44_spill] sm:$0xff]  ;;  %v9234_v47 = vld [vmem:[#allocation5 + $0x2a0] sm:$0xff] }
 0x44e   :  { %v9045_v45 = vpop.eup %9044  ;;  %v6029_v44 = vpack.c.bf16 %v5945_v17, %v13521_v20  ;;  %9064 = vrcp.f32 %v5580_v14  ;;  %v5582_v25 = vadd.f32 1.0, %v9043_v28  ;;  %v13548_v19 = vmul.f32 %v12857_v39, %v15089_v57  ;;  %v4024_v6 = vpop.xlane.xlu1 %4023  ;;  %v13572_v0 = vld [vmem:[#allocation5 + $0x390] sm:$0xff]  ;;  %v13605_v57 = vld [vmem:[#allocation5 + $0x3e8] sm:$0xff] }
 0x44f   :  { %v9047_v11 = vpop.eup %9046  ;;  %4821 = vadd.xlane.f32.xlu0 %v4775_v8  ;;  %v6026_v38 = vpack.c.bf16 %v5938_v9, %v5934_v12  ;;  %9066 = vrcp.f32 %v5584_v27  ;;  %v5586_v15 = vadd.f32 1.0, %v9045_v45  ;;  %v4581_v5 = vmul.f32 %v12773_v54, %v15090_v52  ;;  %7103 = vst.msk [vmem:[%s14235_s11 + $0x3e8] sm:$0xff] %vm383_vm4, %v4024_v6  ;;  %6420 = vmatmul.mubr.bf16.gmra.mrb[248].mxu0 %v6024_v53  ;;  %v9233_v9 = vld [vmem:[#allocation5 + $0x280] sm:$0xff]  ;;  %v13584_v21 = vld [vmem:[#allocation5 + $0x3b0] sm:$0xff]  ;;  %v15091_v53 = vld [vmem:[#allocation52_spill] sm:$0xff] }
 0x450   :  { %v9049_v42 = vpop.eup %9048  ;;  %v4396_v20 = vpop.xlane.xlu0 %4395  ;;  %v6031_v17 = vpack.c.bf16 %v13535_v29, %v13531_v50  ;;  %9068 = vrcp.f32 %v5583_v13  ;;  %v5589_v14 = vadd.f32 1.0, %v9047_v11  ;;  %v13567_v27 = vmul.f32 %v9233_v9, %v13201_v22  ;;  %6427 = vmatprep.mubr.bf16.mxu0 %v6029_v44  ;;  %v9235_v13 = vld [vmem:[#allocation5 + $0x2c8] sm:$0xff]  ;;  %v9236_v26 = vld [vmem:[#allocation5 + $0x290] sm:$0xff] }
 0x451   :  { %v13560_v12 = vpop.eup %9050  ;;  %7146 = vst.msk [vmem:[%s14235_s11 + $0x540] sm:$0xff] %vm383_vm4, %v4396_v20  ;;  %v13570_v41 = vmul.f32 %v9234_v47, %v13211_v36  ;;  %9070 = vrcp.f32 %v5587_v37  ;;  %v5593_v50 = vadd.f32 1.0, %v9049_v42  ;;  %4640 = vadd.xlane.f32.xlu1 %v4581_v5  ;;  %v13577_v28 = vmul.f32 %v9235_v13, %v13263_v63  ;;  %6581 = vmatmul.mubr.bf16.gmra.mrb[0].mxu1 %v6026_v38  ;;  %v9237_v44 = vld [vmem:[#allocation5 + $0x2b0] sm:$0xff]  ;;  %v13625_v20 = vld [vmem:[#allocation5 + $0x3e0] sm:$0xff] }
 0x452   :  { %v13574_v29 = vpop.eup %9052  ;;  %v13581_v22 = vmul.f32 %v13336_v1, %v13000_v61  ;;  %9072 = vrcp.f32 %v5582_v25  ;;  %v7353_v36 = vmul.f32 -1.442695, %v13550_v31  ;;  %v4583_v37 = vmul.f32 %v12773_v54, %v15091_v53  ;;  %v3821_v45 = vpop.xlane.xlu1 %3820  ;;  %v13592_v1 = vld [vmem:[#allocation5 + $0x3c8] sm:$0xff]  ;;  %6588 = vmatprep.mubr.bf16.mxu1 %v6031_v17 }
 0x453   :  { %v13586_v8 = vpop.eup %9054  ;;  %4825 = vadd.xlane.f32.xlu0 %v4777_v16  ;;  %v5942_v63 = vmul.f32 %v9236_v26, %v13242_v34  ;;  %v5946_v61 = vmul.f32 %v9237_v44, %v13249_v18  ;;  %9074 = vrcp.f32 %v5586_v15  ;;  %7073 = vst.msk [vmem:[%s14235_s11 + $0x2f8] sm:$0xff] %vm383_vm4, %v3821_v45  ;;  %v13600_v16 = vmul.f32 %v13400_v43, %v13101_v58  ;;  %v15092_v15 = vld [vmem:[#allocation183_spill] sm:$0xff] }
 0x454   :  { %v9057_v25 = vpop.eup %9056  ;;  %v4400_v11 = vpop.xlane.xlu0 %4399  ;;  %v5955_v34 = vmul.f32 %v13413_v51, %v13111_v3  ;;  %9076 = vrcp.f32 %v5589_v14  ;;  %v7348_v18 = vmul.f32 -1.442695, %v13572_v0  ;;  %v6028_v38 = vpack.c.bf16 %v13570_v41, %v13567_v27  ;;  %v13616_v3 = vld [vmem:[#allocation5 + $0x3c0] sm:$0xff]  ;;  %v15093_v14 = vld [vmem:[#allocation84_spill] sm:$0xff] }
 0x455   :  { %v13607_v6 = vpop.eup %9058  ;;  %7148 = vst.msk [vmem:[%s14235_s11 + $0x550] sm:$0xff] %vm383_vm4, %v4400_v11  ;;  %9078 = vrcp.f32 %v5593_v50  ;;  %v5591_v58 = vadd.f32 1.0, %v9057_v25  ;;  %v7352_v43 = vmul.f32 -1.442695, %v13584_v21  ;;  %v4762_v42 = vmul.f32 %v12857_v39, %v15092_v15  ;;  %4644 = vadd.xlane.f32.xlu1 %v4583_v37  ;;  %v13633_v50 = vld [vmem:[#allocation5 + $0x3d8] sm:$0xff] }
 0x456   :  { %v13618_v51 = vpop.eup %9060  ;;  %v6033_v52 = vpack.c.bf16 %v13581_v22, %v13577_v28  ;;  %9080 = vpow2.f32 %v7353_v36  ;;  %v7355_v5 = vmul.f32 -1.442695, %v13592_v1  ;;  %v4781_v9 = vmul.f32 %v12857_v39, %v15093_v14  ;;  %v4028_v27 = vpop.xlane.xlu1 %4027  ;;  %v15094_v28 = vld [vmem:[#allocation60_spill] sm:$0xff]  ;;  %v13645_v37 = vld [vmem:[#allocation5 + $0x3f8] sm:$0xff] }
 0x457   :  { %v13627_v17 = vpop.eup %9062  ;;  %4829 = vadd.xlane.f32.xlu0 %v13548_v19  ;;  %v6030_v47 = vpack.c.bf16 %v5946_v61, %v5942_v63  ;;  %9082 = vrcp.f32 %v5591_v58  ;;  %v7359_v41 = vmul.f32 -1.442695, %v13605_v57  ;;  %v4585_v22 = vmul.f32 %v12773_v54, %v15094_v28  ;;  %7105 = vst.msk [vmem:[%s14235_s11 + $0x3f8] sm:$0xff] %vm383_vm4, %v4028_v27  ;;  %6428 = vmatmul.mubr.bf16.gmra.mrb[252].mxu0 %v6028_v38  ;;  %v9238_v54 = vld [vmem:[#allocation5 + $0x2c0] sm:$0xff]  ;;  %v13657_v61 = vld [vmem:[#allocation5 + $0x3d0] sm:$0xff] }
 0x458   :  { %v13635_v13 = vpop.eup %9064  ;;  %v4404_v36 = vpop.xlane.xlu0 %4403  ;;  %v6035_v19 = vpack.c.bf16 %v5955_v34, %v13600_v16  ;;  %9084 = vpow2.f32 %v7348_v18  ;;  %v7354_v53 = vmul.f32 -1.442695, %v13616_v3  ;;  %v5948_v26 = vmul.f32 %v9238_v54, %v13349_v60  ;;  %6435 = vmatprep.mubr.bf16.mxu0 %v6033_v52  ;;  %v13666_v34 = vld [vmem:[#allocation5 + $0x3f0] sm:$0xff]  ;;  %v15096_v52 = vld [vmem:[#allocation187_spill] sm:$0xff] }
 0x459   :  { %v13647_v45 = vpop.eup %9066  ;;  %7150 = vst.msk [vmem:[%s14235_s11 + $0x560] sm:$0xff] %vm383_vm4, %v4404_v36  ;;  %v5952_v63 = vmul.f32 %v13374_v35, %v13081_v32  ;;  %9086 = vpow2.f32 %v7352_v43  ;;  %v7358_v44 = vmul.f32 -1.442695, %v13625_v20  ;;  %4648 = vadd.xlane.f32.xlu1 %v4585_v22  ;;  %v5957_v11 = vmul.f32 %v13442_v23, %v13149_v49  ;;  %6589 = vmatmul.mubr.bf16.gmra.mrb[4].mxu1 %v6030_v47  ;;  %v15097_v47 = vld [vmem:[#allocation34_spill] sm:$0xff]  ;;  %v15098_v36 = vld [vmem:[#allocation119_spill] sm:$0xff] }
 0x45a   :  { %v13659_v25 = vpop.eup %9068  ;;  %v5961_v16 = vmul.f32 %v13455_v30, %v13160_v10  ;;  %9088 = vpow2.f32 %v7355_v5  ;;  %v7357_v60 = vmul.f32 -1.442695, %v13633_v50  ;;  %v4223_v35 = vpop.xlane.xlu1 %4222  ;;  %v5950_v18 = vmul.f32 %v13422_v33, %v13121_v46  ;;  %6596 = vmatprep.mubr.bf16.mxu1 %v6035_v19 }
 0x45b   :  { %v13668_v32 = vpop.eup %9070  ;;  %4833 = vadd.xlane.f32.xlu0 %v4781_v9  ;;  %v5954_v38 = vmul.f32 %v13431_v40, %v13134_v4  ;;  %9090 = vpow2.f32 %v7359_v41  ;;  %v7361_v49 = vmul.f32 -1.442695, %v13645_v37  ;;  %7131 = vst.msk [vmem:[%s14235_s11 + $0x4c8] sm:$0xff] %vm383_vm4, %v4223_v35  ;;  %v5959_v30 = vmul.f32 %v13486_v55, %v13199_v62  ;;  %v15095_v40 = vld [vmem:[#allocation26_spill] sm:$0xff] }
 0x45c   :  { %v13675_v10 = vpop.eup %9072  ;;  %v4408_v23 = vpop.xlane.xlu0 %4407  ;;  %v5963_v46 = vmul.f32 %v13502_v7, %v13209_v59  ;;  %9092 = vpow2.f32 %v7354_v53  ;;  %v7356_v4 = vmul.f32 -1.442695, %v13657_v61  ;;  %v4783_v58 = vmul.f32 %v12857_v39, %v15095_v40  ;;  %v15099_v53 = vld [vmem:[#allocation121_spill] sm:$0xff]  ;;  %v15106_v40 = vld [vmem:[#allocation140_spill] sm:$0xff] }
 0x45d   :  { %v13686_v33 = vpop.eup %9074  ;;  %7152 = vst.msk [vmem:[%s14235_s11 + $0x570] sm:$0xff] %vm383_vm4, %v4408_v23  ;;  %v6032_v43 = vpack.c.bf16 %v5952_v63, %v5948_v26  ;;  %9094 = vpow2.f32 %v7358_v44  ;;  %v7360_v62 = vmul.f32 -1.442695, %v13666_v34  ;;  %4795 = vadd.xlane.f32.xlu1 %v4762_v42  ;;  %v6037_v59 = vpack.c.bf16 %v5961_v16, %v5957_v11  ;;  %v15100_v44 = vld [vmem:[#allocation189_spill] sm:$0xff] }
 0x45e   :  { %v13695_v55 = vpop.eup %9076  ;;  %v5588_v7 = vadd.f32 1.0, %v13586_v8  ;;  %9096 = vpow2.f32 %v7357_v60  ;;  %v4764_v5 = vmul.f32 %v12857_v39, %v15096_v52  ;;  %v4227_v14 = vpop.xlane.xlu1 %4226  ;;  %v6034_v9 = vpack.c.bf16 %v5954_v38, %v5950_v18  ;;  %v15101_v11 = vld [vmem:[#allocation129_spill] sm:$0xff]  ;;  %v15102_v60 = vld [vmem:[#allocation131_spill] sm:$0xff] }
 0x45f   :  { %v13698_v15 = vpop.eup %9078  ;;  %4837 = vadd.xlane.f32.xlu0 %v4783_v58  ;;  %9098 = vpow2.f32 %v7361_v49  ;;  %v4785_v41 = vmul.f32 %v12857_v39, %v15097_v47  ;;  %7133 = vst.msk [vmem:[%s14235_s11 + $0x4d8] sm:$0xff] %vm383_vm4, %v4227_v14  ;;  %v6039_v42 = vpack.c.bf16 %v5963_v46, %v5959_v30  ;;  %v5592_v28 = vadd.f32 1.0, %v13607_v6  ;;  %6436 = vmatmul.mubr.bf16.gmra.mrb[0].mxu0 %v6032_v43  ;;  %v15104_v49 = vld [vmem:[#allocation126_spill] sm:$0xff]  ;;  %v15108_v14 = vld [vmem:[#allocation192_spill] sm:$0xff] }
 0x460   :  { %v9081_v27 = vpop.eup %9080  ;;  %v4412_v8 = vpop.xlane.xlu0 %4411  ;;  %9100 = vpow2.f32 %v7356_v4  ;;  %v5956_v19 = vmul.f32 %v13466_v48, %v15098_v36  ;;  %v5960_v54 = vmul.f32 %v13473_v24, %v15099_v53  ;;  %v4766_v6 = vmul.f32 %v12857_v39, %v15100_v44  ;;  %6443 = vmatprep.mubr.bf16.mxu0 %v6037_v59  ;;  %v15103_v24 = vld [vmem:[#allocation124_spill] sm:$0xff]  ;;  %v15111_v44 = vld [vmem:[#allocation134_spill] sm:$0xff] }
 0x461   :  { %v13709_v22 = vpop.eup %9082  ;;  %7154 = vst.msk [vmem:[%s14235_s11 + $0x580] sm:$0xff] %vm383_vm4, %v4412_v8  ;;  %v5595_v26 = vadd.f32 1.0, %v9081_v27  ;;  %9102 = vpow2.f32 %v7360_v62  ;;  %4799 = vadd.xlane.f32.xlu1 %v4764_v5  ;;  %v5965_v16 = vmul.f32 %v13618_v51, %v15101_v11  ;;  %v5969_v35 = vmul.f32 %v13627_v17, %v15102_v60  ;;  %6597 = vmatmul.mubr.bf16.gmra.mrb[8].mxu1 %v6034_v9  ;;  %v15105_v17 = vld [vmem:[#allocation158_spill] sm:$0xff] }
 0x462   :  { %v9085_v63 = vpop.eup %9084  ;;  %9104 = vrcp.f32 %v5588_v7  ;;  %v4231_v48 = vpop.xlane.xlu1 %4230  ;;  %v5958_v38 = vmul.f32 %v13560_v12, %v15103_v24  ;;  %v5962_v23 = vmul.f32 %v13574_v29, %v15104_v49  ;;  %6604 = vmatprep.mubr.bf16.mxu1 %v6039_v42  ;;  %v5967_v4 = vmul.f32 %v13659_v25, %v15105_v17  ;;  %v15107_v29 = vld [vmem:[#allocation42_spill] sm:$0xff] }
 0x463   :  { %v9087_v18 = vpop.eup %9086  ;;  %4841 = vadd.xlane.f32.xlu0 %v4785_v41  ;;  %9106 = vrcp.f32 %v5595_v26  ;;  %v5590_v30 = vadd.f32 1.0, %v9085_v63  ;;  %7135 = vst.msk [vmem:[%s14235_s11 + $0x4e8] sm:$0xff] %vm383_vm4, %v4231_v48  ;;  %v5971_v58 = vmul.f32 %v13668_v32, %v15106_v40  ;;  %v4787_v62 = vmul.f32 %v12857_v39, %v15107_v29  ;;  %v15109_v42 = vld [vmem:[#allocation50_spill] sm:$0xff]  ;;  %v15110_v26 = vld [vmem:[#allocation133_spill] sm:$0xff] }
 0x464   :  { %v9089_v46 = vpop.eup %9088  ;;  %v4416_v51 = vpop.xlane.xlu0 %4415  ;;  %9108 = vrcp.f32 %v5592_v28  ;;  %v5594_v12 = vadd.f32 1.0, %v9087_v18  ;;  %v6036_v59 = vpack.c.bf16 %v5960_v54, %v5956_v19  ;;  %v6041_v25 = vpack.c.bf16 %v5969_v35, %v5965_v16  ;;  %v15112_v35 = vld [vmem:[#allocation70_spill] sm:$0xff] }
 0x465   :  { %v9091_v43 = vpop.eup %9090  ;;  %7156 = vst.msk [vmem:[%s14235_s11 + $0x590] sm:$0xff] %vm383_vm4, %v4416_v51  ;;  %9110 = vrcp.f32 %v5590_v30  ;;  %v5597_v7 = vadd.f32 1.0, %v9089_v46  ;;  %4803 = vadd.xlane.f32.xlu1 %v4766_v6  ;;  %v4768_v9 = vmul.f32 %v12857_v39, %v15108_v14  ;;  %v6038_v47 = vpack.c.bf16 %v5962_v23, %v5958_v38  ;;  %v15113_v38 = vld [vmem:[#allocation163_spill] sm:$0xff]  ;;  %v15114_v49 = vld [vmem:[#allocation142_spill] sm:$0xff]  ;;  %v15115_v51 = vld [vmem:[#allocation29_spill] sm:$0xff] }
 0x466   :  { %v9093_v52 = vpop.eup %9092  ;;  %9112 = vrcp.f32 %v5594_v12  ;;  %v5601_v5 = vadd.f32 1.0, %v9091_v43  ;;  %v4235_v27 = vpop.xlane.xlu1 %4234  ;;  %v4789_v28 = vmul.f32 %v12857_v39, %v15109_v42  ;;  %v6043_v19 = vpack.c.bf16 %v5971_v58, %v5967_v4  ;;  %v15119_v14 = vld [vmem:[#allocation165_spill] sm:$0xff] }
 0x467   :  { %v9095_v32 = vpop.eup %9094  ;;  %4845 = vadd.xlane.f32.xlu0 %v4787_v62  ;;  %9114 = vrcp.f32 %v5597_v7  ;;  %v5596_v41 = vadd.f32 1.0, %v9093_v52  ;;  %7137 = vst.msk [vmem:[%s14235_s11 + $0x4f8] sm:$0xff] %vm383_vm4, %v4235_v27  ;;  %6444 = vmatmul.mubr.bf16.gmra.mrb[4].mxu0 %v6036_v59  ;;  %v5964_v63 = vmul.f32 %v13635_v13, %v15110_v26  ;;  %v5968_v6 = vmul.f32 %v13647_v45, %v15111_v44  ;;  %v15117_v59 = vld [vmem:[#allocation37_spill] sm:$0xff] }
 0x468   :  { %v9097_v8 = vpop.eup %9096  ;;  %v4420_v36 = vpop.xlane.xlu0 %4419  ;;  %9116 = vrcp.f32 %v5601_v5  ;;  %v5600_v53 = vadd.f32 1.0, %v9095_v32  ;;  %6451 = vmatprep.mubr.bf16.mxu0 %v6041_v25  ;;  %v5973_v60 = vmul.f32 %v13695_v55, %v13420_v2  ;;  %v5977_v18 = vmul.f32 %v13698_v15, %v15112_v35  ;;  %v15121_v35 = vld [vmem:[#allocation53_spill] sm:$0xff] }
 0x469   :  { %v9099_v54 = vpop.eup %9098  ;;  %7158 = vst.msk [vmem:[%s14235_s11 + $0x5a0] sm:$0xff] %vm383_vm4, %v4420_v36  ;;  %9118 = vrcp.f32 %v5596_v41  ;;  %v5599_v11 = vadd.f32 1.0, %v9097_v8  ;;  %4807 = vadd.xlane.f32.xlu1 %v4768_v9  ;;  %6605 = vmatmul.mubr.bf16.gmra.mrb[12].mxu1 %v6038_v47  ;;  %v5966_v45 = vmul.f32 %v13675_v10, %v15113_v38  ;;  %v5970_v23 = vmul.f32 %v13686_v33, %v15114_v49  ;;  %v15116_v33 = vld [vmem:[#allocation58_spill] sm:$0xff] }
 0x46a   :  { %v9101_v16 = vpop.eup %9100  ;;  %9120 = vrcp.f32 %v5600_v53  ;;  %v5603_v48 = vadd.f32 1.0, %v9099_v54  ;;  %v4382_v13 = vpop.xlane.xlu1 %4381  ;;  %v4770_v2 = vmul.f32 %v12857_v39, %v15115_v51  ;;  %6612 = vmatprep.mubr.bf16.mxu1 %v6043_v19  ;;  %v5975_v15 = vmul.f32 %v13709_v22, %v13471_v56  ;;  %v15120_v53 = vld [vmem:[#allocation45_spill] sm:$0xff]  ;;  %v15122_v49 = vld [vmem:[#allocation62_spill] sm:$0xff] }
 0x46b   :  { %v9103_v24 = vpop.eup %9102  ;;  %4849 = vadd.xlane.f32.xlu0 %v4789_v28  ;;  %9122 = vrcp.f32 %v5599_v11  ;;  %v5598_v30 = vadd.f32 1.0, %v9101_v16  ;;  %7139 = vst.msk [vmem:[%s14235_s11 + $0x508] sm:$0xff] %vm383_vm4, %v4382_v13  ;;  %v4791_v4 = vmul.f32 %v12857_v39, %v15116_v33  ;;  %v6040_v40 = vpack.c.bf16 %v5968_v6, %v5964_v63  ;;  %v15124_v33 = vld [vmem:[#allocation69_spill] sm:$0xff] }
 0x46c   :  { %v9105_v46 = vpop.eup %9104  ;;  %v4424_v55 = vpop.xlane.xlu0 %4423  ;;  %9124 = vrcp.f32 %v5603_v48  ;;  %v5602_v10 = vadd.f32 1.0, %v9103_v24  ;;  %v6045_v12 = vpack.c.bf16 %v5977_v18, %v5973_v60  ;;  %v6042_v29 = vpack.c.bf16 %v5970_v23, %v5966_v45 }
 0x46d   :  { %v9107_v17 = vpop.eup %9106  ;;  %7160 = vst.msk [vmem:[%s14235_s11 + $0x5b0] sm:$0xff] %vm383_vm4, %v4424_v55  ;;  %9126 = vrcp.f32 %v5598_v30  ;;  %4811 = vadd.xlane.f32.xlu1 %v4770_v2  ;;  %v4772_v7 = vmul.f32 %v12857_v39, %v15117_v59  ;;  %v4774_v54 = vmul.f32 %v12857_v39, %v15120_v53  ;;  %v4776_v18 = vmul.f32 %v12857_v39, %v15121_v35  ;;  %v15123_v55 = vld [vmem:[#allocation76_spill] sm:$0xff] }
 0x46e   :  { %v9109_v58 = vpop.eup %9108  ;;  %v5979_v43 = vmul.f32 %v9107_v17, %v13550_v31  ;;  %9128 = vrcp.f32 %v5602_v10  ;;  %v4386_v22 = vpop.xlane.xlu1 %4385  ;;  %v15118_v31 = vld [vmem:[#allocation66_spill] sm:$0xff]  ;;  %v4778_v23 = vmul.f32 %v12857_v39, %v15122_v49 }
 0x46f   :  { %v9111_v56 = vpop.eup %9110  ;;  %4853 = vadd.xlane.f32.xlu0 %v4791_v4  ;;  %7141 = vst.msk [vmem:[%s14235_s11 + $0x518] sm:$0xff] %vm383_vm4, %v4386_v22  ;;  %6452 = vmatmul.mubr.bf16.gmra.mrb[8].mxu0 %v6040_v40  ;;  %v5972_v32 = vmul.f32 %v9105_v46, %v15118_v31  ;;  %v5976_v9 = vmul.f32 %v9109_v58, %v15119_v14 }
 0x470   :  { %v9113_v62 = vpop.eup %9112  ;;  %v4428_v52 = vpop.xlane.xlu0 %4427  ;;  %v6047_v25 = vpack.c.bf16 %v5979_v43, %v5975_v15  ;;  %6459 = vmatprep.mubr.bf16.mxu0 %v6045_v12  ;;  %v5974_v42 = vmul.f32 %v9111_v56, %v13572_v0  ;;  %v4780_v15 = vmul.f32 %v12857_v39, %v15123_v55  ;;  %v4782_v4 = vmul.f32 %v12857_v39, %v15124_v33  ;;  %v15125_v12 = vld [vmem:[#allocation30_spill] sm:$0xff] }
 0x471   :  { %v9115_v5 = vpop.eup %9114  ;;  %7162 = vst.msk [vmem:[%s14235_s11 + $0x5c0] sm:$0xff] %vm383_vm4, %v4428_v52  ;;  %4815 = vadd.xlane.f32.xlu1 %v4772_v7  ;;  %6613 = vmatmul.mubr.bf16.gmra.mrb[16].mxu1 %v6042_v29  ;;  %v5978_v28 = vmul.f32 %v9113_v62, %v13584_v21  ;;  %v6044_v0 = vpack.c.bf16 %v5976_v9, %v5972_v32  ;;  %v15126_v29 = vld [vmem:[#allocation38_spill] sm:$0xff] }
 0x472   :  { %v9117_v27 = vpop.eup %9116  ;;  %v5981_v47 = vmul.f32 %v9115_v5, %v13592_v1  ;;  %v4390_v8 = vpop.xlane.xlu1 %4389  ;;  %6620 = vmatprep.mubr.bf16.mxu1 %v6047_v25  ;;  %v4784_v43 = vmul.f32 %v12857_v39, %v15125_v12  ;;  %v4786_v62 = vmul.f32 %v12857_v39, %v15126_v29  ;;  %v15127_v52 = vld [vmem:[#allocation46_spill] sm:$0xff] }
 0x473   :  { %v9119_v41 = vpop.eup %9118  ;;  %v5985_v36 = vmul.f32 %v9117_v27, %v13605_v57  ;;  %7143 = vst.msk [vmem:[%s14235_s11 + $0x528] sm:$0xff] %vm383_vm4, %v4390_v8  ;;  %v6046_v11 = vpack.c.bf16 %v5978_v28, %v5974_v42  ;;  %v4788_v25 = vmul.f32 %v12857_v39, %v15127_v52  ;;  %v15128_v32 = vld [vmem:[#allocation54_spill] sm:$0xff] }
 0x474   :  { %v9121_v19 = vpop.eup %9120  ;;  %v4432_v26 = vpop.xlane.xlu0 %4431  ;;  %v4790_v14 = vmul.f32 %v12857_v39, %v15128_v32 }
 0x475   :  { %v9123_v1 = vpop.eup %9122  ;;  %7164 = vst.msk [vmem:[%s14235_s11 + $0x5d0] sm:$0xff] %vm383_vm4, %v4432_v26  ;;  %4819 = vadd.xlane.f32.xlu1 %v4774_v54  ;;  %v6049_v57 = vpack.c.bf16 %v5985_v36, %v5981_v47  ;;  %v15129_v47 = vld [vmem:[#allocation64_spill] sm:$0xff] }
 0x476   :  { %v9125_v21 = vpop.eup %9124  ;;  %v5983_v63 = vmul.f32 %v9123_v1, %v13633_v50  ;;  %v4394_v6 = vpop.xlane.xlu1 %4393  ;;  %v5980_v50 = vmul.f32 %v9119_v41, %v13616_v3  ;;  %v4792_v41 = vmul.f32 %v12857_v39, %v15129_v47 }
 0x477   :  { %v9127_v44 = vpop.eup %9126  ;;  %v5987_v16 = vmul.f32 %v9125_v21, %v13645_v37  ;;  %7145 = vst.msk [vmem:[%s14235_s11 + $0x538] sm:$0xff] %vm383_vm4, %v4394_v6  ;;  %6460 = vmatmul.mubr.bf16.gmra.mrb[12].mxu0 %v6044_v0  ;;  %v5984_v37 = vmul.f32 %v9121_v19, %v13625_v20  ;;  %v4337_v30 = vpop.f32.mrb[208].mxu0 }
 0x478   :  { %v9129_v60 = vpop.eup %9128  ;;  %v4436_v48 = vpop.xlane.xlu0 %4435  ;;  %6467 = vmatprep.mubr.bf16.mxu0 %v6049_v57  ;;  %v5982_v38 = vmul.f32 %v9127_v44, %v13657_v61  ;;  %4342 = vst [vmem:[#allocation9 + $0x4] sm:$0x1] %v4337_v30 }
 0x479   :  { %7166 = vst.msk [vmem:[%s14235_s11 + $0x5e0] sm:$0xff] %vm383_vm4, %v4436_v48  ;;  %v6051_v24 = vpack.c.bf16 %v5987_v16, %v5983_v63  ;;  %4823 = vadd.xlane.f32.xlu1 %v4776_v18  ;;  %6621 = vmatmul.mubr.bf16.gmra.mrb[20].mxu1 %v6046_v11  ;;  %v5986_v45 = vmul.f32 %v9129_v60, %v13666_v34  ;;  %v8121_v20 = vpop.f32.mrb[209].mxu0 }
 0x47a   :  { %v4398_v13 = vpop.xlane.xlu1 %4397  ;;  %v6048_v61 = vpack.c.bf16 %v5984_v37, %v5980_v50  ;;  %v4544_v34 = vpop.f32.mrb[216].mxu1 }
 0x47b   :  { %7147 = vst.msk [vmem:[%s14235_s11 + $0x548] sm:$0xff] %vm383_vm4, %v4398_v13  ;;  %6628 = vmatprep.mubr.bf16.mxu1 %v6051_v24  ;;  %4549 = vst [vmem:[#allocation9 + $0x5] sm:$0x1] %v4544_v34  ;;  %v8156_v51 = vpop.f32.mrb[217].mxu1  ;;  %v6050_v2 = vpack.c.bf16 %v5986_v45, %v5982_v38 }
 0x47c   :  { %v4440_v3 = vpop.xlane.xlu0 %4439 }
 0x47d   :  { %7168 = vst.msk [vmem:[%s14235_s11 + $0x5f0] sm:$0xff] %vm383_vm4, %v4440_v3  ;;  %4827 = vadd.xlane.f32.xlu1 %v4778_v23 }
 0x47e   :  { %v4402_v46 = vpop.xlane.xlu1 %4401 }
 0x47f   :  { %7149 = vst.msk [vmem:[%s14235_s11 + $0x558] sm:$0xff] %vm383_vm4, %v4402_v46  ;;  %6468 = vmatmul.mubr.bf16.gmra.mrb[16].mxu0 %v6048_v61 }
 0x480   :  { %v4587_v10 = vpop.xlane.xlu0 %4586 }
 0x481   :  { %7170 = vst.msk [vmem:[%s14235_s11 + $0x600] sm:$0xff] %vm383_vm4, %v4587_v10  ;;  %4831 = vadd.xlane.f32.xlu1 %v4780_v15  ;;  %6629 = vmatmul.mubr.bf16.gmra.mrb[24].mxu1 %v6050_v2  ;;  %v14043_v10 = vld [vmem:[%s14231_s7] ss:$0 sm:$0xff]  ;;  %s9305_s7 = scalar_lea.vmem %s6693_s6, 128 }
 0x482   :  { %v4406_v17 = vpop.xlane.xlu1 %4405  ;;  %p9306_p10 = scmp.ne.s32.totalorder %s6693_s6, %s9305_s7  ;;  %p9311_p12 = scmp.lt.s32.totalorder %s9305_s7, %s9305_s7 }
 0x483   :  { %7151 = vst.msk [vmem:[%s14235_s11 + $0x568] sm:$0xff] %vm383_vm4, %v4406_v17 }
 0x484   :  { %v4591_v40 = vpop.xlane.xlu0 %4590  ;;  %p9312_p13 = por %p9311_p12, %p9310_p11 }
 0x485   :  { %7172 = vst.msk [vmem:[%s14235_s11 + $0x610] sm:$0xff] %vm383_vm4, %v4591_v40  ;;  %4835 = vadd.xlane.f32.xlu1 %v4782_v4 }
 0x486   :  { %v4410_v58 = vpop.xlane.xlu1 %4409  ;;  %p9313_p0 = pnand %p9312_p13, %p9306_p10 }
 0x487   :  { %7153 = vst.msk [vmem:[%s14235_s11 + $0x578] sm:$0xff] %vm383_vm4, %v4410_v58 }
 0x488   :  { %v4595_v56 = vpop.xlane.xlu0 %4594 }
 0x489   :  { %7174 = vst.msk [vmem:[%s14235_s11 + $0x620] sm:$0xff] %vm383_vm4, %v4595_v56  ;;  %4839 = vadd.xlane.f32.xlu1 %v4784_v43 }
 0x48a   :  { %v4414_v22 = vpop.xlane.xlu1 %4413 }
 0x48b   :  { %7155 = vst.msk [vmem:[%s14235_s11 + $0x588] sm:$0xff] %vm383_vm4, %v4414_v22 }
 0x48c   :  { %v4599_v59 = vpop.xlane.xlu0 %4598 }
 0x48d   :  { %7176 = vst.msk [vmem:[%s14235_s11 + $0x630] sm:$0xff] %vm383_vm4, %v4599_v59  ;;  %4843 = vadd.xlane.f32.xlu1 %v4786_v62 }
 0x48e   :  { %v4418_v7 = vpop.xlane.xlu1 %4417 }
 0x48f   :  { %7157 = vst.msk [vmem:[%s14235_s11 + $0x598] sm:$0xff] %vm383_vm4, %v4418_v7 }
 0x490   :  { %v4603_v5 = vpop.xlane.xlu0 %4602 }
 0x491   :  { %7178 = vst.msk [vmem:[%s14235_s11 + $0x640] sm:$0xff] %vm383_vm4, %v4603_v5  ;;  %4847 = vadd.xlane.f32.xlu1 %v4788_v25 }
 0x492   :  { %v4422_v31 = vpop.xlane.xlu1 %4421 }
 0x493   :  { %7159 = vst.msk [vmem:[%s14235_s11 + $0x5a8] sm:$0xff] %vm383_vm4, %v4422_v31 }
 0x494   :  { %v4607_v9 = vpop.xlane.xlu0 %4606 }
 0x495   :  { %7180 = vst.msk [vmem:[%s14235_s11 + $0x650] sm:$0xff] %vm383_vm4, %v4607_v9  ;;  %4851 = vadd.xlane.f32.xlu1 %v4790_v14 }
 0x496   :  { %v4426_v27 = vpop.xlane.xlu1 %4425 }
 0x497   :  { %7161 = vst.msk [vmem:[%s14235_s11 + $0x5b8] sm:$0xff] %vm383_vm4, %v4426_v27 }
 0x498   :  { %v4611_v8 = vpop.xlane.xlu0 %4610 }
 0x499   :  { %7182 = vst.msk [vmem:[%s14235_s11 + $0x660] sm:$0xff] %vm383_vm4, %v4611_v8  ;;  %4855 = vadd.xlane.f32.xlu1 %v4792_v41 }
 0x49a   :  { %v4430_v42 = vpop.xlane.xlu1 %4429 }
 0x49b   :  { %7163 = vst.msk [vmem:[%s14235_s11 + $0x5c8] sm:$0xff] %vm383_vm4, %v4430_v42 }
 0x49c   :  { %v4615_v28 = vpop.xlane.xlu0 %4614 }
 0x49d   :  { %7184 = vst.msk [vmem:[%s14235_s11 + $0x670] sm:$0xff] %vm383_vm4, %v4615_v28 }
 0x49e   :  { %v4434_v39 = vpop.xlane.xlu1 %4433 }
 0x49f   :  { %7165 = vst.msk [vmem:[%s14235_s11 + $0x5d8] sm:$0xff] %vm383_vm4, %v4434_v39 }
 0x4a0   :  { %v4619_v36 = vpop.xlane.xlu0 %4618 }
 0x4a1   :  { %7186 = vst.msk [vmem:[%s14235_s11 + $0x680] sm:$0xff] %vm383_vm4, %v4619_v36 }
 0x4a2   :  { %v4438_v19 = vpop.xlane.xlu1 %4437 }
 0x4a3   :  { %7167 = vst.msk [vmem:[%s14235_s11 + $0x5e8] sm:$0xff] %vm383_vm4, %v4438_v19 }
 0x4a4   :  { %v4623_v53 = vpop.xlane.xlu0 %4622 }
 0x4a5   :  { %7188 = vst.msk [vmem:[%s14235_s11 + $0x690] sm:$0xff] %vm383_vm4, %v4623_v53 }
 0x4a6   :  { %v4442_v54 = vpop.xlane.xlu1 %4441 }
 0x4a7   :  { %7169 = vst.msk [vmem:[%s14235_s11 + $0x5f8] sm:$0xff] %vm383_vm4, %v4442_v54 }
 0x4a8   :  { %v4627_v26 = vpop.xlane.xlu0 %4626 }
 0x4a9   :  { %7190 = vst.msk [vmem:[%s14235_s11 + $0x6a0] sm:$0xff] %vm383_vm4, %v4627_v26 }
 0x4aa   :  { %v4589_v1 = vpop.xlane.xlu1 %4588 }
 0x4ab   :  { %7171 = vst.msk [vmem:[%s14235_s11 + $0x608] sm:$0xff] %vm383_vm4, %v4589_v1 }
 0x4ac   :  { %v4631_v0 = vpop.xlane.xlu0 %4630 }
 0x4ad   :  { %7192 = vst.msk [vmem:[%s14235_s11 + $0x6b0] sm:$0xff] %vm383_vm4, %v4631_v0 }
 0x4ae   :  { %v4593_v21 = vpop.xlane.xlu1 %4592 }
 0x4af   :  { %7173 = vst.msk [vmem:[%s14235_s11 + $0x618] sm:$0xff] %vm383_vm4, %v4593_v21 }
 0x4b0   :  { %v4635_v57 = vpop.xlane.xlu0 %4634 }
 0x4b1   :  { %7194 = vst.msk [vmem:[%s14235_s11 + $0x6c0] sm:$0xff] %vm383_vm4, %v4635_v57 }
 0x4b2   :  { %v4597_v63 = vpop.xlane.xlu1 %4596 }
 0x4b3   :  { %7175 = vst.msk [vmem:[%s14235_s11 + $0x628] sm:$0xff] %vm383_vm4, %v4597_v63 }
 0x4b4   :  { %v4639_v44 = vpop.xlane.xlu0 %4638 }
 0x4b5   :  { %7196 = vst.msk [vmem:[%s14235_s11 + $0x6d0] sm:$0xff] %vm383_vm4, %v4639_v44 }
 0x4b6   :  { %v4601_v6 = vpop.xlane.xlu1 %4600  ;;  %v4751_v35 = vpop.f32.mrb[210].mxu0 }
 0x4b7   :  { %7177 = vst.msk [vmem:[%s14235_s11 + $0x638] sm:$0xff] %vm383_vm4, %v4601_v6  ;;  %4756 = vst [vmem:[#allocation9 + $0x6] sm:$0x1] %v4751_v35  ;;  %v8191_v18 = vpop.f32.mrb[211].mxu0 }
 0x4b8   :  { %v4643_v11 = vpop.xlane.xlu0 %4642 }
 0x4b9   :  { %7198 = vst.msk [vmem:[%s14235_s11 + $0x6e0] sm:$0xff] %vm383_vm4, %v4643_v11 }
 0x4ba   :  { %v4605_v16 = vpop.xlane.xlu1 %4604  ;;  %v4958_v48 = vpop.f32.mrb[218].mxu1 }
 0x4bb   :  { %7179 = vst.msk [vmem:[%s14235_s11 + $0x648] sm:$0xff] %vm383_vm4, %v4605_v16  ;;  %4963 = vst [vmem:[#allocation9 + $0x7] sm:$0x1] %v4958_v48  ;;  %v8226_v37 = vpop.f32.mrb[219].mxu1 }
 0x4bc   :  { %v4647_v60 = vpop.xlane.xlu0 %4646 }
 0x4bd   :  { %7200 = vst.msk [vmem:[%s14235_s11 + $0x6f0] sm:$0xff] %vm383_vm4, %v4647_v60 }
 0x4be   :  { %v4609_v50 = vpop.xlane.xlu1 %4608 }
 0x4bf   :  { %7181 = vst.msk [vmem:[%s14235_s11 + $0x658] sm:$0xff] %vm383_vm4, %v4609_v50 }
 0x4c0   :  { %v4794_v24 = vpop.xlane.xlu0 %4793 }
 0x4c1   :  { %7202 = vst.msk [vmem:[%s14235_s11 + $0x700] sm:$0xff] %vm383_vm4, %v4794_v24 }
 0x4c2   :  { %v4613_v13 = vpop.xlane.xlu1 %4612 }
 0x4c3   :  { %7183 = vst.msk [vmem:[%s14235_s11 + $0x668] sm:$0xff] %vm383_vm4, %v4613_v13 }
 0x4c4   :  { %v4798_v38 = vpop.xlane.xlu0 %4797 }
 0x4c5   :  { %7204 = vst.msk [vmem:[%s14235_s11 + $0x710] sm:$0xff] %vm383_vm4, %v4798_v38 }
 0x4c6   :  { %v4617_v45 = vpop.xlane.xlu1 %4616 }
 0x4c7   :  { %7185 = vst.msk [vmem:[%s14235_s11 + $0x678] sm:$0xff] %vm383_vm4, %v4617_v45 }
 0x4c8   :  { %v4802_v49 = vpop.xlane.xlu0 %4801 }
 0x4c9   :  { %7206 = vst.msk [vmem:[%s14235_s11 + $0x720] sm:$0xff] %vm383_vm4, %v4802_v49 }
 0x4ca   :  { %v4621_v23 = vpop.xlane.xlu1 %4620 }
 0x4cb   :  { %7187 = vst.msk [vmem:[%s14235_s11 + $0x688] sm:$0xff] %vm383_vm4, %v4621_v23 }
 0x4cc   :  { %v4806_v3 = vpop.xlane.xlu0 %4805 }
 0x4cd   :  { %7208 = vst.msk [vmem:[%s14235_s11 + $0x730] sm:$0xff] %vm383_vm4, %v4806_v3 }
 0x4ce   :  { %v4625_v30 = vpop.xlane.xlu1 %4624 }
 0x4cf   :  { %7189 = vst.msk [vmem:[%s14235_s11 + $0x698] sm:$0xff] %vm383_vm4, %v4625_v30 }
 0x4d0   :  { %v4810_v20 = vpop.xlane.xlu0 %4809 }
 0x4d1   :  { %7210 = vst.msk [vmem:[%s14235_s11 + $0x740] sm:$0xff] %vm383_vm4, %v4810_v20 }
 0x4d2   :  { %v4629_v61 = vpop.xlane.xlu1 %4628 }
 0x4d3   :  { %7191 = vst.msk [vmem:[%s14235_s11 + $0x6a8] sm:$0xff] %vm383_vm4, %v4629_v61 }
 0x4d4   :  { %v4814_v34 = vpop.xlane.xlu0 %4813 }
 0x4d5   :  { %7212 = vst.msk [vmem:[%s14235_s11 + $0x750] sm:$0xff] %vm383_vm4, %v4814_v34 }
 0x4d6   :  { %v4633_v46 = vpop.xlane.xlu1 %4632 }
 0x4d7   :  { %7193 = vst.msk [vmem:[%s14235_s11 + $0x6b8] sm:$0xff] %vm383_vm4, %v4633_v46 }
 0x4d8   :  { %v4818_v51 = vpop.xlane.xlu0 %4817  ;;  %v7739_v15 = vpop.f32.mrb[212].mxu0 }
 0x4d9   :  { %7214 = vst.msk [vmem:[%s14235_s11 + $0x760] sm:$0xff] %vm383_vm4, %v4818_v51  ;;  %v7740_v17 = vpop.f32.mrb[213].mxu0 }
 0x4da   :  { %v4637_v2 = vpop.xlane.xlu1 %4636  ;;  %v7741_v33 = vadd.f32 %v7740_v17, %v7739_v15  ;;  %v7851_v4 = vpop.f32.mrb[220].mxu1 }
 0x4db   :  { %7195 = vst.msk [vmem:[%s14235_s11 + $0x6c8] sm:$0xff] %vm383_vm4, %v4637_v2  ;;  %v7742_v40 = vpop.f32.mrb[214].mxu0  ;;  %v7852_v58 = vpop.f32.mrb[221].mxu1 }
 0x4dc   :  { %v4822_v55 = vpop.xlane.xlu0 %4821  ;;  %v6350_v43 = vadd.f32 %v7741_v33, %v14043_v10  ;;  %v7853_v56 = vadd.f32 %v7852_v58, %v7851_v4  ;;  %v7743_v22 = vpop.f32.mrb[215].mxu0 }
 0x4dd   :  { %7216 = vst.msk [vmem:[%s14235_s11 + $0x770] sm:$0xff] %vm383_vm4, %v4822_v55  ;;  %v7854_v29 = vpop.f32.mrb[222].mxu1 }
 0x4de   :  { %v4641_v12 = vpop.xlane.xlu1 %4640 }
 0x4df   :  { %7197 = vst.msk [vmem:[%s14235_s11 + $0x6d8] sm:$0xff] %vm383_vm4, %v4641_v12 }
 0x4e0   :  { %9316 = shalt.err (!%p9313_p0)
}
 0x4e1   :  { %s9317_s29 = scalar_lea.hbm %s14236_s12, 128 }
 0x4e2   :  { %p9318_p1 = scmp.ne.s32.totalorder %s14236_s12, %s9317_s29  ;;  %p9321_p2 = scmp.lt.u32.totalorder %s9317_s29, %s14236_s12 }
 0x4e4   :  { %p9323_p3 = pnand %p9321_p2, %p9318_p1 }
 0x4e6   :  { %9326 = shalt.err (!%p9323_p3)
}
 0x4e7   :  { %s9392_s14 = smov 16   ;;  %s9393_s0 = smov 1   ;;  %v7744_v62 = vadd.f32 %v7743_v22, %v7742_v40  ;;  %v4826_v59 = vpop.xlane.xlu0 %4825  ;;  %v7855_v7 = vpop.f32.mrb[223].mxu1  ;;  %v6511_v52 = vadd.f32 %v7853_v56, %v6350_v43 }
 0x4e8   :  { %6698 = dma.vmem_to_hbm [thread:$0]  %s6693_s6, 128, %s14236_s12, [#allocation10], %s9392_s14, %s9392_s14, %s9393_s0   ;;  %v7856_v25 = vadd.f32 %v7855_v7, %v7854_v29  ;;  %v4645_v31 = vpop.xlane.xlu1 %4644  ;;  %v7745_v32 = vpop.f32.mrb[216].mxu0 }
 0x4e9   :  { %7218 = vst.msk [vmem:[%s14235_s11 + $0x780] sm:$0xff] %vm383_vm4, %v4826_v59  ;;  %s9394_s16 = smov [#allocation8]   ;;  %v6353_v5 = vadd.f32 %v7744_v62, %v14043_v10  ;;  %6637 = vst [vmem:[#allocation11] sm:$0xff] %v6511_v52 }
 0x4ea   :  { %s6678_s17 = sshll.u32 %s9394_s16, 4  ;;  %7199 = vst.msk [vmem:[%s14235_s11 + $0x6e8] sm:$0xff] %vm383_vm4, %v4645_v31  ;;  %s6679_s17 = int_to_ptr.vmem [resolvable:$true] %s6678_s17 }
 0x4eb   :  { %s9327_s4 = scalar_lea.vmem %s6679_s17, 16384  ;;  %p9332_p5 = scmp.lt.s32.totalorder %s6679_s17, %s6679_s17 }
 0x4ec   :  { %p9328_p4 = scmp.ne.s32.totalorder %s6679_s17, %s9327_s4  ;;  %p9333_p6 = scmp.lt.s32.totalorder %s9327_s4, %s9327_s4 }
 0x4ee   :  { %p9334_p7 = por %p9333_p6, %p9332_p5 }
 0x4f0   :  { %p9335_p8 = pnand %p9334_p7, %p9328_p4 }
 0x4f2   :  { %9338 = shalt.err (!%p9335_p8)
}
 0x4f3   :  { %s9339_s22 = scalar_lea.hbm %s14234_s10, 16384 }
 0x4f4   :  { %p9340_p9 = scmp.ne.s32.totalorder %s14234_s10, %s9339_s22  ;;  %p9343_p10 = scmp.lt.u32.totalorder %s9339_s22, %s14234_s10 }
 0x4f6   :  { %p9345_p11 = pnand %p9343_p10, %p9340_p9 }
 0x4f8   :  { %9348 = shalt.err (!%p9345_p11)
}
 0x4f9   :  { %6684 = dma.vmem_to_hbm [thread:$0]  %s6679_s17, 16384, %s14234_s10, [#allocation4], %s9380_s18, %s9380_s18, %s9381_s19   ;;  %v6514_v14 = vadd.f32 %v7856_v25, %v6353_v5  ;;  %v4830_v9 = vpop.xlane.xlu0 %4829  ;;  %v7746_v27 = vpop.f32.mrb[217].mxu0 }
 0x4fa   :  { %7220 = vst.msk [vmem:[%s14235_s11 + $0x790] sm:$0xff] %vm383_vm4, %v4830_v9  ;;  %v7747_v47 = vadd.f32 %v7746_v27, %v7745_v32  ;;  %v7857_v41 = vpop.f32.mrb[224].mxu1  ;;  %v7748_v8 = vpop.f32.mrb[218].mxu0 }
 0x4fb   :  { %6638 = vst [vmem:[#allocation11 + $0x8] sm:$0xff] %v6514_v14  ;;  %v7858_v42 = vpop.f32.mrb[225].mxu1  ;;  %v4649_v28 = vpop.xlane.xlu1 %4648 }
 0x4fc   :  { %v6358_v39 = vadd.f32 %v7747_v47, %v14043_v10  ;;  %v7859_v36 = vadd.f32 %v7858_v42, %v7857_v41  ;;  %7201 = vst.msk [vmem:[%s14235_s11 + $0x6f8] sm:$0xff] %vm383_vm4, %v4649_v28  ;;  %v7749_v19 = vpop.f32.mrb[219].mxu0  ;;  %v7860_v53 = vpop.f32.mrb[226].mxu1 }
 0x4fd   :  { %v7750_v54 = vadd.f32 %v7749_v19, %v7748_v8  ;;  %v4834_v26 = vpop.xlane.xlu0 %4833  ;;  %v7861_v1 = vpop.f32.mrb[227].mxu1 }
 0x4fe   :  { %v6519_v0 = vadd.f32 %v7859_v36, %v6358_v39  ;;  %7222 = vst.msk [vmem:[%s14235_s11 + $0x7a0] sm:$0xff] %vm383_vm4, %v4834_v26  ;;  %v7862_v21 = vadd.f32 %v7861_v1, %v7860_v53  ;;  %v7751_v44 = vpop.f32.mrb[220].mxu0  ;;  %v7863_v35 = vpop.f32.mrb[228].mxu1 }
 0x4ff   :  { %v6361_v57 = vadd.f32 %v7750_v54, %v14043_v10  ;;  %v4796_v63 = vpop.xlane.xlu1 %4795  ;;  %v7752_v16 = vpop.f32.mrb[221].mxu0 }
 0x500   :  { %6639 = vst [vmem:[#allocation11 + $0x10] sm:$0xff] %v6519_v0  ;;  %7203 = vst.msk [vmem:[%s14235_s11 + $0x708] sm:$0xff] %vm383_vm4, %v4796_v63  ;;  %v7753_v60 = vadd.f32 %v7752_v16, %v7751_v44  ;;  %v7754_v18 = vpop.f32.mrb[222].mxu0  ;;  %v7864_v48 = vpop.f32.mrb[229].mxu1 }
 0x501   :  { %v6522_v6 = vadd.f32 %v7862_v21, %v6361_v57  ;;  %v4838_v11 = vpop.xlane.xlu0 %4837  ;;  %v7865_v24 = vadd.f32 %v7864_v48, %v7863_v35  ;;  %v7755_v13 = vpop.f32.mrb[223].mxu0 }
 0x502   :  { %7224 = vst.msk [vmem:[%s14235_s11 + $0x7b0] sm:$0xff] %vm383_vm4, %v4838_v11  ;;  %v6366_v37 = vadd.f32 %v7753_v60, %v14043_v10  ;;  %v7866_v38 = vpop.f32.mrb[230].mxu1  ;;  %v7756_v45 = vadd.f32 %v7755_v13, %v7754_v18  ;;  %v7757_v34 = vpop.f32.mrb[224].mxu0 }
 0x503   :  { %6640 = vst [vmem:[#allocation11 + $0x18] sm:$0xff] %v6522_v6  ;;  %v4800_v50 = vpop.xlane.xlu1 %4799  ;;  %v7867_v23 = vpop.f32.mrb[231].mxu1 }
 0x504   :  { %7205 = vst.msk [vmem:[%s14235_s11 + $0x718] sm:$0xff] %vm383_vm4, %v4800_v50  ;;  %v6527_v3 = vadd.f32 %v7865_v24, %v6366_v37  ;;  %v7868_v30 = vadd.f32 %v7867_v23, %v7866_v38  ;;  %v6369_v20 = vadd.f32 %v7756_v45, %v14043_v10  ;;  %v7758_v2 = vpop.f32.mrb[225].mxu0  ;;  %v7869_v15 = vpop.f32.mrb[232].mxu1 }
 0x505   :  { %v4842_v49 = vpop.xlane.xlu0 %4841  ;;  %v7759_v55 = vadd.f32 %v7758_v2, %v7757_v34  ;;  %v7760_v17 = vpop.f32.mrb[226].mxu0 }
 0x506   :  { %7226 = vst.msk [vmem:[%s14235_s11 + $0x7c0] sm:$0xff] %vm383_vm4, %v4842_v49  ;;  %6641 = vst [vmem:[#allocation11 + $0x20] sm:$0xff] %v6527_v3  ;;  %v6530_v46 = vadd.f32 %v7868_v30, %v6369_v20  ;;  %v7870_v33 = vpop.f32.mrb[233].mxu1  ;;  %v7761_v12 = vpop.f32.mrb[227].mxu0 }
 0x507   :  { %v4804_v61 = vpop.xlane.xlu1 %4803  ;;  %v6374_v40 = vadd.f32 %v7759_v55, %v14043_v10  ;;  %v7871_v58 = vadd.f32 %v7870_v33, %v7869_v15  ;;  %v7872_v43 = vpop.f32.mrb[234].mxu1  ;;  %v7762_v56 = vadd.f32 %v7761_v12, %v7760_v17 }
 0x508   :  { %7207 = vst.msk [vmem:[%s14235_s11 + $0x728] sm:$0xff] %vm383_vm4, %v4804_v61  ;;  %6642 = vst [vmem:[#allocation11 + $0x28] sm:$0xff] %v6530_v46  ;;  %v7873_v29 = vpop.f32.mrb[235].mxu1  ;;  %v7763_v25 = vpop.f32.mrb[228].mxu0 }
 0x509   :  { %v4846_v51 = vpop.xlane.xlu0 %4845  ;;  %v6535_v62 = vadd.f32 %v7871_v58, %v6374_v40  ;;  %v7874_v59 = vadd.f32 %v7873_v29, %v7872_v43  ;;  %v6377_v7 = vadd.f32 %v7762_v56, %v14043_v10  ;;  %v7764_v32 = vpop.f32.mrb[229].mxu0 }
 0x50a   :  { %7228 = vst.msk [vmem:[%s14235_s11 + $0x7d0] sm:$0xff] %vm383_vm4, %v4846_v51  ;;  %v7765_v14 = vadd.f32 %v7764_v32, %v7763_v25  ;;  %v7875_v9 = vpop.f32.mrb[236].mxu1  ;;  %v7766_v27 = vpop.f32.mrb[230].mxu0 }
 0x50b   :  { %v4808_v4 = vpop.xlane.xlu1 %4807  ;;  %6643 = vst [vmem:[#allocation11 + $0x30] sm:$0xff] %v6535_v62  ;;  %v6538_v5 = vadd.f32 %v7874_v59, %v6377_v7  ;;  %v7876_v47 = vpop.f32.mrb[237].mxu1 }
 0x50c   :  { %7209 = vst.msk [vmem:[%s14235_s11 + $0x738] sm:$0xff] %vm383_vm4, %v4808_v4  ;;  %v6382_v8 = vadd.f32 %v7765_v14, %v14043_v10  ;;  %v7877_v42 = vadd.f32 %v7876_v47, %v7875_v9  ;;  %v7767_v28 = vpop.f32.mrb[231].mxu0  ;;  %v7878_v39 = vpop.f32.mrb[238].mxu1 }
 0x50d   :  { %v4850_v22 = vpop.xlane.xlu0 %4849  ;;  %6644 = vst [vmem:[#allocation11 + $0x38] sm:$0xff] %v6538_v5  ;;  %v7768_v36 = vadd.f32 %v7767_v28, %v7766_v27  ;;  %v7879_v19 = vpop.f32.mrb[239].mxu1 }
 0x50e   :  { %7230 = vst.msk [vmem:[%s14235_s11 + $0x7e0] sm:$0xff] %vm383_vm4, %v4850_v22  ;;  %v6543_v53 = vadd.f32 %v7877_v42, %v6382_v8  ;;  %v7880_v54 = vadd.f32 %v7879_v19, %v7878_v39  ;;  %v7769_v0 = vpop.f32.mrb[232].mxu0  ;;  %v7881_v44 = vpop.f32.mrb[240].mxu1 }
 0x50f   :  { %v4812_v52 = vpop.xlane.xlu1 %4811  ;;  %v6385_v26 = vadd.f32 %v7768_v36, %v14043_v10  ;;  %v7770_v57 = vpop.f32.mrb[233].mxu0 }
 0x510   :  { %7211 = vst.msk [vmem:[%s14235_s11 + $0x748] sm:$0xff] %vm383_vm4, %v4812_v52  ;;  %6645 = vst [vmem:[#allocation11 + $0x40] sm:$0xff] %v6543_v53  ;;  %v7771_v63 = vadd.f32 %v7770_v57, %v7769_v0  ;;  %v7772_v6 = vpop.f32.mrb[234].mxu0  ;;  %v7882_v11 = vpop.f32.mrb[241].mxu1 }
 0x511   :  { %v4854_v31 = vpop.xlane.xlu0 %4853  ;;  %v6546_v21 = vadd.f32 %v7880_v54, %v6385_v26  ;;  %v7883_v35 = vadd.f32 %v7882_v11, %v7881_v44  ;;  %v7773_v18 = vpop.f32.mrb[235].mxu0 }
 0x512   :  { %7232 = vst.msk [vmem:[%s14235_s11 + $0x7f0] sm:$0xff] %vm383_vm4, %v4854_v31  ;;  %v6390_v60 = vadd.f32 %v7771_v63, %v14043_v10  ;;  %v7884_v48 = vpop.f32.mrb[242].mxu1  ;;  %v7774_v50 = vadd.f32 %v7773_v18, %v7772_v6  ;;  %v7775_v49 = vpop.f32.mrb[236].mxu0 }
 0x513   :  { %v4816_v41 = vpop.xlane.xlu1 %4815  ;;  %6646 = vst [vmem:[#allocation11 + $0x48] sm:$0xff] %v6546_v21  ;;  %v7885_v37 = vpop.f32.mrb[243].mxu1 }
 0x514   :  { %7213 = vst.msk [vmem:[%s14235_s11 + $0x758] sm:$0xff] %vm383_vm4, %v4816_v41  ;;  %v6551_v24 = vadd.f32 %v7883_v35, %v6390_v60  ;;  %v7886_v13 = vadd.f32 %v7885_v37, %v7884_v48  ;;  %v6393_v38 = vadd.f32 %v7774_v50, %v14043_v10  ;;  %v7776_v3 = vpop.f32.mrb[237].mxu0  ;;  %v7887_v20 = vpop.f32.mrb[244].mxu1 }
 0x515   :  { %v7777_v30 = vadd.f32 %v7776_v3, %v7775_v49  ;;  %v7778_v61 = vpop.f32.mrb[238].mxu0  ;;  %v7888_v34 = vpop.f32.mrb[245].mxu1 }
 0x516   :  { %6647 = vst [vmem:[#allocation11 + $0x50] sm:$0xff] %v6551_v24  ;;  %v6554_v23 = vadd.f32 %v7886_v13, %v6393_v38  ;;  %v7889_v2 = vadd.f32 %v7888_v34, %v7887_v20  ;;  %v7779_v55 = vpop.f32.mrb[239].mxu0  ;;  %v7890_v15 = vpop.f32.mrb[246].mxu1 }
 0x517   :  { %v4820_v1 = vpop.xlane.xlu1 %4819  ;;  %v6398_v51 = vadd.f32 %v7777_v30, %v14043_v10  ;;  %v7780_v17 = vadd.f32 %v7779_v55, %v7778_v61  ;;  %v7891_v33 = vpop.f32.mrb[247].mxu1 }
 0x518   :  { %7215 = vst.msk [vmem:[%s14235_s11 + $0x768] sm:$0xff] %vm383_vm4, %v4820_v1  ;;  %6648 = vst [vmem:[#allocation11 + $0x58] sm:$0xff] %v6554_v23  ;;  %v7892_v40 = vadd.f32 %v7891_v33, %v7890_v15  ;;  %v7781_v43 = vpop.f32.mrb[240].mxu0  ;;  %v7893_v62 = vpop.f32.mrb[248].mxu1 }
 0x519   :  { %v6559_v4 = vadd.f32 %v7889_v2, %v6398_v51  ;;  %v6401_v58 = vadd.f32 %v7780_v17, %v14043_v10  ;;  %v7782_v22 = vpop.f32.mrb[241].mxu0  ;;  %v7894_v7 = vpop.f32.mrb[249].mxu1 }
 0x51a   :  { %v7783_v29 = vadd.f32 %v7782_v22, %v7781_v43  ;;  %v7784_v59 = vpop.f32.mrb[242].mxu0  ;;  %v7895_v5 = vadd.f32 %v7894_v7, %v7893_v62  ;;  %v7896_v32 = vpop.f32.mrb[250].mxu1 }
 0x51b   :  { %v4824_v16 = vpop.xlane.xlu1 %4823  ;;  %6649 = vst [vmem:[#allocation11 + $0x60] sm:$0xff] %v6559_v4  ;;  %v6562_v56 = vadd.f32 %v7892_v40, %v6401_v58  ;;  %v7785_v31 = vpop.f32.mrb[243].mxu0 }
 0x51c   :  { %7217 = vst.msk [vmem:[%s14235_s11 + $0x778] sm:$0xff] %vm383_vm4, %v4824_v16  ;;  %v6406_v25 = vadd.f32 %v7783_v29, %v14043_v10  ;;  %v7786_v14 = vadd.f32 %v7785_v31, %v7784_v59  ;;  %v7897_v9 = vpop.f32.mrb[251].mxu1  ;;  %v7787_v42 = vpop.f32.mrb[244].mxu0 }
 0x51d   :  { %6650 = vst [vmem:[#allocation11 + $0x68] sm:$0xff] %v6562_v56  ;;  %v7898_v47 = vadd.f32 %v7897_v9, %v7896_v32  ;;  %v7788_v39 = vpop.f32.mrb[245].mxu0  ;;  %v7899_v19 = vpop.f32.mrb[252].mxu1 }
 0x51e   :  { %v6567_v27 = vadd.f32 %v7895_v5, %v6406_v25  ;;  %v6409_v41 = vadd.f32 %v7786_v14, %v14043_v10  ;;  %v7789_v36 = vadd.f32 %v7788_v39, %v7787_v42  ;;  %v7790_v53 = vpop.f32.mrb[246].mxu0  ;;  %v7900_v54 = vpop.f32.mrb[253].mxu1 }
 0x51f   :  { %v4828_v45 = vpop.xlane.xlu1 %4827  ;;  %v7901_v0 = vadd.f32 %v7900_v54, %v7899_v19  ;;  %v7791_v21 = vpop.f32.mrb[247].mxu0 }
 0x520   :  { %7219 = vst.msk [vmem:[%s14235_s11 + $0x788] sm:$0xff] %vm383_vm4, %v4828_v45  ;;  %6651 = vst [vmem:[#allocation11 + $0x70] sm:$0xff] %v6567_v27  ;;  %v6570_v28 = vadd.f32 %v7898_v47, %v6409_v41  ;;  %v6414_v1 = vadd.f32 %v7789_v36, %v14043_v10  ;;  %v7902_v57 = vpop.f32.mrb[254].mxu1  ;;  %v7792_v63 = vadd.f32 %v7791_v21, %v7790_v53 }
 0x521   :  { %v7903_v44 = vpop.f32.mrb[255].mxu1 }
 0x522   :  { %6652 = vst [vmem:[#allocation11 + $0x78] sm:$0xff] %v6570_v28  ;;  %v6575_v6 = vadd.f32 %v7901_v0, %v6414_v1  ;;  %v7904_v11 = vadd.f32 %v7903_v44, %v7902_v57  ;;  %v6417_v16 = vadd.f32 %v7792_v63, %v14043_v10  ;;  %v7793_v35 = vpop.f32.mrb[248].mxu0 }
 0x523   :  { %v4832_v46 = vpop.xlane.xlu1 %4831  ;;  %v7794_v48 = vpop.f32.mrb[249].mxu0 }
 0x524   :  { %7221 = vst.msk [vmem:[%s14235_s11 + $0x798] sm:$0xff] %vm383_vm4, %v4832_v46  ;;  %6653 = vst [vmem:[#allocation11 + $0x80] sm:$0xff] %v6575_v6  ;;  %v6578_v18 = vadd.f32 %v7904_v11, %v6417_v16  ;;  %v7795_v50 = vadd.f32 %v7794_v48, %v7793_v35  ;;  %v7905_v37 = vpop.f32.mrb[0].mxu1  ;;  %v7796_v24 = vpop.f32.mrb[250].mxu0 }
 0x525   :  { %v7906_v13 = vpop.f32.mrb[1].mxu1  ;;  %v7797_v23 = vpop.f32.mrb[251].mxu0 }
 0x526   :  { %6654 = vst [vmem:[#allocation11 + $0x88] sm:$0xff] %v6578_v18  ;;  %v6422_v45 = vadd.f32 %v7795_v50, %v14043_v10  ;;  %v7907_v49 = vadd.f32 %v7906_v13, %v7905_v37  ;;  %v7908_v3 = vpop.f32.mrb[2].mxu1  ;;  %v7798_v30 = vadd.f32 %v7797_v23, %v7796_v24 }
 0x527   :  { %v4836_v12 = vpop.xlane.xlu1 %4835  ;;  %v7909_v20 = vpop.f32.mrb[3].mxu1 }
 0x528   :  { %7223 = vst.msk [vmem:[%s14235_s11 + $0x7a8] sm:$0xff] %vm383_vm4, %v4836_v12  ;;  %v6583_v61 = vadd.f32 %v7907_v49, %v6422_v45  ;;  %v7910_v34 = vadd.f32 %v7909_v20, %v7908_v3  ;;  %v6425_v46 = vadd.f32 %v7798_v30, %v14043_v10 }
 0x52a   :  { %6655 = vst [vmem:[#allocation11 + $0x90] sm:$0xff] %v6583_v61  ;;  %v7799_v51 = vpop.f32.mrb[252].mxu0  ;;  %v6586_v2 = vadd.f32 %v7910_v34, %v6425_v46 }
 0x52b   :  { %v4840_v52 = vpop.xlane.xlu1 %4839  ;;  %v7800_v55 = vpop.f32.mrb[253].mxu0 }
 0x52c   :  { %7225 = vst.msk [vmem:[%s14235_s11 + $0x7b8] sm:$0xff] %vm383_vm4, %v4840_v52  ;;  %v7801_v15 = vadd.f32 %v7800_v55, %v7799_v51  ;;  %v7911_v17 = vpop.f32.mrb[4].mxu1  ;;  %v7802_v33 = vpop.f32.mrb[254].mxu0  ;;  %6656 = vst [vmem:[#allocation11 + $0x98] sm:$0xff] %v6586_v2 }
 0x52d   :  { %v7912_v4 = vpop.f32.mrb[5].mxu1  ;;  %v7803_v40 = vpop.f32.mrb[255].mxu0 }
 0x52e   :  { %v6430_v58 = vadd.f32 %v7801_v15, %v14043_v10  ;;  %v7913_v12 = vadd.f32 %v7912_v4, %v7911_v17  ;;  %v7804_v43 = vadd.f32 %v7803_v40, %v7802_v33  ;;  %v7914_v56 = vpop.f32.mrb[6].mxu1 }
 0x52f   :  { %v4844_v8 = vpop.xlane.xlu1 %4843  ;;  %v7915_v22 = vpop.f32.mrb[7].mxu1 }
 0x530   :  { %7227 = vst.msk [vmem:[%s14235_s11 + $0x7c8] sm:$0xff] %vm383_vm4, %v4844_v8  ;;  %v6591_v29 = vadd.f32 %v7913_v12, %v6430_v58  ;;  %v6433_v62 = vadd.f32 %v7804_v43, %v14043_v10  ;;  %v7916_v59 = vadd.f32 %v7915_v22, %v7914_v56 }
 0x532   :  { %6657 = vst [vmem:[#allocation11 + $0xa0] sm:$0xff] %v6591_v29  ;;  %v6594_v7 = vadd.f32 %v7916_v59, %v6433_v62  ;;  %v7805_v52 = vpop.f32.mrb[0].mxu0 }
 0x533   :  { %v4848_v26 = vpop.xlane.xlu1 %4847  ;;  %v7806_v25 = vpop.f32.mrb[1].mxu0 }
 0x534   :  { %7229 = vst.msk [vmem:[%s14235_s11 + $0x7d8] sm:$0xff] %vm383_vm4, %v4848_v26  ;;  %6658 = vst [vmem:[#allocation11 + $0xa8] sm:$0xff] %v6594_v7  ;;  %v7807_v5 = vadd.f32 %v7806_v25, %v7805_v52  ;;  %v7917_v31 = vpop.f32.mrb[8].mxu1  ;;  %v7808_v32 = vpop.f32.mrb[2].mxu0 }
 0x535   :  { %v7918_v14 = vpop.f32.mrb[9].mxu1  ;;  %v7809_v9 = vpop.f32.mrb[3].mxu0 }
 0x536   :  { %v6438_v27 = vadd.f32 %v7807_v5, %v14043_v10  ;;  %v7919_v47 = vadd.f32 %v7918_v14, %v7917_v31  ;;  %v7810_v41 = vadd.f32 %v7809_v9, %v7808_v32  ;;  %v7920_v8 = vpop.f32.mrb[10].mxu1 }
 0x537   :  { %v4852_v60 = vpop.xlane.xlu1 %4851  ;;  %v7921_v42 = vpop.f32.mrb[11].mxu1 }
 0x538   :  { %7231 = vst.msk [vmem:[%s14235_s11 + $0x7e8] sm:$0xff] %vm383_vm4, %v4852_v60  ;;  %v6599_v28 = vadd.f32 %v7919_v47, %v6438_v27  ;;  %v6441_v39 = vadd.f32 %v7810_v41, %v14043_v10  ;;  %v7922_v36 = vadd.f32 %v7921_v42, %v7920_v8 }
 0x53a   :  { %6659 = vst [vmem:[#allocation11 + $0xb0] sm:$0xff] %v6599_v28  ;;  %v6602_v19 = vadd.f32 %v7922_v36, %v6441_v39  ;;  %v7811_v53 = vpop.f32.mrb[4].mxu0 }
 0x53b   :  { %v4856_v38 = vpop.xlane.xlu1 %4855  ;;  %v7812_v54 = vpop.f32.mrb[5].mxu0 }
 0x53c   :  { %7233 = vst.msk [vmem:[%s14235_s11 + $0x7f8] sm:$0xff] %vm383_vm4, %v4856_v38  ;;  %6660 = vst [vmem:[#allocation11 + $0xb8] sm:$0xff] %v6602_v19  ;;  %v7813_v26 = vadd.f32 %v7812_v54, %v7811_v53  ;;  %v7923_v1 = vpop.f32.mrb[12].mxu1  ;;  %v7814_v0 = vpop.f32.mrb[6].mxu0  ;;  %s9395_s11 = smov [#allocation11]  }
 0x53d   :  { %v7924_v21 = vpop.f32.mrb[13].mxu1  ;;  %v7815_v57 = vpop.f32.mrb[7].mxu0  ;;  %s6704_s4 = sshll.u32 %s9395_s11, 4  ;;  %s6705_s4 = int_to_ptr.vmem [resolvable:$true] %s6704_s4 }
 0x53e   :  { %v6446_v63 = vadd.f32 %v7813_v26, %v14043_v10  ;;  %v7925_v44 = vadd.f32 %v7924_v21, %v7923_v1  ;;  %v7816_v6 = vadd.f32 %v7815_v57, %v7814_v0  ;;  %v7926_v11 = vpop.f32.mrb[14].mxu1  ;;  %s9349_s26 = scalar_lea.vmem %s6705_s4, 4096  ;;  %p9354_p13 = scmp.lt.s32.totalorder %s6705_s4, %s6705_s4 }
 0x53f   :  { %v7927_v16 = vpop.f32.mrb[15].mxu1  ;;  %p9350_p12 = scmp.ne.s32.totalorder %s6705_s4, %s9349_s26  ;;  %p9355_p0 = scmp.lt.s32.totalorder %s9349_s26, %s9349_s26 }
 0x540   :  { %v6607_v60 = vadd.f32 %v7925_v44, %v6446_v63  ;;  %v6449_v35 = vadd.f32 %v7816_v6, %v14043_v10  ;;  %v7928_v18 = vadd.f32 %v7927_v16, %v7926_v11 }
 0x541   :  { %p9356_p1 = por %p9355_p0, %p9354_p13 }
 0x542   :  { %6661 = vst [vmem:[#allocation11 + $0xc0] sm:$0xff] %v6607_v60  ;;  %v6610_v48 = vadd.f32 %v7928_v18, %v6449_v35  ;;  %v7817_v50 = vpop.f32.mrb[8].mxu0 }
 0x543   :  { %v7818_v37 = vpop.f32.mrb[9].mxu0  ;;  %p9357_p2 = pnand %p9356_p1, %p9350_p12 }
 0x544   :  { %6662 = vst [vmem:[#allocation11 + $0xc8] sm:$0xff] %v6610_v48  ;;  %v7819_v24 = vadd.f32 %v7818_v37, %v7817_v50  ;;  %v7929_v13 = vpop.f32.mrb[16].mxu1  ;;  %v7820_v38 = vpop.f32.mrb[10].mxu0 }
 0x545   :  { %v7930_v45 = vpop.f32.mrb[17].mxu1  ;;  %v7821_v49 = vpop.f32.mrb[11].mxu0 }
 0x546   :  { %v6454_v23 = vadd.f32 %v7819_v24, %v14043_v10  ;;  %v7931_v3 = vadd.f32 %v7930_v45, %v7929_v13  ;;  %v7822_v30 = vadd.f32 %v7821_v49, %v7820_v38  ;;  %v7932_v20 = vpop.f32.mrb[18].mxu1 }
 0x547   :  { %v7933_v61 = vpop.f32.mrb[19].mxu1 }
 0x548   :  { %v6615_v34 = vadd.f32 %v7931_v3, %v6454_v23  ;;  %v6457_v46 = vadd.f32 %v7822_v30, %v14043_v10  ;;  %v7934_v51 = vadd.f32 %v7933_v61, %v7932_v20 }
 0x54a   :  { %6663 = vst [vmem:[#allocation11 + $0xd0] sm:$0xff] %v6615_v34  ;;  %v6618_v2 = vadd.f32 %v7934_v51, %v6457_v46  ;;  %v7823_v55 = vpop.f32.mrb[12].mxu0 }
 0x54b   :  { %v7824_v15 = vpop.f32.mrb[13].mxu0 }
 0x54c   :  { %6664 = vst [vmem:[#allocation11 + $0xd8] sm:$0xff] %v6618_v2  ;;  %v7825_v17 = vadd.f32 %v7824_v15, %v7823_v55  ;;  %v7935_v33 = vpop.f32.mrb[20].mxu1  ;;  %v7826_v4 = vpop.f32.mrb[14].mxu0 }
 0x54d   :  { %v7936_v40 = vpop.f32.mrb[21].mxu1  ;;  %v7827_v58 = vpop.f32.mrb[15].mxu0 }
 0x54e   :  { %v6462_v12 = vadd.f32 %v7825_v17, %v14043_v10  ;;  %v7937_v43 = vadd.f32 %v7936_v40, %v7935_v33  ;;  %v7828_v56 = vadd.f32 %v7827_v58, %v7826_v4  ;;  %v7938_v22 = vpop.f32.mrb[22].mxu1 }
 0x54f   :  { %v7939_v29 = vpop.f32.mrb[23].mxu1 }
 0x550   :  { %v6623_v62 = vadd.f32 %v7937_v43, %v6462_v12  ;;  %v6465_v59 = vadd.f32 %v7828_v56, %v14043_v10  ;;  %v7940_v7 = vadd.f32 %v7939_v29, %v7938_v22 }
 0x552   :  { %6665 = vst [vmem:[#allocation11 + $0xe0] sm:$0xff] %v6623_v62  ;;  %v6626_v52 = vadd.f32 %v7940_v7, %v6465_v59  ;;  %v7829_v25 = vpop.f32.mrb[16].mxu0 }
 0x553   :  { %v7830_v5 = vpop.f32.mrb[17].mxu0 }
 0x554   :  { %6666 = vst [vmem:[#allocation11 + $0xe8] sm:$0xff] %v6626_v52  ;;  %v7831_v31 = vadd.f32 %v7830_v5, %v7829_v25  ;;  %v7941_v32 = vpop.f32.mrb[24].mxu1  ;;  %v7832_v14 = vpop.f32.mrb[18].mxu0 }
 0x555   :  { %v7942_v9 = vpop.f32.mrb[25].mxu1  ;;  %v7833_v27 = vpop.f32.mrb[19].mxu0 }
 0x556   :  { %v6470_v47 = vadd.f32 %v7831_v31, %v14043_v10  ;;  %v7943_v41 = vadd.f32 %v7942_v9, %v7941_v32  ;;  %v7834_v8 = vadd.f32 %v7833_v27, %v7832_v14  ;;  %v7944_v42 = vpop.f32.mrb[26].mxu1 }
 0x557   :  { %v7945_v28 = vpop.f32.mrb[27].mxu1 }
 0x558   :  { %v6631_v39 = vadd.f32 %v7943_v41, %v6470_v47  ;;  %v6473_v36 = vadd.f32 %v7834_v8, %v14043_v10  ;;  %v7946_v19 = vadd.f32 %v7945_v28, %v7944_v42 }
 0x55a   :  { %6667 = vst [vmem:[#allocation11 + $0xf0] sm:$0xff] %v6631_v39  ;;  %v6634_v53 = vadd.f32 %v7946_v19, %v6473_v36 }
 0x55c   :  { %6668 = vst [vmem:[#allocation11 + $0xf8] sm:$0xff] %v6634_v53 }
 0x55d   :  { %9360 = shalt.err (!%p9357_p2)
}
 0x55e   :  { %s9361_s24 = scalar_lea.hbm %s14237_s13, 4096 }
 0x55f   :  { %p9362_p3 = scmp.ne.s32.totalorder %s14237_s13, %s9361_s24  ;;  %p9365_p4 = scmp.lt.u32.totalorder %s9361_s24, %s14237_s13 }
 0x561   :  { %p9367_p5 = pnand %p9365_p4, %p9362_p3 }
 0x563   :  { %9370 = shalt.err (!%p9367_p5)
}
 0x564   :  { %s9396_s27 = smov 128   ;;  %s9397_s28 = smov 8  }
 0x565   :  { %6710 = dma.vmem_to_hbm [thread:$0]  %s6705_s4, 4096, %s14237_s13, [#allocation10], %s9396_s27, %s9396_s27, %s9397_s28  }
 0x566   :  { %9375 = dma.done.wait [#allocation4], 16384  }
 0x567   :  { %9376 = vsyncadd [#allocation4], 4294950912 }
 0x568   :  { %9377 = dma.done.wait [#allocation10], 4224  }
 0x569   :  { %9378 = vsyncadd [#allocation10], 4294963072 }
 0x56a   :  { %6726 = vsyncpa [#allocation3], 1 }
 0x56b   :  { %6727 = vsyncpa [#allocation6], 1 }
 0x56c   :  { %6728 = vsyncpa [#allocation4], 1 }
 0x56d   :  { %6729 = vsyncpa [#allocation10], 1 }

</bundles_post_ra>
